<compile_context>
chip_gen: v6e
topology: v6e:2x2x1
jax: 0.10.0
libtpu: 0.0.40
codegen_flags: <defaults>
</compile_context>

<pallas_src>
import numpy as np

import jax
import jax.numpy as jnp
from jax import lax
from jax.experimental import pallas as pl
from jax.experimental.pallas import tpu as pltpu

BN_EPS = 1e-5

# (Cin, Cout, stride) of the 7 Conv2d(3x3, padding=1) layers.
LAYER_CFG = [
    (3, 32, 2),
    (32, 64, 2),
    (64, 64, 1),
    (64, 64, 1),
    (64, 32, 1),
    (32, 32, 1),
    (32, 32, 1),
]

# MXU operand dtype.  float32 preserves the module's numerics exactly; switch
# to jnp.bfloat16 on v6e/v7x for ~2x MXU/DMA at scale (loosen test tolerance).
MXU_DTYPE = jnp.float32


def _make_plan(h, w):
    """Static per-layer geometry for an (N, 3, h, w) input."""
    plan = []
    H, W = h, w
    for cin, cout, s in LAYER_CFG:
        if s == 2:
            assert H % 2 == 0 and W % 2 == 0, "stride-2 layers expect even H, W"
        Ho = (H - 1) // s + 1
        Wo = (W - 1) // s + 1
        plan.append(dict(cin=cin, cout=cout, stride=s, H=H, W=W, Ho=Ho, Wo=Wo))
        H, W = Ho, Wo
    return plan


def _build_kernel(plan, N):
    """Fused 7-layer [conv3x3 -> ReLU -> train-mode BN] kernel (whole net)."""
    n_layers = len(plan)

    def kernel(*refs):
        x0_ref = refs[0]
        param_refs = refs[1:1 + 5 * n_layers]
        out_ref = refs[1 + 5 * n_layers]
        scratch_refs = refs[2 + 5 * n_layers:]

        # Inter-layer activation buffers carry zero H-padding rows: zero once.
        for sref in scratch_refs:
            if len(sref.shape) == 4:      # even/odd grouped (stride-2 consumer)
                for n in range(sref.shape[0]):
                    for g in range(sref.shape[1]):
                        sref[n, g, :, :] = jnp.zeros(sref.shape[2:], sref.dtype)
            else:
                for n in range(sref.shape[0]):
                    sref[n, :, :] = jnp.zeros(sref.shape[1:], sref.dtype)

        in_ref = x0_ref
        for l, lp in enumerate(plan):
            bw_ref, bias_ref, gamma_ref, beta_ref, pmat_ref = (
                param_refs[5 * l:5 * l + 5])
            s, Ho, Wo, cout = lp["stride"], lp["Ho"], lp["Wo"], lp["cout"]
            lanes = Wo * cout

            wk = [bw_ref[kh] for kh in range(3)]          # (W*Cin, Wo*Cout)

            # ---- Conv(3x3): 3 kh-tap MXU matmuls per sample, + bias + ReLU ----
            ys = []
            for n in range(N):
                acc = jnp.zeros((Ho, lanes), jnp.float32)
                for kh in range(3):
                    if s == 2:
                        # even/odd grouped rows: each kh tap is a contiguous slice
                        grp, r0 = ((0, 0), (1, 0), (0, 1))[kh]
                        lhs = in_ref[n, grp, r0:r0 + Ho, :]
                    else:
                        lhs = in_ref[n, kh:kh + Ho, :]
                    acc = acc + jnp.dot(lhs.astype(MXU_DTYPE), wk[kh],
                                        preferred_element_type=jnp.float32)
                ys.append(jnp.maximum(acc + bias_ref[...], 0.0))

            # ---- BatchNorm2d (training batch stats), one-pass sum / sumsq ----
            csum = jnp.zeros((1, lanes), jnp.float32)
            csq = jnp.zeros((1, lanes), jnp.float32)
            for y in ys:
                csum = csum + jnp.sum(y, axis=0, keepdims=True)
                csq = csq + jnp.sum(y * y, axis=0, keepdims=True)
            cnt = float(N * Ho * Wo)
            # pmat (0/1) folds the wo-interleaved lanes per channel and
            # broadcasts the per-channel stat back to every wo block.
            mean_t = jnp.dot(csum, pmat_ref[...],
                             preferred_element_type=jnp.float32) / cnt
            ex2_t = jnp.dot(csq, pmat_ref[...],
                            preferred_element_type=jnp.float32) / cnt
            var_t = ex2_t - mean_t * mean_t
            scale_t = gamma_ref[...] * lax.rsqrt(var_t + BN_EPS)
            shift_t = beta_ref[...] - mean_t * scale_t

            # ---- Normalize and hand off to the next layer (VMEM-resident) ----
            if l == n_layers - 1:
                for n in range(N):
                    out_ref[n, :, :] = ys[n] * scale_t + shift_t
            else:
                dst = scratch_refs[l]
                if plan[l + 1]["stride"] == 2:
                    for n in range(N):
                        z = ys[n] * scale_t + shift_t
                        for h in range(Ho):
                            r = h + 1                    # padded row index
                            dst[n, r % 2, r // 2:r // 2 + 1, :] = z[h:h + 1, :]
                else:
                    for n in range(N):
                        dst[n, 1:Ho + 1, :] = ys[n] * scale_t + shift_t
                in_ref = dst

    return kernel


def _prep_layer_params(w_oihw, bias, gamma, beta, lp):
    """Fold kw taps + W-stride into width-banded weights; tile per-lane params."""
    cin, cout, s = lp["cin"], lp["cout"], lp["stride"]
    W, Wo = lp["W"], lp["Wo"]
    # sel[kw, w, wo] = 1 iff unpadded input column w feeds output column wo at
    # horizontal tap kw (out-of-range columns == zero padding, simply dropped).
    sel = np.zeros((3, W, Wo), np.float32)
    for kw in range(3):
        for wo in range(Wo):
            w_in = s * wo + kw - 1
            if 0 <= w_in < W:
                sel[kw, w_in, wo] = 1.0
    # bigw[kh, w*cin+ci, wo*cout+co] = weight[co, ci, kh, kw] on the band.
    bigw = jnp.einsum("kpw,oihk->hpiwo", jnp.asarray(sel), w_oihw)
    bigw = bigw.reshape(3, W * cin, Wo * cout).astype(MXU_DTYPE)
    bias_t = jnp.tile(bias, (Wo,)).reshape(1, Wo * cout).astype(jnp.float32)
    gamma_t = jnp.tile(gamma, (Wo,)).reshape(1, Wo * cout).astype(jnp.float32)
    beta_t = jnp.tile(beta, (Wo,)).reshape(1, Wo * cout).astype(jnp.float32)
    # (x @ pmat)[wo*cout+c] = sum_wo' x[wo'*cout+c]  (per-channel fold+broadcast)
    pmat = jnp.asarray(np.tile(np.eye(cout, dtype=np.float32), (Wo, Wo)))
    return [bigw, bias_t, gamma_t, beta_t, pmat]


def _prep_input(x_nchw, lp0):
    """NCHW -> (N, 2, (H+2)//2, W*Cin): H-padded, even/odd rows, lanes = (w, c)."""
    N = x_nchw.shape[0]
    H, W, cin = lp0["H"], lp0["W"], lp0["cin"]
    x = jnp.transpose(x_nchw, (0, 2, 3, 1)).astype(jnp.float32)   # NHWC
    xp = jnp.pad(x, ((0, 0), (1, 1), (0, 0), (0, 0)))             # pad H only
    xp = xp.reshape(N, H + 2, W * cin)
    x0 = jnp.stack([xp[:, 0::2, :], xp[:, 1::2, :]], axis=1)
    return x0.astype(MXU_DTYPE)


@jax.jit
def cinic10_encoder(x_nchw, params):
    """Forward pass of Cinic10Encoder (NCHW in, NCHW out), one fused kernel."""
    N, _, H, W = x_nchw.shape
    plan = _make_plan(H, W)

    flat_params = []
    for (w, b, g, bt), lp in zip(params, plan):
        flat_params += _prep_layer_params(w, b, g, bt, lp)
    x0 = _prep_input(x_nchw, plan[0])

    # VMEM scratch: padded input buffer of layer j lives at index j-1.
    scratch_shapes = []
    for j in range(1, len(plan)):
        lp = plan[j]
        if lp["stride"] == 2:
            shape = (N, 2, (lp["H"] + 2) // 2, lp["W"] * lp["cin"])
        else:
            shape = (N, lp["H"] + 2, lp["W"] * lp["cin"])
        scratch_shapes.append(pltpu.VMEM(shape, jnp.float32))

    last = plan[-1]
    out_flat = pl.pallas_call(
        _build_kernel(plan, N),
        out_shape=jax.ShapeDtypeStruct(
            (N, last["Ho"], last["Wo"] * last["cout"]), jnp.float32),
        in_specs=[pl.BlockSpec(memory_space=pltpu.MemorySpace.VMEM)]
        * (1 + len(flat_params)),
        out_specs=pl.BlockSpec(memory_space=pltpu.MemorySpace.VMEM),
        scratch_shapes=scratch_shapes,
    )(x0, *flat_params)

    # (N, Ho, Wo*Cout) with lanes ordered (wo, c)  ->  NCHW
    out = out_flat.reshape(N, last["Ho"], last["Wo"], last["cout"])
    return jnp.transpose(out, (0, 3, 1, 2))


def init_params(key):
    """Deterministic synthetic parameters (Conv weight/bias, BN gamma/beta)."""
    params = []
    for cin, cout, _ in LAYER_CFG:
        k_w, k_b, key = jax.random.split(key, 3)
        fan_in = cin * 9
        bound = 1.0 / np.sqrt(fan_in)
        w = jax.random.uniform(k_w, (cout, cin, 3, 3), jnp.float32,
                               minval=-bound, maxval=bound)
        b = jax.random.uniform(k_b, (cout,), jnp.float32,
                               minval=-bound, maxval=bound)
        gamma = jnp.ones((cout,), jnp.float32)
        beta = jnp.zeros((cout,), jnp.float32)
        params.append((w, b, gamma, beta))
    return params


def reference_encoder(x_nchw, params):
    """Pure-JAX reference (lax.conv) matching the PyTorch module in train mode."""
    x = x_nchw.astype(jnp.float32)
    for (w, b, gamma, beta), (_, _, stride) in zip(params, LAYER_CFG):
        y = lax.conv_general_dilated(
            x, w, window_strides=(stride, stride), padding=((1, 1), (1, 1)),
            dimension_numbers=("NCHW", "OIHW", "NCHW"))
        y = y + b[None, :, None, None]
        y = jnp.maximum(y, 0.0)
        mean = jnp.mean(y, axis=(0, 2, 3), keepdims=True)
        var = jnp.mean(jnp.square(y - mean), axis=(0, 2, 3), keepdims=True)
        y = (y - mean) * lax.rsqrt(var + BN_EPS)
        x = y * gamma[None, :, None, None] + beta[None, :, None, None]
    return x


if __name__ == "__main__":
    key = jax.random.PRNGKey(0)
    k_x, k_p = jax.random.split(key)

    # Small CINIC-10-like input: batch=2, 3 channels, 16x16 spatial (NCHW).
    x = jax.random.normal(k_x, (2, 3, 16, 16), jnp.float32)
    params = init_params(k_p)

    out = jax.block_until_ready(cinic10_encoder(x, params))
    ref = jax.block_until_ready(reference_encoder(x, params))
    assert out.shape == ref.shape, (out.shape, ref.shape)
    np.testing.assert_allclose(np.asarray(out), np.asarray(ref),
                               rtol=2e-3, atol=2e-3)

    print("KERNEL_OK")
</pallas_src>

<mosaic_0001>
module attributes {stable_mosaic.version = 11 : i64} {
  func.func @kernel(%arg0: memref<2x2x9x48xf32, #tpu.memory_space<vmem>>, %arg1: memref<3x48x256xf32, #tpu.memory_space<vmem>>, %arg2: memref<1x256xf32, #tpu.memory_space<vmem>>, %arg3: memref<1x256xf32, #tpu.memory_space<vmem>>, %arg4: memref<1x256xf32, #tpu.memory_space<vmem>>, %arg5: memref<256x256xf32, #tpu.memory_space<vmem>>, %arg6: memref<3x256x256xf32, #tpu.memory_space<vmem>>, %arg7: memref<1x256xf32, #tpu.memory_space<vmem>>, %arg8: memref<1x256xf32, #tpu.memory_space<vmem>>, %arg9: memref<1x256xf32, #tpu.memory_space<vmem>>, %arg10: memref<256x256xf32, #tpu.memory_space<vmem>>, %arg11: memref<3x256x256xf32, #tpu.memory_space<vmem>>, %arg12: memref<1x256xf32, #tpu.memory_space<vmem>>, %arg13: memref<1x256xf32, #tpu.memory_space<vmem>>, %arg14: memref<1x256xf32, #tpu.memory_space<vmem>>, %arg15: memref<256x256xf32, #tpu.memory_space<vmem>>, %arg16: memref<3x256x256xf32, #tpu.memory_space<vmem>>, %arg17: memref<1x256xf32, #tpu.memory_space<vmem>>, %arg18: memref<1x256xf32, #tpu.memory_space<vmem>>, %arg19: memref<1x256xf32, #tpu.memory_space<vmem>>, %arg20: memref<256x256xf32, #tpu.memory_space<vmem>>, %arg21: memref<3x256x128xf32, #tpu.memory_space<vmem>>, %arg22: memref<1x128xf32, #tpu.memory_space<vmem>>, %arg23: memref<1x128xf32, #tpu.memory_space<vmem>>, %arg24: memref<1x128xf32, #tpu.memory_space<vmem>>, %arg25: memref<128x128xf32, #tpu.memory_space<vmem>>, %arg26: memref<3x128x128xf32, #tpu.memory_space<vmem>>, %arg27: memref<1x128xf32, #tpu.memory_space<vmem>>, %arg28: memref<1x128xf32, #tpu.memory_space<vmem>>, %arg29: memref<1x128xf32, #tpu.memory_space<vmem>>, %arg30: memref<128x128xf32, #tpu.memory_space<vmem>>, %arg31: memref<3x128x128xf32, #tpu.memory_space<vmem>>, %arg32: memref<1x128xf32, #tpu.memory_space<vmem>>, %arg33: memref<1x128xf32, #tpu.memory_space<vmem>>, %arg34: memref<1x128xf32, #tpu.memory_space<vmem>>, %arg35: memref<128x128xf32, #tpu.memory_space<vmem>>, %arg36: memref<2x4x128xf32, #tpu.memory_space<vmem>>, %arg37: memref<2x2x5x256xf32, #tpu.memory_space<vmem>>, %arg38: memref<2x6x256xf32, #tpu.memory_space<vmem>>, %arg39: memref<2x6x256xf32, #tpu.memory_space<vmem>>, %arg40: memref<2x6x256xf32, #tpu.memory_space<vmem>>, %arg41: memref<2x6x128xf32, #tpu.memory_space<vmem>>, %arg42: memref<2x6x128xf32, #tpu.memory_space<vmem>>) attributes {dimension_semantics = [], scalar_prefetch = 0 : i64, scratch_operands = 6 : i64, tpu.core_type = #tpu.core_type<tc>} {
    %cst = arith.constant 0.000000e+00 : f32
    %0 = vector.broadcast %cst : f32 to vector<5x256xf32>
    %c0 = arith.constant 0 : index
    %c0_0 = arith.constant 0 : index
    %c0_1 = arith.constant 0 : index
    %c0_2 = arith.constant 0 : index
    %1 = vector.load %arg37[%c0, %c0_0, %c0_1, %c0_2] : memref<2x2x5x256xf32, #tpu.memory_space<vmem>>, vector<1x1x5x256xf32>
    %2 = vector.shape_cast %1 : vector<1x1x5x256xf32> to vector<5x256xf32>
    %3 = vector.shape_cast %0 : vector<5x256xf32> to vector<1x1x5x256xf32>
    tpu.vector_store %arg37[%c0, %c0_0, %c0_1, %c0_2], %3 {strides = array<i32>} : memref<2x2x5x256xf32, #tpu.memory_space<vmem>>, vector<1x1x5x256xf32>,
    %cst_3 = arith.constant 0.000000e+00 : f32
    %4 = vector.broadcast %cst_3 : f32 to vector<5x256xf32>
    %c0_4 = arith.constant 0 : index
    %c1 = arith.constant 1 : index
    %c0_5 = arith.constant 0 : index
    %c0_6 = arith.constant 0 : index
    %5 = vector.load %arg37[%c0_4, %c1, %c0_5, %c0_6] : memref<2x2x5x256xf32, #tpu.memory_space<vmem>>, vector<1x1x5x256xf32>
    %6 = vector.shape_cast %5 : vector<1x1x5x256xf32> to vector<5x256xf32>
    %7 = vector.shape_cast %4 : vector<5x256xf32> to vector<1x1x5x256xf32>
    tpu.vector_store %arg37[%c0_4, %c1, %c0_5, %c0_6], %7 {strides = array<i32>} : memref<2x2x5x256xf32, #tpu.memory_space<vmem>>, vector<1x1x5x256xf32>,
    %cst_7 = arith.constant 0.000000e+00 : f32
    %8 = vector.broadcast %cst_7 : f32 to vector<5x256xf32>
    %c1_8 = arith.constant 1 : index
    %c0_9 = arith.constant 0 : index
    %c0_10 = arith.constant 0 : index
    %c0_11 = arith.constant 0 : index
    %9 = vector.load %arg37[%c1_8, %c0_9, %c0_10, %c0_11] : memref<2x2x5x256xf32, #tpu.memory_space<vmem>>, vector<1x1x5x256xf32>
    %10 = vector.shape_cast %9 : vector<1x1x5x256xf32> to vector<5x256xf32>
    %11 = vector.shape_cast %8 : vector<5x256xf32> to vector<1x1x5x256xf32>
    tpu.vector_store %arg37[%c1_8, %c0_9, %c0_10, %c0_11], %11 {strides = array<i32>} : memref<2x2x5x256xf32, #tpu.memory_space<vmem>>, vector<1x1x5x256xf32>,
    %cst_12 = arith.constant 0.000000e+00 : f32
    %12 = vector.broadcast %cst_12 : f32 to vector<5x256xf32>
    %c1_13 = arith.constant 1 : index
    %c1_14 = arith.constant 1 : index
    %c0_15 = arith.constant 0 : index
    %c0_16 = arith.constant 0 : index
    %13 = vector.load %arg37[%c1_13, %c1_14, %c0_15, %c0_16] : memref<2x2x5x256xf32, #tpu.memory_space<vmem>>, vector<1x1x5x256xf32>
    %14 = vector.shape_cast %13 : vector<1x1x5x256xf32> to vector<5x256xf32>
    %15 = vector.shape_cast %12 : vector<5x256xf32> to vector<1x1x5x256xf32>
    tpu.vector_store %arg37[%c1_13, %c1_14, %c0_15, %c0_16], %15 {strides = array<i32>} : memref<2x2x5x256xf32, #tpu.memory_space<vmem>>, vector<1x1x5x256xf32>,
    %cst_17 = arith.constant 0.000000e+00 : f32
    %16 = vector.broadcast %cst_17 : f32 to vector<6x256xf32>
    %c0_18 = arith.constant 0 : index
    %c0_19 = arith.constant 0 : index
    %c0_20 = arith.constant 0 : index
    %17 = vector.load %arg38[%c0_18, %c0_19, %c0_20] : memref<2x6x256xf32, #tpu.memory_space<vmem>>, vector<1x6x256xf32>
    %18 = vector.shape_cast %17 : vector<1x6x256xf32> to vector<6x256xf32>
    %19 = vector.shape_cast %16 : vector<6x256xf32> to vector<1x6x256xf32>
    tpu.vector_store %arg38[%c0_18, %c0_19, %c0_20], %19 {strides = array<i32>} : memref<2x6x256xf32, #tpu.memory_space<vmem>>, vector<1x6x256xf32>,
    %cst_21 = arith.constant 0.000000e+00 : f32
    %20 = vector.broadcast %cst_21 : f32 to vector<6x256xf32>
    %c1_22 = arith.constant 1 : index
    %c0_23 = arith.constant 0 : index
    %c0_24 = arith.constant 0 : index
    %21 = vector.load %arg38[%c1_22, %c0_23, %c0_24] : memref<2x6x256xf32, #tpu.memory_space<vmem>>, vector<1x6x256xf32>
    %22 = vector.shape_cast %21 : vector<1x6x256xf32> to vector<6x256xf32>
    %23 = vector.shape_cast %20 : vector<6x256xf32> to vector<1x6x256xf32>
    tpu.vector_store %arg38[%c1_22, %c0_23, %c0_24], %23 {strides = array<i32>} : memref<2x6x256xf32, #tpu.memory_space<vmem>>, vector<1x6x256xf32>,
    %cst_25 = arith.constant 0.000000e+00 : f32
    %24 = vector.broadcast %cst_25 : f32 to vector<6x256xf32>
    %c0_26 = arith.constant 0 : index
    %c0_27 = arith.constant 0 : index
    %c0_28 = arith.constant 0 : index
    %25 = vector.load %arg39[%c0_26, %c0_27, %c0_28] : memref<2x6x256xf32, #tpu.memory_space<vmem>>, vector<1x6x256xf32>
    %26 = vector.shape_cast %25 : vector<1x6x256xf32> to vector<6x256xf32>
    %27 = vector.shape_cast %24 : vector<6x256xf32> to vector<1x6x256xf32>
    tpu.vector_store %arg39[%c0_26, %c0_27, %c0_28], %27 {strides = array<i32>} : memref<2x6x256xf32, #tpu.memory_space<vmem>>, vector<1x6x256xf32>,
    %cst_29 = arith.constant 0.000000e+00 : f32
    %28 = vector.broadcast %cst_29 : f32 to vector<6x256xf32>
    %c1_30 = arith.constant 1 : index
    %c0_31 = arith.constant 0 : index
    %c0_32 = arith.constant 0 : index
    %29 = vector.load %arg39[%c1_30, %c0_31, %c0_32] : memref<2x6x256xf32, #tpu.memory_space<vmem>>, vector<1x6x256xf32>
    %30 = vector.shape_cast %29 : vector<1x6x256xf32> to vector<6x256xf32>
    %31 = vector.shape_cast %28 : vector<6x256xf32> to vector<1x6x256xf32>
    tpu.vector_store %arg39[%c1_30, %c0_31, %c0_32], %31 {strides = array<i32>} : memref<2x6x256xf32, #tpu.memory_space<vmem>>, vector<1x6x256xf32>,
    %cst_33 = arith.constant 0.000000e+00 : f32
    %32 = vector.broadcast %cst_33 : f32 to vector<6x256xf32>
    %c0_34 = arith.constant 0 : index
    %c0_35 = arith.constant 0 : index
    %c0_36 = arith.constant 0 : index
    %33 = vector.load %arg40[%c0_34, %c0_35, %c0_36] : memref<2x6x256xf32, #tpu.memory_space<vmem>>, vector<1x6x256xf32>
    %34 = vector.shape_cast %33 : vector<1x6x256xf32> to vector<6x256xf32>
    %35 = vector.shape_cast %32 : vector<6x256xf32> to vector<1x6x256xf32>
    tpu.vector_store %arg40[%c0_34, %c0_35, %c0_36], %35 {strides = array<i32>} : memref<2x6x256xf32, #tpu.memory_space<vmem>>, vector<1x6x256xf32>,
    %cst_37 = arith.constant 0.000000e+00 : f32
    %36 = vector.broadcast %cst_37 : f32 to vector<6x256xf32>
    %c1_38 = arith.constant 1 : index
    %c0_39 = arith.constant 0 : index
    %c0_40 = arith.constant 0 : index
    %37 = vector.load %arg40[%c1_38, %c0_39, %c0_40] : memref<2x6x256xf32, #tpu.memory_space<vmem>>, vector<1x6x256xf32>
    %38 = vector.shape_cast %37 : vector<1x6x256xf32> to vector<6x256xf32>
    %39 = vector.shape_cast %36 : vector<6x256xf32> to vector<1x6x256xf32>
    tpu.vector_store %arg40[%c1_38, %c0_39, %c0_40], %39 {strides = array<i32>} : memref<2x6x256xf32, #tpu.memory_space<vmem>>, vector<1x6x256xf32>,
    %cst_41 = arith.constant 0.000000e+00 : f32
    %40 = vector.broadcast %cst_41 : f32 to vector<6x128xf32>
    %c0_42 = arith.constant 0 : index
    %c0_43 = arith.constant 0 : index
    %c0_44 = arith.constant 0 : index
    %41 = vector.load %arg41[%c0_42, %c0_43, %c0_44] : memref<2x6x128xf32, #tpu.memory_space<vmem>>, vector<1x6x128xf32>
    %42 = vector.shape_cast %41 : vector<1x6x128xf32> to vector<6x128xf32>
    %43 = vector.shape_cast %40 : vector<6x128xf32> to vector<1x6x128xf32>
    tpu.vector_store %arg41[%c0_42, %c0_43, %c0_44], %43 {strides = array<i32>} : memref<2x6x128xf32, #tpu.memory_space<vmem>>, vector<1x6x128xf32>,
    %cst_45 = arith.constant 0.000000e+00 : f32
    %44 = vector.broadcast %cst_45 : f32 to vector<6x128xf32>
    %c1_46 = arith.constant 1 : index
    %c0_47 = arith.constant 0 : index
    %c0_48 = arith.constant 0 : index
    %45 = vector.load %arg41[%c1_46, %c0_47, %c0_48] : memref<2x6x128xf32, #tpu.memory_space<vmem>>, vector<1x6x128xf32>
    %46 = vector.shape_cast %45 : vector<1x6x128xf32> to vector<6x128xf32>
    %47 = vector.shape_cast %44 : vector<6x128xf32> to vector<1x6x128xf32>
    tpu.vector_store %arg41[%c1_46, %c0_47, %c0_48], %47 {strides = array<i32>} : memref<2x6x128xf32, #tpu.memory_space<vmem>>, vector<1x6x128xf32>,
    %cst_49 = arith.constant 0.000000e+00 : f32
    %48 = vector.broadcast %cst_49 : f32 to vector<6x128xf32>
    %c0_50 = arith.constant 0 : index
    %c0_51 = arith.constant 0 : index
    %c0_52 = arith.constant 0 : index
    %49 = vector.load %arg42[%c0_50, %c0_51, %c0_52] : memref<2x6x128xf32, #tpu.memory_space<vmem>>, vector<1x6x128xf32>
    %50 = vector.shape_cast %49 : vector<1x6x128xf32> to vector<6x128xf32>
    %51 = vector.shape_cast %48 : vector<6x128xf32> to vector<1x6x128xf32>
    tpu.vector_store %arg42[%c0_50, %c0_51, %c0_52], %51 {strides = array<i32>} : memref<2x6x128xf32, #tpu.memory_space<vmem>>, vector<1x6x128xf32>,
    %cst_53 = arith.constant 0.000000e+00 : f32
    %52 = vector.broadcast %cst_53 : f32 to vector<6x128xf32>
    %c1_54 = arith.constant 1 : index
    %c0_55 = arith.constant 0 : index
    %c0_56 = arith.constant 0 : index
    %53 = vector.load %arg42[%c1_54, %c0_55, %c0_56] : memref<2x6x128xf32, #tpu.memory_space<vmem>>, vector<1x6x128xf32>
    %54 = vector.shape_cast %53 : vector<1x6x128xf32> to vector<6x128xf32>
    %55 = vector.shape_cast %52 : vector<6x128xf32> to vector<1x6x128xf32>
    tpu.vector_store %arg42[%c1_54, %c0_55, %c0_56], %55 {strides = array<i32>} : memref<2x6x128xf32, #tpu.memory_space<vmem>>, vector<1x6x128xf32>,
    %c0_57 = arith.constant 0 : index
    %c0_58 = arith.constant 0 : index
    %c0_59 = arith.constant 0 : index
    %56 = vector.load %arg1[%c0_57, %c0_58, %c0_59] : memref<3x48x256xf32, #tpu.memory_space<vmem>>, vector<1x48x256xf32>
    %57 = vector.shape_cast %56 : vector<1x48x256xf32> to vector<48x256xf32>
    %c1_60 = arith.constant 1 : index
    %c0_61 = arith.constant 0 : index
    %c0_62 = arith.constant 0 : index
    %58 = vector.load %arg1[%c1_60, %c0_61, %c0_62] : memref<3x48x256xf32, #tpu.memory_space<vmem>>, vector<1x48x256xf32>
    %59 = vector.shape_cast %58 : vector<1x48x256xf32> to vector<48x256xf32>
    %c2 = arith.constant 2 : index
    %c0_63 = arith.constant 0 : index
    %c0_64 = arith.constant 0 : index
    %60 = vector.load %arg1[%c2, %c0_63, %c0_64] : memref<3x48x256xf32, #tpu.memory_space<vmem>>, vector<1x48x256xf32>
    %61 = vector.shape_cast %60 : vector<1x48x256xf32> to vector<48x256xf32>
    %cst_65 = arith.constant 0.000000e+00 : f32
    %62 = vector.broadcast %cst_65 : f32 to vector<8x256xf32>
    %c0_66 = arith.constant 0 : index
    %c0_67 = arith.constant 0 : index
    %c0_68 = arith.constant 0 : index
    %c0_69 = arith.constant 0 : index
    %63 = vector.load %arg0[%c0_66, %c0_67, %c0_68, %c0_69] : memref<2x2x9x48xf32, #tpu.memory_space<vmem>>, vector<1x1x8x48xf32>
    %64 = vector.shape_cast %63 : vector<1x1x8x48xf32> to vector<8x48xf32>
    %cst_70 = arith.constant dense<0.000000e+00> : vector<8x256xf32>
    %65 = tpu.matmul %64, %57, %cst_70 {dimension_numbers = #tpu.dot_dimension_numbers<[1], [0], [0], [1], [0, 0, 1, 1], [], []>} : vector<8x48xf32>, vector<48x256xf32>, vector<8x256xf32> -> vector<8x256xf32>
    %66 = arith.addf %62, %65 : vector<8x256xf32>
    %c0_71 = arith.constant 0 : index
    %c1_72 = arith.constant 1 : index
    %c0_73 = arith.constant 0 : index
    %c0_74 = arith.constant 0 : index
    %67 = vector.load %arg0[%c0_71, %c1_72, %c0_73, %c0_74] : memref<2x2x9x48xf32, #tpu.memory_space<vmem>>, vector<1x1x8x48xf32>
    %68 = vector.shape_cast %67 : vector<1x1x8x48xf32> to vector<8x48xf32>
    %cst_75 = arith.constant dense<0.000000e+00> : vector<8x256xf32>
    %69 = tpu.matmul %68, %59, %cst_75 {dimension_numbers = #tpu.dot_dimension_numbers<[1], [0], [0], [1], [0, 0, 1, 1], [], []>} : vector<8x48xf32>, vector<48x256xf32>, vector<8x256xf32> -> vector<8x256xf32>
    %70 = arith.addf %66, %69 : vector<8x256xf32>
    %c0_76 = arith.constant 0 : index
    %c0_77 = arith.constant 0 : index
    %c1_78 = arith.constant 1 : index
    %c0_79 = arith.constant 0 : index
    %71 = vector.load %arg0[%c0_76, %c0_77, %c1_78, %c0_79] : memref<2x2x9x48xf32, #tpu.memory_space<vmem>>, vector<1x1x8x48xf32>
    %72 = vector.shape_cast %71 : vector<1x1x8x48xf32> to vector<8x48xf32>
    %cst_80 = arith.constant dense<0.000000e+00> : vector<8x256xf32>
    %73 = tpu.matmul %72, %61, %cst_80 {dimension_numbers = #tpu.dot_dimension_numbers<[1], [0], [0], [1], [0, 0, 1, 1], [], []>} : vector<8x48xf32>, vector<48x256xf32>, vector<8x256xf32> -> vector<8x256xf32>
    %74 = arith.addf %70, %73 : vector<8x256xf32>
    %c0_81 = arith.constant 0 : index
    %c0_82 = arith.constant 0 : index
    %75 = vector.load %arg2[%c0_81, %c0_82] : memref<1x256xf32, #tpu.memory_space<vmem>>, vector<1x256xf32>
    %76 = vector.broadcast %75 : vector<1x256xf32> to vector<8x256xf32>
    %77 = arith.addf %74, %76 : vector<8x256xf32>
    %cst_83 = arith.constant 0.000000e+00 : f32
    %78 = vector.broadcast %cst_83 : f32 to vector<8x256xf32>
    %79 = arith.maximumf %77, %78 : vector<8x256xf32>
    %cst_84 = arith.constant 0.000000e+00 : f32
    %80 = vector.broadcast %cst_84 : f32 to vector<8x256xf32>
    %c1_85 = arith.constant 1 : index
    %c0_86 = arith.constant 0 : index
    %c0_87 = arith.constant 0 : index
    %c0_88 = arith.constant 0 : index
    %81 = vector.load %arg0[%c1_85, %c0_86, %c0_87, %c0_88] : memref<2x2x9x48xf32, #tpu.memory_space<vmem>>, vector<1x1x8x48xf32>
    %82 = vector.shape_cast %81 : vector<1x1x8x48xf32> to vector<8x48xf32>
    %cst_89 = arith.constant dense<0.000000e+00> : vector<8x256xf32>
    %83 = tpu.matmul %82, %57, %cst_89 {dimension_numbers = #tpu.dot_dimension_numbers<[1], [0], [0], [1], [0, 0, 1, 1], [], []>} : vector<8x48xf32>, vector<48x256xf32>, vector<8x256xf32> -> vector<8x256xf32>
    %84 = arith.addf %80, %83 : vector<8x256xf32>
    %c1_90 = arith.constant 1 : index
    %c1_91 = arith.constant 1 : index
    %c0_92 = arith.constant 0 : index
    %c0_93 = arith.constant 0 : index
    %85 = vector.load %arg0[%c1_90, %c1_91, %c0_92, %c0_93] : memref<2x2x9x48xf32, #tpu.memory_space<vmem>>, vector<1x1x8x48xf32>
    %86 = vector.shape_cast %85 : vector<1x1x8x48xf32> to vector<8x48xf32>
    %cst_94 = arith.constant dense<0.000000e+00> : vector<8x256xf32>
    %87 = tpu.matmul %86, %59, %cst_94 {dimension_numbers = #tpu.dot_dimension_numbers<[1], [0], [0], [1], [0, 0, 1, 1], [], []>} : vector<8x48xf32>, vector<48x256xf32>, vector<8x256xf32> -> vector<8x256xf32>
    %88 = arith.addf %84, %87 : vector<8x256xf32>
    %c1_95 = arith.constant 1 : index
    %c0_96 = arith.constant 0 : index
    %c1_97 = arith.constant 1 : index
    %c0_98 = arith.constant 0 : index
    %89 = vector.load %arg0[%c1_95, %c0_96, %c1_97, %c0_98] : memref<2x2x9x48xf32, #tpu.memory_space<vmem>>, vector<1x1x8x48xf32>
    %90 = vector.shape_cast %89 : vector<1x1x8x48xf32> to vector<8x48xf32>
    %cst_99 = arith.constant dense<0.000000e+00> : vector<8x256xf32>
    %91 = tpu.matmul %90, %61, %cst_99 {dimension_numbers = #tpu.dot_dimension_numbers<[1], [0], [0], [1], [0, 0, 1, 1], [], []>} : vector<8x48xf32>, vector<48x256xf32>, vector<8x256xf32> -> vector<8x256xf32>
    %92 = arith.addf %88, %91 : vector<8x256xf32>
    %c0_100 = arith.constant 0 : index
    %c0_101 = arith.constant 0 : index
    %93 = vector.load %arg2[%c0_100, %c0_101] : memref<1x256xf32, #tpu.memory_space<vmem>>, vector<1x256xf32>
    %94 = vector.broadcast %93 : vector<1x256xf32> to vector<8x256xf32>
    %95 = arith.addf %92, %94 : vector<8x256xf32>
    %cst_102 = arith.constant 0.000000e+00 : f32
    %96 = vector.broadcast %cst_102 : f32 to vector<8x256xf32>
    %97 = arith.maximumf %95, %96 : vector<8x256xf32>
    %cst_103 = arith.constant 0.000000e+00 : f32
    %98 = vector.broadcast %cst_103 : f32 to vector<1x256xf32>
    %cst_104 = arith.constant 0.000000e+00 : f32
    %99 = vector.broadcast %cst_104 : f32 to vector<1x256xf32>
    %cst_105 = arith.constant dense<0.000000e+00> : vector<256xf32>
    %100 = vector.multi_reduction <add>, %79, %cst_105 [0] : vector<8x256xf32> to vector<256xf32>
    %101 = vector.shape_cast %100 : vector<256xf32> to vector<1x256xf32>
    %102 = arith.addf %98, %101 : vector<1x256xf32>
    %103 = arith.mulf %79, %79 : vector<8x256xf32>
    %cst_106 = arith.constant dense<0.000000e+00> : vector<256xf32>
    %104 = vector.multi_reduction <add>, %103, %cst_106 [0] : vector<8x256xf32> to vector<256xf32>
    %105 = vector.shape_cast %104 : vector<256xf32> to vector<1x256xf32>
    %106 = arith.addf %99, %105 : vector<1x256xf32>
    %cst_107 = arith.constant dense<0.000000e+00> : vector<256xf32>
    %107 = vector.multi_reduction <add>, %97, %cst_107 [0] : vector<8x256xf32> to vector<256xf32>
    %108 = vector.shape_cast %107 : vector<256xf32> to vector<1x256xf32>
    %109 = arith.addf %102, %108 : vector<1x256xf32>
    %110 = arith.mulf %97, %97 : vector<8x256xf32>
    %cst_108 = arith.constant dense<0.000000e+00> : vector<256xf32>
    %111 = vector.multi_reduction <add>, %110, %cst_108 [0] : vector<8x256xf32> to vector<256xf32>
    %112 = vector.shape_cast %111 : vector<256xf32> to vector<1x256xf32>
    %113 = arith.addf %106, %112 : vector<1x256xf32>
    %c0_109 = arith.constant 0 : index
    %c0_110 = arith.constant 0 : index
    %114 = vector.load %arg5[%c0_109, %c0_110] : memref<256x256xf32, #tpu.memory_space<vmem>>, vector<256x256xf32>
    %cst_111 = arith.constant dense<0.000000e+00> : vector<1x256xf32>
    %115 = tpu.matmul %109, %114, %cst_111 {dimension_numbers = #tpu.dot_dimension_numbers<[1], [0], [0], [1], [0, 0, 1, 1], [], []>} : vector<1x256xf32>, vector<256x256xf32>, vector<1x256xf32> -> vector<1x256xf32>
    %cst_112 = arith.constant 1.280000e+02 : f32
    %116 = vector.broadcast %cst_112 : f32 to vector<1x256xf32>
    %117 = arith.divf %115, %116 : vector<1x256xf32>
    %c0_113 = arith.constant 0 : index
    %c0_114 = arith.constant 0 : index
    %118 = vector.load %arg5[%c0_113, %c0_114] : memref<256x256xf32, #tpu.memory_space<vmem>>, vector<256x256xf32>
    %cst_115 = arith.constant dense<0.000000e+00> : vector<1x256xf32>
    %119 = tpu.matmul %113, %118, %cst_115 {dimension_numbers = #tpu.dot_dimension_numbers<[1], [0], [0], [1], [0, 0, 1, 1], [], []>} : vector<1x256xf32>, vector<256x256xf32>, vector<1x256xf32> -> vector<1x256xf32>
    %cst_116 = arith.constant 1.280000e+02 : f32
    %120 = vector.broadcast %cst_116 : f32 to vector<1x256xf32>
    %121 = arith.divf %119, %120 : vector<1x256xf32>
    %122 = arith.mulf %117, %117 : vector<1x256xf32>
    %123 = arith.subf %121, %122 : vector<1x256xf32>
    %c0_117 = arith.constant 0 : index
    %c0_118 = arith.constant 0 : index
    %124 = vector.load %arg3[%c0_117, %c0_118] : memref<1x256xf32, #tpu.memory_space<vmem>>, vector<1x256xf32>
    %cst_119 = arith.constant 9.99999974E-6 : f32
    %125 = vector.broadcast %cst_119 : f32 to vector<1x256xf32>
    %126 = arith.addf %123, %125 : vector<1x256xf32>
    %127 = math.rsqrt %126 : vector<1x256xf32>
    %128 = arith.mulf %124, %127 : vector<1x256xf32>
    %c0_120 = arith.constant 0 : index
    %c0_121 = arith.constant 0 : index
    %129 = vector.load %arg4[%c0_120, %c0_121] : memref<1x256xf32, #tpu.memory_space<vmem>>, vector<1x256xf32>
    %130 = arith.mulf %117, %128 : vector<1x256xf32>
    %131 = arith.subf %129, %130 : vector<1x256xf32>
    %132 = vector.broadcast %128 : vector<1x256xf32> to vector<8x256xf32>
    %133 = arith.mulf %79, %132 : vector<8x256xf32>
    %134 = vector.broadcast %131 : vector<1x256xf32> to vector<8x256xf32>
    %135 = arith.addf %133, %134 : vector<8x256xf32>
    %136 = vector.extract_strided_slice %135 {offsets = [0, 0], sizes = [1, 256], strides = [1, 1]} : vector<8x256xf32> to vector<1x256xf32>
    %c0_122 = arith.constant 0 : index
    %c1_123 = arith.constant 1 : index
    %c0_124 = arith.constant 0 : index
    %c0_125 = arith.constant 0 : index
    %137 = vector.load %arg37[%c0_122, %c1_123, %c0_124, %c0_125] : memref<2x2x5x256xf32, #tpu.memory_space<vmem>>, vector<1x1x1x256xf32>
    %138 = vector.shape_cast %137 : vector<1x1x1x256xf32> to vector<1x256xf32>
    %139 = vector.shape_cast %136 : vector<1x256xf32> to vector<1x1x1x256xf32>
    tpu.vector_store %arg37[%c0_122, %c1_123, %c0_124, %c0_125], %139 {strides = array<i32>} : memref<2x2x5x256xf32, #tpu.memory_space<vmem>>, vector<1x1x1x256xf32>,
    %140 = vector.extract_strided_slice %135 {offsets = [1, 0], sizes = [1, 256], strides = [1, 1]} : vector<8x256xf32> to vector<1x256xf32>
    %c0_126 = arith.constant 0 : index
    %c0_127 = arith.constant 0 : index
    %c1_128 = arith.constant 1 : index
    %c0_129 = arith.constant 0 : index
    %141 = vector.load %arg37[%c0_126, %c0_127, %c1_128, %c0_129] : memref<2x2x5x256xf32, #tpu.memory_space<vmem>>, vector<1x1x1x256xf32>
    %142 = vector.shape_cast %141 : vector<1x1x1x256xf32> to vector<1x256xf32>
    %143 = vector.shape_cast %140 : vector<1x256xf32> to vector<1x1x1x256xf32>
    tpu.vector_store %arg37[%c0_126, %c0_127, %c1_128, %c0_129], %143 {strides = array<i32>} : memref<2x2x5x256xf32, #tpu.memory_space<vmem>>, vector<1x1x1x256xf32>,
    %144 = vector.extract_strided_slice %135 {offsets = [2, 0], sizes = [1, 256], strides = [1, 1]} : vector<8x256xf32> to vector<1x256xf32>
    %c0_130 = arith.constant 0 : index
    %c1_131 = arith.constant 1 : index
    %c1_132 = arith.constant 1 : index
    %c0_133 = arith.constant 0 : index
    %145 = vector.load %arg37[%c0_130, %c1_131, %c1_132, %c0_133] : memref<2x2x5x256xf32, #tpu.memory_space<vmem>>, vector<1x1x1x256xf32>
    %146 = vector.shape_cast %145 : vector<1x1x1x256xf32> to vector<1x256xf32>
    %147 = vector.shape_cast %144 : vector<1x256xf32> to vector<1x1x1x256xf32>
    tpu.vector_store %arg37[%c0_130, %c1_131, %c1_132, %c0_133], %147 {strides = array<i32>} : memref<2x2x5x256xf32, #tpu.memory_space<vmem>>, vector<1x1x1x256xf32>,
    %148 = vector.extract_strided_slice %135 {offsets = [3, 0], sizes = [1, 256], strides = [1, 1]} : vector<8x256xf32> to vector<1x256xf32>
    %c0_134 = arith.constant 0 : index
    %c0_135 = arith.constant 0 : index
    %c2_136 = arith.constant 2 : index
    %c0_137 = arith.constant 0 : index
    %149 = vector.load %arg37[%c0_134, %c0_135, %c2_136, %c0_137] : memref<2x2x5x256xf32, #tpu.memory_space<vmem>>, vector<1x1x1x256xf32>
    %150 = vector.shape_cast %149 : vector<1x1x1x256xf32> to vector<1x256xf32>
    %151 = vector.shape_cast %148 : vector<1x256xf32> to vector<1x1x1x256xf32>
    tpu.vector_store %arg37[%c0_134, %c0_135, %c2_136, %c0_137], %151 {strides = array<i32>} : memref<2x2x5x256xf32, #tpu.memory_space<vmem>>, vector<1x1x1x256xf32>,
    %152 = vector.extract_strided_slice %135 {offsets = [4, 0], sizes = [1, 256], strides = [1, 1]} : vector<8x256xf32> to vector<1x256xf32>
    %c0_138 = arith.constant 0 : index
    %c1_139 = arith.constant 1 : index
    %c2_140 = arith.constant 2 : index
    %c0_141 = arith.constant 0 : index
    %153 = vector.load %arg37[%c0_138, %c1_139, %c2_140, %c0_141] : memref<2x2x5x256xf32, #tpu.memory_space<vmem>>, vector<1x1x1x256xf32>
    %154 = vector.shape_cast %153 : vector<1x1x1x256xf32> to vector<1x256xf32>
    %155 = vector.shape_cast %152 : vector<1x256xf32> to vector<1x1x1x256xf32>
    tpu.vector_store %arg37[%c0_138, %c1_139, %c2_140, %c0_141], %155 {strides = array<i32>} : memref<2x2x5x256xf32, #tpu.memory_space<vmem>>, vector<1x1x1x256xf32>,
    %156 = vector.extract_strided_slice %135 {offsets = [5, 0], sizes = [1, 256], strides = [1, 1]} : vector<8x256xf32> to vector<1x256xf32>
    %c0_142 = arith.constant 0 : index
    %c0_143 = arith.constant 0 : index
    %c3 = arith.constant 3 : index
    %c0_144 = arith.constant 0 : index
    %157 = vector.load %arg37[%c0_142, %c0_143, %c3, %c0_144] : memref<2x2x5x256xf32, #tpu.memory_space<vmem>>, vector<1x1x1x256xf32>
    %158 = vector.shape_cast %157 : vector<1x1x1x256xf32> to vector<1x256xf32>
    %159 = vector.shape_cast %156 : vector<1x256xf32> to vector<1x1x1x256xf32>
    tpu.vector_store %arg37[%c0_142, %c0_143, %c3, %c0_144], %159 {strides = array<i32>} : memref<2x2x5x256xf32, #tpu.memory_space<vmem>>, vector<1x1x1x256xf32>,
    %160 = vector.extract_strided_slice %135 {offsets = [6, 0], sizes = [1, 256], strides = [1, 1]} : vector<8x256xf32> to vector<1x256xf32>
    %c0_145 = arith.constant 0 : index
    %c1_146 = arith.constant 1 : index
    %c3_147 = arith.constant 3 : index
    %c0_148 = arith.constant 0 : index
    %161 = vector.load %arg37[%c0_145, %c1_146, %c3_147, %c0_148] : memref<2x2x5x256xf32, #tpu.memory_space<vmem>>, vector<1x1x1x256xf32>
    %162 = vector.shape_cast %161 : vector<1x1x1x256xf32> to vector<1x256xf32>
    %163 = vector.shape_cast %160 : vector<1x256xf32> to vector<1x1x1x256xf32>
    tpu.vector_store %arg37[%c0_145, %c1_146, %c3_147, %c0_148], %163 {strides = array<i32>} : memref<2x2x5x256xf32, #tpu.memory_space<vmem>>, vector<1x1x1x256xf32>,
    %164 = vector.extract_strided_slice %135 {offsets = [7, 0], sizes = [1, 256], strides = [1, 1]} : vector<8x256xf32> to vector<1x256xf32>
    %c0_149 = arith.constant 0 : index
    %c0_150 = arith.constant 0 : index
    %c4 = arith.constant 4 : index
    %c0_151 = arith.constant 0 : index
    %165 = vector.load %arg37[%c0_149, %c0_150, %c4, %c0_151] : memref<2x2x5x256xf32, #tpu.memory_space<vmem>>, vector<1x1x1x256xf32>
    %166 = vector.shape_cast %165 : vector<1x1x1x256xf32> to vector<1x256xf32>
    %167 = vector.shape_cast %164 : vector<1x256xf32> to vector<1x1x1x256xf32>
    tpu.vector_store %arg37[%c0_149, %c0_150, %c4, %c0_151], %167 {strides = array<i32>} : memref<2x2x5x256xf32, #tpu.memory_space<vmem>>, vector<1x1x1x256xf32>,
    %168 = vector.broadcast %128 : vector<1x256xf32> to vector<8x256xf32>
    %169 = arith.mulf %97, %168 : vector<8x256xf32>
    %170 = vector.broadcast %131 : vector<1x256xf32> to vector<8x256xf32>
    %171 = arith.addf %169, %170 : vector<8x256xf32>
    %172 = vector.extract_strided_slice %171 {offsets = [0, 0], sizes = [1, 256], strides = [1, 1]} : vector<8x256xf32> to vector<1x256xf32>
    %c1_152 = arith.constant 1 : index
    %c1_153 = arith.constant 1 : index
    %c0_154 = arith.constant 0 : index
    %c0_155 = arith.constant 0 : index
    %173 = vector.load %arg37[%c1_152, %c1_153, %c0_154, %c0_155] : memref<2x2x5x256xf32, #tpu.memory_space<vmem>>, vector<1x1x1x256xf32>
    %174 = vector.shape_cast %173 : vector<1x1x1x256xf32> to vector<1x256xf32>
    %175 = vector.shape_cast %172 : vector<1x256xf32> to vector<1x1x1x256xf32>
    tpu.vector_store %arg37[%c1_152, %c1_153, %c0_154, %c0_155], %175 {strides = array<i32>} : memref<2x2x5x256xf32, #tpu.memory_space<vmem>>, vector<1x1x1x256xf32>,
    %176 = vector.extract_strided_slice %171 {offsets = [1, 0], sizes = [1, 256], strides = [1, 1]} : vector<8x256xf32> to vector<1x256xf32>
    %c1_156 = arith.constant 1 : index
    %c0_157 = arith.constant 0 : index
    %c1_158 = arith.constant 1 : index
    %c0_159 = arith.constant 0 : index
    %177 = vector.load %arg37[%c1_156, %c0_157, %c1_158, %c0_159] : memref<2x2x5x256xf32, #tpu.memory_space<vmem>>, vector<1x1x1x256xf32>
    %178 = vector.shape_cast %177 : vector<1x1x1x256xf32> to vector<1x256xf32>
    %179 = vector.shape_cast %176 : vector<1x256xf32> to vector<1x1x1x256xf32>
    tpu.vector_store %arg37[%c1_156, %c0_157, %c1_158, %c0_159], %179 {strides = array<i32>} : memref<2x2x5x256xf32, #tpu.memory_space<vmem>>, vector<1x1x1x256xf32>,
    %180 = vector.extract_strided_slice %171 {offsets = [2, 0], sizes = [1, 256], strides = [1, 1]} : vector<8x256xf32> to vector<1x256xf32>
    %c1_160 = arith.constant 1 : index
    %c1_161 = arith.constant 1 : index
    %c1_162 = arith.constant 1 : index
    %c0_163 = arith.constant 0 : index
    %181 = vector.load %arg37[%c1_160, %c1_161, %c1_162, %c0_163] : memref<2x2x5x256xf32, #tpu.memory_space<vmem>>, vector<1x1x1x256xf32>
    %182 = vector.shape_cast %181 : vector<1x1x1x256xf32> to vector<1x256xf32>
    %183 = vector.shape_cast %180 : vector<1x256xf32> to vector<1x1x1x256xf32>
    tpu.vector_store %arg37[%c1_160, %c1_161, %c1_162, %c0_163], %183 {strides = array<i32>} : memref<2x2x5x256xf32, #tpu.memory_space<vmem>>, vector<1x1x1x256xf32>,
    %184 = vector.extract_strided_slice %171 {offsets = [3, 0], sizes = [1, 256], strides = [1, 1]} : vector<8x256xf32> to vector<1x256xf32>
    %c1_164 = arith.constant 1 : index
    %c0_165 = arith.constant 0 : index
    %c2_166 = arith.constant 2 : index
    %c0_167 = arith.constant 0 : index
    %185 = vector.load %arg37[%c1_164, %c0_165, %c2_166, %c0_167] : memref<2x2x5x256xf32, #tpu.memory_space<vmem>>, vector<1x1x1x256xf32>
    %186 = vector.shape_cast %185 : vector<1x1x1x256xf32> to vector<1x256xf32>
    %187 = vector.shape_cast %184 : vector<1x256xf32> to vector<1x1x1x256xf32>
    tpu.vector_store %arg37[%c1_164, %c0_165, %c2_166, %c0_167], %187 {strides = array<i32>} : memref<2x2x5x256xf32, #tpu.memory_space<vmem>>, vector<1x1x1x256xf32>,
    %188 = vector.extract_strided_slice %171 {offsets = [4, 0], sizes = [1, 256], strides = [1, 1]} : vector<8x256xf32> to vector<1x256xf32>
    %c1_168 = arith.constant 1 : index
    %c1_169 = arith.constant 1 : index
    %c2_170 = arith.constant 2 : index
    %c0_171 = arith.constant 0 : index
    %189 = vector.load %arg37[%c1_168, %c1_169, %c2_170, %c0_171] : memref<2x2x5x256xf32, #tpu.memory_space<vmem>>, vector<1x1x1x256xf32>
    %190 = vector.shape_cast %189 : vector<1x1x1x256xf32> to vector<1x256xf32>
    %191 = vector.shape_cast %188 : vector<1x256xf32> to vector<1x1x1x256xf32>
    tpu.vector_store %arg37[%c1_168, %c1_169, %c2_170, %c0_171], %191 {strides = array<i32>} : memref<2x2x5x256xf32, #tpu.memory_space<vmem>>, vector<1x1x1x256xf32>,
    %192 = vector.extract_strided_slice %171 {offsets = [5, 0], sizes = [1, 256], strides = [1, 1]} : vector<8x256xf32> to vector<1x256xf32>
    %c1_172 = arith.constant 1 : index
    %c0_173 = arith.constant 0 : index
    %c3_174 = arith.constant 3 : index
    %c0_175 = arith.constant 0 : index
    %193 = vector.load %arg37[%c1_172, %c0_173, %c3_174, %c0_175] : memref<2x2x5x256xf32, #tpu.memory_space<vmem>>, vector<1x1x1x256xf32>
    %194 = vector.shape_cast %193 : vector<1x1x1x256xf32> to vector<1x256xf32>
    %195 = vector.shape_cast %192 : vector<1x256xf32> to vector<1x1x1x256xf32>
    tpu.vector_store %arg37[%c1_172, %c0_173, %c3_174, %c0_175], %195 {strides = array<i32>} : memref<2x2x5x256xf32, #tpu.memory_space<vmem>>, vector<1x1x1x256xf32>,
    %196 = vector.extract_strided_slice %171 {offsets = [6, 0], sizes = [1, 256], strides = [1, 1]} : vector<8x256xf32> to vector<1x256xf32>
    %c1_176 = arith.constant 1 : index
    %c1_177 = arith.constant 1 : index
    %c3_178 = arith.constant 3 : index
    %c0_179 = arith.constant 0 : index
    %197 = vector.load %arg37[%c1_176, %c1_177, %c3_178, %c0_179] : memref<2x2x5x256xf32, #tpu.memory_space<vmem>>, vector<1x1x1x256xf32>
    %198 = vector.shape_cast %197 : vector<1x1x1x256xf32> to vector<1x256xf32>
    %199 = vector.shape_cast %196 : vector<1x256xf32> to vector<1x1x1x256xf32>
    tpu.vector_store %arg37[%c1_176, %c1_177, %c3_178, %c0_179], %199 {strides = array<i32>} : memref<2x2x5x256xf32, #tpu.memory_space<vmem>>, vector<1x1x1x256xf32>,
    %200 = vector.extract_strided_slice %171 {offsets = [7, 0], sizes = [1, 256], strides = [1, 1]} : vector<8x256xf32> to vector<1x256xf32>
    %c1_180 = arith.constant 1 : index
    %c0_181 = arith.constant 0 : index
    %c4_182 = arith.constant 4 : index
    %c0_183 = arith.constant 0 : index
    %201 = vector.load %arg37[%c1_180, %c0_181, %c4_182, %c0_183] : memref<2x2x5x256xf32, #tpu.memory_space<vmem>>, vector<1x1x1x256xf32>
    %202 = vector.shape_cast %201 : vector<1x1x1x256xf32> to vector<1x256xf32>
    %203 = vector.shape_cast %200 : vector<1x256xf32> to vector<1x1x1x256xf32>
    tpu.vector_store %arg37[%c1_180, %c0_181, %c4_182, %c0_183], %203 {strides = array<i32>} : memref<2x2x5x256xf32, #tpu.memory_space<vmem>>, vector<1x1x1x256xf32>,
    %c0_184 = arith.constant 0 : index
    %c0_185 = arith.constant 0 : index
    %c0_186 = arith.constant 0 : index
    %204 = vector.load %arg6[%c0_184, %c0_185, %c0_186] : memref<3x256x256xf32, #tpu.memory_space<vmem>>, vector<1x256x256xf32>
    %205 = vector.shape_cast %204 : vector<1x256x256xf32> to vector<256x256xf32>
    %c1_187 = arith.constant 1 : index
    %c0_188 = arith.constant 0 : index
    %c0_189 = arith.constant 0 : index
    %206 = vector.load %arg6[%c1_187, %c0_188, %c0_189] : memref<3x256x256xf32, #tpu.memory_space<vmem>>, vector<1x256x256xf32>
    %207 = vector.shape_cast %206 : vector<1x256x256xf32> to vector<256x256xf32>
    %c2_190 = arith.constant 2 : index
    %c0_191 = arith.constant 0 : index
    %c0_192 = arith.constant 0 : index
    %208 = vector.load %arg6[%c2_190, %c0_191, %c0_192] : memref<3x256x256xf32, #tpu.memory_space<vmem>>, vector<1x256x256xf32>
    %209 = vector.shape_cast %208 : vector<1x256x256xf32> to vector<256x256xf32>
    %cst_193 = arith.constant 0.000000e+00 : f32
    %210 = vector.broadcast %cst_193 : f32 to vector<4x256xf32>
    %c0_194 = arith.constant 0 : index
    %c0_195 = arith.constant 0 : index
    %c0_196 = arith.constant 0 : index
    %c0_197 = arith.constant 0 : index
    %211 = vector.load %arg37[%c0_194, %c0_195, %c0_196, %c0_197] : memref<2x2x5x256xf32, #tpu.memory_space<vmem>>, vector<1x1x4x256xf32>
    %212 = vector.shape_cast %211 : vector<1x1x4x256xf32> to vector<4x256xf32>
    %cst_198 = arith.constant dense<0.000000e+00> : vector<4x256xf32>
    %213 = tpu.matmul %212, %205, %cst_198 {dimension_numbers = #tpu.dot_dimension_numbers<[1], [0], [0], [1], [0, 0, 1, 1], [], []>} : vector<4x256xf32>, vector<256x256xf32>, vector<4x256xf32> -> vector<4x256xf32>
    %214 = arith.addf %210, %213 : vector<4x256xf32>
    %c0_199 = arith.constant 0 : index
    %c1_200 = arith.constant 1 : index
    %c0_201 = arith.constant 0 : index
    %c0_202 = arith.constant 0 : index
    %215 = vector.load %arg37[%c0_199, %c1_200, %c0_201, %c0_202] : memref<2x2x5x256xf32, #tpu.memory_space<vmem>>, vector<1x1x4x256xf32>
    %216 = vector.shape_cast %215 : vector<1x1x4x256xf32> to vector<4x256xf32>
    %cst_203 = arith.constant dense<0.000000e+00> : vector<4x256xf32>
    %217 = tpu.matmul %216, %207, %cst_203 {dimension_numbers = #tpu.dot_dimension_numbers<[1], [0], [0], [1], [0, 0, 1, 1], [], []>} : vector<4x256xf32>, vector<256x256xf32>, vector<4x256xf32> -> vector<4x256xf32>
    %218 = arith.addf %214, %217 : vector<4x256xf32>
    %c0_204 = arith.constant 0 : index
    %c0_205 = arith.constant 0 : index
    %c1_206 = arith.constant 1 : index
    %c0_207 = arith.constant 0 : index
    %219 = vector.load %arg37[%c0_204, %c0_205, %c1_206, %c0_207] : memref<2x2x5x256xf32, #tpu.memory_space<vmem>>, vector<1x1x4x256xf32>
    %220 = vector.shape_cast %219 : vector<1x1x4x256xf32> to vector<4x256xf32>
    %cst_208 = arith.constant dense<0.000000e+00> : vector<4x256xf32>
    %221 = tpu.matmul %220, %209, %cst_208 {dimension_numbers = #tpu.dot_dimension_numbers<[1], [0], [0], [1], [0, 0, 1, 1], [], []>} : vector<4x256xf32>, vector<256x256xf32>, vector<4x256xf32> -> vector<4x256xf32>
    %222 = arith.addf %218, %221 : vector<4x256xf32>
    %c0_209 = arith.constant 0 : index
    %c0_210 = arith.constant 0 : index
    %223 = vector.load %arg7[%c0_209, %c0_210] : memref<1x256xf32, #tpu.memory_space<vmem>>, vector<1x256xf32>
    %224 = vector.broadcast %223 : vector<1x256xf32> to vector<4x256xf32>
    %225 = arith.addf %222, %224 : vector<4x256xf32>
    %cst_211 = arith.constant 0.000000e+00 : f32
    %226 = vector.broadcast %cst_211 : f32 to vector<4x256xf32>
    %227 = arith.maximumf %225, %226 : vector<4x256xf32>
    %cst_212 = arith.constant 0.000000e+00 : f32
    %228 = vector.broadcast %cst_212 : f32 to vector<4x256xf32>
    %c1_213 = arith.constant 1 : index
    %c0_214 = arith.constant 0 : index
    %c0_215 = arith.constant 0 : index
    %c0_216 = arith.constant 0 : index
    %229 = vector.load %arg37[%c1_213, %c0_214, %c0_215, %c0_216] : memref<2x2x5x256xf32, #tpu.memory_space<vmem>>, vector<1x1x4x256xf32>
    %230 = vector.shape_cast %229 : vector<1x1x4x256xf32> to vector<4x256xf32>
    %cst_217 = arith.constant dense<0.000000e+00> : vector<4x256xf32>
    %231 = tpu.matmul %230, %205, %cst_217 {dimension_numbers = #tpu.dot_dimension_numbers<[1], [0], [0], [1], [0, 0, 1, 1], [], []>} : vector<4x256xf32>, vector<256x256xf32>, vector<4x256xf32> -> vector<4x256xf32>
    %232 = arith.addf %228, %231 : vector<4x256xf32>
    %c1_218 = arith.constant 1 : index
    %c1_219 = arith.constant 1 : index
    %c0_220 = arith.constant 0 : index
    %c0_221 = arith.constant 0 : index
    %233 = vector.load %arg37[%c1_218, %c1_219, %c0_220, %c0_221] : memref<2x2x5x256xf32, #tpu.memory_space<vmem>>, vector<1x1x4x256xf32>
    %234 = vector.shape_cast %233 : vector<1x1x4x256xf32> to vector<4x256xf32>
    %cst_222 = arith.constant dense<0.000000e+00> : vector<4x256xf32>
    %235 = tpu.matmul %234, %207, %cst_222 {dimension_numbers = #tpu.dot_dimension_numbers<[1], [0], [0], [1], [0, 0, 1, 1], [], []>} : vector<4x256xf32>, vector<256x256xf32>, vector<4x256xf32> -> vector<4x256xf32>
    %236 = arith.addf %232, %235 : vector<4x256xf32>
    %c1_223 = arith.constant 1 : index
    %c0_224 = arith.constant 0 : index
    %c1_225 = arith.constant 1 : index
    %c0_226 = arith.constant 0 : index
    %237 = vector.load %arg37[%c1_223, %c0_224, %c1_225, %c0_226] : memref<2x2x5x256xf32, #tpu.memory_space<vmem>>, vector<1x1x4x256xf32>
    %238 = vector.shape_cast %237 : vector<1x1x4x256xf32> to vector<4x256xf32>
    %cst_227 = arith.constant dense<0.000000e+00> : vector<4x256xf32>
    %239 = tpu.matmul %238, %209, %cst_227 {dimension_numbers = #tpu.dot_dimension_numbers<[1], [0], [0], [1], [0, 0, 1, 1], [], []>} : vector<4x256xf32>, vector<256x256xf32>, vector<4x256xf32> -> vector<4x256xf32>
    %240 = arith.addf %236, %239 : vector<4x256xf32>
    %c0_228 = arith.constant 0 : index
    %c0_229 = arith.constant 0 : index
    %241 = vector.load %arg7[%c0_228, %c0_229] : memref<1x256xf32, #tpu.memory_space<vmem>>, vector<1x256xf32>
    %242 = vector.broadcast %241 : vector<1x256xf32> to vector<4x256xf32>
    %243 = arith.addf %240, %242 : vector<4x256xf32>
    %cst_230 = arith.constant 0.000000e+00 : f32
    %244 = vector.broadcast %cst_230 : f32 to vector<4x256xf32>
    %245 = arith.maximumf %243, %244 : vector<4x256xf32>
    %cst_231 = arith.constant 0.000000e+00 : f32
    %246 = vector.broadcast %cst_231 : f32 to vector<1x256xf32>
    %cst_232 = arith.constant 0.000000e+00 : f32
    %247 = vector.broadcast %cst_232 : f32 to vector<1x256xf32>
    %cst_233 = arith.constant dense<0.000000e+00> : vector<256xf32>
    %248 = vector.multi_reduction <add>, %227, %cst_233 [0] : vector<4x256xf32> to vector<256xf32>
    %249 = vector.shape_cast %248 : vector<256xf32> to vector<1x256xf32>
    %250 = arith.addf %246, %249 : vector<1x256xf32>
    %251 = arith.mulf %227, %227 : vector<4x256xf32>
    %cst_234 = arith.constant dense<0.000000e+00> : vector<256xf32>
    %252 = vector.multi_reduction <add>, %251, %cst_234 [0] : vector<4x256xf32> to vector<256xf32>
    %253 = vector.shape_cast %252 : vector<256xf32> to vector<1x256xf32>
    %254 = arith.addf %247, %253 : vector<1x256xf32>
    %cst_235 = arith.constant dense<0.000000e+00> : vector<256xf32>
    %255 = vector.multi_reduction <add>, %245, %cst_235 [0] : vector<4x256xf32> to vector<256xf32>
    %256 = vector.shape_cast %255 : vector<256xf32> to vector<1x256xf32>
    %257 = arith.addf %250, %256 : vector<1x256xf32>
    %258 = arith.mulf %245, %245 : vector<4x256xf32>
    %cst_236 = arith.constant dense<0.000000e+00> : vector<256xf32>
    %259 = vector.multi_reduction <add>, %258, %cst_236 [0] : vector<4x256xf32> to vector<256xf32>
    %260 = vector.shape_cast %259 : vector<256xf32> to vector<1x256xf32>
    %261 = arith.addf %254, %260 : vector<1x256xf32>
    %c0_237 = arith.constant 0 : index
    %c0_238 = arith.constant 0 : index
    %262 = vector.load %arg10[%c0_237, %c0_238] : memref<256x256xf32, #tpu.memory_space<vmem>>, vector<256x256xf32>
    %cst_239 = arith.constant dense<0.000000e+00> : vector<1x256xf32>
    %263 = tpu.matmul %257, %262, %cst_239 {dimension_numbers = #tpu.dot_dimension_numbers<[1], [0], [0], [1], [0, 0, 1, 1], [], []>} : vector<1x256xf32>, vector<256x256xf32>, vector<1x256xf32> -> vector<1x256xf32>
    %cst_240 = arith.constant 3.200000e+01 : f32
    %264 = vector.broadcast %cst_240 : f32 to vector<1x256xf32>
    %265 = arith.divf %263, %264 : vector<1x256xf32>
    %c0_241 = arith.constant 0 : index
    %c0_242 = arith.constant 0 : index
    %266 = vector.load %arg10[%c0_241, %c0_242] : memref<256x256xf32, #tpu.memory_space<vmem>>, vector<256x256xf32>
    %cst_243 = arith.constant dense<0.000000e+00> : vector<1x256xf32>
    %267 = tpu.matmul %261, %266, %cst_243 {dimension_numbers = #tpu.dot_dimension_numbers<[1], [0], [0], [1], [0, 0, 1, 1], [], []>} : vector<1x256xf32>, vector<256x256xf32>, vector<1x256xf32> -> vector<1x256xf32>
    %cst_244 = arith.constant 3.200000e+01 : f32
    %268 = vector.broadcast %cst_244 : f32 to vector<1x256xf32>
    %269 = arith.divf %267, %268 : vector<1x256xf32>
    %270 = arith.mulf %265, %265 : vector<1x256xf32>
    %271 = arith.subf %269, %270 : vector<1x256xf32>
    %c0_245 = arith.constant 0 : index
    %c0_246 = arith.constant 0 : index
    %272 = vector.load %arg8[%c0_245, %c0_246] : memref<1x256xf32, #tpu.memory_space<vmem>>, vector<1x256xf32>
    %cst_247 = arith.constant 9.99999974E-6 : f32
    %273 = vector.broadcast %cst_247 : f32 to vector<1x256xf32>
    %274 = arith.addf %271, %273 : vector<1x256xf32>
    %275 = math.rsqrt %274 : vector<1x256xf32>
    %276 = arith.mulf %272, %275 : vector<1x256xf32>
    %c0_248 = arith.constant 0 : index
    %c0_249 = arith.constant 0 : index
    %277 = vector.load %arg9[%c0_248, %c0_249] : memref<1x256xf32, #tpu.memory_space<vmem>>, vector<1x256xf32>
    %278 = arith.mulf %265, %276 : vector<1x256xf32>
    %279 = arith.subf %277, %278 : vector<1x256xf32>
    %280 = vector.broadcast %276 : vector<1x256xf32> to vector<4x256xf32>
    %281 = arith.mulf %227, %280 : vector<4x256xf32>
    %282 = vector.broadcast %279 : vector<1x256xf32> to vector<4x256xf32>
    %283 = arith.addf %281, %282 : vector<4x256xf32>
    %c0_250 = arith.constant 0 : index
    %c1_251 = arith.constant 1 : index
    %c0_252 = arith.constant 0 : index
    %284 = vector.load %arg38[%c0_250, %c1_251, %c0_252] : memref<2x6x256xf32, #tpu.memory_space<vmem>>, vector<1x4x256xf32>
    %285 = vector.shape_cast %284 : vector<1x4x256xf32> to vector<4x256xf32>
    %286 = vector.shape_cast %283 : vector<4x256xf32> to vector<1x4x256xf32>
    tpu.vector_store %arg38[%c0_250, %c1_251, %c0_252], %286 {strides = array<i32>} : memref<2x6x256xf32, #tpu.memory_space<vmem>>, vector<1x4x256xf32>,
    %287 = vector.broadcast %276 : vector<1x256xf32> to vector<4x256xf32>
    %288 = arith.mulf %245, %287 : vector<4x256xf32>
    %289 = vector.broadcast %279 : vector<1x256xf32> to vector<4x256xf32>
    %290 = arith.addf %288, %289 : vector<4x256xf32>
    %c1_253 = arith.constant 1 : index
    %c1_254 = arith.constant 1 : index
    %c0_255 = arith.constant 0 : index
    %291 = vector.load %arg38[%c1_253, %c1_254, %c0_255] : memref<2x6x256xf32, #tpu.memory_space<vmem>>, vector<1x4x256xf32>
    %292 = vector.shape_cast %291 : vector<1x4x256xf32> to vector<4x256xf32>
    %293 = vector.shape_cast %290 : vector<4x256xf32> to vector<1x4x256xf32>
    tpu.vector_store %arg38[%c1_253, %c1_254, %c0_255], %293 {strides = array<i32>} : memref<2x6x256xf32, #tpu.memory_space<vmem>>, vector<1x4x256xf32>,
    %c0_256 = arith.constant 0 : index
    %c0_257 = arith.constant 0 : index
    %c0_258 = arith.constant 0 : index
    %294 = vector.load %arg11[%c0_256, %c0_257, %c0_258] : memref<3x256x256xf32, #tpu.memory_space<vmem>>, vector<1x256x256xf32>
    %295 = vector.shape_cast %294 : vector<1x256x256xf32> to vector<256x256xf32>
    %c1_259 = arith.constant 1 : index
    %c0_260 = arith.constant 0 : index
    %c0_261 = arith.constant 0 : index
    %296 = vector.load %arg11[%c1_259, %c0_260, %c0_261] : memref<3x256x256xf32, #tpu.memory_space<vmem>>, vector<1x256x256xf32>
    %297 = vector.shape_cast %296 : vector<1x256x256xf32> to vector<256x256xf32>
    %c2_262 = arith.constant 2 : index
    %c0_263 = arith.constant 0 : index
    %c0_264 = arith.constant 0 : index
    %298 = vector.load %arg11[%c2_262, %c0_263, %c0_264] : memref<3x256x256xf32, #tpu.memory_space<vmem>>, vector<1x256x256xf32>
    %299 = vector.shape_cast %298 : vector<1x256x256xf32> to vector<256x256xf32>
    %cst_265 = arith.constant 0.000000e+00 : f32
    %300 = vector.broadcast %cst_265 : f32 to vector<4x256xf32>
    %c0_266 = arith.constant 0 : index
    %c0_267 = arith.constant 0 : index
    %c0_268 = arith.constant 0 : index
    %301 = vector.load %arg38[%c0_266, %c0_267, %c0_268] : memref<2x6x256xf32, #tpu.memory_space<vmem>>, vector<1x4x256xf32>
    %302 = vector.shape_cast %301 : vector<1x4x256xf32> to vector<4x256xf32>
    %cst_269 = arith.constant dense<0.000000e+00> : vector<4x256xf32>
    %303 = tpu.matmul %302, %295, %cst_269 {dimension_numbers = #tpu.dot_dimension_numbers<[1], [0], [0], [1], [0, 0, 1, 1], [], []>} : vector<4x256xf32>, vector<256x256xf32>, vector<4x256xf32> -> vector<4x256xf32>
    %304 = arith.addf %300, %303 : vector<4x256xf32>
    %c0_270 = arith.constant 0 : index
    %c1_271 = arith.constant 1 : index
    %c0_272 = arith.constant 0 : index
    %305 = vector.load %arg38[%c0_270, %c1_271, %c0_272] : memref<2x6x256xf32, #tpu.memory_space<vmem>>, vector<1x4x256xf32>
    %306 = vector.shape_cast %305 : vector<1x4x256xf32> to vector<4x256xf32>
    %cst_273 = arith.constant dense<0.000000e+00> : vector<4x256xf32>
    %307 = tpu.matmul %306, %297, %cst_273 {dimension_numbers = #tpu.dot_dimension_numbers<[1], [0], [0], [1], [0, 0, 1, 1], [], []>} : vector<4x256xf32>, vector<256x256xf32>, vector<4x256xf32> -> vector<4x256xf32>
    %308 = arith.addf %304, %307 : vector<4x256xf32>
    %c0_274 = arith.constant 0 : index
    %c2_275 = arith.constant 2 : index
    %c0_276 = arith.constant 0 : index
    %309 = vector.load %arg38[%c0_274, %c2_275, %c0_276] : memref<2x6x256xf32, #tpu.memory_space<vmem>>, vector<1x4x256xf32>
    %310 = vector.shape_cast %309 : vector<1x4x256xf32> to vector<4x256xf32>
    %cst_277 = arith.constant dense<0.000000e+00> : vector<4x256xf32>
    %311 = tpu.matmul %310, %299, %cst_277 {dimension_numbers = #tpu.dot_dimension_numbers<[1], [0], [0], [1], [0, 0, 1, 1], [], []>} : vector<4x256xf32>, vector<256x256xf32>, vector<4x256xf32> -> vector<4x256xf32>
    %312 = arith.addf %308, %311 : vector<4x256xf32>
    %c0_278 = arith.constant 0 : index
    %c0_279 = arith.constant 0 : index
    %313 = vector.load %arg12[%c0_278, %c0_279] : memref<1x256xf32, #tpu.memory_space<vmem>>, vector<1x256xf32>
    %314 = vector.broadcast %313 : vector<1x256xf32> to vector<4x256xf32>
    %315 = arith.addf %312, %314 : vector<4x256xf32>
    %cst_280 = arith.constant 0.000000e+00 : f32
    %316 = vector.broadcast %cst_280 : f32 to vector<4x256xf32>
    %317 = arith.maximumf %315, %316 : vector<4x256xf32>
    %cst_281 = arith.constant 0.000000e+00 : f32
    %318 = vector.broadcast %cst_281 : f32 to vector<4x256xf32>
    %c1_282 = arith.constant 1 : index
    %c0_283 = arith.constant 0 : index
    %c0_284 = arith.constant 0 : index
    %319 = vector.load %arg38[%c1_282, %c0_283, %c0_284] : memref<2x6x256xf32, #tpu.memory_space<vmem>>, vector<1x4x256xf32>
    %320 = vector.shape_cast %319 : vector<1x4x256xf32> to vector<4x256xf32>
    %cst_285 = arith.constant dense<0.000000e+00> : vector<4x256xf32>
    %321 = tpu.matmul %320, %295, %cst_285 {dimension_numbers = #tpu.dot_dimension_numbers<[1], [0], [0], [1], [0, 0, 1, 1], [], []>} : vector<4x256xf32>, vector<256x256xf32>, vector<4x256xf32> -> vector<4x256xf32>
    %322 = arith.addf %318, %321 : vector<4x256xf32>
    %c1_286 = arith.constant 1 : index
    %c1_287 = arith.constant 1 : index
    %c0_288 = arith.constant 0 : index
    %323 = vector.load %arg38[%c1_286, %c1_287, %c0_288] : memref<2x6x256xf32, #tpu.memory_space<vmem>>, vector<1x4x256xf32>
    %324 = vector.shape_cast %323 : vector<1x4x256xf32> to vector<4x256xf32>
    %cst_289 = arith.constant dense<0.000000e+00> : vector<4x256xf32>
    %325 = tpu.matmul %324, %297, %cst_289 {dimension_numbers = #tpu.dot_dimension_numbers<[1], [0], [0], [1], [0, 0, 1, 1], [], []>} : vector<4x256xf32>, vector<256x256xf32>, vector<4x256xf32> -> vector<4x256xf32>
    %326 = arith.addf %322, %325 : vector<4x256xf32>
    %c1_290 = arith.constant 1 : index
    %c2_291 = arith.constant 2 : index
    %c0_292 = arith.constant 0 : index
    %327 = vector.load %arg38[%c1_290, %c2_291, %c0_292] : memref<2x6x256xf32, #tpu.memory_space<vmem>>, vector<1x4x256xf32>
    %328 = vector.shape_cast %327 : vector<1x4x256xf32> to vector<4x256xf32>
    %cst_293 = arith.constant dense<0.000000e+00> : vector<4x256xf32>
    %329 = tpu.matmul %328, %299, %cst_293 {dimension_numbers = #tpu.dot_dimension_numbers<[1], [0], [0], [1], [0, 0, 1, 1], [], []>} : vector<4x256xf32>, vector<256x256xf32>, vector<4x256xf32> -> vector<4x256xf32>
    %330 = arith.addf %326, %329 : vector<4x256xf32>
    %c0_294 = arith.constant 0 : index
    %c0_295 = arith.constant 0 : index
    %331 = vector.load %arg12[%c0_294, %c0_295] : memref<1x256xf32, #tpu.memory_space<vmem>>, vector<1x256xf32>
    %332 = vector.broadcast %331 : vector<1x256xf32> to vector<4x256xf32>
    %333 = arith.addf %330, %332 : vector<4x256xf32>
    %cst_296 = arith.constant 0.000000e+00 : f32
    %334 = vector.broadcast %cst_296 : f32 to vector<4x256xf32>
    %335 = arith.maximumf %333, %334 : vector<4x256xf32>
    %cst_297 = arith.constant 0.000000e+00 : f32
    %336 = vector.broadcast %cst_297 : f32 to vector<1x256xf32>
    %cst_298 = arith.constant 0.000000e+00 : f32
    %337 = vector.broadcast %cst_298 : f32 to vector<1x256xf32>
    %cst_299 = arith.constant dense<0.000000e+00> : vector<256xf32>
    %338 = vector.multi_reduction <add>, %317, %cst_299 [0] : vector<4x256xf32> to vector<256xf32>
    %339 = vector.shape_cast %338 : vector<256xf32> to vector<1x256xf32>
    %340 = arith.addf %336, %339 : vector<1x256xf32>
    %341 = arith.mulf %317, %317 : vector<4x256xf32>
    %cst_300 = arith.constant dense<0.000000e+00> : vector<256xf32>
    %342 = vector.multi_reduction <add>, %341, %cst_300 [0] : vector<4x256xf32> to vector<256xf32>
    %343 = vector.shape_cast %342 : vector<256xf32> to vector<1x256xf32>
    %344 = arith.addf %337, %343 : vector<1x256xf32>
    %cst_301 = arith.constant dense<0.000000e+00> : vector<256xf32>
    %345 = vector.multi_reduction <add>, %335, %cst_301 [0] : vector<4x256xf32> to vector<256xf32>
    %346 = vector.shape_cast %345 : vector<256xf32> to vector<1x256xf32>
    %347 = arith.addf %340, %346 : vector<1x256xf32>
    %348 = arith.mulf %335, %335 : vector<4x256xf32>
    %cst_302 = arith.constant dense<0.000000e+00> : vector<256xf32>
    %349 = vector.multi_reduction <add>, %348, %cst_302 [0] : vector<4x256xf32> to vector<256xf32>
    %350 = vector.shape_cast %349 : vector<256xf32> to vector<1x256xf32>
    %351 = arith.addf %344, %350 : vector<1x256xf32>
    %c0_303 = arith.constant 0 : index
    %c0_304 = arith.constant 0 : index
    %352 = vector.load %arg15[%c0_303, %c0_304] : memref<256x256xf32, #tpu.memory_space<vmem>>, vector<256x256xf32>
    %cst_305 = arith.constant dense<0.000000e+00> : vector<1x256xf32>
    %353 = tpu.matmul %347, %352, %cst_305 {dimension_numbers = #tpu.dot_dimension_numbers<[1], [0], [0], [1], [0, 0, 1, 1], [], []>} : vector<1x256xf32>, vector<256x256xf32>, vector<1x256xf32> -> vector<1x256xf32>
    %cst_306 = arith.constant 3.200000e+01 : f32
    %354 = vector.broadcast %cst_306 : f32 to vector<1x256xf32>
    %355 = arith.divf %353, %354 : vector<1x256xf32>
    %c0_307 = arith.constant 0 : index
    %c0_308 = arith.constant 0 : index
    %356 = vector.load %arg15[%c0_307, %c0_308] : memref<256x256xf32, #tpu.memory_space<vmem>>, vector<256x256xf32>
    %cst_309 = arith.constant dense<0.000000e+00> : vector<1x256xf32>
    %357 = tpu.matmul %351, %356, %cst_309 {dimension_numbers = #tpu.dot_dimension_numbers<[1], [0], [0], [1], [0, 0, 1, 1], [], []>} : vector<1x256xf32>, vector<256x256xf32>, vector<1x256xf32> -> vector<1x256xf32>
    %cst_310 = arith.constant 3.200000e+01 : f32
    %358 = vector.broadcast %cst_310 : f32 to vector<1x256xf32>
    %359 = arith.divf %357, %358 : vector<1x256xf32>
    %360 = arith.mulf %355, %355 : vector<1x256xf32>
    %361 = arith.subf %359, %360 : vector<1x256xf32>
    %c0_311 = arith.constant 0 : index
    %c0_312 = arith.constant 0 : index
    %362 = vector.load %arg13[%c0_311, %c0_312] : memref<1x256xf32, #tpu.memory_space<vmem>>, vector<1x256xf32>
    %cst_313 = arith.constant 9.99999974E-6 : f32
    %363 = vector.broadcast %cst_313 : f32 to vector<1x256xf32>
    %364 = arith.addf %361, %363 : vector<1x256xf32>
    %365 = math.rsqrt %364 : vector<1x256xf32>
    %366 = arith.mulf %362, %365 : vector<1x256xf32>
    %c0_314 = arith.constant 0 : index
    %c0_315 = arith.constant 0 : index
    %367 = vector.load %arg14[%c0_314, %c0_315] : memref<1x256xf32, #tpu.memory_space<vmem>>, vector<1x256xf32>
    %368 = arith.mulf %355, %366 : vector<1x256xf32>
    %369 = arith.subf %367, %368 : vector<1x256xf32>
    %370 = vector.broadcast %366 : vector<1x256xf32> to vector<4x256xf32>
    %371 = arith.mulf %317, %370 : vector<4x256xf32>
    %372 = vector.broadcast %369 : vector<1x256xf32> to vector<4x256xf32>
    %373 = arith.addf %371, %372 : vector<4x256xf32>
    %c0_316 = arith.constant 0 : index
    %c1_317 = arith.constant 1 : index
    %c0_318 = arith.constant 0 : index
    %374 = vector.load %arg39[%c0_316, %c1_317, %c0_318] : memref<2x6x256xf32, #tpu.memory_space<vmem>>, vector<1x4x256xf32>
    %375 = vector.shape_cast %374 : vector<1x4x256xf32> to vector<4x256xf32>
    %376 = vector.shape_cast %373 : vector<4x256xf32> to vector<1x4x256xf32>
    tpu.vector_store %arg39[%c0_316, %c1_317, %c0_318], %376 {strides = array<i32>} : memref<2x6x256xf32, #tpu.memory_space<vmem>>, vector<1x4x256xf32>,
    %377 = vector.broadcast %366 : vector<1x256xf32> to vector<4x256xf32>
    %378 = arith.mulf %335, %377 : vector<4x256xf32>
    %379 = vector.broadcast %369 : vector<1x256xf32> to vector<4x256xf32>
    %380 = arith.addf %378, %379 : vector<4x256xf32>
    %c1_319 = arith.constant 1 : index
    %c1_320 = arith.constant 1 : index
    %c0_321 = arith.constant 0 : index
    %381 = vector.load %arg39[%c1_319, %c1_320, %c0_321] : memref<2x6x256xf32, #tpu.memory_space<vmem>>, vector<1x4x256xf32>
    %382 = vector.shape_cast %381 : vector<1x4x256xf32> to vector<4x256xf32>
    %383 = vector.shape_cast %380 : vector<4x256xf32> to vector<1x4x256xf32>
    tpu.vector_store %arg39[%c1_319, %c1_320, %c0_321], %383 {strides = array<i32>} : memref<2x6x256xf32, #tpu.memory_space<vmem>>, vector<1x4x256xf32>,
    %c0_322 = arith.constant 0 : index
    %c0_323 = arith.constant 0 : index
    %c0_324 = arith.constant 0 : index
    %384 = vector.load %arg16[%c0_322, %c0_323, %c0_324] : memref<3x256x256xf32, #tpu.memory_space<vmem>>, vector<1x256x256xf32>
    %385 = vector.shape_cast %384 : vector<1x256x256xf32> to vector<256x256xf32>
    %c1_325 = arith.constant 1 : index
    %c0_326 = arith.constant 0 : index
    %c0_327 = arith.constant 0 : index
    %386 = vector.load %arg16[%c1_325, %c0_326, %c0_327] : memref<3x256x256xf32, #tpu.memory_space<vmem>>, vector<1x256x256xf32>
    %387 = vector.shape_cast %386 : vector<1x256x256xf32> to vector<256x256xf32>
    %c2_328 = arith.constant 2 : index
    %c0_329 = arith.constant 0 : index
    %c0_330 = arith.constant 0 : index
    %388 = vector.load %arg16[%c2_328, %c0_329, %c0_330] : memref<3x256x256xf32, #tpu.memory_space<vmem>>, vector<1x256x256xf32>
    %389 = vector.shape_cast %388 : vector<1x256x256xf32> to vector<256x256xf32>
    %cst_331 = arith.constant 0.000000e+00 : f32
    %390 = vector.broadcast %cst_331 : f32 to vector<4x256xf32>
    %c0_332 = arith.constant 0 : index
    %c0_333 = arith.constant 0 : index
    %c0_334 = arith.constant 0 : index
    %391 = vector.load %arg39[%c0_332, %c0_333, %c0_334] : memref<2x6x256xf32, #tpu.memory_space<vmem>>, vector<1x4x256xf32>
    %392 = vector.shape_cast %391 : vector<1x4x256xf32> to vector<4x256xf32>
    %cst_335 = arith.constant dense<0.000000e+00> : vector<4x256xf32>
    %393 = tpu.matmul %392, %385, %cst_335 {dimension_numbers = #tpu.dot_dimension_numbers<[1], [0], [0], [1], [0, 0, 1, 1], [], []>} : vector<4x256xf32>, vector<256x256xf32>, vector<4x256xf32> -> vector<4x256xf32>
    %394 = arith.addf %390, %393 : vector<4x256xf32>
    %c0_336 = arith.constant 0 : index
    %c1_337 = arith.constant 1 : index
    %c0_338 = arith.constant 0 : index
    %395 = vector.load %arg39[%c0_336, %c1_337, %c0_338] : memref<2x6x256xf32, #tpu.memory_space<vmem>>, vector<1x4x256xf32>
    %396 = vector.shape_cast %395 : vector<1x4x256xf32> to vector<4x256xf32>
    %cst_339 = arith.constant dense<0.000000e+00> : vector<4x256xf32>
    %397 = tpu.matmul %396, %387, %cst_339 {dimension_numbers = #tpu.dot_dimension_numbers<[1], [0], [0], [1], [0, 0, 1, 1], [], []>} : vector<4x256xf32>, vector<256x256xf32>, vector<4x256xf32> -> vector<4x256xf32>
    %398 = arith.addf %394, %397 : vector<4x256xf32>
    %c0_340 = arith.constant 0 : index
    %c2_341 = arith.constant 2 : index
    %c0_342 = arith.constant 0 : index
    %399 = vector.load %arg39[%c0_340, %c2_341, %c0_342] : memref<2x6x256xf32, #tpu.memory_space<vmem>>, vector<1x4x256xf32>
    %400 = vector.shape_cast %399 : vector<1x4x256xf32> to vector<4x256xf32>
    %cst_343 = arith.constant dense<0.000000e+00> : vector<4x256xf32>
    %401 = tpu.matmul %400, %389, %cst_343 {dimension_numbers = #tpu.dot_dimension_numbers<[1], [0], [0], [1], [0, 0, 1, 1], [], []>} : vector<4x256xf32>, vector<256x256xf32>, vector<4x256xf32> -> vector<4x256xf32>
    %402 = arith.addf %398, %401 : vector<4x256xf32>
    %c0_344 = arith.constant 0 : index
    %c0_345 = arith.constant 0 : index
    %403 = vector.load %arg17[%c0_344, %c0_345] : memref<1x256xf32, #tpu.memory_space<vmem>>, vector<1x256xf32>
    %404 = vector.broadcast %403 : vector<1x256xf32> to vector<4x256xf32>
    %405 = arith.addf %402, %404 : vector<4x256xf32>
    %cst_346 = arith.constant 0.000000e+00 : f32
    %406 = vector.broadcast %cst_346 : f32 to vector<4x256xf32>
    %407 = arith.maximumf %405, %406 : vector<4x256xf32>
    %cst_347 = arith.constant 0.000000e+00 : f32
    %408 = vector.broadcast %cst_347 : f32 to vector<4x256xf32>
    %c1_348 = arith.constant 1 : index
    %c0_349 = arith.constant 0 : index
    %c0_350 = arith.constant 0 : index
    %409 = vector.load %arg39[%c1_348, %c0_349, %c0_350] : memref<2x6x256xf32, #tpu.memory_space<vmem>>, vector<1x4x256xf32>
    %410 = vector.shape_cast %409 : vector<1x4x256xf32> to vector<4x256xf32>
    %cst_351 = arith.constant dense<0.000000e+00> : vector<4x256xf32>
    %411 = tpu.matmul %410, %385, %cst_351 {dimension_numbers = #tpu.dot_dimension_numbers<[1], [0], [0], [1], [0, 0, 1, 1], [], []>} : vector<4x256xf32>, vector<256x256xf32>, vector<4x256xf32> -> vector<4x256xf32>
    %412 = arith.addf %408, %411 : vector<4x256xf32>
    %c1_352 = arith.constant 1 : index
    %c1_353 = arith.constant 1 : index
    %c0_354 = arith.constant 0 : index
    %413 = vector.load %arg39[%c1_352, %c1_353, %c0_354] : memref<2x6x256xf32, #tpu.memory_space<vmem>>, vector<1x4x256xf32>
    %414 = vector.shape_cast %413 : vector<1x4x256xf32> to vector<4x256xf32>
    %cst_355 = arith.constant dense<0.000000e+00> : vector<4x256xf32>
    %415 = tpu.matmul %414, %387, %cst_355 {dimension_numbers = #tpu.dot_dimension_numbers<[1], [0], [0], [1], [0, 0, 1, 1], [], []>} : vector<4x256xf32>, vector<256x256xf32>, vector<4x256xf32> -> vector<4x256xf32>
    %416 = arith.addf %412, %415 : vector<4x256xf32>
    %c1_356 = arith.constant 1 : index
    %c2_357 = arith.constant 2 : index
    %c0_358 = arith.constant 0 : index
    %417 = vector.load %arg39[%c1_356, %c2_357, %c0_358] : memref<2x6x256xf32, #tpu.memory_space<vmem>>, vector<1x4x256xf32>
    %418 = vector.shape_cast %417 : vector<1x4x256xf32> to vector<4x256xf32>
    %cst_359 = arith.constant dense<0.000000e+00> : vector<4x256xf32>
    %419 = tpu.matmul %418, %389, %cst_359 {dimension_numbers = #tpu.dot_dimension_numbers<[1], [0], [0], [1], [0, 0, 1, 1], [], []>} : vector<4x256xf32>, vector<256x256xf32>, vector<4x256xf32> -> vector<4x256xf32>
    %420 = arith.addf %416, %419 : vector<4x256xf32>
    %c0_360 = arith.constant 0 : index
    %c0_361 = arith.constant 0 : index
    %421 = vector.load %arg17[%c0_360, %c0_361] : memref<1x256xf32, #tpu.memory_space<vmem>>, vector<1x256xf32>
    %422 = vector.broadcast %421 : vector<1x256xf32> to vector<4x256xf32>
    %423 = arith.addf %420, %422 : vector<4x256xf32>
    %cst_362 = arith.constant 0.000000e+00 : f32
    %424 = vector.broadcast %cst_362 : f32 to vector<4x256xf32>
    %425 = arith.maximumf %423, %424 : vector<4x256xf32>
    %cst_363 = arith.constant 0.000000e+00 : f32
    %426 = vector.broadcast %cst_363 : f32 to vector<1x256xf32>
    %cst_364 = arith.constant 0.000000e+00 : f32
    %427 = vector.broadcast %cst_364 : f32 to vector<1x256xf32>
    %cst_365 = arith.constant dense<0.000000e+00> : vector<256xf32>
    %428 = vector.multi_reduction <add>, %407, %cst_365 [0] : vector<4x256xf32> to vector<256xf32>
    %429 = vector.shape_cast %428 : vector<256xf32> to vector<1x256xf32>
    %430 = arith.addf %426, %429 : vector<1x256xf32>
    %431 = arith.mulf %407, %407 : vector<4x256xf32>
    %cst_366 = arith.constant dense<0.000000e+00> : vector<256xf32>
    %432 = vector.multi_reduction <add>, %431, %cst_366 [0] : vector<4x256xf32> to vector<256xf32>
    %433 = vector.shape_cast %432 : vector<256xf32> to vector<1x256xf32>
    %434 = arith.addf %427, %433 : vector<1x256xf32>
    %cst_367 = arith.constant dense<0.000000e+00> : vector<256xf32>
    %435 = vector.multi_reduction <add>, %425, %cst_367 [0] : vector<4x256xf32> to vector<256xf32>
    %436 = vector.shape_cast %435 : vector<256xf32> to vector<1x256xf32>
    %437 = arith.addf %430, %436 : vector<1x256xf32>
    %438 = arith.mulf %425, %425 : vector<4x256xf32>
    %cst_368 = arith.constant dense<0.000000e+00> : vector<256xf32>
    %439 = vector.multi_reduction <add>, %438, %cst_368 [0] : vector<4x256xf32> to vector<256xf32>
    %440 = vector.shape_cast %439 : vector<256xf32> to vector<1x256xf32>
    %441 = arith.addf %434, %440 : vector<1x256xf32>
    %c0_369 = arith.constant 0 : index
    %c0_370 = arith.constant 0 : index
    %442 = vector.load %arg20[%c0_369, %c0_370] : memref<256x256xf32, #tpu.memory_space<vmem>>, vector<256x256xf32>
    %cst_371 = arith.constant dense<0.000000e+00> : vector<1x256xf32>
    %443 = tpu.matmul %437, %442, %cst_371 {dimension_numbers = #tpu.dot_dimension_numbers<[1], [0], [0], [1], [0, 0, 1, 1], [], []>} : vector<1x256xf32>, vector<256x256xf32>, vector<1x256xf32> -> vector<1x256xf32>
    %cst_372 = arith.constant 3.200000e+01 : f32
    %444 = vector.broadcast %cst_372 : f32 to vector<1x256xf32>
    %445 = arith.divf %443, %444 : vector<1x256xf32>
    %c0_373 = arith.constant 0 : index
    %c0_374 = arith.constant 0 : index
    %446 = vector.load %arg20[%c0_373, %c0_374] : memref<256x256xf32, #tpu.memory_space<vmem>>, vector<256x256xf32>
    %cst_375 = arith.constant dense<0.000000e+00> : vector<1x256xf32>
    %447 = tpu.matmul %441, %446, %cst_375 {dimension_numbers = #tpu.dot_dimension_numbers<[1], [0], [0], [1], [0, 0, 1, 1], [], []>} : vector<1x256xf32>, vector<256x256xf32>, vector<1x256xf32> -> vector<1x256xf32>
    %cst_376 = arith.constant 3.200000e+01 : f32
    %448 = vector.broadcast %cst_376 : f32 to vector<1x256xf32>
    %449 = arith.divf %447, %448 : vector<1x256xf32>
    %450 = arith.mulf %445, %445 : vector<1x256xf32>
    %451 = arith.subf %449, %450 : vector<1x256xf32>
    %c0_377 = arith.constant 0 : index
    %c0_378 = arith.constant 0 : index
    %452 = vector.load %arg18[%c0_377, %c0_378] : memref<1x256xf32, #tpu.memory_space<vmem>>, vector<1x256xf32>
    %cst_379 = arith.constant 9.99999974E-6 : f32
    %453 = vector.broadcast %cst_379 : f32 to vector<1x256xf32>
    %454 = arith.addf %451, %453 : vector<1x256xf32>
    %455 = math.rsqrt %454 : vector<1x256xf32>
    %456 = arith.mulf %452, %455 : vector<1x256xf32>
    %c0_380 = arith.constant 0 : index
    %c0_381 = arith.constant 0 : index
    %457 = vector.load %arg19[%c0_380, %c0_381] : memref<1x256xf32, #tpu.memory_space<vmem>>, vector<1x256xf32>
    %458 = arith.mulf %445, %456 : vector<1x256xf32>
    %459 = arith.subf %457, %458 : vector<1x256xf32>
    %460 = vector.broadcast %456 : vector<1x256xf32> to vector<4x256xf32>
    %461 = arith.mulf %407, %460 : vector<4x256xf32>
    %462 = vector.broadcast %459 : vector<1x256xf32> to vector<4x256xf32>
    %463 = arith.addf %461, %462 : vector<4x256xf32>
    %c0_382 = arith.constant 0 : index
    %c1_383 = arith.constant 1 : index
    %c0_384 = arith.constant 0 : index
    %464 = vector.load %arg40[%c0_382, %c1_383, %c0_384] : memref<2x6x256xf32, #tpu.memory_space<vmem>>, vector<1x4x256xf32>
    %465 = vector.shape_cast %464 : vector<1x4x256xf32> to vector<4x256xf32>
    %466 = vector.shape_cast %463 : vector<4x256xf32> to vector<1x4x256xf32>
    tpu.vector_store %arg40[%c0_382, %c1_383, %c0_384], %466 {strides = array<i32>} : memref<2x6x256xf32, #tpu.memory_space<vmem>>, vector<1x4x256xf32>,
    %467 = vector.broadcast %456 : vector<1x256xf32> to vector<4x256xf32>
    %468 = arith.mulf %425, %467 : vector<4x256xf32>
    %469 = vector.broadcast %459 : vector<1x256xf32> to vector<4x256xf32>
    %470 = arith.addf %468, %469 : vector<4x256xf32>
    %c1_385 = arith.constant 1 : index
    %c1_386 = arith.constant 1 : index
    %c0_387 = arith.constant 0 : index
    %471 = vector.load %arg40[%c1_385, %c1_386, %c0_387] : memref<2x6x256xf32, #tpu.memory_space<vmem>>, vector<1x4x256xf32>
    %472 = vector.shape_cast %471 : vector<1x4x256xf32> to vector<4x256xf32>
    %473 = vector.shape_cast %470 : vector<4x256xf32> to vector<1x4x256xf32>
    tpu.vector_store %arg40[%c1_385, %c1_386, %c0_387], %473 {strides = array<i32>} : memref<2x6x256xf32, #tpu.memory_space<vmem>>, vector<1x4x256xf32>,
    %c0_388 = arith.constant 0 : index
    %c0_389 = arith.constant 0 : index
    %c0_390 = arith.constant 0 : index
    %474 = vector.load %arg21[%c0_388, %c0_389, %c0_390] : memref<3x256x128xf32, #tpu.memory_space<vmem>>, vector<1x256x128xf32>
    %475 = vector.shape_cast %474 : vector<1x256x128xf32> to vector<256x128xf32>
    %c1_391 = arith.constant 1 : index
    %c0_392 = arith.constant 0 : index
    %c0_393 = arith.constant 0 : index
    %476 = vector.load %arg21[%c1_391, %c0_392, %c0_393] : memref<3x256x128xf32, #tpu.memory_space<vmem>>, vector<1x256x128xf32>
    %477 = vector.shape_cast %476 : vector<1x256x128xf32> to vector<256x128xf32>
    %c2_394 = arith.constant 2 : index
    %c0_395 = arith.constant 0 : index
    %c0_396 = arith.constant 0 : index
    %478 = vector.load %arg21[%c2_394, %c0_395, %c0_396] : memref<3x256x128xf32, #tpu.memory_space<vmem>>, vector<1x256x128xf32>
    %479 = vector.shape_cast %478 : vector<1x256x128xf32> to vector<256x128xf32>
    %cst_397 = arith.constant 0.000000e+00 : f32
    %480 = vector.broadcast %cst_397 : f32 to vector<4x128xf32>
    %c0_398 = arith.constant 0 : index
    %c0_399 = arith.constant 0 : index
    %c0_400 = arith.constant 0 : index
    %481 = vector.load %arg40[%c0_398, %c0_399, %c0_400] : memref<2x6x256xf32, #tpu.memory_space<vmem>>, vector<1x4x256xf32>
    %482 = vector.shape_cast %481 : vector<1x4x256xf32> to vector<4x256xf32>
    %cst_401 = arith.constant dense<0.000000e+00> : vector<4x128xf32>
    %483 = tpu.matmul %482, %475, %cst_401 {dimension_numbers = #tpu.dot_dimension_numbers<[1], [0], [0], [1], [0, 0, 1, 1], [], []>} : vector<4x256xf32>, vector<256x128xf32>, vector<4x128xf32> -> vector<4x128xf32>
    %484 = arith.addf %480, %483 : vector<4x128xf32>
    %c0_402 = arith.constant 0 : index
    %c1_403 = arith.constant 1 : index
    %c0_404 = arith.constant 0 : index
    %485 = vector.load %arg40[%c0_402, %c1_403, %c0_404] : memref<2x6x256xf32, #tpu.memory_space<vmem>>, vector<1x4x256xf32>
    %486 = vector.shape_cast %485 : vector<1x4x256xf32> to vector<4x256xf32>
    %cst_405 = arith.constant dense<0.000000e+00> : vector<4x128xf32>
    %487 = tpu.matmul %486, %477, %cst_405 {dimension_numbers = #tpu.dot_dimension_numbers<[1], [0], [0], [1], [0, 0, 1, 1], [], []>} : vector<4x256xf32>, vector<256x128xf32>, vector<4x128xf32> -> vector<4x128xf32>
    %488 = arith.addf %484, %487 : vector<4x128xf32>
    %c0_406 = arith.constant 0 : index
    %c2_407 = arith.constant 2 : index
    %c0_408 = arith.constant 0 : index
    %489 = vector.load %arg40[%c0_406, %c2_407, %c0_408] : memref<2x6x256xf32, #tpu.memory_space<vmem>>, vector<1x4x256xf32>
    %490 = vector.shape_cast %489 : vector<1x4x256xf32> to vector<4x256xf32>
    %cst_409 = arith.constant dense<0.000000e+00> : vector<4x128xf32>
    %491 = tpu.matmul %490, %479, %cst_409 {dimension_numbers = #tpu.dot_dimension_numbers<[1], [0], [0], [1], [0, 0, 1, 1], [], []>} : vector<4x256xf32>, vector<256x128xf32>, vector<4x128xf32> -> vector<4x128xf32>
    %492 = arith.addf %488, %491 : vector<4x128xf32>
    %c0_410 = arith.constant 0 : index
    %c0_411 = arith.constant 0 : index
    %493 = vector.load %arg22[%c0_410, %c0_411] : memref<1x128xf32, #tpu.memory_space<vmem>>, vector<1x128xf32>
    %494 = vector.broadcast %493 : vector<1x128xf32> to vector<4x128xf32>
    %495 = arith.addf %492, %494 : vector<4x128xf32>
    %cst_412 = arith.constant 0.000000e+00 : f32
    %496 = vector.broadcast %cst_412 : f32 to vector<4x128xf32>
    %497 = arith.maximumf %495, %496 : vector<4x128xf32>
    %cst_413 = arith.constant 0.000000e+00 : f32
    %498 = vector.broadcast %cst_413 : f32 to vector<4x128xf32>
    %c1_414 = arith.constant 1 : index
    %c0_415 = arith.constant 0 : index
    %c0_416 = arith.constant 0 : index
    %499 = vector.load %arg40[%c1_414, %c0_415, %c0_416] : memref<2x6x256xf32, #tpu.memory_space<vmem>>, vector<1x4x256xf32>
    %500 = vector.shape_cast %499 : vector<1x4x256xf32> to vector<4x256xf32>
    %cst_417 = arith.constant dense<0.000000e+00> : vector<4x128xf32>
    %501 = tpu.matmul %500, %475, %cst_417 {dimension_numbers = #tpu.dot_dimension_numbers<[1], [0], [0], [1], [0, 0, 1, 1], [], []>} : vector<4x256xf32>, vector<256x128xf32>, vector<4x128xf32> -> vector<4x128xf32>
    %502 = arith.addf %498, %501 : vector<4x128xf32>
    %c1_418 = arith.constant 1 : index
    %c1_419 = arith.constant 1 : index
    %c0_420 = arith.constant 0 : index
    %503 = vector.load %arg40[%c1_418, %c1_419, %c0_420] : memref<2x6x256xf32, #tpu.memory_space<vmem>>, vector<1x4x256xf32>
    %504 = vector.shape_cast %503 : vector<1x4x256xf32> to vector<4x256xf32>
    %cst_421 = arith.constant dense<0.000000e+00> : vector<4x128xf32>
    %505 = tpu.matmul %504, %477, %cst_421 {dimension_numbers = #tpu.dot_dimension_numbers<[1], [0], [0], [1], [0, 0, 1, 1], [], []>} : vector<4x256xf32>, vector<256x128xf32>, vector<4x128xf32> -> vector<4x128xf32>
    %506 = arith.addf %502, %505 : vector<4x128xf32>
    %c1_422 = arith.constant 1 : index
    %c2_423 = arith.constant 2 : index
    %c0_424 = arith.constant 0 : index
    %507 = vector.load %arg40[%c1_422, %c2_423, %c0_424] : memref<2x6x256xf32, #tpu.memory_space<vmem>>, vector<1x4x256xf32>
    %508 = vector.shape_cast %507 : vector<1x4x256xf32> to vector<4x256xf32>
    %cst_425 = arith.constant dense<0.000000e+00> : vector<4x128xf32>
    %509 = tpu.matmul %508, %479, %cst_425 {dimension_numbers = #tpu.dot_dimension_numbers<[1], [0], [0], [1], [0, 0, 1, 1], [], []>} : vector<4x256xf32>, vector<256x128xf32>, vector<4x128xf32> -> vector<4x128xf32>
    %510 = arith.addf %506, %509 : vector<4x128xf32>
    %c0_426 = arith.constant 0 : index
    %c0_427 = arith.constant 0 : index
    %511 = vector.load %arg22[%c0_426, %c0_427] : memref<1x128xf32, #tpu.memory_space<vmem>>, vector<1x128xf32>
    %512 = vector.broadcast %511 : vector<1x128xf32> to vector<4x128xf32>
    %513 = arith.addf %510, %512 : vector<4x128xf32>
    %cst_428 = arith.constant 0.000000e+00 : f32
    %514 = vector.broadcast %cst_428 : f32 to vector<4x128xf32>
    %515 = arith.maximumf %513, %514 : vector<4x128xf32>
    %cst_429 = arith.constant 0.000000e+00 : f32
    %516 = vector.broadcast %cst_429 : f32 to vector<1x128xf32>
    %cst_430 = arith.constant 0.000000e+00 : f32
    %517 = vector.broadcast %cst_430 : f32 to vector<1x128xf32>
    %cst_431 = arith.constant dense<0.000000e+00> : vector<128xf32>
    %518 = vector.multi_reduction <add>, %497, %cst_431 [0] : vector<4x128xf32> to vector<128xf32>
    %519 = vector.shape_cast %518 : vector<128xf32> to vector<1x128xf32>
    %520 = arith.addf %516, %519 : vector<1x128xf32>
    %521 = arith.mulf %497, %497 : vector<4x128xf32>
    %cst_432 = arith.constant dense<0.000000e+00> : vector<128xf32>
    %522 = vector.multi_reduction <add>, %521, %cst_432 [0] : vector<4x128xf32> to vector<128xf32>
    %523 = vector.shape_cast %522 : vector<128xf32> to vector<1x128xf32>
    %524 = arith.addf %517, %523 : vector<1x128xf32>
    %cst_433 = arith.constant dense<0.000000e+00> : vector<128xf32>
    %525 = vector.multi_reduction <add>, %515, %cst_433 [0] : vector<4x128xf32> to vector<128xf32>
    %526 = vector.shape_cast %525 : vector<128xf32> to vector<1x128xf32>
    %527 = arith.addf %520, %526 : vector<1x128xf32>
    %528 = arith.mulf %515, %515 : vector<4x128xf32>
    %cst_434 = arith.constant dense<0.000000e+00> : vector<128xf32>
    %529 = vector.multi_reduction <add>, %528, %cst_434 [0] : vector<4x128xf32> to vector<128xf32>
    %530 = vector.shape_cast %529 : vector<128xf32> to vector<1x128xf32>
    %531 = arith.addf %524, %530 : vector<1x128xf32>
    %c0_435 = arith.constant 0 : index
    %c0_436 = arith.constant 0 : index
    %532 = vector.load %arg25[%c0_435, %c0_436] : memref<128x128xf32, #tpu.memory_space<vmem>>, vector<128x128xf32>
    %cst_437 = arith.constant dense<0.000000e+00> : vector<1x128xf32>
    %533 = tpu.matmul %527, %532, %cst_437 {dimension_numbers = #tpu.dot_dimension_numbers<[1], [0], [0], [1], [0, 0, 1, 1], [], []>} : vector<1x128xf32>, vector<128x128xf32>, vector<1x128xf32> -> vector<1x128xf32>
    %cst_438 = arith.constant 3.200000e+01 : f32
    %534 = vector.broadcast %cst_438 : f32 to vector<1x128xf32>
    %535 = arith.divf %533, %534 : vector<1x128xf32>
    %c0_439 = arith.constant 0 : index
    %c0_440 = arith.constant 0 : index
    %536 = vector.load %arg25[%c0_439, %c0_440] : memref<128x128xf32, #tpu.memory_space<vmem>>, vector<128x128xf32>
    %cst_441 = arith.constant dense<0.000000e+00> : vector<1x128xf32>
    %537 = tpu.matmul %531, %536, %cst_441 {dimension_numbers = #tpu.dot_dimension_numbers<[1], [0], [0], [1], [0, 0, 1, 1], [], []>} : vector<1x128xf32>, vector<128x128xf32>, vector<1x128xf32> -> vector<1x128xf32>
    %cst_442 = arith.constant 3.200000e+01 : f32
    %538 = vector.broadcast %cst_442 : f32 to vector<1x128xf32>
    %539 = arith.divf %537, %538 : vector<1x128xf32>
    %540 = arith.mulf %535, %535 : vector<1x128xf32>
    %541 = arith.subf %539, %540 : vector<1x128xf32>
    %c0_443 = arith.constant 0 : index
    %c0_444 = arith.constant 0 : index
    %542 = vector.load %arg23[%c0_443, %c0_444] : memref<1x128xf32, #tpu.memory_space<vmem>>, vector<1x128xf32>
    %cst_445 = arith.constant 9.99999974E-6 : f32
    %543 = vector.broadcast %cst_445 : f32 to vector<1x128xf32>
    %544 = arith.addf %541, %543 : vector<1x128xf32>
    %545 = math.rsqrt %544 : vector<1x128xf32>
    %546 = arith.mulf %542, %545 : vector<1x128xf32>
    %c0_446 = arith.constant 0 : index
    %c0_447 = arith.constant 0 : index
    %547 = vector.load %arg24[%c0_446, %c0_447] : memref<1x128xf32, #tpu.memory_space<vmem>>, vector<1x128xf32>
    %548 = arith.mulf %535, %546 : vector<1x128xf32>
    %549 = arith.subf %547, %548 : vector<1x128xf32>
    %550 = vector.broadcast %546 : vector<1x128xf32> to vector<4x128xf32>
    %551 = arith.mulf %497, %550 : vector<4x128xf32>
    %552 = vector.broadcast %549 : vector<1x128xf32> to vector<4x128xf32>
    %553 = arith.addf %551, %552 : vector<4x128xf32>
    %c0_448 = arith.constant 0 : index
    %c1_449 = arith.constant 1 : index
    %c0_450 = arith.constant 0 : index
    %554 = vector.load %arg41[%c0_448, %c1_449, %c0_450] : memref<2x6x128xf32, #tpu.memory_space<vmem>>, vector<1x4x128xf32>
    %555 = vector.shape_cast %554 : vector<1x4x128xf32> to vector<4x128xf32>
    %556 = vector.shape_cast %553 : vector<4x128xf32> to vector<1x4x128xf32>
    tpu.vector_store %arg41[%c0_448, %c1_449, %c0_450], %556 {strides = array<i32>} : memref<2x6x128xf32, #tpu.memory_space<vmem>>, vector<1x4x128xf32>,
    %557 = vector.broadcast %546 : vector<1x128xf32> to vector<4x128xf32>
    %558 = arith.mulf %515, %557 : vector<4x128xf32>
    %559 = vector.broadcast %549 : vector<1x128xf32> to vector<4x128xf32>
    %560 = arith.addf %558, %559 : vector<4x128xf32>
    %c1_451 = arith.constant 1 : index
    %c1_452 = arith.constant 1 : index
    %c0_453 = arith.constant 0 : index
    %561 = vector.load %arg41[%c1_451, %c1_452, %c0_453] : memref<2x6x128xf32, #tpu.memory_space<vmem>>, vector<1x4x128xf32>
    %562 = vector.shape_cast %561 : vector<1x4x128xf32> to vector<4x128xf32>
    %563 = vector.shape_cast %560 : vector<4x128xf32> to vector<1x4x128xf32>
    tpu.vector_store %arg41[%c1_451, %c1_452, %c0_453], %563 {strides = array<i32>} : memref<2x6x128xf32, #tpu.memory_space<vmem>>, vector<1x4x128xf32>,
    %c0_454 = arith.constant 0 : index
    %c0_455 = arith.constant 0 : index
    %c0_456 = arith.constant 0 : index
    %564 = vector.load %arg26[%c0_454, %c0_455, %c0_456] : memref<3x128x128xf32, #tpu.memory_space<vmem>>, vector<1x128x128xf32>
    %565 = vector.shape_cast %564 : vector<1x128x128xf32> to vector<128x128xf32>
    %c1_457 = arith.constant 1 : index
    %c0_458 = arith.constant 0 : index
    %c0_459 = arith.constant 0 : index
    %566 = vector.load %arg26[%c1_457, %c0_458, %c0_459] : memref<3x128x128xf32, #tpu.memory_space<vmem>>, vector<1x128x128xf32>
    %567 = vector.shape_cast %566 : vector<1x128x128xf32> to vector<128x128xf32>
    %c2_460 = arith.constant 2 : index
    %c0_461 = arith.constant 0 : index
    %c0_462 = arith.constant 0 : index
    %568 = vector.load %arg26[%c2_460, %c0_461, %c0_462] : memref<3x128x128xf32, #tpu.memory_space<vmem>>, vector<1x128x128xf32>
    %569 = vector.shape_cast %568 : vector<1x128x128xf32> to vector<128x128xf32>
    %cst_463 = arith.constant 0.000000e+00 : f32
    %570 = vector.broadcast %cst_463 : f32 to vector<4x128xf32>
    %c0_464 = arith.constant 0 : index
    %c0_465 = arith.constant 0 : index
    %c0_466 = arith.constant 0 : index
    %571 = vector.load %arg41[%c0_464, %c0_465, %c0_466] : memref<2x6x128xf32, #tpu.memory_space<vmem>>, vector<1x4x128xf32>
    %572 = vector.shape_cast %571 : vector<1x4x128xf32> to vector<4x128xf32>
    %cst_467 = arith.constant dense<0.000000e+00> : vector<4x128xf32>
    %573 = tpu.matmul %572, %565, %cst_467 {dimension_numbers = #tpu.dot_dimension_numbers<[1], [0], [0], [1], [0, 0, 1, 1], [], []>} : vector<4x128xf32>, vector<128x128xf32>, vector<4x128xf32> -> vector<4x128xf32>
    %574 = arith.addf %570, %573 : vector<4x128xf32>
    %c0_468 = arith.constant 0 : index
    %c1_469 = arith.constant 1 : index
    %c0_470 = arith.constant 0 : index
    %575 = vector.load %arg41[%c0_468, %c1_469, %c0_470] : memref<2x6x128xf32, #tpu.memory_space<vmem>>, vector<1x4x128xf32>
    %576 = vector.shape_cast %575 : vector<1x4x128xf32> to vector<4x128xf32>
    %cst_471 = arith.constant dense<0.000000e+00> : vector<4x128xf32>
    %577 = tpu.matmul %576, %567, %cst_471 {dimension_numbers = #tpu.dot_dimension_numbers<[1], [0], [0], [1], [0, 0, 1, 1], [], []>} : vector<4x128xf32>, vector<128x128xf32>, vector<4x128xf32> -> vector<4x128xf32>
    %578 = arith.addf %574, %577 : vector<4x128xf32>
    %c0_472 = arith.constant 0 : index
    %c2_473 = arith.constant 2 : index
    %c0_474 = arith.constant 0 : index
    %579 = vector.load %arg41[%c0_472, %c2_473, %c0_474] : memref<2x6x128xf32, #tpu.memory_space<vmem>>, vector<1x4x128xf32>
    %580 = vector.shape_cast %579 : vector<1x4x128xf32> to vector<4x128xf32>
    %cst_475 = arith.constant dense<0.000000e+00> : vector<4x128xf32>
    %581 = tpu.matmul %580, %569, %cst_475 {dimension_numbers = #tpu.dot_dimension_numbers<[1], [0], [0], [1], [0, 0, 1, 1], [], []>} : vector<4x128xf32>, vector<128x128xf32>, vector<4x128xf32> -> vector<4x128xf32>
    %582 = arith.addf %578, %581 : vector<4x128xf32>
    %c0_476 = arith.constant 0 : index
    %c0_477 = arith.constant 0 : index
    %583 = vector.load %arg27[%c0_476, %c0_477] : memref<1x128xf32, #tpu.memory_space<vmem>>, vector<1x128xf32>
    %584 = vector.broadcast %583 : vector<1x128xf32> to vector<4x128xf32>
    %585 = arith.addf %582, %584 : vector<4x128xf32>
    %cst_478 = arith.constant 0.000000e+00 : f32
    %586 = vector.broadcast %cst_478 : f32 to vector<4x128xf32>
    %587 = arith.maximumf %585, %586 : vector<4x128xf32>
    %cst_479 = arith.constant 0.000000e+00 : f32
    %588 = vector.broadcast %cst_479 : f32 to vector<4x128xf32>
    %c1_480 = arith.constant 1 : index
    %c0_481 = arith.constant 0 : index
    %c0_482 = arith.constant 0 : index
    %589 = vector.load %arg41[%c1_480, %c0_481, %c0_482] : memref<2x6x128xf32, #tpu.memory_space<vmem>>, vector<1x4x128xf32>
    %590 = vector.shape_cast %589 : vector<1x4x128xf32> to vector<4x128xf32>
    %cst_483 = arith.constant dense<0.000000e+00> : vector<4x128xf32>
    %591 = tpu.matmul %590, %565, %cst_483 {dimension_numbers = #tpu.dot_dimension_numbers<[1], [0], [0], [1], [0, 0, 1, 1], [], []>} : vector<4x128xf32>, vector<128x128xf32>, vector<4x128xf32> -> vector<4x128xf32>
    %592 = arith.addf %588, %591 : vector<4x128xf32>
    %c1_484 = arith.constant 1 : index
    %c1_485 = arith.constant 1 : index
    %c0_486 = arith.constant 0 : index
    %593 = vector.load %arg41[%c1_484, %c1_485, %c0_486] : memref<2x6x128xf32, #tpu.memory_space<vmem>>, vector<1x4x128xf32>
    %594 = vector.shape_cast %593 : vector<1x4x128xf32> to vector<4x128xf32>
    %cst_487 = arith.constant dense<0.000000e+00> : vector<4x128xf32>
    %595 = tpu.matmul %594, %567, %cst_487 {dimension_numbers = #tpu.dot_dimension_numbers<[1], [0], [0], [1], [0, 0, 1, 1], [], []>} : vector<4x128xf32>, vector<128x128xf32>, vector<4x128xf32> -> vector<4x128xf32>
    %596 = arith.addf %592, %595 : vector<4x128xf32>
    %c1_488 = arith.constant 1 : index
    %c2_489 = arith.constant 2 : index
    %c0_490 = arith.constant 0 : index
    %597 = vector.load %arg41[%c1_488, %c2_489, %c0_490] : memref<2x6x128xf32, #tpu.memory_space<vmem>>, vector<1x4x128xf32>
    %598 = vector.shape_cast %597 : vector<1x4x128xf32> to vector<4x128xf32>
    %cst_491 = arith.constant dense<0.000000e+00> : vector<4x128xf32>
    %599 = tpu.matmul %598, %569, %cst_491 {dimension_numbers = #tpu.dot_dimension_numbers<[1], [0], [0], [1], [0, 0, 1, 1], [], []>} : vector<4x128xf32>, vector<128x128xf32>, vector<4x128xf32> -> vector<4x128xf32>
    %600 = arith.addf %596, %599 : vector<4x128xf32>
    %c0_492 = arith.constant 0 : index
    %c0_493 = arith.constant 0 : index
    %601 = vector.load %arg27[%c0_492, %c0_493] : memref<1x128xf32, #tpu.memory_space<vmem>>, vector<1x128xf32>
    %602 = vector.broadcast %601 : vector<1x128xf32> to vector<4x128xf32>
    %603 = arith.addf %600, %602 : vector<4x128xf32>
    %cst_494 = arith.constant 0.000000e+00 : f32
    %604 = vector.broadcast %cst_494 : f32 to vector<4x128xf32>
    %605 = arith.maximumf %603, %604 : vector<4x128xf32>
    %cst_495 = arith.constant 0.000000e+00 : f32
    %606 = vector.broadcast %cst_495 : f32 to vector<1x128xf32>
    %cst_496 = arith.constant 0.000000e+00 : f32
    %607 = vector.broadcast %cst_496 : f32 to vector<1x128xf32>
    %cst_497 = arith.constant dense<0.000000e+00> : vector<128xf32>
    %608 = vector.multi_reduction <add>, %587, %cst_497 [0] : vector<4x128xf32> to vector<128xf32>
    %609 = vector.shape_cast %608 : vector<128xf32> to vector<1x128xf32>
    %610 = arith.addf %606, %609 : vector<1x128xf32>
    %611 = arith.mulf %587, %587 : vector<4x128xf32>
    %cst_498 = arith.constant dense<0.000000e+00> : vector<128xf32>
    %612 = vector.multi_reduction <add>, %611, %cst_498 [0] : vector<4x128xf32> to vector<128xf32>
    %613 = vector.shape_cast %612 : vector<128xf32> to vector<1x128xf32>
    %614 = arith.addf %607, %613 : vector<1x128xf32>
    %cst_499 = arith.constant dense<0.000000e+00> : vector<128xf32>
    %615 = vector.multi_reduction <add>, %605, %cst_499 [0] : vector<4x128xf32> to vector<128xf32>
    %616 = vector.shape_cast %615 : vector<128xf32> to vector<1x128xf32>
    %617 = arith.addf %610, %616 : vector<1x128xf32>
    %618 = arith.mulf %605, %605 : vector<4x128xf32>
    %cst_500 = arith.constant dense<0.000000e+00> : vector<128xf32>
    %619 = vector.multi_reduction <add>, %618, %cst_500 [0] : vector<4x128xf32> to vector<128xf32>
    %620 = vector.shape_cast %619 : vector<128xf32> to vector<1x128xf32>
    %621 = arith.addf %614, %620 : vector<1x128xf32>
    %c0_501 = arith.constant 0 : index
    %c0_502 = arith.constant 0 : index
    %622 = vector.load %arg30[%c0_501, %c0_502] : memref<128x128xf32, #tpu.memory_space<vmem>>, vector<128x128xf32>
    %cst_503 = arith.constant dense<0.000000e+00> : vector<1x128xf32>
    %623 = tpu.matmul %617, %622, %cst_503 {dimension_numbers = #tpu.dot_dimension_numbers<[1], [0], [0], [1], [0, 0, 1, 1], [], []>} : vector<1x128xf32>, vector<128x128xf32>, vector<1x128xf32> -> vector<1x128xf32>
    %cst_504 = arith.constant 3.200000e+01 : f32
    %624 = vector.broadcast %cst_504 : f32 to vector<1x128xf32>
    %625 = arith.divf %623, %624 : vector<1x128xf32>
    %c0_505 = arith.constant 0 : index
    %c0_506 = arith.constant 0 : index
    %626 = vector.load %arg30[%c0_505, %c0_506] : memref<128x128xf32, #tpu.memory_space<vmem>>, vector<128x128xf32>
    %cst_507 = arith.constant dense<0.000000e+00> : vector<1x128xf32>
    %627 = tpu.matmul %621, %626, %cst_507 {dimension_numbers = #tpu.dot_dimension_numbers<[1], [0], [0], [1], [0, 0, 1, 1], [], []>} : vector<1x128xf32>, vector<128x128xf32>, vector<1x128xf32> -> vector<1x128xf32>
    %cst_508 = arith.constant 3.200000e+01 : f32
    %628 = vector.broadcast %cst_508 : f32 to vector<1x128xf32>
    %629 = arith.divf %627, %628 : vector<1x128xf32>
    %630 = arith.mulf %625, %625 : vector<1x128xf32>
    %631 = arith.subf %629, %630 : vector<1x128xf32>
    %c0_509 = arith.constant 0 : index
    %c0_510 = arith.constant 0 : index
    %632 = vector.load %arg28[%c0_509, %c0_510] : memref<1x128xf32, #tpu.memory_space<vmem>>, vector<1x128xf32>
    %cst_511 = arith.constant 9.99999974E-6 : f32
    %633 = vector.broadcast %cst_511 : f32 to vector<1x128xf32>
    %634 = arith.addf %631, %633 : vector<1x128xf32>
    %635 = math.rsqrt %634 : vector<1x128xf32>
    %636 = arith.mulf %632, %635 : vector<1x128xf32>
    %c0_512 = arith.constant 0 : index
    %c0_513 = arith.constant 0 : index
    %637 = vector.load %arg29[%c0_512, %c0_513] : memref<1x128xf32, #tpu.memory_space<vmem>>, vector<1x128xf32>
    %638 = arith.mulf %625, %636 : vector<1x128xf32>
    %639 = arith.subf %637, %638 : vector<1x128xf32>
    %640 = vector.broadcast %636 : vector<1x128xf32> to vector<4x128xf32>
    %641 = arith.mulf %587, %640 : vector<4x128xf32>
    %642 = vector.broadcast %639 : vector<1x128xf32> to vector<4x128xf32>
    %643 = arith.addf %641, %642 : vector<4x128xf32>
    %c0_514 = arith.constant 0 : index
    %c1_515 = arith.constant 1 : index
    %c0_516 = arith.constant 0 : index
    %644 = vector.load %arg42[%c0_514, %c1_515, %c0_516] : memref<2x6x128xf32, #tpu.memory_space<vmem>>, vector<1x4x128xf32>
    %645 = vector.shape_cast %644 : vector<1x4x128xf32> to vector<4x128xf32>
    %646 = vector.shape_cast %643 : vector<4x128xf32> to vector<1x4x128xf32>
    tpu.vector_store %arg42[%c0_514, %c1_515, %c0_516], %646 {strides = array<i32>} : memref<2x6x128xf32, #tpu.memory_space<vmem>>, vector<1x4x128xf32>,
    %647 = vector.broadcast %636 : vector<1x128xf32> to vector<4x128xf32>
    %648 = arith.mulf %605, %647 : vector<4x128xf32>
    %649 = vector.broadcast %639 : vector<1x128xf32> to vector<4x128xf32>
    %650 = arith.addf %648, %649 : vector<4x128xf32>
    %c1_517 = arith.constant 1 : index
    %c1_518 = arith.constant 1 : index
    %c0_519 = arith.constant 0 : index
    %651 = vector.load %arg42[%c1_517, %c1_518, %c0_519] : memref<2x6x128xf32, #tpu.memory_space<vmem>>, vector<1x4x128xf32>
    %652 = vector.shape_cast %651 : vector<1x4x128xf32> to vector<4x128xf32>
    %653 = vector.shape_cast %650 : vector<4x128xf32> to vector<1x4x128xf32>
    tpu.vector_store %arg42[%c1_517, %c1_518, %c0_519], %653 {strides = array<i32>} : memref<2x6x128xf32, #tpu.memory_space<vmem>>, vector<1x4x128xf32>,
    %c0_520 = arith.constant 0 : index
    %c0_521 = arith.constant 0 : index
    %c0_522 = arith.constant 0 : index
    %654 = vector.load %arg31[%c0_520, %c0_521, %c0_522] : memref<3x128x128xf32, #tpu.memory_space<vmem>>, vector<1x128x128xf32>
    %655 = vector.shape_cast %654 : vector<1x128x128xf32> to vector<128x128xf32>
    %c1_523 = arith.constant 1 : index
    %c0_524 = arith.constant 0 : index
    %c0_525 = arith.constant 0 : index
    %656 = vector.load %arg31[%c1_523, %c0_524, %c0_525] : memref<3x128x128xf32, #tpu.memory_space<vmem>>, vector<1x128x128xf32>
    %657 = vector.shape_cast %656 : vector<1x128x128xf32> to vector<128x128xf32>
    %c2_526 = arith.constant 2 : index
    %c0_527 = arith.constant 0 : index
    %c0_528 = arith.constant 0 : index
    %658 = vector.load %arg31[%c2_526, %c0_527, %c0_528] : memref<3x128x128xf32, #tpu.memory_space<vmem>>, vector<1x128x128xf32>
    %659 = vector.shape_cast %658 : vector<1x128x128xf32> to vector<128x128xf32>
    %cst_529 = arith.constant 0.000000e+00 : f32
    %660 = vector.broadcast %cst_529 : f32 to vector<4x128xf32>
    %c0_530 = arith.constant 0 : index
    %c0_531 = arith.constant 0 : index
    %c0_532 = arith.constant 0 : index
    %661 = vector.load %arg42[%c0_530, %c0_531, %c0_532] : memref<2x6x128xf32, #tpu.memory_space<vmem>>, vector<1x4x128xf32>
    %662 = vector.shape_cast %661 : vector<1x4x128xf32> to vector<4x128xf32>
    %cst_533 = arith.constant dense<0.000000e+00> : vector<4x128xf32>
    %663 = tpu.matmul %662, %655, %cst_533 {dimension_numbers = #tpu.dot_dimension_numbers<[1], [0], [0], [1], [0, 0, 1, 1], [], []>} : vector<4x128xf32>, vector<128x128xf32>, vector<4x128xf32> -> vector<4x128xf32>
    %664 = arith.addf %660, %663 : vector<4x128xf32>
    %c0_534 = arith.constant 0 : index
    %c1_535 = arith.constant 1 : index
    %c0_536 = arith.constant 0 : index
    %665 = vector.load %arg42[%c0_534, %c1_535, %c0_536] : memref<2x6x128xf32, #tpu.memory_space<vmem>>, vector<1x4x128xf32>
    %666 = vector.shape_cast %665 : vector<1x4x128xf32> to vector<4x128xf32>
    %cst_537 = arith.constant dense<0.000000e+00> : vector<4x128xf32>
    %667 = tpu.matmul %666, %657, %cst_537 {dimension_numbers = #tpu.dot_dimension_numbers<[1], [0], [0], [1], [0, 0, 1, 1], [], []>} : vector<4x128xf32>, vector<128x128xf32>, vector<4x128xf32> -> vector<4x128xf32>
    %668 = arith.addf %664, %667 : vector<4x128xf32>
    %c0_538 = arith.constant 0 : index
    %c2_539 = arith.constant 2 : index
    %c0_540 = arith.constant 0 : index
    %669 = vector.load %arg42[%c0_538, %c2_539, %c0_540] : memref<2x6x128xf32, #tpu.memory_space<vmem>>, vector<1x4x128xf32>
    %670 = vector.shape_cast %669 : vector<1x4x128xf32> to vector<4x128xf32>
    %cst_541 = arith.constant dense<0.000000e+00> : vector<4x128xf32>
    %671 = tpu.matmul %670, %659, %cst_541 {dimension_numbers = #tpu.dot_dimension_numbers<[1], [0], [0], [1], [0, 0, 1, 1], [], []>} : vector<4x128xf32>, vector<128x128xf32>, vector<4x128xf32> -> vector<4x128xf32>
    %672 = arith.addf %668, %671 : vector<4x128xf32>
    %c0_542 = arith.constant 0 : index
    %c0_543 = arith.constant 0 : index
    %673 = vector.load %arg32[%c0_542, %c0_543] : memref<1x128xf32, #tpu.memory_space<vmem>>, vector<1x128xf32>
    %674 = vector.broadcast %673 : vector<1x128xf32> to vector<4x128xf32>
    %675 = arith.addf %672, %674 : vector<4x128xf32>
    %cst_544 = arith.constant 0.000000e+00 : f32
    %676 = vector.broadcast %cst_544 : f32 to vector<4x128xf32>
    %677 = arith.maximumf %675, %676 : vector<4x128xf32>
    %cst_545 = arith.constant 0.000000e+00 : f32
    %678 = vector.broadcast %cst_545 : f32 to vector<4x128xf32>
    %c1_546 = arith.constant 1 : index
    %c0_547 = arith.constant 0 : index
    %c0_548 = arith.constant 0 : index
    %679 = vector.load %arg42[%c1_546, %c0_547, %c0_548] : memref<2x6x128xf32, #tpu.memory_space<vmem>>, vector<1x4x128xf32>
    %680 = vector.shape_cast %679 : vector<1x4x128xf32> to vector<4x128xf32>
    %cst_549 = arith.constant dense<0.000000e+00> : vector<4x128xf32>
    %681 = tpu.matmul %680, %655, %cst_549 {dimension_numbers = #tpu.dot_dimension_numbers<[1], [0], [0], [1], [0, 0, 1, 1], [], []>} : vector<4x128xf32>, vector<128x128xf32>, vector<4x128xf32> -> vector<4x128xf32>
    %682 = arith.addf %678, %681 : vector<4x128xf32>
    %c1_550 = arith.constant 1 : index
    %c1_551 = arith.constant 1 : index
    %c0_552 = arith.constant 0 : index
    %683 = vector.load %arg42[%c1_550, %c1_551, %c0_552] : memref<2x6x128xf32, #tpu.memory_space<vmem>>, vector<1x4x128xf32>
    %684 = vector.shape_cast %683 : vector<1x4x128xf32> to vector<4x128xf32>
    %cst_553 = arith.constant dense<0.000000e+00> : vector<4x128xf32>
    %685 = tpu.matmul %684, %657, %cst_553 {dimension_numbers = #tpu.dot_dimension_numbers<[1], [0], [0], [1], [0, 0, 1, 1], [], []>} : vector<4x128xf32>, vector<128x128xf32>, vector<4x128xf32> -> vector<4x128xf32>
    %686 = arith.addf %682, %685 : vector<4x128xf32>
    %c1_554 = arith.constant 1 : index
    %c2_555 = arith.constant 2 : index
    %c0_556 = arith.constant 0 : index
    %687 = vector.load %arg42[%c1_554, %c2_555, %c0_556] : memref<2x6x128xf32, #tpu.memory_space<vmem>>, vector<1x4x128xf32>
    %688 = vector.shape_cast %687 : vector<1x4x128xf32> to vector<4x128xf32>
    %cst_557 = arith.constant dense<0.000000e+00> : vector<4x128xf32>
    %689 = tpu.matmul %688, %659, %cst_557 {dimension_numbers = #tpu.dot_dimension_numbers<[1], [0], [0], [1], [0, 0, 1, 1], [], []>} : vector<4x128xf32>, vector<128x128xf32>, vector<4x128xf32> -> vector<4x128xf32>
    %690 = arith.addf %686, %689 : vector<4x128xf32>
    %c0_558 = arith.constant 0 : index
    %c0_559 = arith.constant 0 : index
    %691 = vector.load %arg32[%c0_558, %c0_559] : memref<1x128xf32, #tpu.memory_space<vmem>>, vector<1x128xf32>
    %692 = vector.broadcast %691 : vector<1x128xf32> to vector<4x128xf32>
    %693 = arith.addf %690, %692 : vector<4x128xf32>
    %cst_560 = arith.constant 0.000000e+00 : f32
    %694 = vector.broadcast %cst_560 : f32 to vector<4x128xf32>
    %695 = arith.maximumf %693, %694 : vector<4x128xf32>
    %cst_561 = arith.constant 0.000000e+00 : f32
    %696 = vector.broadcast %cst_561 : f32 to vector<1x128xf32>
    %cst_562 = arith.constant 0.000000e+00 : f32
    %697 = vector.broadcast %cst_562 : f32 to vector<1x128xf32>
    %cst_563 = arith.constant dense<0.000000e+00> : vector<128xf32>
    %698 = vector.multi_reduction <add>, %677, %cst_563 [0] : vector<4x128xf32> to vector<128xf32>
    %699 = vector.shape_cast %698 : vector<128xf32> to vector<1x128xf32>
    %700 = arith.addf %696, %699 : vector<1x128xf32>
    %701 = arith.mulf %677, %677 : vector<4x128xf32>
    %cst_564 = arith.constant dense<0.000000e+00> : vector<128xf32>
    %702 = vector.multi_reduction <add>, %701, %cst_564 [0] : vector<4x128xf32> to vector<128xf32>
    %703 = vector.shape_cast %702 : vector<128xf32> to vector<1x128xf32>
    %704 = arith.addf %697, %703 : vector<1x128xf32>
    %cst_565 = arith.constant dense<0.000000e+00> : vector<128xf32>
    %705 = vector.multi_reduction <add>, %695, %cst_565 [0] : vector<4x128xf32> to vector<128xf32>
    %706 = vector.shape_cast %705 : vector<128xf32> to vector<1x128xf32>
    %707 = arith.addf %700, %706 : vector<1x128xf32>
    %708 = arith.mulf %695, %695 : vector<4x128xf32>
    %cst_566 = arith.constant dense<0.000000e+00> : vector<128xf32>
    %709 = vector.multi_reduction <add>, %708, %cst_566 [0] : vector<4x128xf32> to vector<128xf32>
    %710 = vector.shape_cast %709 : vector<128xf32> to vector<1x128xf32>
    %711 = arith.addf %704, %710 : vector<1x128xf32>
    %c0_567 = arith.constant 0 : index
    %c0_568 = arith.constant 0 : index
    %712 = vector.load %arg35[%c0_567, %c0_568] : memref<128x128xf32, #tpu.memory_space<vmem>>, vector<128x128xf32>
    %cst_569 = arith.constant dense<0.000000e+00> : vector<1x128xf32>
    %713 = tpu.matmul %707, %712, %cst_569 {dimension_numbers = #tpu.dot_dimension_numbers<[1], [0], [0], [1], [0, 0, 1, 1], [], []>} : vector<1x128xf32>, vector<128x128xf32>, vector<1x128xf32> -> vector<1x128xf32>
    %cst_570 = arith.constant 3.200000e+01 : f32
    %714 = vector.broadcast %cst_570 : f32 to vector<1x128xf32>
    %715 = arith.divf %713, %714 : vector<1x128xf32>
    %c0_571 = arith.constant 0 : index
    %c0_572 = arith.constant 0 : index
    %716 = vector.load %arg35[%c0_571, %c0_572] : memref<128x128xf32, #tpu.memory_space<vmem>>, vector<128x128xf32>
    %cst_573 = arith.constant dense<0.000000e+00> : vector<1x128xf32>
    %717 = tpu.matmul %711, %716, %cst_573 {dimension_numbers = #tpu.dot_dimension_numbers<[1], [0], [0], [1], [0, 0, 1, 1], [], []>} : vector<1x128xf32>, vector<128x128xf32>, vector<1x128xf32> -> vector<1x128xf32>
    %cst_574 = arith.constant 3.200000e+01 : f32
    %718 = vector.broadcast %cst_574 : f32 to vector<1x128xf32>
    %719 = arith.divf %717, %718 : vector<1x128xf32>
    %720 = arith.mulf %715, %715 : vector<1x128xf32>
    %721 = arith.subf %719, %720 : vector<1x128xf32>
    %c0_575 = arith.constant 0 : index
    %c0_576 = arith.constant 0 : index
    %722 = vector.load %arg33[%c0_575, %c0_576] : memref<1x128xf32, #tpu.memory_space<vmem>>, vector<1x128xf32>
    %cst_577 = arith.constant 9.99999974E-6 : f32
    %723 = vector.broadcast %cst_577 : f32 to vector<1x128xf32>
    %724 = arith.addf %721, %723 : vector<1x128xf32>
    %725 = math.rsqrt %724 : vector<1x128xf32>
    %726 = arith.mulf %722, %725 : vector<1x128xf32>
    %c0_578 = arith.constant 0 : index
    %c0_579 = arith.constant 0 : index
    %727 = vector.load %arg34[%c0_578, %c0_579] : memref<1x128xf32, #tpu.memory_space<vmem>>, vector<1x128xf32>
    %728 = arith.mulf %715, %726 : vector<1x128xf32>
    %729 = arith.subf %727, %728 : vector<1x128xf32>
    %730 = vector.broadcast %726 : vector<1x128xf32> to vector<4x128xf32>
    %731 = arith.mulf %677, %730 : vector<4x128xf32>
    %732 = vector.broadcast %729 : vector<1x128xf32> to vector<4x128xf32>
    %733 = arith.addf %731, %732 : vector<4x128xf32>
    %c0_580 = arith.constant 0 : index
    %c0_581 = arith.constant 0 : index
    %c0_582 = arith.constant 0 : index
    %734 = vector.load %arg36[%c0_580, %c0_581, %c0_582] : memref<2x4x128xf32, #tpu.memory_space<vmem>>, vector<1x4x128xf32>
    %735 = vector.shape_cast %734 : vector<1x4x128xf32> to vector<4x128xf32>
    %736 = vector.shape_cast %733 : vector<4x128xf32> to vector<1x4x128xf32>
    tpu.vector_store %arg36[%c0_580, %c0_581, %c0_582], %736 {strides = array<i32>} : memref<2x4x128xf32, #tpu.memory_space<vmem>>, vector<1x4x128xf32>,
    %737 = vector.broadcast %726 : vector<1x128xf32> to vector<4x128xf32>
    %738 = arith.mulf %695, %737 : vector<4x128xf32>
    %739 = vector.broadcast %729 : vector<1x128xf32> to vector<4x128xf32>
    %740 = arith.addf %738, %739 : vector<4x128xf32>
    %c1_583 = arith.constant 1 : index
    %c0_584 = arith.constant 0 : index
    %c0_585 = arith.constant 0 : index
    %741 = vector.load %arg36[%c1_583, %c0_584, %c0_585] : memref<2x4x128xf32, #tpu.memory_space<vmem>>, vector<1x4x128xf32>
    %742 = vector.shape_cast %741 : vector<1x4x128xf32> to vector<4x128xf32>
    %743 = vector.shape_cast %740 : vector<4x128xf32> to vector<1x4x128xf32>
    tpu.vector_store %arg36[%c1_583, %c0_584, %c0_585], %743 {strides = array<i32>} : memref<2x4x128xf32, #tpu.memory_space<vmem>>, vector<1x4x128xf32>,
    return
  }
}

</mosaic_0001>

<bundles_post_ra>
// kernel: tile.108
= control target key start
LH: loop header
LB: loop body
LE: loop exit
PB: predicated region body
PF: predicated region fallthrough
CT: control target
= control target key end

     0   :  { %s22_s0 = inlined_call_operand.vmem [shape: f32[32], index: 0, kind: input, shape index: {}]   ;;  %s23_s1 = inlined_call_operand.vmem [shape: f32[8,32], index: 1, kind: output, shape index: {}]  }
   0x1   :  { %v4_v0 = vld [vmem:[%s22_s0] ss:$0 sm:$0xff] }
   0x2   :  { %5 = vst [vmem:[%s23_s1] sm:$0xff] %v4_v0 }

// kernel: tile.109
= control target key start
LH: loop header
LB: loop body
LE: loop exit
PB: predicated region body
PF: predicated region fallthrough
CT: control target
= control target key end

     0   :  { %s7_s6 = smov 3  ;;  %s14_s9 = smov 3  ;;  %vm4_vm0 = vcmask 261120   ;;  %vm11_vm1 = vcmask 1048320   ;;  %vm18_vm2 = vcmask 785920   ;;  %vm25_vm3 = vcmask 523520   ;;  %s79_s0 = inlined_call_operand.vmem [shape: f32[8,32], index: 0, kind: input, shape index: {}]   ;;  %s80_s1 = inlined_call_operand.vmem [shape: f32[1,256], index: 1, kind: output, shape index: {}]  }
   0x1   :  { %v41_v0 = vld [vmem:[%s79_s0 + $0x3] ss:$4 sm:%s7_s6]   ;;  %s48_s10 = smov 96   ;;  %s21_s11 = smov 3  ;;  %v42_v1 = vld [vmem:[%s79_s0 + $0x2] ss:$4 sm:%s14_s9]  }
   0x2   :  { %9 = vrot.lane.b32.xlu0 %v41_v0, %s48_s10  ;;  %v43_v2 = vld [vmem:[%s79_s0 + $0x1] ss:$4 sm:%s21_s11]   ;;  %s2_s16 = smov 3  ;;  %s49_s17 = smov 32  }
   0x3   :  { %23 = vrot.lane.b32.xlu1 %v43_v2, %s49_s17  ;;  %v3_v3 = vld [vmem:[%s79_s0] ss:$4 sm:%s2_s16]   ;;  %s50_s0 = smov 64  }
   0x4   :  { %5 = vst.msk [vmem:[#allocation0] ss:$8 sm:$0x3] %vm4_vm0, %v3_v3  }
   0x6   :  { %16 = vrot.lane.b32.xlu0 %v42_v1, %s50_s0 }
  0x74   :  { %v10_v4 = vpop.permute.xlu0 %9  }
  0x75   :  { %12 = vst.msk [vmem:[#allocation0] ss:$8 sm:$0x3] %vm11_vm1, %v10_v4   ;;  %v24_v5 = vpop.permute.xlu1 %23  }
  0x78   :  { %v17_v6 = vpop.permute.xlu0 %16  }
  0x79   :  { %19 = vst.msk [vmem:[#allocation0] ss:$8 sm:$0x3] %vm18_vm2, %v17_v6  }
  0x7a   :  { %26 = vst.msk [vmem:[#allocation0] ss:$8 sm:$0x3] %vm25_vm3, %v24_v5  }
  0x81   :  { %v31_v7 = vld [vmem:[#allocation0] sm:$0x1]  ;;  %v36_v8 = vld [vmem:[#allocation0 + $0x8] sm:$0x1] }
  0x82   :  { %34 = vst [vmem:[%s80_s1] sm:$0x1] %v31_v7  ;;  %44 = vst [vmem:[%s80_s1 + $0x1] sm:$0x1] %v36_v8 }

// kernel: tile.123
= control target key start
LH: loop header
LB: loop body
LE: loop exit
PB: predicated region body
PF: predicated region fallthrough
CT: control target
= control target key end

     0   :  { %s22_s0 = inlined_call_operand.vmem [shape: f32[64], index: 0, kind: input, shape index: {}]   ;;  %s23_s1 = inlined_call_operand.vmem [shape: f32[4,64], index: 1, kind: output, shape index: {}]  }
   0x1   :  { %v4_v0 = vld [vmem:[%s22_s0] ss:$0 sm:$0xff] }
   0x2   :  { %5 = vst [vmem:[%s23_s1] sm:$0xf] %v4_v0 }

// kernel: tile.124
= control target key start
LH: loop header
LB: loop body
LE: loop exit
PB: predicated region body
PF: predicated region fallthrough
CT: control target
= control target key end

     0   :  { %s7_s8 = smov 3  ;;  %vm9_vm0 = vcmask 523264   ;;  %s34_s9 = smov 64   ;;  %vm16_vm1 = vcmask 1048064   ;;  %s54_s0 = inlined_call_operand.vmem [shape: f32[4,64], index: 0, kind: input, shape index: {}]   ;;  %s55_s1 = inlined_call_operand.vmem [shape: f32[1,256], index: 1, kind: output, shape index: {}]  }
   0x1   :  { %v5_v0 = vld [vmem:[%s54_s0] sm:$0xf]  ;;  %s12_s0 = smov 3 }
   0x2   :  { %6 = vst [vmem:[#allocation1] sm:$0xf] %v5_v0 }
   0x9   :  { %v13_v1 = vld [vmem:[#allocation1 + $0x1] ss:$2 sm:%s12_s0]   ;;  %v8_v2 = vld [vmem:[#allocation1] ss:$2 sm:%s7_s8]  }
   0xa   :  { %14 = vrot.lane.b32.xlu0 %v13_v1, %s34_s9  ;;  %10 = vst.msk [vmem:[#allocation0] ss:$8 sm:$0x3] %vm9_vm0, %v8_v2  }
  0x7c   :  { %v15_v3 = vpop.permute.xlu0 %14  }
  0x7d   :  { %17 = vst.msk [vmem:[#allocation0] ss:$8 sm:$0x3] %vm16_vm1, %v15_v3  }
  0x84   :  { %v22_v4 = vld [vmem:[#allocation0] sm:$0x1]  ;;  %v27_v5 = vld [vmem:[#allocation0 + $0x8] sm:$0x1] }
  0x85   :  { %25 = vst [vmem:[%s55_s1] sm:$0x1] %v22_v4  ;;  %32 = vst [vmem:[%s55_s1 + $0x1] sm:$0x1] %v27_v5 }

// kernel: tile.168
= control target key start
LH: loop header
LB: loop body
LE: loop exit
PB: predicated region body
PF: predicated region fallthrough
CT: control target
= control target key end

     0   :  { %s22_s0 = inlined_call_operand.vmem [shape: f32[32], index: 0, kind: input, shape index: {}]   ;;  %s23_s1 = inlined_call_operand.vmem [shape: f32[4,32], index: 1, kind: output, shape index: {}]  }
   0x1   :  { %v4_v0 = vld [vmem:[%s22_s0] ss:$0 sm:$0xff] }
   0x2   :  { %5 = vst [vmem:[%s23_s1] sm:$0xf] %v4_v0 }

// kernel: tile.169
= control target key start
LH: loop header
LB: loop body
LE: loop exit
PB: predicated region body
PF: predicated region fallthrough
CT: control target
= control target key end

     0   :  { %vm8_vm0 = vcmask 261120   ;;  %s40_s8 = smov 32   ;;  %s41_s9 = smov 64   ;;  %vm14_vm1 = vcmask 1048320   ;;  %vm20_vm2 = vcmask 785920   ;;  %vm26_vm3 = vcmask 523520   ;;  %s58_s0 = inlined_call_operand.vmem [shape: f32[4,32], index: 0, kind: input, shape index: {}]   ;;  %s59_s1 = inlined_call_operand.vmem [shape: f32[1,128], index: 1, kind: output, shape index: {}]  }
   0x1   :  { %v5_v0 = vld [vmem:[%s58_s0] sm:$0xf]  ;;  %s39_s0 = smov 96  }
   0x2   :  { %6 = vst [vmem:[#allocation1] sm:$0xf] %v5_v0 }
   0x9   :  { %v11_v1 = vld [vmem:[#allocation1 + $0x3] sm:$0x1]   ;;  %v23_v2 = vld [vmem:[#allocation1 + $0x1] sm:$0x1]   ;;  %v7_v3 = vld [vmem:[#allocation1] sm:$0x1]  }
   0xa   :  { %12 = vrot.lane.b32.xlu0 %v11_v1, %s39_s0  ;;  %24 = vrot.lane.b32.xlu1 %v23_v2, %s40_s8  ;;  %v17_v4 = vld [vmem:[#allocation1 + $0x2] sm:$0x1]   ;;  %9 = vst.msk [vmem:[#allocation0] sm:$0x1] %vm8_vm0, %v7_v3  }
   0xe   :  { %18 = vrot.lane.b32.xlu0 %v17_v4, %s41_s9 }
  0x7c   :  { %v13_v5 = vpop.permute.xlu0 %12   ;;  %v25_v6 = vpop.permute.xlu1 %24  }
  0x7d   :  { %15 = vst.msk [vmem:[#allocation0] sm:$0x1] %vm14_vm1, %v13_v5  }
  0x80   :  { %v19_v7 = vpop.permute.xlu0 %18  }
  0x81   :  { %21 = vst.msk [vmem:[#allocation0] sm:$0x1] %vm20_vm2, %v19_v7  }
  0x82   :  { %27 = vst.msk [vmem:[#allocation0] sm:$0x1] %vm26_vm3, %v25_v6  }
  0x89   :  { %v32_v8 = vld [vmem:[#allocation0] sm:$0x1] }
  0x8a   :  { %35 = vst [vmem:[%s59_s1] sm:$0x1] %v32_v8 }

// kernel: cinic10_encoder.1
= control target key start
LH: loop header
LB: loop body
LE: loop exit
PB: predicated region body
PF: predicated region fallthrough
CT: control target
= control target key end

     0   :  { %s8429_s3 = smov 1   ;;  %v13338_v0 = vmov 0.0   ;;  %vm223_vm0 = vcmask 392192   ;;  %s8431_s10 = smov 5   ;;  %vm1887_vm2 = vcmask 1043456   ;;  %vm8453_vm3 = vmmov 0   ;;  %s13337_s0 = inlined_call_operand.smem [shape: u32[37], index: -1, kind: input, shape index: {}] }
   0x1   :  { %s8476_s6 = sld [smem:[%s13337_s0 + %s8429_s3]]   ;;  %291 = vmatprep.mubr.f32.mxu0 %v13338_v0  ;;  %150 = vst [vmem:[#allocation2] sm:$0x1f] %v13338_v0  ;;  %151 = vst [vmem:[#allocation2 + $0x8] sm:$0x1f] %v13338_v0  ;;  %365 = vmatprep.mubr.f32.mxu1 %v13338_v0  ;;  %s8432_s14 = smov 2  }
   0x2   :  { %153 = vst [vmem:[#allocation2 + $0x10] sm:$0x1f] %v13338_v0  ;;  %154 = vst [vmem:[#allocation2 + $0x18] sm:$0x1f] %v13338_v0  ;;  %s8526_s9 = sld [smem:[%s13337_s0]]   ;;  %s8433_s18 = smov 6  }
   0x3   :  { %156 = vst [vmem:[#allocation2 + $0x20] sm:$0x1f] %v13338_v0  ;;  %157 = vst [vmem:[#allocation2 + $0x28] sm:$0x1f] %v13338_v0  ;;  %s8598_s13 = sld [smem:[%s13337_s0 + %s8431_s10]]   ;;  %s8435_s22 = smov 3  }
   0x4   :  { %159 = vst [vmem:[#allocation2 + $0x30] sm:$0x1f] %v13338_v0  ;;  %160 = vst [vmem:[#allocation2 + $0x38] sm:$0x1f] %v13338_v0  ;;  %s6589_s17 = sld [smem:[%s13337_s0 + %s8432_s14]]   ;;  %s8436_s26 = smov 4  }
   0x5   :  { %161 = vst [vmem:[#allocation3 + $0x10] sm:$0x3f] %v13338_v0  ;;  %162 = vst [vmem:[#allocation3] sm:$0x3f] %v13338_v0  ;;  %s8719_s21 = sld [smem:[%s13337_s0 + %s8433_s18]]   ;;  %s8437_s30 = smov 10  }
   0x6   :  { %164 = vst [vmem:[#allocation3 + $0x18] sm:$0x3f] %v13338_v0  ;;  %165 = vst [vmem:[#allocation3 + $0x8] sm:$0x3f] %v13338_v0  ;;  %s6590_s25 = sld [smem:[%s13337_s0 + %s8435_s22]]   ;;  %s8438_s4 = smov 11  }
   0x7   :  { %166 = vst [vmem:[#allocation4] sm:$0x3f] %v13338_v0  ;;  %167 = vst [vmem:[#allocation4 + $0x18] sm:$0x3f] %v13338_v0  ;;  %v6635_v1 = vld [vmem:[%s8476_s6 + $0xb8] sm:$0xff]  ;;  %v6634_v3 = vld [vmem:[%s8476_s6 + $0xb0] sm:$0xff]  ;;  %s6591_s29 = sld [smem:[%s13337_s0 + %s8436_s26]]  }
   0x8   :  { %169 = vst [vmem:[#allocation4 + $0x8] sm:$0x3f] %v13338_v0  ;;  %170 = vst [vmem:[#allocation4 + $0x10] sm:$0x3f] %v13338_v0  ;;  %v8506_v2 = vld [vmem:[%s8476_s6 + $0x58] sm:$0xff]  ;;  %247 = vmatprep.subr.mxu0 %v6635_v1  ;;  %v8511_v4 = vld [vmem:[%s8476_s6 + $0x50] sm:$0xff]  ;;  %s9682_s3 = sld [smem:[%s13337_s0 + %s8437_s30]]  }
   0x9   :  { %171 = vst [vmem:[#allocation5] sm:$0x3f] %v13338_v0  ;;  %172 = vst [vmem:[#allocation5 + $0x8] sm:$0x3f] %v13338_v0  ;;  %321 = vmatprep.subr.mxu1 %v8506_v2  ;;  %v6633_v5 = vld [vmem:[%s8476_s6 + $0xa8] sm:$0xff]  ;;  %248 = vmatpush1.msra.mxu0 %v6634_v3  ;;  %v6632_v7 = vld [vmem:[%s8476_s6 + $0xa0] sm:$0xff]  ;;  %s9751_s7 = sld [smem:[%s13337_s0 + %s8438_s4]]  }
   0xa   :  { %174 = vst [vmem:[#allocation5 + $0x10] sm:$0x3f] %v13338_v0  ;;  %175 = vst [vmem:[#allocation5 + $0x18] sm:$0x3f] %v13338_v0  ;;  %v8515_v6 = vld [vmem:[%s8476_s6 + $0x48] sm:$0xff]  ;;  %322 = vmatpush1.msra.mxu1 %v8511_v4  ;;  %v8520_v8 = vld [vmem:[%s8476_s6 + $0x40] sm:$0xff]  ;;  %249 = vmatprep.subr.mxu0 %v6633_v5 }
   0xb   :  { %176 = vst [vmem:[#allocation6] sm:$0x3f] %v13338_v0  ;;  %178 = vst [vmem:[#allocation6 + $0x8] sm:$0x3f] %v13338_v0  ;;  %v6631_v9 = vld [vmem:[%s8476_s6 + $0x98] sm:$0xff]  ;;  %323 = vmatprep.subr.mxu1 %v8515_v6  ;;  %v6630_v11 = vld [vmem:[%s8476_s6 + $0x90] sm:$0xff]  ;;  %250 = vmatpush1.msra.mxu0 %v6632_v7 }
   0xc   :  { %179 = vst [vmem:[#allocation7] sm:$0x3f] %v13338_v0  ;;  %181 = vst [vmem:[#allocation7 + $0x8] sm:$0x3f] %v13338_v0  ;;  %v8530_v10 = vld [vmem:[%s8476_s6 + $0x38] sm:$0xff]  ;;  %v8534_v12 = vld [vmem:[%s8476_s6 + $0x30] sm:$0xff]  ;;  %324 = vmatpush1.msra.mxu1 %v8520_v8  ;;  %251 = vmatprep.subr.mxu0 %v6631_v9 }
   0xd   :  { %v6629_v13 = vld [vmem:[%s8476_s6 + $0x88] sm:$0xff]  ;;  %325 = vmatprep.subr.mxu1 %v8530_v10  ;;  %v6628_v15 = vld [vmem:[%s8476_s6 + $0x80] sm:$0xff]  ;;  %252 = vmatpush1.msra.mxu0 %v6630_v11  ;;  %v6627_v17 = vld [vmem:[%s8476_s6 + $0x78] sm:$0xff]  ;;  %s8439_s8 = smov 7   ;;  %s8440_s12 = smov 8  }
   0xe   :  { %v8539_v14 = vld [vmem:[%s8476_s6 + $0x28] sm:$0xff]  ;;  %v8544_v16 = vld [vmem:[%s8476_s6 + $0x20] sm:$0xff]  ;;  %326 = vmatpush1.msra.mxu1 %v8534_v12  ;;  %v8549_v18 = vld [vmem:[%s8476_s6 + $0x18] sm:$0xff]  ;;  %253 = vmatprep.subr.mxu0 %v6629_v13  ;;  %s6594_s11 = sld [smem:[%s13337_s0 + %s8439_s8]]   ;;  %s8441_s16 = smov 9  }
   0xf   :  { %327 = vmatprep.subr.mxu1 %v8539_v14  ;;  %v6626_v19 = vld [vmem:[%s8476_s6 + $0x70] sm:$0xff]  ;;  %254 = vmatpush1.msra.mxu0 %v6628_v15  ;;  %v6625_v21 = vld [vmem:[%s8476_s6 + $0x68] sm:$0xff]  ;;  %v6624_v23 = vld [vmem:[%s8476_s6 + $0x60] sm:$0xff]  ;;  %s6595_s15 = sld [smem:[%s13337_s0 + %s8440_s12]]   ;;  %s8442_s20 = smov 15  }
  0x10   :  { %v8554_v20 = vld [vmem:[%s8476_s6 + $0x10] sm:$0xff]  ;;  %328 = vmatpush1.msra.mxu1 %v8544_v16  ;;  %v8559_v22 = vld [vmem:[%s8476_s6 + $0x8] sm:$0xff]  ;;  %255 = vmatprep.subr.mxu0 %v6627_v17  ;;  %v8564_v24 = vld [vmem:[%s8476_s6] sm:$0xff]  ;;  %s6596_s19 = sld [smem:[%s13337_s0 + %s8441_s16]]   ;;  %s8443_s24 = smov 16  }
  0x11   :  { %329 = vmatprep.subr.mxu1 %v8549_v18  ;;  %256 = vmatpush1.msra.mxu0 %v6626_v19  ;;  %v6648_v25 = vld [vmem:[%s8526_s9 + $0x10] sm:$0xff]  ;;  %v220_v26 = vld [vmem:[%s8526_s9] sm:$0xff]  ;;  %v6647_v27 = vld [vmem:[%s8476_s6 + $0x118] sm:$0xff]  ;;  %s10731_s23 = sld [smem:[%s13337_s0 + %s8442_s20]]   ;;  %s8444_s28 = smov 12  }
  0x12   :  { %330 = vmatpush1.msra.mxu1 %v8554_v20  ;;  %257 = vmatprep.subr.mxu0 %v6625_v21  ;;  %v6646_v28 = vld [vmem:[%s8476_s6 + $0x110] sm:$0xff]  ;;  %v6645_v29 = vld [vmem:[%s8476_s6 + $0x108] sm:$0xff]  ;;  %v6644_v30 = vld [vmem:[%s8476_s6 + $0x100] sm:$0xff]  ;;  %s10800_s27 = sld [smem:[%s13337_s0 + %s8443_s24]]   ;;  %s8445_s2 = smov 13  }
  0x13   :  { %331 = vmatprep.subr.mxu1 %v8559_v22  ;;  %258 = vmatpush1.msra.mxu0 %v6624_v23  ;;  %v6643_v31 = vld [vmem:[%s8476_s6 + $0xf8] sm:$0xff]  ;;  %v6642_v32 = vld [vmem:[%s8476_s6 + $0xf0] sm:$0xff]  ;;  %v6641_v33 = vld [vmem:[%s8476_s6 + $0xe8] sm:$0xff]  ;;  %s6599_s1 = sld [smem:[%s13337_s0 + %s8444_s28]]   ;;  %s8447_s10 = smov 20  }
  0x14   :  { %332 = vmatpush1.msra.mxu1 %v8564_v24  ;;  %6649 = vmatmul.mubr.msk.f32.vlgmr.msra.gmra.mxu0 %vm223_vm0, %v6648_v25  ;;  %v6640_v34 = vld [vmem:[%s8476_s6 + $0xe0] sm:$0xff]  ;;  %v6639_v35 = vld [vmem:[%s8476_s6 + $0xd8] sm:$0xff]  ;;  %v6638_v36 = vld [vmem:[%s8476_s6 + $0xd0] sm:$0xff]  ;;  %s6600_s5 = sld [smem:[%s13337_s0 + %s8445_s2]]   ;;  %s8448_s14 = smov 17  }
  0x15   :  { %6650 = vmatmul.mubr.msk.f32.vlgmr.msra.gmra.mxu1 %vm223_vm0, %v220_v26  ;;  %396 = vmatprep.subr.mxu0 %v6647_v27  ;;  %v6637_v37 = vld [vmem:[%s8476_s6 + $0xc8] sm:$0xff]  ;;  %v6636_v38 = vld [vmem:[%s8476_s6 + $0xc0] sm:$0xff]  ;;  %v6653_v40 = vld [vmem:[%s8526_s9 + $0x30] sm:$0xff]  ;;  %s8446_s6 = smov 14   ;;  %s8449_s18 = smov 21  }
  0x16   :  { %492 = vmatprep.subr.mxu1 %v6635_v1  ;;  %397 = vmatpush1.msra.mxu0 %v6646_v28  ;;  %v372_v39 = vld [vmem:[%s8526_s9 + $0x1] sm:$0xff]  ;;  %v789_v43 = vld [vmem:[%s8598_s13 + $0xf8] sm:$0xff]  ;;  %v788_v44 = vld [vmem:[%s8598_s13 + $0xf0] sm:$0xff]  ;;  %s8450_s22 = smov 18   ;;  %s8451_s26 = smov 19  }
  0x17   :  { %493 = vmatpush1.msra.mxu1 %v6634_v3  ;;  %398 = vmatprep.subr.mxu0 %v6645_v29  ;;  %v6652_v41 = vld [vmem:[%s8526_s9 + $0x20] sm:$0xff]  ;;  %v787_v45 = vld [vmem:[%s8598_s13 + $0xe8] sm:$0xff]  ;;  %v785_v47 = vld [vmem:[%s8598_s13 + $0xd8] sm:$0xff]  ;;  %s8452_s30 = smov 25   ;;  %s8454_s4 = smov 22  }
  0x18   :  { %494 = vmatprep.subr.mxu1 %v6633_v5  ;;  %399 = vmatpush1.msra.mxu0 %v6644_v30  ;;  %v6656_v42 = vld [vmem:[%s8526_s9 + $0x21] sm:$0xff]  ;;  %v784_v48 = vld [vmem:[%s8598_s13 + $0xd0] sm:$0xff]  ;;  %v781_v51 = vld [vmem:[%s8598_s13 + $0xb8] sm:$0xff]  ;;  %s6601_s9 = sld [smem:[%s13337_s0 + %s8446_s6]]   ;;  %s8455_s8 = smov 26  }
  0x19   :  { %495 = vmatpush1.msra.mxu1 %v6632_v7  ;;  %400 = vmatprep.subr.mxu0 %v6643_v31  ;;  %v786_v46 = vld [vmem:[%s8598_s13 + $0xe0] sm:$0xff]  ;;  %v783_v49 = vld [vmem:[%s8598_s13 + $0xc8] sm:$0xff]  ;;  %v780_v52 = vld [vmem:[%s8598_s13 + $0xb0] sm:$0xff]  ;;  %s8456_s12 = smov 23   ;;  %s8457_s16 = smov 24  }
  0x1a   :  { %496 = vmatprep.subr.mxu1 %v6631_v9  ;;  %401 = vmatpush1.msra.mxu0 %v6642_v32  ;;  %v782_v50 = vld [vmem:[%s8598_s13 + $0xc0] sm:$0xff]  ;;  %v779_v53 = vld [vmem:[%s8598_s13 + $0xa8] sm:$0xff]  ;;  %v777_v55 = vld [vmem:[%s8598_s13 + $0x98] sm:$0xff]  ;;  %s8458_s20 = smov 30   ;;  %s8459_s24 = smov 27  }
  0x1b   :  { %497 = vmatpush1.msra.mxu1 %v6630_v11  ;;  %402 = vmatprep.subr.mxu0 %v6641_v33  ;;  %v778_v54 = vld [vmem:[%s8598_s13 + $0xa0] sm:$0xff]  ;;  %v776_v56 = vld [vmem:[%s8598_s13 + $0x90] sm:$0xff]  ;;  %v775_v57 = vld [vmem:[%s8598_s13 + $0x88] sm:$0xff]  ;;  %s8460_s28 = smov 31   ;;  %s8461_s2 = smov 28  }
  0x1c   :  { %498 = vmatprep.subr.mxu1 %v6629_v13  ;;  %403 = vmatpush1.msra.mxu0 %v6640_v34  ;;  %v774_v58 = vld [vmem:[%s8598_s13 + $0x80] sm:$0xff]  ;;  %v773_v59 = vld [vmem:[%s8598_s13 + $0x78] sm:$0xff]  ;;  %v772_v60 = vld [vmem:[%s8598_s13 + $0x70] sm:$0xff]  ;;  %s8462_s6 = smov 29  }
  0x1d   :  { %499 = vmatpush1.msra.mxu1 %v6628_v15  ;;  %404 = vmatprep.subr.mxu0 %v6639_v35  ;;  %v771_v61 = vld [vmem:[%s8598_s13 + $0x68] sm:$0xff]  ;;  %v770_v62 = vld [vmem:[%s8598_s13 + $0x60] sm:$0xff]  ;;  %v769_v63 = vld [vmem:[%s8598_s13 + $0x58] sm:$0xff] }
  0x1e   :  { %500 = vmatprep.subr.mxu1 %v6627_v17  ;;  %405 = vmatpush1.msra.mxu0 %v6638_v36  ;;  %v768_v1 = vld [vmem:[%s8598_s13 + $0x50] sm:$0xff]  ;;  %v766_v3 = vld [vmem:[%s8598_s13 + $0x40] sm:$0xff]  ;;  %v807_v26 = vld [vmem:[%s8598_s13 + $0x188] sm:$0xff] }
  0x1f   :  { %501 = vmatpush1.msra.mxu1 %v6626_v19  ;;  %406 = vmatprep.subr.mxu0 %v6637_v37  ;;  %v764_v5 = vld [vmem:[%s8598_s13 + $0x30] sm:$0xff]  ;;  %v762_v7 = vld [vmem:[%s8598_s13 + $0x20] sm:$0xff] }
  0x20   :  { %502 = vmatprep.subr.mxu1 %v6625_v21  ;;  %407 = vmatpush1.msra.mxu0 %v6636_v38  ;;  %v760_v9 = vld [vmem:[%s8598_s13 + $0x10] sm:$0xff]  ;;  %v758_v11 = vld [vmem:[%s8598_s13] sm:$0xff] }
  0x21   :  { %440 = vmatprep.mubr.f32.mxu0 %v13338_v0  ;;  %503 = vmatpush1.msra.mxu1 %v6624_v23  ;;  %v820_v13 = vld [vmem:[%s8598_s13 + $0x1f0] sm:$0xff]  ;;  %v818_v15 = vld [vmem:[%s8598_s13 + $0x1e0] sm:$0xff] }
  0x22   :  { %6651 = vmatmul.mubr.msk.f32.vlgmr.msra.gmra.mxu0 %vm223_vm0, %v372_v39  ;;  %536 = vmatprep.mubr.f32.mxu1 %v13338_v0  ;;  %v816_v17 = vld [vmem:[%s8598_s13 + $0x1d0] sm:$0xff]  ;;  %v814_v19 = vld [vmem:[%s8598_s13 + $0x1c0] sm:$0xff] }
  0x23   :  { %566 = vmatprep.subr.mxu0 %v8506_v2  ;;  %641 = vmatprep.subr.mxu1 %v6647_v27  ;;  %v767_v2 = vld [vmem:[%s8598_s13 + $0x48] sm:$0xff]  ;;  %v812_v21 = vld [vmem:[%s8598_s13 + $0x1b0] sm:$0xff]  ;;  %v810_v23 = vld [vmem:[%s8598_s13 + $0x1a0] sm:$0xff] }
  0x24   :  { %6654 = vmatmul.mubr.msk.f32.vlgmr.msra.gmra.mxu1 %vm223_vm0, %v6653_v40  ;;  %567 = vmatpush1.msra.mxu0 %v8511_v4  ;;  %v765_v4 = vld [vmem:[%s8598_s13 + $0x38] sm:$0xff]  ;;  %v808_v25 = vld [vmem:[%s8598_s13 + $0x190] sm:$0xff]  ;;  %v806_v27 = vld [vmem:[%s8598_s13 + $0x180] sm:$0xff] }
  0x25   :  { %642 = vmatpush1.msra.mxu1 %v6646_v28  ;;  %568 = vmatprep.subr.mxu0 %v8515_v6  ;;  %v763_v6 = vld [vmem:[%s8598_s13 + $0x28] sm:$0xff]  ;;  %v805_v28 = vld [vmem:[%s8598_s13 + $0x178] sm:$0xff]  ;;  %v794_v39 = vld [vmem:[%s8598_s13 + $0x120] sm:$0xff] }
  0x26   :  { %643 = vmatprep.subr.mxu1 %v6645_v29  ;;  %569 = vmatpush1.msra.mxu0 %v8520_v8  ;;  %v761_v8 = vld [vmem:[%s8598_s13 + $0x18] sm:$0xff]  ;;  %v804_v29 = vld [vmem:[%s8598_s13 + $0x170] sm:$0xff] }
  0x27   :  { %644 = vmatpush1.msra.mxu1 %v6644_v30  ;;  %570 = vmatprep.subr.mxu0 %v8530_v10  ;;  %v759_v10 = vld [vmem:[%s8598_s13 + $0x8] sm:$0xff]  ;;  %v793_v40 = vld [vmem:[%s8598_s13 + $0x118] sm:$0xff] }
  0x28   :  { %645 = vmatprep.subr.mxu1 %v6643_v31  ;;  %571 = vmatpush1.msra.mxu0 %v8534_v12  ;;  %v821_v12 = vld [vmem:[%s8598_s13 + $0x1f8] sm:$0xff]  ;;  %v803_v30 = vld [vmem:[%s8598_s13 + $0x168] sm:$0xff]  ;;  %v802_v31 = vld [vmem:[%s8598_s13 + $0x160] sm:$0xff] }
  0x29   :  { %646 = vmatpush1.msra.mxu1 %v6642_v32  ;;  %572 = vmatprep.subr.mxu0 %v8539_v14  ;;  %v819_v14 = vld [vmem:[%s8598_s13 + $0x1e8] sm:$0xff]  ;;  %v801_v32 = vld [vmem:[%s8598_s13 + $0x158] sm:$0xff] }
  0x2a   :  { %647 = vmatprep.subr.mxu1 %v6641_v33  ;;  %573 = vmatpush1.msra.mxu0 %v8544_v16  ;;  %v817_v16 = vld [vmem:[%s8598_s13 + $0x1d8] sm:$0xff]  ;;  %v800_v33 = vld [vmem:[%s8598_s13 + $0x150] sm:$0xff] }
  0x2b   :  { %648 = vmatpush1.msra.mxu1 %v6640_v34  ;;  %574 = vmatprep.subr.mxu0 %v8549_v18  ;;  %v815_v18 = vld [vmem:[%s8598_s13 + $0x1c8] sm:$0xff] }
  0x2c   :  { %649 = vmatprep.subr.mxu1 %v6639_v35  ;;  %575 = vmatpush1.msra.mxu0 %v8554_v20  ;;  %v813_v20 = vld [vmem:[%s8598_s13 + $0x1b8] sm:$0xff]  ;;  %v799_v34 = vld [vmem:[%s8598_s13 + $0x148] sm:$0xff]  ;;  %v798_v35 = vld [vmem:[%s8598_s13 + $0x140] sm:$0xff] }
  0x2d   :  { %650 = vmatpush1.msra.mxu1 %v6638_v36  ;;  %576 = vmatprep.subr.mxu0 %v8559_v22  ;;  %v811_v22 = vld [vmem:[%s8598_s13 + $0x1a8] sm:$0xff]  ;;  %v797_v36 = vld [vmem:[%s8598_s13 + $0x138] sm:$0xff] }
  0x2e   :  { %651 = vmatprep.subr.mxu1 %v6637_v37  ;;  %577 = vmatpush1.msra.mxu0 %v8564_v24  ;;  %v809_v24 = vld [vmem:[%s8598_s13 + $0x198] sm:$0xff]  ;;  %v796_v37 = vld [vmem:[%s8598_s13 + $0x130] sm:$0xff] }
  0x2f   :  { %610 = vmatprep.mubr.f32.mxu0 %v13338_v0  ;;  %652 = vmatpush1.msra.mxu1 %v6636_v38  ;;  %v795_v38 = vld [vmem:[%s8598_s13 + $0x128] sm:$0xff] }
  0x30   :  { %685 = vmatprep.mubr.f32.mxu1 %v13338_v0  ;;  %6655 = vmatmul.mubr.msk.f32.vlgmr.msra.gmra.mxu0 %vm223_vm0, %v6652_v41  ;;  %v792_v41 = vld [vmem:[%s8598_s13 + $0x110] sm:$0xff]  ;;  %v8965_v0 = vld [vmem:[%s8719_s21 + $0x1c8] sm:$0xff] }
  0x31   :  { %6657 = vmatmul.mubr.msk.f32.vlgmr.msra.gmra.mxu1 %vm223_vm0, %v6656_v42  ;;  %822 = vmatprep.subr.mxu0 %v789_v43  ;;  %v791_v42 = vld [vmem:[%s8598_s13 + $0x108] sm:$0xff]  ;;  %13637 = vst [vmem:[#allocation25_spill] sm:$0xff] %v8965_v0 }
  0x32   :  { %896 = vmatprep.subr.mxu1 %v789_v43  ;;  %823 = vmatpush1.msra.mxu0 %v788_v44  ;;  %v790_v43 = vld [vmem:[%s8598_s13 + $0x100] sm:$0xff]  ;;  %s11780_s13 = sld [smem:[%s13337_s0 + %s8447_s10]]   ;;  %s8463_s10 = smov 35  }
  0x33   :  { %897 = vmatpush1.msra.mxu1 %v788_v44  ;;  %824 = vmatprep.subr.mxu0 %v787_v45  ;;  %v13340_v44 = vlaneseq }
  0x34   :  { %898 = vmatprep.subr.mxu1 %v787_v45  ;;  %825 = vmatpush1.msra.mxu0 %v786_v46 }
  0x35   :  { %899 = vmatpush1.msra.mxu1 %v786_v46  ;;  %826 = vmatprep.subr.mxu0 %v785_v47 }
  0x36   :  { %900 = vmatprep.subr.mxu1 %v785_v47  ;;  %827 = vmatpush1.msra.mxu0 %v784_v48  ;;  %v8682_v47 = vshrl.u32 %v13340_v44, 7  ;;  %v8970_v44 = vld [vmem:[%s8719_s21 + $0x3b0] sm:$0xff] }
  0x37   :  { %901 = vmatpush1.msra.mxu1 %v784_v48  ;;  %828 = vmatprep.subr.mxu0 %v783_v49  ;;  %13638 = vst [vmem:[#allocation26_spill] sm:$0xff] %v8970_v44 }
  0x38   :  { %902 = vmatprep.subr.mxu1 %v783_v49  ;;  %829 = vmatpush1.msra.mxu0 %v782_v50  ;;  %v8685_v48 = vsub.s32 1, %v8682_v47 }
  0x39   :  { %903 = vmatpush1.msra.mxu1 %v782_v50  ;;  %830 = vmatprep.subr.mxu0 %v781_v51 }
  0x3a   :  { %904 = vmatprep.subr.mxu1 %v781_v51  ;;  %831 = vmatpush1.msra.mxu0 %v780_v52  ;;  %13620 = vst [vmem:[#allocation8_spill] sm:$0xff] %v8685_v48  ;;  %v8688_v51 = vsub.s32 0, %v8682_v47 }
  0x3b   :  { %905 = vmatpush1.msra.mxu1 %v780_v52  ;;  %832 = vmatprep.subr.mxu0 %v779_v53 }
  0x3c   :  { %906 = vmatprep.subr.mxu1 %v779_v53  ;;  %833 = vmatpush1.msra.mxu0 %v778_v54  ;;  %13621 = vst [vmem:[#allocation9_spill] sm:$0xff] %v8688_v51  ;;  %v449_v53 = vld [vmem:[%s6589_s17] sm:$0x3]  ;;  %s6604_s17 = sld [smem:[%s13337_s0 + %s8448_s14]]   ;;  %s8464_s14 = smov 32  }
  0x3d   :  { %907 = vmatpush1.msra.mxu1 %v778_v54  ;;  %834 = vmatprep.subr.mxu0 %v777_v55 }
  0x3e   :  { %908 = vmatprep.subr.mxu1 %v777_v55  ;;  %835 = vmatpush1.msra.mxu0 %v776_v56 }
  0x3f   :  { %909 = vmatpush1.msra.mxu1 %v776_v56  ;;  %836 = vmatprep.subr.mxu0 %v775_v57  ;;  %v458_v56 = vrot.slane %v449_v53, %v8685_v48 }
  0x40   :  { %910 = vmatprep.subr.mxu1 %v775_v57  ;;  %837 = vmatpush1.msra.mxu0 %v774_v58 }
  0x41   :  { %911 = vmatpush1.msra.mxu1 %v774_v58  ;;  %838 = vmatprep.subr.mxu0 %v773_v59 }
  0x42   :  { %912 = vmatprep.subr.mxu1 %v773_v59  ;;  %839 = vmatpush1.msra.mxu0 %v772_v60  ;;  %v454_v59 = vrot.slane %v449_v53, %v8688_v51 }
  0x43   :  { %913 = vmatpush1.msra.mxu1 %v772_v60  ;;  %840 = vmatprep.subr.mxu0 %v771_v61 }
  0x44   :  { %914 = vmatprep.subr.mxu1 %v771_v61  ;;  %841 = vmatpush1.msra.mxu0 %v770_v62 }
  0x45   :  { %915 = vmatpush1.msra.mxu1 %v770_v62  ;;  %842 = vmatprep.subr.mxu0 %v769_v63 }
  0x46   :  { %916 = vmatprep.subr.mxu1 %v769_v63  ;;  %843 = vmatpush1.msra.mxu0 %v768_v1 }
  0x47   :  { %917 = vmatpush1.msra.mxu1 %v768_v1  ;;  %844 = vmatprep.subr.mxu0 %v767_v2 }
  0x48   :  { %918 = vmatprep.subr.mxu1 %v767_v2  ;;  %845 = vmatpush1.msra.mxu0 %v766_v3 }
  0x49   :  { %919 = vmatpush1.msra.mxu1 %v766_v3  ;;  %846 = vmatprep.subr.mxu0 %v765_v4 }
  0x4a   :  { %920 = vmatprep.subr.mxu1 %v765_v4  ;;  %847 = vmatpush1.msra.mxu0 %v764_v5 }
  0x4b   :  { %921 = vmatpush1.msra.mxu1 %v764_v5  ;;  %848 = vmatprep.subr.mxu0 %v763_v6 }
  0x4c   :  { %922 = vmatprep.subr.mxu1 %v763_v6  ;;  %849 = vmatpush1.msra.mxu0 %v762_v7 }
  0x4d   :  { %923 = vmatpush1.msra.mxu1 %v762_v7  ;;  %850 = vmatprep.subr.mxu0 %v761_v8 }
  0x4e   :  { %924 = vmatprep.subr.mxu1 %v761_v8  ;;  %851 = vmatpush1.msra.mxu0 %v760_v9 }
  0x4f   :  { %925 = vmatpush1.msra.mxu1 %v760_v9  ;;  %852 = vmatprep.subr.mxu0 %v759_v10 }
  0x50   :  { %926 = vmatprep.subr.mxu1 %v759_v10  ;;  %853 = vmatpush1.msra.mxu0 %v758_v11 }
  0x51   :  { %927 = vmatpush1.msra.mxu1 %v758_v11  ;;  %854 = vmatprep.subr.mxu0 %v821_v12 }
  0x52   :  { %928 = vmatprep.subr.mxu1 %v821_v12  ;;  %855 = vmatpush2.msra.mxu0 %v820_v13 }
  0x53   :  { %929 = vmatpush2.msra.mxu1 %v820_v13  ;;  %856 = vmatprep.subr.mxu0 %v819_v14 }
  0x54   :  { %930 = vmatprep.subr.mxu1 %v819_v14  ;;  %857 = vmatpush2.msra.mxu0 %v818_v15 }
  0x55   :  { %931 = vmatpush2.msra.mxu1 %v818_v15  ;;  %858 = vmatprep.subr.mxu0 %v817_v16 }
  0x56   :  { %932 = vmatprep.subr.mxu1 %v817_v16  ;;  %859 = vmatpush2.msra.mxu0 %v816_v17 }
  0x57   :  { %933 = vmatpush2.msra.mxu1 %v816_v17  ;;  %860 = vmatprep.subr.mxu0 %v815_v18 }
  0x58   :  { %934 = vmatprep.subr.mxu1 %v815_v18  ;;  %861 = vmatpush2.msra.mxu0 %v814_v19 }
  0x59   :  { %935 = vmatpush2.msra.mxu1 %v814_v19  ;;  %862 = vmatprep.subr.mxu0 %v813_v20 }
  0x5a   :  { %936 = vmatprep.subr.mxu1 %v813_v20  ;;  %863 = vmatpush2.msra.mxu0 %v812_v21 }
  0x5b   :  { %937 = vmatpush2.msra.mxu1 %v812_v21  ;;  %864 = vmatprep.subr.mxu0 %v811_v22 }
  0x5c   :  { %938 = vmatprep.subr.mxu1 %v811_v22  ;;  %865 = vmatpush2.msra.mxu0 %v810_v23 }
  0x5d   :  { %939 = vmatpush2.msra.mxu1 %v810_v23  ;;  %866 = vmatprep.subr.mxu0 %v809_v24 }
  0x5e   :  { %940 = vmatprep.subr.mxu1 %v809_v24  ;;  %867 = vmatpush2.msra.mxu0 %v808_v25 }
  0x5f   :  { %941 = vmatpush2.msra.mxu1 %v808_v25  ;;  %868 = vmatprep.subr.mxu0 %v807_v26 }
  0x60   :  { %942 = vmatprep.subr.mxu1 %v807_v26  ;;  %869 = vmatpush2.msra.mxu0 %v806_v27 }
  0x61   :  { %943 = vmatpush2.msra.mxu1 %v806_v27  ;;  %870 = vmatprep.subr.mxu0 %v805_v28 }
  0x62   :  { %944 = vmatprep.subr.mxu1 %v805_v28  ;;  %871 = vmatpush2.msra.mxu0 %v804_v29 }
  0x63   :  { %945 = vmatpush2.msra.mxu1 %v804_v29  ;;  %872 = vmatprep.subr.mxu0 %v803_v30 }
  0x64   :  { %946 = vmatprep.subr.mxu1 %v803_v30  ;;  %873 = vmatpush2.msra.mxu0 %v802_v31 }
  0x65   :  { %947 = vmatpush2.msra.mxu1 %v802_v31  ;;  %874 = vmatprep.subr.mxu0 %v801_v32 }
  0x66   :  { %948 = vmatprep.subr.mxu1 %v801_v32  ;;  %875 = vmatpush2.msra.mxu0 %v800_v33 }
  0x67   :  { %949 = vmatpush2.msra.mxu1 %v800_v33  ;;  %876 = vmatprep.subr.mxu0 %v799_v34 }
  0x68   :  { %950 = vmatprep.subr.mxu1 %v799_v34  ;;  %877 = vmatpush2.msra.mxu0 %v798_v35 }
  0x69   :  { %951 = vmatpush2.msra.mxu1 %v798_v35  ;;  %878 = vmatprep.subr.mxu0 %v797_v36 }
  0x6a   :  { %952 = vmatprep.subr.mxu1 %v797_v36  ;;  %879 = vmatpush2.msra.mxu0 %v796_v37 }
  0x6b   :  { %953 = vmatpush2.msra.mxu1 %v796_v37  ;;  %880 = vmatprep.subr.mxu0 %v795_v38 }
  0x6c   :  { %954 = vmatprep.subr.mxu1 %v795_v38  ;;  %881 = vmatpush2.msra.mxu0 %v794_v39 }
  0x6d   :  { %955 = vmatpush2.msra.mxu1 %v794_v39  ;;  %882 = vmatprep.subr.mxu0 %v793_v40 }
  0x6e   :  { %956 = vmatprep.subr.mxu1 %v793_v40  ;;  %883 = vmatpush2.msra.mxu0 %v792_v41 }
  0x6f   :  { %957 = vmatpush2.msra.mxu1 %v792_v41  ;;  %884 = vmatprep.subr.mxu0 %v791_v42 }
  0x70   :  { %958 = vmatprep.subr.mxu1 %v791_v42  ;;  %885 = vmatpush2.msra.mxu0 %v790_v43 }
  0x71   :  { %959 = vmatpush2.msra.mxu1 %v790_v43 }
  0xd4   :  { %v293_v45 = vpop.f32.mrf.mxu0 }
  0xd5   :  { %v367_v46 = vpop.f32.mrf.mxu1 }
  0xd6   :  { %v295_v49 = vpop.f32.mrf.mxu0  ;;  %v368_v54 = vadd.f32 %v367_v46, %v293_v45 }
  0xd7   :  { %v369_v50 = vpop.f32.mrf.mxu1 }
  0xd8   :  { %v370_v55 = vadd.f32 %v369_v50, %v295_v49 }
  0xe2   :  { %v442_v52 = vpop.f32.mrf.mxu0 }
  0xe3   :  { %v447_v58 = vadd.f32 %v442_v52, %v368_v54 }
  0xe4   :  { %v444_v57 = vpop.f32.mrf.mxu0  ;;  %v538_v63 = vpop.f32.mrf.mxu1 }
  0xe5   :  { %v448_v60 = vadd.f32 %v444_v57, %v370_v55  ;;  %v461_v62 = vadd.f32 %v454_v59, %v447_v58 }
  0xe6   :  { %v540_v4 = vpop.f32.mrf.mxu1 }
  0xe7   :  { %v462_v61 = vadd.f32 %v458_v56, %v448_v60  ;;  %v8694_v2 = vmax.f32 %v461_v62, 0.0 }
  0xe9   :  { %v8692_v1 = vmax.f32 %v462_v61, 0.0  ;;  %v712_v5 = vmul.f32 %v8694_v2, %v8694_v2  ;;  %v698_v10 = vrot.slane %v8694_v2, 4 }
  0xeb   :  { %v713_v3 = vmul.f32 %v8692_v1, %v8692_v1  ;;  %v704_v6 = vrot.slane %v8692_v1, 4  ;;  %v714_v15 = vrot.slane %v712_v5, 4  ;;  %v699_v20 = vadd.f32 %v698_v10, %v8694_v2 }
  0xed   :  { %v720_v12 = vrot.slane %v713_v3, 4  ;;  %v705_v17 = vadd.f32 %v704_v6, %v8692_v1  ;;  %v715_v24 = vadd.f32 %v714_v15, %v712_v5  ;;  %v700_v29 = vrot.slane %v699_v20, 2  ;;  %v8722_v15 = vld [vmem:[%s8719_s21 + $0x2f8] sm:$0xff] }
  0xee   :  { %1417 = vmatprep.subr.mxu0 %v8722_v15 }
  0xef   :  { %v721_v21 = vadd.f32 %v720_v12, %v713_v3  ;;  %v706_v25 = vrot.slane %v705_v17, 2  ;;  %v716_v36 = vrot.slane %v715_v24, 2  ;;  %v701_v41 = vadd.f32 %v700_v29, %v699_v20  ;;  %v1249_v20 = vld [vmem:[%s8719_s21 + $0xf0] sm:$0xff]  ;;  %v8755_v29 = vld [vmem:[%s8719_s21 + $0x2c0] sm:$0xff] }
  0xf0   :  { %v612_v7 = vpop.f32.mrf.mxu0 }
  0xf1   :  { %v687_v8 = vpop.f32.mrf.mxu1  ;;  %v613_v9 = vadd.f32 %v612_v7, %v538_v63  ;;  %v722_v30 = vrot.slane %v721_v21, 2  ;;  %v707_v35 = vadd.f32 %v706_v25, %v705_v17  ;;  %v717_v52 = vadd.f32 %v716_v36, %v715_v24  ;;  %v8730_v17 = vld [vmem:[%s8719_s21 + $0x2e8] sm:$0xff]  ;;  %v8745_v24 = vld [vmem:[%s8719_s21 + $0x2d0] sm:$0xff]  ;;  %v1247_v25 = vld [vmem:[%s8719_s21 + $0xe0] sm:$0xff] }
  0xf2   :  { %v614_v11 = vpop.f32.mrf.mxu0  ;;  %v702_v57 = vrot.slane %v701_v41, 1  ;;  %v1242_v36 = vld [vmem:[%s8719_s21 + $0xb8] sm:$0xff] }
  0xf3   :  { %v692_v13 = vadd.f32 %v687_v8, %v613_v9  ;;  %v615_v14 = vadd.f32 %v614_v11, %v540_v4  ;;  %v689_v16 = vpop.f32.mrf.mxu1  ;;  %v723_v42 = vadd.f32 %v722_v30, %v721_v21  ;;  %v708_v50 = vrot.slane %v707_v35, 1  ;;  %v8740_v21 = vld [vmem:[%s8719_s21 + $0x2d8] sm:$0xff]  ;;  %v1245_v30 = vld [vmem:[%s8719_s21 + $0xd0] sm:$0xff] }
  0xf4   :  { %v718_v63 = vrot.slane %v717_v52, 1  ;;  %v703_v6 = vadd.f32 %v702_v57, %v701_v41  ;;  %v8785_v41 = vld [vmem:[%s8719_s21 + $0x290] sm:$0xff]  ;;  %v8815_v57 = vld [vmem:[%s8719_s21 + $0x260] sm:$0xff] }
  0xf5   :  { %v694_v18 = vadd.f32 %v692_v13, %v454_v59  ;;  %v693_v19 = vadd.f32 %v689_v16, %v615_v14  ;;  %v724_v59 = vrot.slane %v723_v42, 1  ;;  %v709_v3 = vadd.f32 %v708_v50, %v707_v35  ;;  %v8726_v16 = vld [vmem:[%s8719_s21 + $0x2f0] sm:$0xff]  ;;  %v8770_v35 = vld [vmem:[%s8719_s21 + $0x2a8] sm:$0xff]  ;;  %v8800_v50 = vld [vmem:[%s8719_s21 + $0x278] sm:$0xff] }
  0xf6   :  { %v719_v12 = vadd.f32 %v718_v63, %v717_v52  ;;  %v1236_v52 = vld [vmem:[%s8719_s21 + $0x88] sm:$0xff] }
  0xf7   :  { %v8704_v22 = vmax.f32 %v694_v18, 0.0  ;;  %v695_v23 = vadd.f32 %v693_v19, %v458_v56  ;;  %v725_v9 = vadd.f32 %v724_v59, %v723_v42  ;;  %v1250_v18 = vld [vmem:[%s8719_s21 + $0xf8] sm:$0xff]  ;;  %v8735_v19 = vld [vmem:[%s8719_s21 + $0x2e0] sm:$0xff]  ;;  %v8830_v63 = vld [vmem:[%s8719_s21 + $0x248] sm:$0xff] }
  0xf8   :  { %1488 = vmatprep.subr.mxu1 %v1250_v18  ;;  %v1239_v42 = vld [vmem:[%s8719_s21 + $0xa0] sm:$0xff]  ;;  %v8820_v59 = vld [vmem:[%s8719_s21 + $0x258] sm:$0xff]  ;;  %v8869_v18 = vld [vmem:[%s8719_s21 + $0x28] sm:$0xff] }
  0xf9   :  { %v728_v26 = vrot.slane %v8704_v22, 4  ;;  %v742_v27 = vmul.f32 %v8704_v22, %v8704_v22  ;;  %v8709_v28 = vmax.f32 %v695_v23, 0.0  ;;  %v1248_v23 = vld [vmem:[%s8719_s21 + $0xe8] sm:$0xff]  ;;  %13624 = vst [vmem:[#allocation12_spill] sm:$0xff] %v8869_v18 }
  0xfb   :  { %v729_v31 = vadd.f32 %v728_v26, %v8704_v22  ;;  %v744_v32 = vrot.slane %v742_v27, 4  ;;  %v734_v33 = vrot.slane %v8709_v28, 4  ;;  %v743_v34 = vmul.f32 %v8709_v28, %v8709_v28  ;;  %v8750_v26 = vld [vmem:[%s8719_s21 + $0x2c8] sm:$0xff] }
  0xfd   :  { %v730_v37 = vrot.slane %v729_v31, 2  ;;  %v745_v38 = vadd.f32 %v744_v32, %v742_v27  ;;  %v735_v39 = vadd.f32 %v734_v33, %v8709_v28  ;;  %v750_v40 = vrot.slane %v743_v34, 4  ;;  %v1246_v27 = vld [vmem:[%s8719_s21 + $0xd8] sm:$0xff]  ;;  %v1244_v32 = vld [vmem:[%s8719_s21 + $0xc8] sm:$0xff]  ;;  %v8765_v33 = vld [vmem:[%s8719_s21 + $0x2b0] sm:$0xff] }
  0xff   :  { %v736_v43 = vrot.slane %v735_v39, 2  ;;  %v731_v45 = vadd.f32 %v730_v37, %v729_v31  ;;  %v751_v46 = vadd.f32 %v750_v40, %v743_v34  ;;  %v746_v49 = vrot.slane %v745_v38, 2  ;;  %v8760_v31 = vld [vmem:[%s8719_s21 + $0x2b8] sm:$0xff]  ;;  %v1243_v34 = vld [vmem:[%s8719_s21 + $0xc0] sm:$0xff]  ;;  %v1240_v40 = vld [vmem:[%s8719_s21 + $0xa8] sm:$0xff] }
 0x100   :  { %v8775_v37 = vld [vmem:[%s8719_s21 + $0x2a0] sm:$0xff] }
 0x101   :  { %v737_v53 = vadd.f32 %v736_v43, %v735_v39  ;;  %v732_v54 = vrot.slane %v731_v45, 1  ;;  %v752_v55 = vrot.slane %v751_v46, 2  ;;  %v747_v56 = vadd.f32 %v746_v49, %v745_v38  ;;  %v1241_v38 = vld [vmem:[%s8719_s21 + $0xb0] sm:$0xff]  ;;  %v8780_v39 = vld [vmem:[%s8719_s21 + $0x298] sm:$0xff]  ;;  %v8790_v43 = vld [vmem:[%s8719_s21 + $0x288] sm:$0xff] }
 0x102   :  { %v1237_v49 = vld [vmem:[%s8719_s21 + $0x90] sm:$0xff] }
 0x103   :  { %v738_v58 = vrot.slane %v737_v53, 1  ;;  %v753_v60 = vadd.f32 %v752_v55, %v751_v46  ;;  %v748_v61 = vrot.slane %v747_v56, 1  ;;  %v733_v62 = vadd.f32 %v732_v54, %v731_v45  ;;  %v1238_v45 = vld [vmem:[%s8719_s21 + $0x98] sm:$0xff]  ;;  %v8795_v46 = vld [vmem:[%s8719_s21 + $0x280] sm:$0xff]  ;;  %v8810_v55 = vld [vmem:[%s8719_s21 + $0x268] sm:$0xff] }
 0x104   :  { %v1235_v54 = vld [vmem:[%s8719_s21 + $0x80] sm:$0xff] }
 0x105   :  { %v739_v4 = vadd.f32 %v738_v58, %v737_v53  ;;  %v754_v5 = vrot.slane %v753_v60, 1  ;;  %v749_v7 = vadd.f32 %v748_v61, %v747_v56  ;;  %v740_v11 = vadd.f32 %v733_v62, %v703_v6  ;;  %v8805_v53 = vld [vmem:[%s8719_s21 + $0x270] sm:$0xff]  ;;  %v1234_v56 = vld [vmem:[%s8719_s21 + $0x78] sm:$0xff]  ;;  %v1231_v62 = vld [vmem:[%s8719_s21 + $0x60] sm:$0xff] }
 0x106   :  { %v1233_v58 = vld [vmem:[%s8719_s21 + $0x70] sm:$0xff]  ;;  %v8840_v6 = vld [vmem:[%s8719_s21 + $0x238] sm:$0xff] }
 0x107   :  { %v741_v8 = vadd.f32 %v739_v4, %v709_v3  ;;  %v755_v10 = vadd.f32 %v754_v5, %v753_v60  ;;  %v756_v14 = vadd.f32 %v749_v7, %v719_v12  ;;  %v1232_v60 = vld [vmem:[%s8719_s21 + $0x68] sm:$0xff]  ;;  %v8825_v61 = vld [vmem:[%s8719_s21 + $0x250] sm:$0xff]  ;;  %v1230_v3 = vld [vmem:[%s8719_s21 + $0x58] sm:$0xff] }
 0x108   :  { %v8835_v4 = vld [vmem:[%s8719_s21 + $0x240] sm:$0xff]  ;;  %v1229_v5 = vld [vmem:[%s8719_s21 + $0x50] sm:$0xff]  ;;  %v1228_v7 = vld [vmem:[%s8719_s21 + $0x48] sm:$0xff] }
 0x109   :  { %886 = vmatprep.mubr.f32.mxu0 %v741_v8  ;;  %v757_v13 = vadd.f32 %v755_v10, %v725_v9  ;;  %v8845_v8 = vld [vmem:[%s8719_s21 + $0x230] sm:$0xff]  ;;  %v1227_v9 = vld [vmem:[%s8719_s21 + $0x40] sm:$0xff]  ;;  %v8850_v10 = vld [vmem:[%s8719_s21 + $0x228] sm:$0xff] }
 0x10a   :  { %887 = vmatmul.mubr.f32.vlgmr.msra.gmra.mxu0 %v740_v11  ;;  %v8853_v11 = vld [vmem:[%s8719_s21 + $0x38] sm:$0xff]  ;;  %v8858_v12 = vld [vmem:[%s8719_s21 + $0x220] sm:$0xff] }
 0x10b   :  { %960 = vmatprep.mubr.f32.mxu1 %v757_v13  ;;  %1418 = vmatpush1.msra.mxu0 %v8726_v16  ;;  %13622 = vst [vmem:[#allocation10_spill] sm:$0xff] %v8853_v11  ;;  %v8861_v13 = vld [vmem:[%s8719_s21 + $0x30] sm:$0xff] }
 0x10c   :  { %961 = vmatmul.mubr.f32.vlgmr.msra.gmra.mxu1 %v756_v14  ;;  %1419 = vmatprep.subr.mxu0 %v8730_v17  ;;  %13623 = vst [vmem:[#allocation11_spill] sm:$0xff] %v8861_v13  ;;  %v8866_v14 = vld [vmem:[%s8719_s21 + $0x218] sm:$0xff] }
 0x10d   :  { %1420 = vmatpush1.msra.mxu0 %v8735_v19  ;;  %1489 = vmatpush1.msra.mxu1 %v1249_v20  ;;  %v8874_v20 = vld [vmem:[%s8719_s21 + $0x210] sm:$0xff] }
 0x10e   :  { %1421 = vmatprep.subr.mxu0 %v8740_v21  ;;  %1490 = vmatprep.subr.mxu1 %v1248_v23  ;;  %v8877_v23 = vld [vmem:[%s8719_s21 + $0x20] sm:$0xff] }
 0x10f   :  { %1422 = vmatpush1.msra.mxu0 %v8745_v24  ;;  %1491 = vmatpush1.msra.mxu1 %v1247_v25  ;;  %13625 = vst [vmem:[#allocation13_spill] sm:$0xff] %v8877_v23  ;;  %v8882_v25 = vld [vmem:[%s8719_s21 + $0x208] sm:$0xff] }
 0x110   :  { %1423 = vmatprep.subr.mxu0 %v8750_v26  ;;  %1492 = vmatprep.subr.mxu1 %v1246_v27  ;;  %v8885_v27 = vld [vmem:[%s8719_s21 + $0x18] sm:$0xff] }
 0x111   :  { %1424 = vmatpush1.msra.mxu0 %v8755_v29  ;;  %1493 = vmatpush1.msra.mxu1 %v1245_v30  ;;  %13626 = vst [vmem:[#allocation14_spill] sm:$0xff] %v8885_v27  ;;  %v8890_v30 = vld [vmem:[%s8719_s21 + $0x200] sm:$0xff] }
 0x112   :  { %1425 = vmatprep.subr.mxu0 %v8760_v31  ;;  %1494 = vmatprep.subr.mxu1 %v1244_v32  ;;  %v8893_v32 = vld [vmem:[%s8719_s21 + $0x10] sm:$0xff] }
 0x113   :  { %1426 = vmatpush1.msra.mxu0 %v8765_v33  ;;  %1495 = vmatpush1.msra.mxu1 %v1243_v34  ;;  %13627 = vst [vmem:[#allocation15_spill] sm:$0xff] %v8893_v32  ;;  %v8898_v34 = vld [vmem:[%s8719_s21 + $0x3f8] sm:$0xff] }
 0x114   :  { %1427 = vmatprep.subr.mxu0 %v8770_v35  ;;  %1496 = vmatprep.subr.mxu1 %v1242_v36  ;;  %v8901_v36 = vld [vmem:[%s8719_s21 + $0x8] sm:$0xff] }
 0x115   :  { %1428 = vmatpush1.msra.mxu0 %v8775_v37  ;;  %1497 = vmatpush1.msra.mxu1 %v1241_v38  ;;  %13628 = vst [vmem:[#allocation16_spill] sm:$0xff] %v8901_v36  ;;  %v8906_v38 = vld [vmem:[%s8719_s21 + $0x3f0] sm:$0xff] }
 0x116   :  { %1429 = vmatprep.subr.mxu0 %v8780_v39  ;;  %1498 = vmatprep.subr.mxu1 %v1240_v40  ;;  %v8909_v40 = vld [vmem:[%s8719_s21] sm:$0xff] }
 0x117   :  { %1430 = vmatpush1.msra.mxu0 %v8785_v41  ;;  %1499 = vmatpush1.msra.mxu1 %v1239_v42  ;;  %13629 = vst [vmem:[#allocation17_spill] sm:$0xff] %v8909_v40  ;;  %v8914_v42 = vld [vmem:[%s8719_s21 + $0x3e8] sm:$0xff] }
 0x118   :  { %1431 = vmatprep.subr.mxu0 %v8790_v43  ;;  %1500 = vmatprep.subr.mxu1 %v1238_v45  ;;  %v8917_v45 = vld [vmem:[%s8719_s21 + $0x1f8] sm:$0xff] }
 0x119   :  { %1432 = vmatpush1.msra.mxu0 %v8795_v46  ;;  %1501 = vmatpush1.msra.mxu1 %v1237_v49  ;;  %13630 = vst [vmem:[#allocation18_spill] sm:$0xff] %v8917_v45  ;;  %v8922_v49 = vld [vmem:[%s8719_s21 + $0x3e0] sm:$0xff] }
 0x11a   :  { %1433 = vmatprep.subr.mxu0 %v8800_v50  ;;  %1502 = vmatprep.subr.mxu1 %v1236_v52  ;;  %v8925_v52 = vld [vmem:[%s8719_s21 + $0x1f0] sm:$0xff] }
 0x11b   :  { %1434 = vmatpush1.msra.mxu0 %v8805_v53  ;;  %1503 = vmatpush1.msra.mxu1 %v1235_v54  ;;  %13631 = vst [vmem:[#allocation19_spill] sm:$0xff] %v8925_v52  ;;  %v8930_v54 = vld [vmem:[%s8719_s21 + $0x3d8] sm:$0xff] }
 0x11c   :  { %1435 = vmatprep.subr.mxu0 %v8810_v55  ;;  %1504 = vmatprep.subr.mxu1 %v1234_v56  ;;  %v8933_v56 = vld [vmem:[%s8719_s21 + $0x1e8] sm:$0xff] }
 0x11d   :  { %1436 = vmatpush1.msra.mxu0 %v8815_v57  ;;  %1505 = vmatpush1.msra.mxu1 %v1233_v58  ;;  %13632 = vst [vmem:[#allocation20_spill] sm:$0xff] %v8933_v56  ;;  %v8938_v58 = vld [vmem:[%s8719_s21 + $0x3d0] sm:$0xff] }
 0x11e   :  { %1437 = vmatprep.subr.mxu0 %v8820_v59  ;;  %1506 = vmatprep.subr.mxu1 %v1232_v60  ;;  %v8941_v60 = vld [vmem:[%s8719_s21 + $0x1e0] sm:$0xff] }
 0x11f   :  { %1438 = vmatpush1.msra.mxu0 %v8825_v61  ;;  %1507 = vmatpush1.msra.mxu1 %v1231_v62  ;;  %13633 = vst [vmem:[#allocation21_spill] sm:$0xff] %v8941_v60  ;;  %v8946_v62 = vld [vmem:[%s8719_s21 + $0x3c8] sm:$0xff] }
 0x120   :  { %1439 = vmatprep.subr.mxu0 %v8830_v63  ;;  %1508 = vmatprep.subr.mxu1 %v1230_v3  ;;  %v8949_v3 = vld [vmem:[%s8719_s21 + $0x1d8] sm:$0xff] }
 0x121   :  { %1440 = vmatpush1.msra.mxu0 %v8835_v4  ;;  %1509 = vmatpush1.msra.mxu1 %v1229_v5  ;;  %13634 = vst [vmem:[#allocation22_spill] sm:$0xff] %v8949_v3  ;;  %v8954_v5 = vld [vmem:[%s8719_s21 + $0x3c0] sm:$0xff] }
 0x122   :  { %1441 = vmatprep.subr.mxu0 %v8840_v6  ;;  %1510 = vmatprep.subr.mxu1 %v1228_v7  ;;  %v8957_v7 = vld [vmem:[%s8719_s21 + $0x1d0] sm:$0xff] }
 0x123   :  { %1442 = vmatpush1.msra.mxu0 %v8845_v8  ;;  %1511 = vmatpush1.msra.mxu1 %v1227_v9  ;;  %13635 = vst [vmem:[#allocation23_spill] sm:$0xff] %v8957_v7  ;;  %v8962_v9 = vld [vmem:[%s8719_s21 + $0x3b8] sm:$0xff] }
 0x124   :  { %1443 = vmatprep.subr.mxu0 %v8850_v10  ;;  %1512 = vmatprep.subr.mxu1 %v8853_v11  ;;  %13636 = vst [vmem:[#allocation24_spill] sm:$0xff] %v8962_v9  ;;  %v9069_v11 = vld [vmem:[%s8719_s21 + $0x160] sm:$0xff] }
 0x125   :  { %1444 = vmatpush1.msra.mxu0 %v8858_v12  ;;  %1513 = vmatpush1.msra.mxu1 %v8861_v13  ;;  %v9061_v13 = vld [vmem:[%s8719_s21 + $0x168] sm:$0xff]  ;;  %13663 = vst [vmem:[#allocation51_spill] sm:$0xff] %v9069_v11 }
 0x126   :  { %1445 = vmatprep.subr.mxu0 %v8866_v14  ;;  %1514 = vmatprep.subr.mxu1 %v8869_v18  ;;  %v9053_v18 = vld [vmem:[%s8719_s21 + $0x170] sm:$0xff]  ;;  %13661 = vst [vmem:[#allocation49_spill] sm:$0xff] %v9061_v13 }
 0x127   :  { %1446 = vmatpush1.msra.mxu0 %v8874_v20  ;;  %1515 = vmatpush1.msra.mxu1 %v8877_v23  ;;  %v9045_v23 = vld [vmem:[%s8719_s21 + $0x178] sm:$0xff]  ;;  %13659 = vst [vmem:[#allocation47_spill] sm:$0xff] %v9053_v18 }
 0x128   :  { %1447 = vmatprep.subr.mxu0 %v8882_v25  ;;  %1516 = vmatprep.subr.mxu1 %v8885_v27  ;;  %v9037_v27 = vld [vmem:[%s8719_s21 + $0x180] sm:$0xff]  ;;  %13657 = vst [vmem:[#allocation45_spill] sm:$0xff] %v9045_v23 }
 0x129   :  { %1448 = vmatpush1.msra.mxu0 %v8890_v30  ;;  %1517 = vmatpush1.msra.mxu1 %v8893_v32  ;;  %v9029_v32 = vld [vmem:[%s8719_s21 + $0x188] sm:$0xff]  ;;  %13655 = vst [vmem:[#allocation43_spill] sm:$0xff] %v9037_v27 }
 0x12a   :  { %1449 = vmatprep.subr.mxu0 %v8898_v34  ;;  %1518 = vmatprep.subr.mxu1 %v8901_v36  ;;  %v9021_v36 = vld [vmem:[%s8719_s21 + $0x190] sm:$0xff]  ;;  %13653 = vst [vmem:[#allocation41_spill] sm:$0xff] %v9029_v32 }
 0x12b   :  { %1450 = vmatpush2.msra.mxu0 %v8906_v38  ;;  %1519 = vmatpush1.msra.mxu1 %v8909_v40  ;;  %v9013_v40 = vld [vmem:[%s8719_s21 + $0x198] sm:$0xff]  ;;  %13651 = vst [vmem:[#allocation39_spill] sm:$0xff] %v9021_v36 }
 0x12c   :  { %1451 = vmatprep.subr.mxu0 %v8914_v42  ;;  %1520 = vmatprep.subr.mxu1 %v8917_v45  ;;  %v9005_v45 = vld [vmem:[%s8719_s21 + $0x1a0] sm:$0xff]  ;;  %13649 = vst [vmem:[#allocation37_spill] sm:$0xff] %v9013_v40 }
 0x12d   :  { %1452 = vmatpush2.msra.mxu0 %v8922_v49  ;;  %1521 = vmatpush2.msra.mxu1 %v8925_v52  ;;  %v8997_v52 = vld [vmem:[%s8719_s21 + $0x1a8] sm:$0xff]  ;;  %13647 = vst [vmem:[#allocation35_spill] sm:$0xff] %v9005_v45 }
 0x12e   :  { %1453 = vmatprep.subr.mxu0 %v8930_v54  ;;  %1522 = vmatprep.subr.mxu1 %v8933_v56  ;;  %v8989_v56 = vld [vmem:[%s8719_s21 + $0x1b0] sm:$0xff]  ;;  %13645 = vst [vmem:[#allocation33_spill] sm:$0xff] %v8997_v52 }
 0x12f   :  { %1454 = vmatpush2.msra.mxu0 %v8938_v58  ;;  %1523 = vmatpush2.msra.mxu1 %v8941_v60  ;;  %v8981_v60 = vld [vmem:[%s8719_s21 + $0x1b8] sm:$0xff]  ;;  %13643 = vst [vmem:[#allocation31_spill] sm:$0xff] %v8989_v56 }
 0x130   :  { %1455 = vmatprep.subr.mxu0 %v8946_v62  ;;  %1524 = vmatprep.subr.mxu1 %v8949_v3  ;;  %v8973_v3 = vld [vmem:[%s8719_s21 + $0x1c0] sm:$0xff]  ;;  %13641 = vst [vmem:[#allocation29_spill] sm:$0xff] %v8981_v60 }
 0x131   :  { %1456 = vmatpush2.msra.mxu0 %v8954_v5  ;;  %1525 = vmatpush2.msra.mxu1 %v8957_v7  ;;  %13639 = vst [vmem:[#allocation27_spill] sm:$0xff] %v8973_v3  ;;  %v8978_v7 = vld [vmem:[%s8719_s21 + $0x3a8] sm:$0xff] }
 0x132   :  { %1457 = vmatprep.subr.mxu0 %v8962_v9  ;;  %1526 = vmatprep.subr.mxu1 %v8965_v0  ;;  %13640 = vst [vmem:[#allocation28_spill] sm:$0xff] %v8978_v7  ;;  %v8986_v0 = vld [vmem:[%s8719_s21 + $0x3a0] sm:$0xff] }
 0x133   :  { %1458 = vmatpush2.msra.mxu0 %v8970_v44  ;;  %1527 = vmatpush2.msra.mxu1 %v8973_v3  ;;  %13642 = vst [vmem:[#allocation30_spill] sm:$0xff] %v8986_v0  ;;  %v8994_v3 = vld [vmem:[%s8719_s21 + $0x398] sm:$0xff]  ;;  %v8434_v44 = vmov 1966171168  }
 0x134   :  { %1459 = vmatprep.subr.mxu0 %v8978_v7  ;;  %1528 = vmatprep.subr.mxu1 %v8981_v60  ;;  %13644 = vst [vmem:[#allocation32_spill] sm:$0xff] %v8994_v3  ;;  %v9002_v60 = vld [vmem:[%s8719_s21 + $0x390] sm:$0xff] }
 0x135   :  { %1460 = vmatpush2.msra.mxu0 %v8986_v0  ;;  %1529 = vmatpush2.msra.mxu1 %v8989_v56  ;;  %13646 = vst [vmem:[#allocation34_spill] sm:$0xff] %v9002_v60  ;;  %v9010_v56 = vld [vmem:[%s8719_s21 + $0x388] sm:$0xff] }
 0x136   :  { %1461 = vmatprep.subr.mxu0 %v8994_v3  ;;  %1530 = vmatprep.subr.mxu1 %v8997_v52  ;;  %13648 = vst [vmem:[#allocation36_spill] sm:$0xff] %v9010_v56  ;;  %v9018_v52 = vld [vmem:[%s8719_s21 + $0x380] sm:$0xff] }
 0x137   :  { %1462 = vmatpush2.msra.mxu0 %v9002_v60  ;;  %1531 = vmatpush2.msra.mxu1 %v9005_v45  ;;  %13650 = vst [vmem:[#allocation38_spill] sm:$0xff] %v9018_v52  ;;  %v9026_v45 = vld [vmem:[%s8719_s21 + $0x378] sm:$0xff] }
 0x138   :  { %1463 = vmatprep.subr.mxu0 %v9010_v56  ;;  %1532 = vmatprep.subr.mxu1 %v9013_v40  ;;  %13652 = vst [vmem:[#allocation40_spill] sm:$0xff] %v9026_v45  ;;  %v9034_v40 = vld [vmem:[%s8719_s21 + $0x370] sm:$0xff] }
 0x139   :  { %1464 = vmatpush2.msra.mxu0 %v9018_v52  ;;  %1533 = vmatpush2.msra.mxu1 %v9021_v36  ;;  %13654 = vst [vmem:[#allocation42_spill] sm:$0xff] %v9034_v40  ;;  %v9042_v36 = vld [vmem:[%s8719_s21 + $0x368] sm:$0xff]  ;;  %v9145_v52 = vld [vmem:[%s8719_s21 + $0x110] sm:$0xff] }
 0x13a   :  { %1465 = vmatprep.subr.mxu0 %v9026_v45  ;;  %1534 = vmatprep.subr.mxu1 %v9029_v32  ;;  %13656 = vst [vmem:[#allocation44_spill] sm:$0xff] %v9042_v36  ;;  %v9050_v32 = vld [vmem:[%s8719_s21 + $0x360] sm:$0xff]  ;;  %v9126_v45 = vld [vmem:[%s8719_s21 + $0x310] sm:$0xff]  ;;  %13683 = vst [vmem:[#allocation71_spill] sm:$0xff] %v9145_v52 }
 0x13b   :  { %1466 = vmatpush2.msra.mxu0 %v9034_v40  ;;  %1535 = vmatpush2.msra.mxu1 %v9037_v27  ;;  %13658 = vst [vmem:[#allocation46_spill] sm:$0xff] %v9050_v32  ;;  %v9058_v27 = vld [vmem:[%s8719_s21 + $0x358] sm:$0xff]  ;;  %v9123_v40 = vld [vmem:[%s8719_s21 + $0x128] sm:$0xff]  ;;  %13678 = vst [vmem:[#allocation66_spill] sm:$0xff] %v9126_v45 }
 0x13c   :  { %1467 = vmatprep.subr.mxu0 %v9042_v36  ;;  %1536 = vmatprep.subr.mxu1 %v9045_v23  ;;  %13660 = vst [vmem:[#allocation48_spill] sm:$0xff] %v9058_v27  ;;  %v9066_v23 = vld [vmem:[%s8719_s21 + $0x350] sm:$0xff]  ;;  %v9120_v36 = vld [vmem:[%s8719_s21 + $0x318] sm:$0xff]  ;;  %13677 = vst [vmem:[#allocation65_spill] sm:$0xff] %v9123_v40 }
 0x13d   :  { %1468 = vmatpush2.msra.mxu0 %v9050_v32  ;;  %1537 = vmatpush2.msra.mxu1 %v9053_v18  ;;  %13662 = vst [vmem:[#allocation50_spill] sm:$0xff] %v9066_v23  ;;  %v9074_v18 = vld [vmem:[%s8719_s21 + $0x348] sm:$0xff]  ;;  %v9077_v32 = vld [vmem:[%s8719_s21 + $0x158] sm:$0xff]  ;;  %13676 = vst [vmem:[#allocation64_spill] sm:$0xff] %v9120_v36 }
 0x13e   :  { %1469 = vmatprep.subr.mxu0 %v9058_v27  ;;  %1538 = vmatprep.subr.mxu1 %v9061_v13  ;;  %13664 = vst [vmem:[#allocation52_spill] sm:$0xff] %v9074_v18  ;;  %13665 = vst [vmem:[#allocation53_spill] sm:$0xff] %v9077_v32  ;;  %v9082_v13 = vld [vmem:[%s8719_s21 + $0x340] sm:$0xff]  ;;  %v9085_v27 = vld [vmem:[%s8719_s21 + $0x150] sm:$0xff] }
 0x13f   :  { %1470 = vmatpush2.msra.mxu0 %v9066_v23  ;;  %1539 = vmatpush2.msra.mxu1 %v9069_v11  ;;  %13666 = vst [vmem:[#allocation54_spill] sm:$0xff] %v9082_v13  ;;  %13667 = vst [vmem:[#allocation55_spill] sm:$0xff] %v9085_v27  ;;  %v9090_v11 = vld [vmem:[%s8719_s21 + $0x338] sm:$0xff]  ;;  %v9093_v23 = vld [vmem:[%s8719_s21 + $0x148] sm:$0xff] }
 0x140   :  { %1471 = vmatprep.subr.mxu0 %v9074_v18  ;;  %1540 = vmatprep.subr.mxu1 %v9077_v32  ;;  %13668 = vst [vmem:[#allocation56_spill] sm:$0xff] %v9090_v11  ;;  %13669 = vst [vmem:[#allocation57_spill] sm:$0xff] %v9093_v23  ;;  %v9098_v32 = vld [vmem:[%s8719_s21 + $0x330] sm:$0xff]  ;;  %v9101_v18 = vld [vmem:[%s8719_s21 + $0x140] sm:$0xff] }
 0x141   :  { %1472 = vmatpush2.msra.mxu0 %v9082_v13  ;;  %1541 = vmatpush2.msra.mxu1 %v9085_v27  ;;  %13670 = vst [vmem:[#allocation58_spill] sm:$0xff] %v9098_v32  ;;  %13671 = vst [vmem:[#allocation59_spill] sm:$0xff] %v9101_v18  ;;  %v9104_v13 = vld [vmem:[%s8719_s21 + $0x328] sm:$0xff]  ;;  %v9109_v27 = vld [vmem:[%s8719_s21 + $0x138] sm:$0xff] }
 0x142   :  { %1473 = vmatprep.subr.mxu0 %v9090_v11  ;;  %1542 = vmatprep.subr.mxu1 %v9093_v23  ;;  %13672 = vst [vmem:[#allocation60_spill] sm:$0xff] %v9104_v13  ;;  %13673 = vst [vmem:[#allocation61_spill] sm:$0xff] %v9109_v27  ;;  %v9112_v11 = vld [vmem:[%s8719_s21 + $0x320] sm:$0xff]  ;;  %v9115_v23 = vld [vmem:[%s8719_s21 + $0x130] sm:$0xff] }
 0x143   :  { %1474 = vmatpush2.msra.mxu0 %v9098_v32  ;;  %1543 = vmatpush2.msra.mxu1 %v9101_v18  ;;  %13674 = vst [vmem:[#allocation62_spill] sm:$0xff] %v9112_v11  ;;  %13675 = vst [vmem:[#allocation63_spill] sm:$0xff] %v9115_v23  ;;  %v9131_v18 = vld [vmem:[%s8719_s21 + $0x120] sm:$0xff]  ;;  %v9134_v32 = vld [vmem:[%s8719_s21 + $0x308] sm:$0xff] }
 0x144   :  { %1475 = vmatprep.subr.mxu0 %v9104_v13  ;;  %1544 = vmatprep.subr.mxu1 %v9109_v27  ;;  %13679 = vst [vmem:[#allocation67_spill] sm:$0xff] %v9131_v18  ;;  %13680 = vst [vmem:[#allocation68_spill] sm:$0xff] %v9134_v32  ;;  %v9137_v13 = vld [vmem:[%s8719_s21 + $0x118] sm:$0xff]  ;;  %v9142_v27 = vld [vmem:[%s8719_s21 + $0x300] sm:$0xff] }
 0x145   :  { %1476 = vmatpush2.msra.mxu0 %v9112_v11  ;;  %1545 = vmatpush2.msra.mxu1 %v9115_v23  ;;  %13681 = vst [vmem:[#allocation69_spill] sm:$0xff] %v9137_v13  ;;  %13682 = vst [vmem:[#allocation70_spill] sm:$0xff] %v9142_v27  ;;  %v9154_v23 = vld [vmem:[%s8719_s21 + $0x108] sm:$0xff] }
 0x146   :  { %1477 = vmatprep.subr.mxu0 %v9120_v36  ;;  %1546 = vmatprep.subr.mxu1 %v9123_v40  ;;  %13684 = vst [vmem:[#allocation72_spill] sm:$0xff] %v9154_v23  ;;  %v9157_v36 = vld [vmem:[%s8719_s21 + $0x4f8] sm:$0xff]  ;;  %v9162_v40 = vld [vmem:[%s8719_s21 + $0x100] sm:$0xff] }
 0x147   :  { %1478 = vmatpush2.msra.mxu0 %v9126_v45  ;;  %1547 = vmatpush2.msra.mxu1 %v9131_v18  ;;  %13685 = vst [vmem:[#allocation73_spill] sm:$0xff] %v9157_v36  ;;  %13686 = vst [vmem:[#allocation74_spill] sm:$0xff] %v9162_v40 }
 0x148   :  { %1479 = vmatprep.subr.mxu0 %v9134_v32  ;;  %1548 = vmatprep.subr.mxu1 %v9137_v13 }
 0x149   :  { %1480 = vmatpush2.msra.mxu0 %v9142_v27  ;;  %1549 = vmatpush2.msra.mxu1 %v9145_v52 }
 0x14a   :  { %1550 = vmatprep.subr.mxu1 %v9154_v23  ;;  %1567 = vmatprep.subr.mxu0 %v9157_v36 }
 0x14b   :  { %1551 = vmatpush2.msra.mxu1 %v9162_v40  ;;  %v982_v40 = vunpack.c.l.s4 %v8434_v44 }
 0x14c   :  { %1660 = vmatprep.subr.mxu1 %v8722_v15 }
 0x14d   :  { %v983_v9 = vunpack.c.0.s8 %v982_v40 }
 0x1ca   :  { %v888_v18 = vpop.f32.mrf.mxu0 }
 0x1cb   :  { %v894_v13 = vmul.f32 0.0078125, %v888_v18  ;;  %v9170_v18 = vsub.s32 %v983_v9, %v8682_v47 }
 0x1cc   :  { %v890_v32 = vpop.f32.mrf.mxu0  ;;  %v962_v27 = vpop.f32.mrf.mxu1 }
 0x1cd   :  { %v969_v45 = vmul.f32 %v894_v13, %v894_v13  ;;  %v895_v52 = vmul.f32 0.0078125, %v890_v32  ;;  %v967_v11 = vmul.f32 0.0078125, %v962_v27  ;;  %13687 = vst [vmem:[#allocation75_spill] sm:$0xff] %v9170_v18 }
 0x1ce   :  { %v964_v56 = vpop.f32.mrf.mxu1 }
 0x1cf   :  { %v970_v60 = vmul.f32 %v895_v52, %v895_v52  ;;  %v971_v3 = vsub.f32 %v967_v11, %v969_v45  ;;  %v968_v0 = vmul.f32 0.0078125, %v964_v56 }
 0x1d1   :  { %v974_v23 = vadd.f32 1e-05, %v971_v3  ;;  %v972_v7 = vsub.f32 %v968_v0, %v970_v60  ;;  %v973_v0 = vld [vmem:[%s6590_s25] sm:$0x3]  ;;  %s6605_s25 = sld [smem:[%s13337_s0 + %s8450_s22]]   ;;  %s8466_s22 = smov 34  }
 0x1d2   :  { %v997_v3 = vld [vmem:[%s6591_s29] sm:$0x3]  ;;  %s6606_s29 = sld [smem:[%s13337_s0 + %s8451_s26]]   ;;  %s8467_s26 = smov 36  }
 0x1d3   :  { %v975_v36 = vadd.f32 1e-05, %v972_v7  ;;  %8359 = vrsqrt.f32 %v974_v23 }
 0x1d5   :  { %8361 = vrsqrt.f32 %v975_v36 }
 0x1e0   :  { %v8360_v15 = vpop.eup %8359 }
 0x1e2   :  { %v8362_v27 = vpop.eup %8361 }
 0x1e3   :  { %v980_v11 = vcombine.low %v8360_v15, %v8362_v27 }
 0x1e5   :  { %v987_v32 = vrot.slane %v980_v11, %v9170_v18 }
 0x1e7   :  { %v994_v23 = vrot.slane %v987_v32, %v9170_v18 }
 0x1e9   :  { %v996_v36 = vmul.f32 %v994_v23, %v973_v0 }
 0x1eb   :  { %v1002_v44 = vrot.slane %v996_v36, %v8688_v51  ;;  %v1006_v40 = vrot.slane %v996_v36, %v8685_v48 }
 0x1ed   :  { %v1009_v45 = vmul.f32 %v1002_v44, %v894_v13  ;;  %v1010_v47 = vmul.f32 %v1006_v40, %v895_v52  ;;  %v1030_v15 = vmul.f32 %v1002_v44, %v8694_v2  ;;  %v1031_v27 = vmul.f32 %v1006_v40, %v8692_v1 }
 0x1ee   :  { %v1132_v0 = vmul.f32 %v1002_v44, %v8704_v22  ;;  %v1133_v13 = vmul.f32 %v1006_v40, %v8709_v28  ;;  %v9247_v22 = vld [vmem:[%s8719_s21 + $0x4d8] sm:$0xff] }
 0x1ef   :  { %v1013_v56 = vcombine.low %v1009_v45, %v1010_v47 }
 0x1f1   :  { %v1020_v60 = vrot.slane %v1013_v56, %v9170_v18 }
 0x1f3   :  { %v1027_v7 = vrot.slane %v1020_v60, %v9170_v18 }
 0x1f5   :  { %v1029_v9 = vsub.f32 %v997_v3, %v1027_v7 }
 0x1f7   :  { %v1036_v11 = vrot.slane %v1029_v9, %v8688_v51  ;;  %v1040_v32 = vrot.slane %v1029_v9, %v8685_v48  ;;  %v13688_v51 = vlaneseq  ;;  %v13714_v48 = vld [vmem:[#allocation56_spill] sm:$0xff] }
 0x1f9   :  { %v1043_v52 = vadd.f32 %v1036_v11, %v1030_v15  ;;  %v1044_v23 = vadd.f32 %v1040_v32, %v1031_v27  ;;  %v1134_v36 = vadd.f32 %v1132_v0, %v1036_v11  ;;  %v1135_v45 = vadd.f32 %v1133_v13, %v1040_v32 }
 0x1fa   :  { %vm9192_vm1 = vcmp.lt.s32.totalorder %v13688_v51, 256 }
 0x1fb   :  { %v1047_v47 = vcombine.low %v1043_v52, %v1044_v23  ;;  %v1091_v56 = vcombine.high %v1043_v52, %v1044_v23  ;;  %v1138_v60 = vcombine.low %v1134_v36, %v1135_v45  ;;  %v1178_v3 = vcombine.high %v1134_v36, %v1135_v45 }
 0x1fd   :  { %v1054_v2 = vrot.slane %v1047_v47, %v9170_v18  ;;  %v1098_v1 = vrot.slane %v1091_v56, %v9170_v18  ;;  %v1145_v7 = vrot.slane %v1138_v60, %v9170_v18  ;;  %v1185_v9 = vrot.slane %v1178_v3, %v9170_v18 }
 0x1ff   :  { %v1061_v28 = vrot.slane %v1054_v2, %v9170_v18  ;;  %v1069_v44 = vcombine.high %v1054_v2, %v1054_v2  ;;  %v1105_v40 = vrot.slane %v1098_v1, %v9170_v18  ;;  %v1110_v15 = vcombine.high %v1098_v1, %v1098_v1 }
 0x200   :  { %v1152_v27 = vrot.slane %v1145_v7, %v9170_v18  ;;  %v1156_v11 = vcombine.high %v1145_v7, %v1145_v7  ;;  %v1192_v32 = vrot.slane %v1185_v9, %v9170_v18  ;;  %v1197_v0 = vcombine.high %v1185_v9, %v1185_v9 }
 0x201   :  { %v1076_v13 = vrot.slane %v1069_v44, %v9170_v18  ;;  %v1081_v52 = vcombine.high %v1061_v28, %v1061_v28  ;;  %v1117_v51 = vrot.slane %v1110_v15, %v9170_v18  ;;  %v1122_v23 = vcombine.high %v1105_v40, %v1105_v40  ;;  %1067 = vst.msk [vmem:[#allocation2 + $0x10] ss:$8 sm:$0x3] %vm9192_vm1, %v1061_v28  ;;  %v9237_v28 = vld [vmem:[%s8719_s21 + $0x4f0] sm:$0xff]  ;;  %v9240_v44 = vld [vmem:[%s8719_s21 + $0x4e8] sm:$0xff] }
 0x202   :  { %1108 = vst.msk [vmem:[#allocation2 + $0x12] ss:$8 sm:$0x3] %vm9192_vm1, %v1105_v40  ;;  %v1163_v36 = vrot.slane %v1156_v11, %v9170_v18  ;;  %v1168_v45 = vcombine.high %v1152_v27, %v1152_v27  ;;  %v1204_v47 = vrot.slane %v1197_v0, %v9170_v18  ;;  %v1209_v56 = vcombine.high %v1192_v32, %v1192_v32  ;;  %v9243_v40 = vld [vmem:[%s8719_s21 + $0x4e0] sm:$0xff]  ;;  %v9253_v0 = vld [vmem:[%s8719_s21 + $0x4d0] sm:$0xff] }
 0x203   :  { %1154 = vst.msk [vmem:[#allocation2 + $0x30] ss:$8 sm:$0x3] %vm9192_vm1, %v1152_v27  ;;  %1195 = vst.msk [vmem:[#allocation2 + $0x32] ss:$8 sm:$0x3] %vm9192_vm1, %v1192_v32  ;;  %v1127_v60 = vcombine.high %v1117_v51, %v1117_v51  ;;  %v1086_v3 = vcombine.high %v1076_v13, %v1076_v13 }
 0x204   :  { %1084 = vst.msk [vmem:[#allocation2 + $0x11] ss:$8 sm:$0x3] %vm9192_vm1, %v1081_v52  ;;  %1125 = vst.msk [vmem:[#allocation2 + $0x13] ss:$8 sm:$0x3] %vm9192_vm1, %v1122_v23  ;;  %v1214_v2 = vcombine.high %v1204_v47, %v1204_v47  ;;  %v1173_v1 = vcombine.high %v1163_v36, %v1163_v36 }
 0x205   :  { %1079 = vst.msk [vmem:[#allocation2 + $0x1] ss:$8 sm:$0x3] %vm9192_vm1, %v1076_v13  ;;  %1120 = vst.msk [vmem:[#allocation2 + $0x3] ss:$8 sm:$0x3] %vm9192_vm1, %v1117_v51 }
 0x206   :  { %1166 = vst.msk [vmem:[#allocation2 + $0x21] ss:$8 sm:$0x3] %vm9192_vm1, %v1163_v36  ;;  %1171 = vst.msk [vmem:[#allocation2 + $0x31] ss:$8 sm:$0x3] %vm9192_vm1, %v1168_v45 }
 0x207   :  { %1207 = vst.msk [vmem:[#allocation2 + $0x23] ss:$8 sm:$0x3] %vm9192_vm1, %v1204_v47  ;;  %1212 = vst.msk [vmem:[#allocation2 + $0x33] ss:$8 sm:$0x3] %vm9192_vm1, %v1209_v56 }
 0x208   :  { %1130 = vst.msk [vmem:[#allocation2 + $0x4] ss:$8 sm:$0x3] %vm9192_vm1, %v1127_v60  ;;  %1089 = vst.msk [vmem:[#allocation2 + $0x2] ss:$8 sm:$0x3] %vm9192_vm1, %v1086_v3 }
 0x209   :  { %1217 = vst.msk [vmem:[#allocation2 + $0x24] ss:$8 sm:$0x3] %vm9192_vm1, %v1214_v2  ;;  %1176 = vst.msk [vmem:[#allocation2 + $0x22] ss:$8 sm:$0x3] %vm9192_vm1, %v1173_v1 }
 0x20a   :  { %v9257_v52 = vld [vmem:[%s8719_s21 + $0x4c8] sm:$0xff]  ;;  %v9261_v51 = vld [vmem:[%s8719_s21 + $0x4c0] sm:$0xff]  ;;  %v9271_v23 = vld [vmem:[%s8719_s21 + $0x4b0] sm:$0xff] }
 0x20b   :  { %v1416_v7 = vld [vmem:[#allocation2 + $0x18] sm:$0xf]  ;;  %v1415_v9 = vld [vmem:[#allocation2 + $0x10] sm:$0xf]  ;;  %v9456_v45 = vld [vmem:[%s8719_s21 + $0x588] sm:$0xff] }
 0x20c   :  { %1481 = vmatprep.mubr.f32.mxu0 %v1416_v7  ;;  %v9451_v36 = vld [vmem:[%s8719_s21 + $0x590] sm:$0xff]  ;;  %v9461_v47 = vld [vmem:[%s8719_s21 + $0x580] sm:$0xff]  ;;  %v9466_v60 = vld [vmem:[%s8719_s21 + $0x578] sm:$0xff] }
 0x20d   :  { %1482 = vmatmul.mubr.f32.vlgmr.msra.gmra.mxu0 %v1415_v9  ;;  %v13694_v56 = vld [vmem:[#allocation30_spill] sm:$0xff]  ;;  %v13695_v3 = vld [vmem:[#allocation32_spill] sm:$0xff]  ;;  %v9476_v7 = vld [vmem:[%s8719_s21 + $0x568] sm:$0xff] }
 0x20e   :  { %1568 = vmatpush1.msra.mxu0 %v9237_v28  ;;  %v1659_v13 = vld [vmem:[#allocation2 + $0x38] sm:$0xf]  ;;  %v9471_v2 = vld [vmem:[%s8719_s21 + $0x570] sm:$0xff]  ;;  %v13697_v9 = vld [vmem:[#allocation36_spill] sm:$0xff] }
 0x20f   :  { %v1414_v15 = vld [vmem:[#allocation2 + $0x8] sm:$0xf]  ;;  %v1413_v27 = vld [vmem:[#allocation2] sm:$0xf]  ;;  %1569 = vmatprep.subr.mxu0 %v9240_v44  ;;  %v13696_v1 = vld [vmem:[#allocation34_spill] sm:$0xff] }
 0x210   :  { %v1560_v11 = vld [vmem:[#allocation2 + $0x8] sm:$0x1e]  ;;  %1552 = vmatprep.mubr.f32.mxu1 %v1414_v15  ;;  %1570 = vmatpush1.msra.mxu0 %v9243_v40  ;;  %v9481_v15 = vld [vmem:[%s8719_s21 + $0x560] sm:$0xff]  ;;  %v13712_v18 = vld [vmem:[#allocation54_spill] sm:$0xff] }
 0x211   :  { %v1564_v32 = vrot.slane %v1560_v11, 1  ;;  %1553 = vmatmul.mubr.f32.vlgmr.msra.gmra.mxu1 %v1413_v27  ;;  %1571 = vmatprep.subr.mxu0 %v9247_v22  ;;  %v13698_v27 = vld [vmem:[#allocation38_spill] sm:$0xff]  ;;  %v9486_v11 = vld [vmem:[%s8719_s21 + $0x558] sm:$0xff] }
 0x212   :  { %1661 = vmatpush1.msra.mxu1 %v8726_v16  ;;  %1724 = vmatprep.mubr.f32.mxu1 %v1659_v13  ;;  %v9266_v16 = vld [vmem:[%s8719_s21 + $0x4b8] sm:$0xff]  ;;  %v9491_v13 = vld [vmem:[%s8719_s21 + $0x550] sm:$0xff] }
 0x213   :  { %1631 = vmatprep.mubr.f32.mxu0 %v1564_v32  ;;  %1662 = vmatprep.subr.mxu1 %v8730_v17  ;;  %v9276_v17 = vld [vmem:[%s8719_s21 + $0x4a8] sm:$0xff]  ;;  %v13699_v32 = vld [vmem:[#allocation40_spill] sm:$0xff] }
 0x214   :  { %1572 = vmatpush1.msra.mxu0 %v9253_v0  ;;  %1663 = vmatpush1.msra.mxu1 %v8735_v19  ;;  %v9281_v19 = vld [vmem:[%s8719_s21 + $0x4a0] sm:$0xff] }
 0x215   :  { %1573 = vmatprep.subr.mxu0 %v9257_v52  ;;  %1664 = vmatprep.subr.mxu1 %v8740_v21  ;;  %v9286_v21 = vld [vmem:[%s8719_s21 + $0x498] sm:$0xff] }
 0x216   :  { %1574 = vmatpush1.msra.mxu0 %v9261_v51  ;;  %1665 = vmatpush1.msra.mxu1 %v8745_v24  ;;  %v9291_v24 = vld [vmem:[%s8719_s21 + $0x490] sm:$0xff] }
 0x217   :  { %1575 = vmatprep.subr.mxu0 %v9266_v16  ;;  %1666 = vmatprep.subr.mxu1 %v8750_v26  ;;  %v9296_v26 = vld [vmem:[%s8719_s21 + $0x488] sm:$0xff] }
 0x218   :  { %1576 = vmatpush1.msra.mxu0 %v9271_v23  ;;  %1667 = vmatpush1.msra.mxu1 %v8755_v29  ;;  %v9301_v29 = vld [vmem:[%s8719_s21 + $0x480] sm:$0xff] }
 0x219   :  { %1577 = vmatprep.subr.mxu0 %v9276_v17  ;;  %1668 = vmatprep.subr.mxu1 %v8760_v31  ;;  %v9306_v31 = vld [vmem:[%s8719_s21 + $0x478] sm:$0xff] }
 0x21a   :  { %1578 = vmatpush1.msra.mxu0 %v9281_v19  ;;  %1669 = vmatpush1.msra.mxu1 %v8765_v33  ;;  %v9311_v33 = vld [vmem:[%s8719_s21 + $0x470] sm:$0xff] }
 0x21b   :  { %1579 = vmatprep.subr.mxu0 %v9286_v21  ;;  %1670 = vmatprep.subr.mxu1 %v8770_v35  ;;  %v9316_v35 = vld [vmem:[%s8719_s21 + $0x468] sm:$0xff] }
 0x21c   :  { %1580 = vmatpush1.msra.mxu0 %v9291_v24  ;;  %1671 = vmatpush1.msra.mxu1 %v8775_v37  ;;  %v9321_v37 = vld [vmem:[%s8719_s21 + $0x460] sm:$0xff] }
 0x21d   :  { %1581 = vmatprep.subr.mxu0 %v9296_v26  ;;  %1672 = vmatprep.subr.mxu1 %v8780_v39  ;;  %v9326_v39 = vld [vmem:[%s8719_s21 + $0x458] sm:$0xff] }
 0x21e   :  { %1582 = vmatpush1.msra.mxu0 %v9301_v29  ;;  %1673 = vmatpush1.msra.mxu1 %v8785_v41  ;;  %v9331_v41 = vld [vmem:[%s8719_s21 + $0x450] sm:$0xff] }
 0x21f   :  { %1583 = vmatprep.subr.mxu0 %v9306_v31  ;;  %1674 = vmatprep.subr.mxu1 %v8790_v43  ;;  %v9336_v43 = vld [vmem:[%s8719_s21 + $0x448] sm:$0xff] }
 0x220   :  { %1584 = vmatpush1.msra.mxu0 %v9311_v33  ;;  %1675 = vmatpush1.msra.mxu1 %v8795_v46  ;;  %v9341_v46 = vld [vmem:[%s8719_s21 + $0x440] sm:$0xff] }
 0x221   :  { %1585 = vmatprep.subr.mxu0 %v9316_v35  ;;  %1676 = vmatprep.subr.mxu1 %v8800_v50  ;;  %v9346_v50 = vld [vmem:[%s8719_s21 + $0x438] sm:$0xff] }
 0x222   :  { %1586 = vmatpush1.msra.mxu0 %v9321_v37  ;;  %1677 = vmatpush1.msra.mxu1 %v8805_v53  ;;  %v9351_v53 = vld [vmem:[%s8719_s21 + $0x430] sm:$0xff] }
 0x223   :  { %1587 = vmatprep.subr.mxu0 %v9326_v39  ;;  %1678 = vmatprep.subr.mxu1 %v8810_v55  ;;  %v9356_v55 = vld [vmem:[%s8719_s21 + $0x428] sm:$0xff] }
 0x224   :  { %1588 = vmatpush1.msra.mxu0 %v9331_v41  ;;  %1679 = vmatpush1.msra.mxu1 %v8815_v57  ;;  %v9361_v57 = vld [vmem:[%s8719_s21 + $0x420] sm:$0xff] }
 0x225   :  { %1589 = vmatprep.subr.mxu0 %v9336_v43  ;;  %1680 = vmatprep.subr.mxu1 %v8820_v59  ;;  %v9366_v59 = vld [vmem:[%s8719_s21 + $0x418] sm:$0xff] }
 0x226   :  { %1590 = vmatpush1.msra.mxu0 %v9341_v46  ;;  %1681 = vmatpush1.msra.mxu1 %v8825_v61  ;;  %v9371_v61 = vld [vmem:[%s8719_s21 + $0x410] sm:$0xff] }
 0x227   :  { %1591 = vmatprep.subr.mxu0 %v9346_v50  ;;  %1682 = vmatprep.subr.mxu1 %v8830_v63  ;;  %v9376_v63 = vld [vmem:[%s8719_s21 + $0x408] sm:$0xff] }
 0x228   :  { %1592 = vmatpush1.msra.mxu0 %v9351_v53  ;;  %1683 = vmatpush1.msra.mxu1 %v8835_v4  ;;  %v9381_v4 = vld [vmem:[%s8719_s21 + $0x400] sm:$0xff] }
 0x229   :  { %1593 = vmatprep.subr.mxu0 %v9356_v55  ;;  %1684 = vmatprep.subr.mxu1 %v8840_v6  ;;  %v9386_v6 = vld [vmem:[%s8719_s21 + $0x5f8] sm:$0xff] }
 0x22a   :  { %1594 = vmatpush1.msra.mxu0 %v9361_v57  ;;  %1685 = vmatpush1.msra.mxu1 %v8845_v8  ;;  %v9391_v8 = vld [vmem:[%s8719_s21 + $0x5f0] sm:$0xff] }
 0x22b   :  { %1595 = vmatprep.subr.mxu0 %v9366_v59  ;;  %1686 = vmatprep.subr.mxu1 %v8850_v10  ;;  %v9396_v10 = vld [vmem:[%s8719_s21 + $0x5e8] sm:$0xff] }
 0x22c   :  { %1596 = vmatpush1.msra.mxu0 %v9371_v61  ;;  %1687 = vmatpush1.msra.mxu1 %v8858_v12  ;;  %v9401_v12 = vld [vmem:[%s8719_s21 + $0x5e0] sm:$0xff] }
 0x22d   :  { %1597 = vmatprep.subr.mxu0 %v9376_v63  ;;  %1688 = vmatprep.subr.mxu1 %v8866_v14  ;;  %v9406_v14 = vld [vmem:[%s8719_s21 + $0x5d8] sm:$0xff] }
 0x22e   :  { %1598 = vmatpush1.msra.mxu0 %v9381_v4  ;;  %1689 = vmatpush1.msra.mxu1 %v8874_v20  ;;  %v9411_v20 = vld [vmem:[%s8719_s21 + $0x5d0] sm:$0xff] }
 0x22f   :  { %1599 = vmatprep.subr.mxu0 %v9386_v6  ;;  %1690 = vmatprep.subr.mxu1 %v8882_v25  ;;  %v9416_v25 = vld [vmem:[%s8719_s21 + $0x5c8] sm:$0xff] }
 0x230   :  { %1600 = vmatpush2.msra.mxu0 %v9391_v8  ;;  %1691 = vmatpush1.msra.mxu1 %v8890_v30  ;;  %v9421_v30 = vld [vmem:[%s8719_s21 + $0x5c0] sm:$0xff] }
 0x231   :  { %1601 = vmatprep.subr.mxu0 %v9396_v10  ;;  %1692 = vmatprep.subr.mxu1 %v8898_v34  ;;  %v9426_v34 = vld [vmem:[%s8719_s21 + $0x5b8] sm:$0xff] }
 0x232   :  { %1602 = vmatpush2.msra.mxu0 %v9401_v12  ;;  %1693 = vmatpush2.msra.mxu1 %v8906_v38  ;;  %v9431_v38 = vld [vmem:[%s8719_s21 + $0x5b0] sm:$0xff] }
 0x233   :  { %1603 = vmatprep.subr.mxu0 %v9406_v14  ;;  %1694 = vmatprep.subr.mxu1 %v8914_v42  ;;  %v9436_v42 = vld [vmem:[%s8719_s21 + $0x5a8] sm:$0xff] }
 0x234   :  { %1604 = vmatpush2.msra.mxu0 %v9411_v20  ;;  %1695 = vmatpush2.msra.mxu1 %v8922_v49  ;;  %v9441_v49 = vld [vmem:[%s8719_s21 + $0x5a0] sm:$0xff] }
 0x235   :  { %1605 = vmatprep.subr.mxu0 %v9416_v25  ;;  %1696 = vmatprep.subr.mxu1 %v8930_v54  ;;  %v9446_v54 = vld [vmem:[%s8719_s21 + $0x598] sm:$0xff] }
 0x236   :  { %1606 = vmatpush2.msra.mxu0 %v9421_v30  ;;  %1697 = vmatpush2.msra.mxu1 %v8938_v58  ;;  %v13691_v58 = vld [vmem:[#allocation24_spill] sm:$0xff] }
 0x237   :  { %1607 = vmatprep.subr.mxu0 %v9426_v34  ;;  %1698 = vmatprep.subr.mxu1 %v8946_v62  ;;  %v13692_v62 = vld [vmem:[#allocation26_spill] sm:$0xff] }
 0x238   :  { %1608 = vmatpush2.msra.mxu0 %v9431_v38  ;;  %1699 = vmatpush2.msra.mxu1 %v8954_v5  ;;  %v13693_v5 = vld [vmem:[#allocation28_spill] sm:$0xff] }
 0x239   :  { %1609 = vmatprep.subr.mxu0 %v9436_v42  ;;  %1700 = vmatprep.subr.mxu1 %v13691_v58  ;;  %v13700_v58 = vld [vmem:[#allocation42_spill] sm:$0xff] }
 0x23a   :  { %1610 = vmatpush2.msra.mxu0 %v9441_v49  ;;  %1701 = vmatpush2.msra.mxu1 %v13692_v62  ;;  %v9496_v62 = vld [vmem:[%s8719_s21 + $0x548] sm:$0xff] }
 0x23b   :  { %1611 = vmatprep.subr.mxu0 %v9446_v54  ;;  %1702 = vmatprep.subr.mxu1 %v13693_v5  ;;  %13701 = vst [vmem:[#allocation24_spill] sm:$0xff] %v9496_v62  ;;  %v13702_v5 = vld [vmem:[#allocation44_spill] sm:$0xff] }
 0x23c   :  { %1612 = vmatpush2.msra.mxu0 %v9451_v36  ;;  %1703 = vmatpush2.msra.mxu1 %v13694_v56  ;;  %v9501_v56 = vld [vmem:[%s8719_s21 + $0x540] sm:$0xff] }
 0x23d   :  { %1613 = vmatprep.subr.mxu0 %v9456_v45  ;;  %1704 = vmatprep.subr.mxu1 %v13695_v3  ;;  %13703 = vst [vmem:[#allocation26_spill] sm:$0xff] %v9501_v56  ;;  %v13704_v3 = vld [vmem:[#allocation46_spill] sm:$0xff] }
 0x23e   :  { %1614 = vmatpush2.msra.mxu0 %v9461_v47  ;;  %1705 = vmatpush2.msra.mxu1 %v13696_v1  ;;  %v9506_v1 = vld [vmem:[%s8719_s21 + $0x538] sm:$0xff] }
 0x23f   :  { %1615 = vmatprep.subr.mxu0 %v9466_v60  ;;  %1706 = vmatprep.subr.mxu1 %v13697_v9  ;;  %13705 = vst [vmem:[#allocation28_spill] sm:$0xff] %v9506_v1  ;;  %v13706_v9 = vld [vmem:[#allocation48_spill] sm:$0xff] }
 0x240   :  { %1616 = vmatpush2.msra.mxu0 %v9471_v2  ;;  %1707 = vmatpush2.msra.mxu1 %v13698_v27  ;;  %v9511_v27 = vld [vmem:[%s8719_s21 + $0x530] sm:$0xff] }
 0x241   :  { %1617 = vmatprep.subr.mxu0 %v9476_v7  ;;  %1708 = vmatprep.subr.mxu1 %v13699_v32  ;;  %13707 = vst [vmem:[#allocation30_spill] sm:$0xff] %v9511_v27  ;;  %v13708_v32 = vld [vmem:[#allocation50_spill] sm:$0xff] }
 0x242   :  { %1618 = vmatpush2.msra.mxu0 %v9481_v15  ;;  %1709 = vmatpush2.msra.mxu1 %v13700_v58  ;;  %v9516_v58 = vld [vmem:[%s8719_s21 + $0x528] sm:$0xff] }
 0x243   :  { %1619 = vmatprep.subr.mxu0 %v9486_v11  ;;  %1710 = vmatprep.subr.mxu1 %v13702_v5  ;;  %13709 = vst [vmem:[#allocation32_spill] sm:$0xff] %v9516_v58  ;;  %v13710_v5 = vld [vmem:[#allocation52_spill] sm:$0xff] }
 0x244   :  { %1620 = vmatpush2.msra.mxu0 %v9491_v13  ;;  %1711 = vmatpush2.msra.mxu1 %v13704_v3  ;;  %v9521_v3 = vld [vmem:[%s8719_s21 + $0x520] sm:$0xff] }
 0x245   :  { %1621 = vmatprep.subr.mxu0 %v9496_v62  ;;  %1712 = vmatprep.subr.mxu1 %v13706_v9  ;;  %13711 = vst [vmem:[#allocation34_spill] sm:$0xff] %v9521_v3  ;;  %v9526_v9 = vld [vmem:[%s8719_s21 + $0x518] sm:$0xff] }
 0x246   :  { %1622 = vmatpush2.msra.mxu0 %v9501_v56  ;;  %1713 = vmatpush2.msra.mxu1 %v13708_v32  ;;  %13713 = vst [vmem:[#allocation36_spill] sm:$0xff] %v9526_v9  ;;  %v9531_v32 = vld [vmem:[%s8719_s21 + $0x510] sm:$0xff]  ;;  %v8381_v62 = vld [vmem:[%s8719_s21 + $0xf8] sm:$0xff] }
 0x247   :  { %1623 = vmatprep.subr.mxu0 %v9506_v1  ;;  %1714 = vmatprep.subr.mxu1 %v13710_v5  ;;  %13715 = vst [vmem:[#allocation38_spill] sm:$0xff] %v9531_v32  ;;  %v13716_v56 = vld [vmem:[#allocation58_spill] sm:$0xff]  ;;  %v9536_v5 = vld [vmem:[%s8719_s21 + $0x508] sm:$0xff]  ;;  %v1559_v1 = vld [vmem:[#allocation2] sm:$0x1e] }
 0x248   :  { %1624 = vmatpush2.msra.mxu0 %v9511_v27  ;;  %1715 = vmatpush2.msra.mxu1 %v13712_v18  ;;  %13717 = vst [vmem:[#allocation40_spill] sm:$0xff] %v9536_v5  ;;  %v13718_v27 = vld [vmem:[#allocation60_spill] sm:$0xff] }
 0x249   :  { %1625 = vmatprep.subr.mxu0 %v9516_v58  ;;  %1716 = vmatprep.subr.mxu1 %v13714_v48  ;;  %v9541_v18 = vld [vmem:[%s8719_s21 + $0x500] sm:$0xff]  ;;  %v13719_v48 = vld [vmem:[#allocation62_spill] sm:$0xff] }
 0x24a   :  { %1626 = vmatpush2.msra.mxu0 %v9521_v3  ;;  %1717 = vmatpush2.msra.mxu1 %v13716_v56  ;;  %v13720_v3 = vld [vmem:[#allocation64_spill] sm:$0xff]  ;;  %v1563_v56 = vrot.slane %v1559_v1, 1  ;;  %v13721_v58 = vld [vmem:[#allocation66_spill] sm:$0xff] }
 0x24b   :  { %1627 = vmatprep.subr.mxu0 %v9526_v9  ;;  %1718 = vmatprep.subr.mxu1 %v13718_v27  ;;  %v13722_v9 = vld [vmem:[#allocation68_spill] sm:$0xff]  ;;  %v1803_v27 = vld [vmem:[#allocation2 + $0x28] sm:$0x1e]  ;;  %v1658_v1 = vld [vmem:[#allocation2 + $0x30] sm:$0xf] }
 0x24c   :  { %1628 = vmatpush2.msra.mxu0 %v9531_v32  ;;  %1719 = vmatpush2.msra.mxu1 %v13719_v48  ;;  %v13723_v32 = vld [vmem:[#allocation70_spill] sm:$0xff]  ;;  %v1657_v48 = vld [vmem:[#allocation2 + $0x28] sm:$0xf] }
 0x24d   :  { %1629 = vmatprep.subr.mxu0 %v9536_v5  ;;  %1720 = vmatprep.subr.mxu1 %v13720_v3  ;;  %v8382_v5 = vld [vmem:[%s8719_s21 + $0xf0] sm:$0xff]  ;;  %v8383_v3 = vld [vmem:[%s8719_s21 + $0xe8] sm:$0xff] }
 0x24e   :  { %1630 = vmatpush2.msra.mxu0 %v9541_v18  ;;  %1721 = vmatpush2.msra.mxu1 %v13721_v58  ;;  %v1807_v58 = vrot.slane %v1803_v27, 1  ;;  %v8388_v27 = vld [vmem:[%s8719_s21 + $0xc0] sm:$0xff] }
 0x24f   :  { %1632 = vmatmul.mubr.f32.vlgmr.msra.gmra.mxu0 %v1563_v56  ;;  %1722 = vmatprep.subr.mxu1 %v13722_v9  ;;  %v13724_v56 = vld [vmem:[#allocation73_spill] sm:$0xff]  ;;  %v8384_v9 = vld [vmem:[%s8719_s21 + $0xe0] sm:$0xff] }
 0x250   :  { %1731 = vmatprep.subr.mxu0 %v8381_v62  ;;  %1723 = vmatpush2.msra.mxu1 %v13723_v32  ;;  %v8385_v62 = vld [vmem:[%s8719_s21 + $0xd8] sm:$0xff]  ;;  %v8386_v32 = vld [vmem:[%s8719_s21 + $0xd0] sm:$0xff] }
 0x251   :  { %1732 = vmatpush1.msra.mxu0 %v8382_v5  ;;  %1795 = vmatprep.mubr.f32.mxu0 %v1657_v48  ;;  %v8387_v5 = vld [vmem:[%s8719_s21 + $0xc8] sm:$0xff]  ;;  %v8402_v48 = vld [vmem:[%s8719_s21 + $0x50] sm:$0xff] }
 0x252   :  { %1725 = vmatmul.mubr.f32.vlgmr.msra.gmra.mxu1 %v1658_v1  ;;  %1733 = vmatprep.subr.mxu0 %v8383_v3  ;;  %v13758_v1 = vld [vmem:[#allocation24_spill] sm:$0xff]  ;;  %v13760_v3 = vld [vmem:[#allocation26_spill] sm:$0xff] }
 0x253   :  { %1810 = vmatprep.subr.mxu1 %v13724_v56  ;;  %1734 = vmatpush1.msra.mxu0 %v8384_v9  ;;  %v13764_v56 = vld [vmem:[#allocation30_spill] sm:$0xff]  ;;  %v13766_v9 = vld [vmem:[#allocation32_spill] sm:$0xff] }
 0x254   :  { %1811 = vmatpush1.msra.mxu1 %v9237_v28  ;;  %1874 = vmatprep.mubr.f32.mxu1 %v1807_v58  ;;  %v8389_v28 = vld [vmem:[%s8719_s21 + $0xb8] sm:$0xff]  ;;  %v13762_v58 = vld [vmem:[#allocation28_spill] sm:$0xff] }
 0x255   :  { %1735 = vmatprep.subr.mxu0 %v8385_v62  ;;  %1812 = vmatprep.subr.mxu1 %v9240_v44  ;;  %v8390_v44 = vld [vmem:[%s8719_s21 + $0xb0] sm:$0xff] }
 0x256   :  { %1736 = vmatpush1.msra.mxu0 %v8386_v32  ;;  %1813 = vmatpush1.msra.mxu1 %v9243_v40  ;;  %v8391_v40 = vld [vmem:[%s8719_s21 + $0xa8] sm:$0xff]  ;;  %v13768_v62 = vld [vmem:[#allocation34_spill] sm:$0xff]  ;;  %v1802_v32 = vld [vmem:[#allocation2 + $0x20] sm:$0x1e] }
 0x257   :  { %1737 = vmatprep.subr.mxu0 %v8387_v5  ;;  %1814 = vmatprep.subr.mxu1 %v9247_v22  ;;  %v8392_v22 = vld [vmem:[%s8719_s21 + $0xa0] sm:$0xff] }
 0x258   :  { %1738 = vmatpush1.msra.mxu0 %v8388_v27  ;;  %1815 = vmatpush1.msra.mxu1 %v9253_v0  ;;  %v8393_v0 = vld [vmem:[%s8719_s21 + $0x98] sm:$0xff]  ;;  %v13769_v5 = vld [vmem:[#allocation72_spill] sm:$0xff] }
 0x259   :  { %1739 = vmatprep.subr.mxu0 %v8389_v28  ;;  %1816 = vmatprep.subr.mxu1 %v9257_v52  ;;  %v8394_v52 = vld [vmem:[%s8719_s21 + $0x90] sm:$0xff]  ;;  %v13770_v27 = vld [vmem:[#allocation36_spill] sm:$0xff] }
 0x25a   :  { %1740 = vmatpush1.msra.mxu0 %v8390_v44  ;;  %1817 = vmatpush1.msra.mxu1 %v9261_v51  ;;  %v8395_v51 = vld [vmem:[%s8719_s21 + $0x88] sm:$0xff]  ;;  %v13771_v28 = vld [vmem:[#allocation74_spill] sm:$0xff] }
 0x25b   :  { %1741 = vmatprep.subr.mxu0 %v8391_v40  ;;  %1818 = vmatprep.subr.mxu1 %v9266_v16  ;;  %v8396_v16 = vld [vmem:[%s8719_s21 + $0x80] sm:$0xff]  ;;  %v13772_v44 = vld [vmem:[#allocation38_spill] sm:$0xff] }
 0x25c   :  { %1742 = vmatpush1.msra.mxu0 %v8392_v22  ;;  %1819 = vmatpush1.msra.mxu1 %v9271_v23  ;;  %v8397_v23 = vld [vmem:[%s8719_s21 + $0x78] sm:$0xff]  ;;  %v1656_v40 = vld [vmem:[#allocation2 + $0x20] sm:$0xf] }
 0x25d   :  { %1743 = vmatprep.subr.mxu0 %v8393_v0  ;;  %1820 = vmatprep.subr.mxu1 %v9276_v17  ;;  %v8398_v17 = vld [vmem:[%s8719_s21 + $0x70] sm:$0xff]  ;;  %v13773_v22 = vld [vmem:[#allocation40_spill] sm:$0xff]  ;;  %v1806_v0 = vrot.slane %v1802_v32, 1  ;;  %v1995_v32 = vld [vmem:[%s9682_s3 + $0x138] sm:$0xff] }
 0x25e   :  { %1744 = vmatpush1.msra.mxu0 %v8394_v52  ;;  %1821 = vmatpush1.msra.mxu1 %v9281_v19  ;;  %v8399_v19 = vld [vmem:[%s8719_s21 + $0x68] sm:$0xff]  ;;  %v1987_v52 = vld [vmem:[%s9682_s3 + $0xf8] sm:$0xff] }
 0x25f   :  { %1745 = vmatprep.subr.mxu0 %v8395_v51  ;;  %1822 = vmatprep.subr.mxu1 %v9286_v21  ;;  %v8400_v21 = vld [vmem:[%s8719_s21 + $0x60] sm:$0xff]  ;;  %v1986_v51 = vld [vmem:[%s9682_s3 + $0xf0] sm:$0xff] }
 0x260   :  { %1746 = vmatpush1.msra.mxu0 %v8396_v16  ;;  %1823 = vmatpush1.msra.mxu1 %v9291_v24  ;;  %v8401_v24 = vld [vmem:[%s8719_s21 + $0x58] sm:$0xff]  ;;  %v1985_v16 = vld [vmem:[%s9682_s3 + $0xe8] sm:$0xff] }
 0x261   :  { %1747 = vmatprep.subr.mxu0 %v8397_v23  ;;  %1824 = vmatprep.subr.mxu1 %v9296_v26  ;;  %v8403_v26 = vld [vmem:[%s8719_s21 + $0x48] sm:$0xff]  ;;  %v1983_v23 = vld [vmem:[%s9682_s3 + $0xd8] sm:$0xff] }
 0x262   :  { %1748 = vmatpush1.msra.mxu0 %v8398_v17  ;;  %1825 = vmatpush1.msra.mxu1 %v9301_v29  ;;  %v8404_v29 = vld [vmem:[%s8719_s21 + $0x40] sm:$0xff]  ;;  %v1982_v17 = vld [vmem:[%s9682_s3 + $0xd0] sm:$0xff]  ;;  %s11882_s21 = sld [smem:[%s13337_s0 + %s8449_s18]]   ;;  %s8465_s18 = smov 33  }
 0x263   :  { %1749 = vmatprep.subr.mxu0 %v8399_v19  ;;  %1826 = vmatprep.subr.mxu1 %v9306_v31  ;;  %v13725_v31 = vld [vmem:[#allocation10_spill] sm:$0xff]  ;;  %v1981_v19 = vld [vmem:[%s9682_s3 + $0xc8] sm:$0xff] }
 0x264   :  { %1750 = vmatpush1.msra.mxu0 %v8400_v21  ;;  %1827 = vmatpush1.msra.mxu1 %v9311_v33  ;;  %v13726_v33 = vld [vmem:[#allocation11_spill] sm:$0xff]  ;;  %v1980_v21 = vld [vmem:[%s9682_s3 + $0xc0] sm:$0xff] }
 0x265   :  { %1751 = vmatprep.subr.mxu0 %v8401_v24  ;;  %1828 = vmatprep.subr.mxu1 %v9316_v35  ;;  %v13727_v35 = vld [vmem:[#allocation12_spill] sm:$0xff]  ;;  %v1979_v24 = vld [vmem:[%s9682_s3 + $0xb8] sm:$0xff] }
 0x266   :  { %1752 = vmatpush1.msra.mxu0 %v8402_v48  ;;  %1829 = vmatpush1.msra.mxu1 %v9321_v37  ;;  %v13728_v37 = vld [vmem:[#allocation13_spill] sm:$0xff]  ;;  %v1978_v48 = vld [vmem:[%s9682_s3 + $0xb0] sm:$0xff] }
 0x267   :  { %1753 = vmatprep.subr.mxu0 %v8403_v26  ;;  %1830 = vmatprep.subr.mxu1 %v9326_v39  ;;  %v13729_v39 = vld [vmem:[#allocation14_spill] sm:$0xff]  ;;  %v1977_v26 = vld [vmem:[%s9682_s3 + $0xa8] sm:$0xff] }
 0x268   :  { %1754 = vmatpush1.msra.mxu0 %v8404_v29  ;;  %1831 = vmatpush1.msra.mxu1 %v9331_v41  ;;  %v13730_v41 = vld [vmem:[#allocation15_spill] sm:$0xff]  ;;  %v1976_v29 = vld [vmem:[%s9682_s3 + $0xa0] sm:$0xff] }
 0x269   :  { %1755 = vmatprep.subr.mxu0 %v13725_v31  ;;  %1832 = vmatprep.subr.mxu1 %v9336_v43  ;;  %v13731_v43 = vld [vmem:[#allocation16_spill] sm:$0xff]  ;;  %v1975_v31 = vld [vmem:[%s9682_s3 + $0x98] sm:$0xff] }
 0x26a   :  { %1756 = vmatpush1.msra.mxu0 %v13726_v33  ;;  %1833 = vmatpush1.msra.mxu1 %v9341_v46  ;;  %v13732_v46 = vld [vmem:[#allocation17_spill] sm:$0xff]  ;;  %v1974_v33 = vld [vmem:[%s9682_s3 + $0x90] sm:$0xff] }
 0x26b   :  { %1757 = vmatprep.subr.mxu0 %v13727_v35  ;;  %1834 = vmatprep.subr.mxu1 %v9346_v50  ;;  %v13733_v50 = vld [vmem:[#allocation18_spill] sm:$0xff]  ;;  %v1973_v35 = vld [vmem:[%s9682_s3 + $0x88] sm:$0xff] }
 0x26c   :  { %1758 = vmatpush1.msra.mxu0 %v13728_v37  ;;  %1835 = vmatpush1.msra.mxu1 %v9351_v53  ;;  %v13734_v53 = vld [vmem:[#allocation19_spill] sm:$0xff]  ;;  %v1972_v37 = vld [vmem:[%s9682_s3 + $0x80] sm:$0xff] }
 0x26d   :  { %1759 = vmatprep.subr.mxu0 %v13729_v39  ;;  %1836 = vmatprep.subr.mxu1 %v9356_v55  ;;  %v13735_v55 = vld [vmem:[#allocation20_spill] sm:$0xff]  ;;  %v1971_v39 = vld [vmem:[%s9682_s3 + $0x78] sm:$0xff] }
 0x26e   :  { %1760 = vmatpush1.msra.mxu0 %v13730_v41  ;;  %1837 = vmatpush1.msra.mxu1 %v9361_v57  ;;  %v13736_v57 = vld [vmem:[#allocation21_spill] sm:$0xff]  ;;  %v1970_v41 = vld [vmem:[%s9682_s3 + $0x70] sm:$0xff] }
 0x26f   :  { %1761 = vmatprep.subr.mxu0 %v13731_v43  ;;  %1838 = vmatprep.subr.mxu1 %v9366_v59  ;;  %v13737_v59 = vld [vmem:[#allocation22_spill] sm:$0xff]  ;;  %v1969_v43 = vld [vmem:[%s9682_s3 + $0x68] sm:$0xff] }
 0x270   :  { %1762 = vmatpush1.msra.mxu0 %v13732_v46  ;;  %1839 = vmatpush1.msra.mxu1 %v9371_v61  ;;  %v13738_v61 = vld [vmem:[#allocation23_spill] sm:$0xff]  ;;  %v1968_v46 = vld [vmem:[%s9682_s3 + $0x60] sm:$0xff] }
 0x271   :  { %1763 = vmatprep.subr.mxu0 %v13733_v50  ;;  %1840 = vmatprep.subr.mxu1 %v9376_v63  ;;  %v13739_v63 = vld [vmem:[#allocation25_spill] sm:$0xff]  ;;  %v1967_v50 = vld [vmem:[%s9682_s3 + $0x58] sm:$0xff] }
 0x272   :  { %1764 = vmatpush2.msra.mxu0 %v13734_v53  ;;  %1841 = vmatpush1.msra.mxu1 %v9381_v4  ;;  %v13740_v4 = vld [vmem:[#allocation27_spill] sm:$0xff]  ;;  %v1966_v53 = vld [vmem:[%s9682_s3 + $0x50] sm:$0xff] }
 0x273   :  { %1765 = vmatprep.subr.mxu0 %v13735_v55  ;;  %1842 = vmatprep.subr.mxu1 %v9386_v6  ;;  %v13741_v6 = vld [vmem:[#allocation29_spill] sm:$0xff] }
 0x274   :  { %1766 = vmatpush2.msra.mxu0 %v13736_v57  ;;  %1843 = vmatpush2.msra.mxu1 %v9391_v8  ;;  %v13742_v8 = vld [vmem:[#allocation31_spill] sm:$0xff]  ;;  %v1965_v55 = vld [vmem:[%s9682_s3 + $0x48] sm:$0xff]  ;;  %v1964_v57 = vld [vmem:[%s9682_s3 + $0x40] sm:$0xff] }
 0x275   :  { %1767 = vmatprep.subr.mxu0 %v13737_v59  ;;  %1844 = vmatprep.subr.mxu1 %v9396_v10  ;;  %v13743_v10 = vld [vmem:[#allocation33_spill] sm:$0xff]  ;;  %v1963_v59 = vld [vmem:[%s9682_s3 + $0x38] sm:$0xff] }
 0x276   :  { %1768 = vmatpush2.msra.mxu0 %v13738_v61  ;;  %1845 = vmatpush2.msra.mxu1 %v9401_v12  ;;  %v13744_v12 = vld [vmem:[#allocation35_spill] sm:$0xff]  ;;  %v1962_v61 = vld [vmem:[%s9682_s3 + $0x30] sm:$0xff] }
 0x277   :  { %1769 = vmatprep.subr.mxu0 %v13739_v63  ;;  %1846 = vmatprep.subr.mxu1 %v9406_v14  ;;  %v13745_v14 = vld [vmem:[#allocation37_spill] sm:$0xff] }
 0x278   :  { %1770 = vmatpush2.msra.mxu0 %v13740_v4  ;;  %1847 = vmatpush2.msra.mxu1 %v9411_v20  ;;  %v13746_v20 = vld [vmem:[#allocation39_spill] sm:$0xff]  ;;  %v1961_v63 = vld [vmem:[%s9682_s3 + $0x28] sm:$0xff]  ;;  %v1960_v4 = vld [vmem:[%s9682_s3 + $0x20] sm:$0xff] }
 0x279   :  { %1771 = vmatprep.subr.mxu0 %v13741_v6  ;;  %1848 = vmatprep.subr.mxu1 %v9416_v25  ;;  %v13747_v25 = vld [vmem:[#allocation41_spill] sm:$0xff]  ;;  %v1959_v6 = vld [vmem:[%s9682_s3 + $0x18] sm:$0xff] }
 0x27a   :  { %1772 = vmatpush2.msra.mxu0 %v13742_v8  ;;  %1849 = vmatpush2.msra.mxu1 %v9421_v30  ;;  %v13748_v30 = vld [vmem:[#allocation43_spill] sm:$0xff]  ;;  %v1958_v8 = vld [vmem:[%s9682_s3 + $0x10] sm:$0xff] }
 0x27b   :  { %1773 = vmatprep.subr.mxu0 %v13743_v10  ;;  %1850 = vmatprep.subr.mxu1 %v9426_v34  ;;  %v13749_v34 = vld [vmem:[#allocation45_spill] sm:$0xff] }
 0x27c   :  { %1774 = vmatpush2.msra.mxu0 %v13744_v12  ;;  %1851 = vmatpush2.msra.mxu1 %v9431_v38  ;;  %v13750_v38 = vld [vmem:[#allocation47_spill] sm:$0xff]  ;;  %v1957_v10 = vld [vmem:[%s9682_s3 + $0x8] sm:$0xff]  ;;  %v1956_v12 = vld [vmem:[%s9682_s3] sm:$0xff] }
 0x27d   :  { %1775 = vmatprep.subr.mxu0 %v13745_v14  ;;  %1852 = vmatprep.subr.mxu1 %v9436_v42  ;;  %v13751_v42 = vld [vmem:[#allocation49_spill] sm:$0xff]  ;;  %v2019_v14 = vld [vmem:[%s9682_s3 + $0x1f8] sm:$0xff] }
 0x27e   :  { %1776 = vmatpush2.msra.mxu0 %v13746_v20  ;;  %1853 = vmatpush2.msra.mxu1 %v9441_v49  ;;  %v13752_v49 = vld [vmem:[#allocation51_spill] sm:$0xff]  ;;  %v2018_v20 = vld [vmem:[%s9682_s3 + $0x1f0] sm:$0xff] }
 0x27f   :  { %1777 = vmatprep.subr.mxu0 %v13747_v25  ;;  %1854 = vmatprep.subr.mxu1 %v9446_v54  ;;  %v13753_v54 = vld [vmem:[#allocation53_spill] sm:$0xff] }
 0x280   :  { %1778 = vmatpush2.msra.mxu0 %v13748_v30  ;;  %1855 = vmatpush2.msra.mxu1 %v9451_v36  ;;  %v13754_v36 = vld [vmem:[#allocation55_spill] sm:$0xff]  ;;  %v2017_v25 = vld [vmem:[%s9682_s3 + $0x1e8] sm:$0xff]  ;;  %v2016_v30 = vld [vmem:[%s9682_s3 + $0x1e0] sm:$0xff] }
 0x281   :  { %1779 = vmatprep.subr.mxu0 %v13749_v34  ;;  %1856 = vmatprep.subr.mxu1 %v9456_v45  ;;  %v13755_v45 = vld [vmem:[#allocation57_spill] sm:$0xff]  ;;  %v2015_v34 = vld [vmem:[%s9682_s3 + $0x1d8] sm:$0xff] }
 0x282   :  { %1780 = vmatpush2.msra.mxu0 %v13750_v38  ;;  %1857 = vmatpush2.msra.mxu1 %v9461_v47  ;;  %v13756_v47 = vld [vmem:[#allocation59_spill] sm:$0xff]  ;;  %v2014_v38 = vld [vmem:[%s9682_s3 + $0x1d0] sm:$0xff] }
 0x283   :  { %1781 = vmatprep.subr.mxu0 %v13751_v42  ;;  %1858 = vmatprep.subr.mxu1 %v9466_v60  ;;  %v13757_v60 = vld [vmem:[#allocation61_spill] sm:$0xff] }
 0x284   :  { %1782 = vmatpush2.msra.mxu0 %v13752_v49  ;;  %1859 = vmatpush2.msra.mxu1 %v9471_v2  ;;  %v13759_v2 = vld [vmem:[#allocation63_spill] sm:$0xff]  ;;  %v2013_v42 = vld [vmem:[%s9682_s3 + $0x1c8] sm:$0xff]  ;;  %v2012_v49 = vld [vmem:[%s9682_s3 + $0x1c0] sm:$0xff] }
 0x285   :  { %1783 = vmatprep.subr.mxu0 %v13753_v54  ;;  %1860 = vmatprep.subr.mxu1 %v9476_v7  ;;  %v13761_v7 = vld [vmem:[#allocation65_spill] sm:$0xff]  ;;  %v2011_v54 = vld [vmem:[%s9682_s3 + $0x1b8] sm:$0xff] }
 0x286   :  { %1784 = vmatpush2.msra.mxu0 %v13754_v36  ;;  %1861 = vmatpush2.msra.mxu1 %v9481_v15  ;;  %v13763_v15 = vld [vmem:[#allocation67_spill] sm:$0xff]  ;;  %v2010_v36 = vld [vmem:[%s9682_s3 + $0x1b0] sm:$0xff] }
 0x287   :  { %1785 = vmatprep.subr.mxu0 %v13755_v45  ;;  %1862 = vmatprep.subr.mxu1 %v9486_v11  ;;  %v13765_v11 = vld [vmem:[#allocation69_spill] sm:$0xff] }
 0x288   :  { %1786 = vmatpush2.msra.mxu0 %v13756_v47  ;;  %1863 = vmatpush2.msra.mxu1 %v9491_v13  ;;  %v13767_v13 = vld [vmem:[#allocation71_spill] sm:$0xff]  ;;  %v2009_v45 = vld [vmem:[%s9682_s3 + $0x1a8] sm:$0xff]  ;;  %v2008_v47 = vld [vmem:[%s9682_s3 + $0x1a0] sm:$0xff] }
 0x289   :  { %1787 = vmatprep.subr.mxu0 %v13757_v60  ;;  %1864 = vmatprep.subr.mxu1 %v13758_v1  ;;  %v2007_v60 = vld [vmem:[%s9682_s3 + $0x198] sm:$0xff]  ;;  %v2006_v1 = vld [vmem:[%s9682_s3 + $0x190] sm:$0xff] }
 0x28a   :  { %1788 = vmatpush2.msra.mxu0 %v13759_v2  ;;  %1865 = vmatpush2.msra.mxu1 %v13760_v3  ;;  %v2005_v2 = vld [vmem:[%s9682_s3 + $0x188] sm:$0xff]  ;;  %v2004_v3 = vld [vmem:[%s9682_s3 + $0x180] sm:$0xff] }
 0x28b   :  { %1789 = vmatprep.subr.mxu0 %v13761_v7  ;;  %1866 = vmatprep.subr.mxu1 %v13762_v58  ;;  %v2003_v7 = vld [vmem:[%s9682_s3 + $0x178] sm:$0xff]  ;;  %v2002_v58 = vld [vmem:[%s9682_s3 + $0x170] sm:$0xff] }
 0x28c   :  { %1790 = vmatpush2.msra.mxu0 %v13763_v15  ;;  %1867 = vmatpush2.msra.mxu1 %v13764_v56  ;;  %v2001_v15 = vld [vmem:[%s9682_s3 + $0x168] sm:$0xff]  ;;  %v2000_v56 = vld [vmem:[%s9682_s3 + $0x160] sm:$0xff] }
 0x28d   :  { %1791 = vmatprep.subr.mxu0 %v13765_v11  ;;  %1868 = vmatprep.subr.mxu1 %v13766_v9  ;;  %v1999_v11 = vld [vmem:[%s9682_s3 + $0x158] sm:$0xff]  ;;  %v1998_v9 = vld [vmem:[%s9682_s3 + $0x150] sm:$0xff] }
 0x28e   :  { %1792 = vmatpush2.msra.mxu0 %v13767_v13  ;;  %1869 = vmatpush2.msra.mxu1 %v13768_v62  ;;  %v1997_v13 = vld [vmem:[%s9682_s3 + $0x148] sm:$0xff]  ;;  %v1996_v62 = vld [vmem:[%s9682_s3 + $0x140] sm:$0xff] }
 0x28f   :  { %1793 = vmatprep.subr.mxu0 %v13769_v5  ;;  %1870 = vmatprep.subr.mxu1 %v13770_v27  ;;  %v1994_v5 = vld [vmem:[%s9682_s3 + $0x130] sm:$0xff]  ;;  %v1993_v27 = vld [vmem:[%s9682_s3 + $0x128] sm:$0xff] }
 0x290   :  { %1794 = vmatpush2.msra.mxu0 %v13771_v28  ;;  %1871 = vmatpush2.msra.mxu1 %v13772_v44  ;;  %v1992_v28 = vld [vmem:[%s9682_s3 + $0x120] sm:$0xff]  ;;  %v1991_v44 = vld [vmem:[%s9682_s3 + $0x118] sm:$0xff] }
 0x291   :  { %1796 = vmatmul.mubr.f32.vlgmr.msra.gmra.mxu0 %v1656_v40  ;;  %1872 = vmatprep.subr.mxu1 %v13773_v22  ;;  %v1990_v40 = vld [vmem:[%s9682_s3 + $0x110] sm:$0xff]  ;;  %v1989_v22 = vld [vmem:[%s9682_s3 + $0x108] sm:$0xff] }
 0x292   :  { %1873 = vmatpush2.msra.mxu1 %v9541_v18  ;;  %2020 = vmatprep.subr.mxu0 %v1987_v52  ;;  %v1984_v18 = vld [vmem:[%s9682_s3 + $0xe0] sm:$0xff] }
 0x293   :  { %1875 = vmatmul.mubr.f32.vlgmr.msra.gmra.mxu1 %v1806_v0  ;;  %2094 = vmatprep.subr.mxu1 %v1987_v52  ;;  %v1988_v0 = vld [vmem:[%s9682_s3 + $0x100] sm:$0xff]  ;;  %v2294_v52 = vld [vmem:[%s9751_s7 + $0xf8] sm:$0xff]  ;;  %s12387_s3 = sld [smem:[%s13337_s0 + %s8452_s30]]  }
 0x294   :  { %2021 = vmatpush1.msra.mxu0 %v1986_v51  ;;  %2095 = vmatpush1.msra.mxu1 %v1986_v51  ;;  %v9755_v51 = vld [vmem:[%s9751_s7 + $0x2f8] sm:$0xff] }
 0x295   :  { %2022 = vmatprep.subr.mxu0 %v1985_v16  ;;  %2096 = vmatprep.subr.mxu1 %v1985_v16 }
 0x296   :  { %2023 = vmatpush1.msra.mxu0 %v1984_v18  ;;  %2097 = vmatpush1.msra.mxu1 %v1984_v18 }
 0x297   :  { %2024 = vmatprep.subr.mxu0 %v1983_v23  ;;  %2098 = vmatprep.subr.mxu1 %v1983_v23 }
 0x298   :  { %2025 = vmatpush1.msra.mxu0 %v1982_v17  ;;  %2099 = vmatpush1.msra.mxu1 %v1982_v17 }
 0x299   :  { %2026 = vmatprep.subr.mxu0 %v1981_v19  ;;  %2100 = vmatprep.subr.mxu1 %v1981_v19 }
 0x29a   :  { %2027 = vmatpush1.msra.mxu0 %v1980_v21  ;;  %2101 = vmatpush1.msra.mxu1 %v1980_v21 }
 0x29b   :  { %2028 = vmatprep.subr.mxu0 %v1979_v24  ;;  %2102 = vmatprep.subr.mxu1 %v1979_v24 }
 0x29c   :  { %2029 = vmatpush1.msra.mxu0 %v1978_v48  ;;  %2103 = vmatpush1.msra.mxu1 %v1978_v48  ;;  %v1640_v48 = vld [vmem:[%s6594_s11] sm:$0x3]  ;;  %s12465_s11 = sld [smem:[%s13337_s0 + %s8455_s8]]  }
 0x29d   :  { %2030 = vmatprep.subr.mxu0 %v1977_v26  ;;  %2104 = vmatprep.subr.mxu1 %v1977_v26 }
 0x29e   :  { %2031 = vmatpush1.msra.mxu0 %v1976_v29  ;;  %2105 = vmatpush1.msra.mxu1 %v1976_v29 }
 0x29f   :  { %2032 = vmatprep.subr.mxu0 %v1975_v31  ;;  %2106 = vmatprep.subr.mxu1 %v1975_v31  ;;  %v13774_v31 = vld [vmem:[#allocation8_spill] sm:$0xff] }
 0x2a0   :  { %2033 = vmatpush1.msra.mxu0 %v1974_v33  ;;  %2107 = vmatpush1.msra.mxu1 %v1974_v33  ;;  %v1649_v33 = vrot.slane %v1640_v48, %v13774_v31 }
 0x2a1   :  { %2034 = vmatprep.subr.mxu0 %v1973_v35  ;;  %2108 = vmatprep.subr.mxu1 %v1973_v35 }
 0x2a2   :  { %2035 = vmatpush1.msra.mxu0 %v1972_v37  ;;  %2109 = vmatpush1.msra.mxu1 %v1972_v37  ;;  %v13775_v37 = vld [vmem:[#allocation9_spill] sm:$0xff] }
 0x2a3   :  { %2036 = vmatprep.subr.mxu0 %v1971_v39  ;;  %2110 = vmatprep.subr.mxu1 %v1971_v39  ;;  %v1645_v39 = vrot.slane %v1640_v48, %v13775_v37 }
 0x2a4   :  { %2037 = vmatpush1.msra.mxu0 %v1970_v41  ;;  %2111 = vmatpush1.msra.mxu1 %v1970_v41 }
 0x2a5   :  { %2038 = vmatprep.subr.mxu0 %v1969_v43  ;;  %2112 = vmatprep.subr.mxu1 %v1969_v43 }
 0x2a6   :  { %2039 = vmatpush1.msra.mxu0 %v1968_v46  ;;  %2113 = vmatpush1.msra.mxu1 %v1968_v46 }
 0x2a7   :  { %2040 = vmatprep.subr.mxu0 %v1967_v50  ;;  %2114 = vmatprep.subr.mxu1 %v1967_v50 }
 0x2a8   :  { %2041 = vmatpush1.msra.mxu0 %v1966_v53  ;;  %2115 = vmatpush1.msra.mxu1 %v1966_v53 }
 0x2a9   :  { %2042 = vmatprep.subr.mxu0 %v1965_v55  ;;  %2116 = vmatprep.subr.mxu1 %v1965_v55 }
 0x2aa   :  { %2043 = vmatpush1.msra.mxu0 %v1964_v57  ;;  %2117 = vmatpush1.msra.mxu1 %v1964_v57 }
 0x2ab   :  { %2044 = vmatprep.subr.mxu0 %v1963_v59  ;;  %2118 = vmatprep.subr.mxu1 %v1963_v59 }
 0x2ac   :  { %2045 = vmatpush1.msra.mxu0 %v1962_v61  ;;  %2119 = vmatpush1.msra.mxu1 %v1962_v61 }
 0x2ad   :  { %2046 = vmatprep.subr.mxu0 %v1961_v63  ;;  %2120 = vmatprep.subr.mxu1 %v1961_v63 }
 0x2ae   :  { %2047 = vmatpush1.msra.mxu0 %v1960_v4  ;;  %2121 = vmatpush1.msra.mxu1 %v1960_v4 }
 0x2af   :  { %2048 = vmatprep.subr.mxu0 %v1959_v6  ;;  %2122 = vmatprep.subr.mxu1 %v1959_v6 }
 0x2b0   :  { %2049 = vmatpush1.msra.mxu0 %v1958_v8  ;;  %2123 = vmatpush1.msra.mxu1 %v1958_v8 }
 0x2b1   :  { %2050 = vmatprep.subr.mxu0 %v1957_v10  ;;  %2124 = vmatprep.subr.mxu1 %v1957_v10 }
 0x2b2   :  { %2051 = vmatpush1.msra.mxu0 %v1956_v12  ;;  %2125 = vmatpush1.msra.mxu1 %v1956_v12 }
 0x2b3   :  { %2052 = vmatprep.subr.mxu0 %v2019_v14  ;;  %2126 = vmatprep.subr.mxu1 %v2019_v14 }
 0x2b4   :  { %2053 = vmatpush2.msra.mxu0 %v2018_v20  ;;  %2127 = vmatpush2.msra.mxu1 %v2018_v20 }
 0x2b5   :  { %2054 = vmatprep.subr.mxu0 %v2017_v25  ;;  %2128 = vmatprep.subr.mxu1 %v2017_v25 }
 0x2b6   :  { %2055 = vmatpush2.msra.mxu0 %v2016_v30  ;;  %2129 = vmatpush2.msra.mxu1 %v2016_v30 }
 0x2b7   :  { %2056 = vmatprep.subr.mxu0 %v2015_v34  ;;  %2130 = vmatprep.subr.mxu1 %v2015_v34 }
 0x2b8   :  { %2057 = vmatpush2.msra.mxu0 %v2014_v38  ;;  %2131 = vmatpush2.msra.mxu1 %v2014_v38 }
 0x2b9   :  { %2058 = vmatprep.subr.mxu0 %v2013_v42  ;;  %2132 = vmatprep.subr.mxu1 %v2013_v42 }
 0x2ba   :  { %2059 = vmatpush2.msra.mxu0 %v2012_v49  ;;  %2133 = vmatpush2.msra.mxu1 %v2012_v49 }
 0x2bb   :  { %2060 = vmatprep.subr.mxu0 %v2011_v54  ;;  %2134 = vmatprep.subr.mxu1 %v2011_v54 }
 0x2bc   :  { %2061 = vmatpush2.msra.mxu0 %v2010_v36  ;;  %2135 = vmatpush2.msra.mxu1 %v2010_v36 }
 0x2bd   :  { %2062 = vmatprep.subr.mxu0 %v2009_v45  ;;  %2136 = vmatprep.subr.mxu1 %v2009_v45 }
 0x2be   :  { %2063 = vmatpush2.msra.mxu0 %v2008_v47  ;;  %2137 = vmatpush2.msra.mxu1 %v2008_v47 }
 0x2bf   :  { %2064 = vmatprep.subr.mxu0 %v2007_v60  ;;  %2138 = vmatprep.subr.mxu1 %v2007_v60 }
 0x2c0   :  { %2065 = vmatpush2.msra.mxu0 %v2006_v1  ;;  %2139 = vmatpush2.msra.mxu1 %v2006_v1 }
 0x2c1   :  { %2066 = vmatprep.subr.mxu0 %v2005_v2  ;;  %2140 = vmatprep.subr.mxu1 %v2005_v2 }
 0x2c2   :  { %2067 = vmatpush2.msra.mxu0 %v2004_v3  ;;  %2141 = vmatpush2.msra.mxu1 %v2004_v3 }
 0x2c3   :  { %2068 = vmatprep.subr.mxu0 %v2003_v7  ;;  %2142 = vmatprep.subr.mxu1 %v2003_v7 }
 0x2c4   :  { %2069 = vmatpush2.msra.mxu0 %v2002_v58  ;;  %2143 = vmatpush2.msra.mxu1 %v2002_v58 }
 0x2c5   :  { %2070 = vmatprep.subr.mxu0 %v2001_v15  ;;  %2144 = vmatprep.subr.mxu1 %v2001_v15 }
 0x2c6   :  { %2071 = vmatpush2.msra.mxu0 %v2000_v56  ;;  %2145 = vmatpush2.msra.mxu1 %v2000_v56 }
 0x2c7   :  { %2072 = vmatprep.subr.mxu0 %v1999_v11  ;;  %2146 = vmatprep.subr.mxu1 %v1999_v11 }
 0x2c8   :  { %2073 = vmatpush2.msra.mxu0 %v1998_v9  ;;  %2147 = vmatpush2.msra.mxu1 %v1998_v9 }
 0x2c9   :  { %2074 = vmatprep.subr.mxu0 %v1997_v13  ;;  %2148 = vmatprep.subr.mxu1 %v1997_v13 }
 0x2ca   :  { %2075 = vmatpush2.msra.mxu0 %v1996_v62  ;;  %2149 = vmatpush2.msra.mxu1 %v1996_v62 }
 0x2cb   :  { %2076 = vmatprep.subr.mxu0 %v1995_v32  ;;  %2150 = vmatprep.subr.mxu1 %v1995_v32 }
 0x2cc   :  { %2077 = vmatpush2.msra.mxu0 %v1994_v5  ;;  %2151 = vmatpush2.msra.mxu1 %v1994_v5 }
 0x2cd   :  { %2078 = vmatprep.subr.mxu0 %v1993_v27  ;;  %2152 = vmatprep.subr.mxu1 %v1993_v27  ;;  %v1483_v16 = vpop.f32.mrf.mxu0 }
 0x2ce   :  { %2079 = vmatpush2.msra.mxu0 %v1992_v28  ;;  %2153 = vmatpush2.msra.mxu1 %v1992_v28 }
 0x2cf   :  { %2080 = vmatprep.subr.mxu0 %v1991_v44  ;;  %2154 = vmatprep.subr.mxu1 %v1991_v44  ;;  %v1485_v18 = vpop.f32.mrf.mxu0 }
 0x2d0   :  { %2081 = vmatpush2.msra.mxu0 %v1990_v40  ;;  %2155 = vmatpush2.msra.mxu1 %v1990_v40 }
 0x2d1   :  { %2082 = vmatprep.subr.mxu0 %v1989_v22  ;;  %2156 = vmatprep.subr.mxu1 %v1989_v22  ;;  %v1554_v23 = vpop.f32.mrf.mxu1 }
 0x2d2   :  { %2083 = vmatpush2.msra.mxu0 %v1988_v0  ;;  %2157 = vmatpush2.msra.mxu1 %v1988_v0  ;;  %v1555_v26 = vadd.f32 %v1554_v23, %v1483_v16 }
 0x2d3   :  { %2538 = vmatprep.subr.mxu1 %v2294_v52  ;;  %2467 = vmatprep.subr.mxu0 %v9755_v51  ;;  %v1556_v19 = vpop.f32.mrf.mxu1 }
 0x2d4   :  { %v1557_v24 = vadd.f32 %v1556_v19, %v1485_v18 }
 0x30f   :  { %v1633_v17 = vpop.f32.mrf.mxu0 }
 0x310   :  { %v1638_v35 = vadd.f32 %v1633_v17, %v1555_v26 }
 0x311   :  { %v1635_v21 = vpop.f32.mrf.mxu0 }
 0x312   :  { %v1639_v29 = vadd.f32 %v1635_v21, %v1557_v24  ;;  %v1652_v43 = vadd.f32 %v1645_v39, %v1638_v35  ;;  %v1726_v55 = vpop.f32.mrf.mxu1 }
 0x314   :  { %v1653_v41 = vadd.f32 %v1649_v33, %v1639_v29  ;;  %v9765_v50 = vmax.f32 %v1652_v43, 0.0  ;;  %v1728_v4 = vpop.f32.mrf.mxu1 }
 0x316   :  { %v9763_v46 = vmax.f32 %v1653_v41, 0.0  ;;  %v1904_v57 = vmul.f32 %v9765_v50, %v9765_v50  ;;  %v1888_v61 = vsel %vm1887_vm2, %v9765_v50, 0.0 }
 0x317   :  { %v1889_v14 = vrot.slane %v1888_v61, 4 }
 0x318   :  { %v1905_v53 = vmul.f32 %v9763_v46, %v9763_v46  ;;  %v1895_v59 = vsel %vm1887_vm2, %v9763_v46, 0.0  ;;  %v1906_v8 = vsel %vm1887_vm2, %v1904_v57, 0.0 }
 0x319   :  { %v1896_v10 = vrot.slane %v1895_v59, 4  ;;  %v1907_v42 = vrot.slane %v1906_v8, 4  ;;  %v1890_v47 = vadd.f32 %v1889_v14, %v1888_v61 }
 0x31a   :  { %v1913_v63 = vsel %vm1887_vm2, %v1905_v53, 0.0 }
 0x31b   :  { %v1914_v30 = vrot.slane %v1913_v63, 4  ;;  %v1897_v54 = vadd.f32 %v1896_v10, %v1895_v59  ;;  %v1908_v3 = vadd.f32 %v1907_v42, %v1906_v8  ;;  %v1891_v11 = vrot.slane %v1890_v47, 2  ;;  %v9792_v42 = vld [vmem:[%s9751_s7 + $0x2f0] sm:$0xff] }
 0x31d   :  { %v1915_v2 = vadd.f32 %v1914_v30, %v1913_v63  ;;  %v1898_v56 = vrot.slane %v1897_v54, 2  ;;  %v1909_v40 = vrot.slane %v1908_v3, 2  ;;  %v1892_v17 = vadd.f32 %v1891_v11, %v1890_v47  ;;  %v2292_v47 = vld [vmem:[%s9751_s7 + $0xe8] sm:$0xff]  ;;  %v9814_v11 = vld [vmem:[%s9751_s7 + $0x2d0] sm:$0xff] }
 0x31f   :  { %v1916_v5 = vrot.slane %v1915_v2, 2  ;;  %v1899_v0 = vadd.f32 %v1898_v56, %v1897_v54  ;;  %v1893_v53 = vrot.slane %v1892_v17, 1  ;;  %v9795_v54 = vld [vmem:[%s9751_s7 + $0x2e8] sm:$0xff] }
 0x320   :  { %v2288_v56 = vld [vmem:[%s9751_s7 + $0xc8] sm:$0xff] }
 0x321   :  { %v1917_v19 = vadd.f32 %v1916_v5, %v1915_v2  ;;  %v1900_v29 = vrot.slane %v1899_v0, 1  ;;  %v2290_v2 = vld [vmem:[%s9751_s7 + $0xd8] sm:$0xff]  ;;  %v2285_v5 = vld [vmem:[%s9751_s7 + $0xb0] sm:$0xff] }
 0x323   :  { %v1918_v57 = vrot.slane %v1917_v19, 1 }
 0x351   :  { %v1797_v6 = vpop.f32.mrf.mxu0 }
 0x352   :  { %v1798_v12 = vadd.f32 %v1797_v6, %v1726_v55  ;;  %v1901_v6 = vadd.f32 %v1900_v29, %v1899_v0  ;;  %v9842_v0 = vld [vmem:[%s9751_s7 + $0x98] sm:$0xff] }
 0x353   :  { %v1799_v20 = vpop.f32.mrf.mxu0  ;;  %v1876_v25 = vpop.f32.mrf.mxu1  ;;  %13776 = vst [vmem:[#allocation42_spill] sm:$0xff] %v9842_v0  ;;  %v9887_v29 = vld [vmem:[%s9751_s7 + $0x278] sm:$0xff] }
 0x354   :  { %v1800_v34 = vadd.f32 %v1799_v20, %v1728_v4  ;;  %v1881_v38 = vadd.f32 %v1876_v25, %v1798_v12  ;;  %v1894_v12 = vadd.f32 %v1893_v53, %v1892_v17  ;;  %v1919_v25 = vadd.f32 %v1918_v57, %v1917_v19  ;;  %v9863_v17 = vld [vmem:[%s9751_s7 + $0x290] sm:$0xff]  ;;  %v9866_v19 = vld [vmem:[%s9751_s7 + $0x80] sm:$0xff]  ;;  %v9919_v57 = vld [vmem:[%s9751_s7 + $0x258] sm:$0xff] }
 0x355   :  { %v1878_v49 = vpop.f32.mrf.mxu1  ;;  %13779 = vst [vmem:[#allocation48_spill] sm:$0xff] %v9866_v19  ;;  %v9911_v53 = vld [vmem:[%s9751_s7 + $0x260] sm:$0xff] }
 0x356   :  { %v1883_v36 = vadd.f32 %v1881_v38, %v1645_v39  ;;  %v1882_v45 = vadd.f32 %v1878_v49, %v1800_v34 }
 0x358   :  { %v9777_v60 = vmax.f32 %v1883_v36, 0.0  ;;  %v1884_v1 = vadd.f32 %v1882_v45, %v1649_v33  ;;  %v1910_v33 = vadd.f32 %v1909_v40, %v1908_v3  ;;  %v2293_v45 = vld [vmem:[%s9751_s7 + $0xf0] sm:$0xff]  ;;  %v9804_v3 = vld [vmem:[%s9751_s7 + $0x2e0] sm:$0xff] }
 0x359   :  { %v2283_v40 = vld [vmem:[%s9751_s7 + $0xa0] sm:$0xff] }
 0x35a   :  { %v1922_v7 = vsel %vm1887_vm2, %v9777_v60, 0.0  ;;  %v1938_v58 = vmul.f32 %v9777_v60, %v9777_v60  ;;  %v9783_v15 = vmax.f32 %v1884_v1, 0.0  ;;  %v1911_v4 = vrot.slane %v1910_v33, 1  ;;  %v2291_v1 = vld [vmem:[%s9751_s7 + $0xe0] sm:$0xff] }
 0x35b   :  { %v1923_v9 = vrot.slane %v1922_v7, 4 }
 0x35c   :  { %v1940_v13 = vsel %vm1887_vm2, %v1938_v58, 0.0  ;;  %v1929_v62 = vsel %vm1887_vm2, %v9783_v15, 0.0  ;;  %v1939_v32 = vmul.f32 %v9783_v15, %v9783_v15  ;;  %v1912_v38 = vadd.f32 %v1911_v4, %v1910_v33  ;;  %v9809_v58 = vld [vmem:[%s9751_s7 + $0x2d8] sm:$0xff]  ;;  %v9890_v33 = vld [vmem:[%s9751_s7 + $0x68] sm:$0xff] }
 0x35d   :  { %v1924_v27 = vadd.f32 %v1923_v9, %v1922_v7  ;;  %v1941_v28 = vrot.slane %v1940_v13, 4  ;;  %v1930_v44 = vrot.slane %v1929_v62, 4  ;;  %v2289_v7 = vld [vmem:[%s9751_s7 + $0xd0] sm:$0xff]  ;;  %v2287_v9 = vld [vmem:[%s9751_s7 + $0xc0] sm:$0xff]  ;;  %13782 = vst [vmem:[#allocation54_spill] sm:$0xff] %v9890_v33  ;;  %v9935_v4 = vld [vmem:[%s9751_s7 + $0x248] sm:$0xff] }
 0x35e   :  { %v1947_v22 = vsel %vm1887_vm2, %v1939_v32, 0.0  ;;  %v9824_v32 = vld [vmem:[%s9751_s7 + $0x2c0] sm:$0xff] }
 0x35f   :  { %v1925_v52 = vrot.slane %v1924_v27, 2  ;;  %v1942_v16 = vadd.f32 %v1941_v28, %v1940_v13  ;;  %v1931_v18 = vadd.f32 %v1930_v44, %v1929_v62  ;;  %v1948_v23 = vrot.slane %v1947_v22, 4  ;;  %v9819_v13 = vld [vmem:[%s9751_s7 + $0x2c8] sm:$0xff]  ;;  %v2286_v62 = vld [vmem:[%s9751_s7 + $0xb8] sm:$0xff]  ;;  %v9834_v44 = vld [vmem:[%s9751_s7 + $0x2b0] sm:$0xff] }
 0x360   :  { %v2284_v28 = vld [vmem:[%s9751_s7 + $0xa8] sm:$0xff] }
 0x361   :  { %v1926_v21 = vadd.f32 %v1925_v52, %v1924_v27  ;;  %v1943_v24 = vrot.slane %v1942_v16, 2  ;;  %v1932_v48 = vrot.slane %v1931_v18, 2  ;;  %v1949_v26 = vadd.f32 %v1948_v23, %v1947_v22  ;;  %v9829_v27 = vld [vmem:[%s9751_s7 + $0x2b8] sm:$0xff]  ;;  %v9839_v22 = vld [vmem:[%s9751_s7 + $0x2a8] sm:$0xff]  ;;  %v9847_v52 = vld [vmem:[%s9751_s7 + $0x2a0] sm:$0xff] }
 0x362   :  { %v9858_v23 = vld [vmem:[%s9751_s7 + $0x88] sm:$0xff] }
 0x363   :  { %v1933_v35 = vadd.f32 %v1932_v48, %v1931_v18  ;;  %v1927_v39 = vrot.slane %v1926_v21, 1  ;;  %v1950_v41 = vrot.slane %v1949_v26, 2  ;;  %v1944_v43 = vadd.f32 %v1943_v24, %v1942_v16  ;;  %v9850_v16 = vld [vmem:[%s9751_s7 + $0x90] sm:$0xff]  ;;  %v9855_v18 = vld [vmem:[%s9751_s7 + $0x298] sm:$0xff]  ;;  %13778 = vst [vmem:[#allocation46_spill] sm:$0xff] %v9858_v23  ;;  %v9879_v48 = vld [vmem:[%s9751_s7 + $0x280] sm:$0xff] }
 0x364   :  { %13777 = vst [vmem:[#allocation44_spill] sm:$0xff] %v9850_v16  ;;  %v9874_v24 = vld [vmem:[%s9751_s7 + $0x78] sm:$0xff] }
 0x365   :  { %v1934_v55 = vrot.slane %v1933_v35, 1  ;;  %v1951_v59 = vadd.f32 %v1950_v41, %v1949_v26  ;;  %v1945_v61 = vrot.slane %v1944_v43, 1  ;;  %v1928_v63 = vadd.f32 %v1927_v39, %v1926_v21  ;;  %v9871_v21 = vld [vmem:[%s9751_s7 + $0x288] sm:$0xff]  ;;  %13780 = vst [vmem:[#allocation50_spill] sm:$0xff] %v9874_v24  ;;  %v9882_v26 = vld [vmem:[%s9751_s7 + $0x70] sm:$0xff]  ;;  %v9898_v39 = vld [vmem:[%s9751_s7 + $0x60] sm:$0xff] }
 0x366   :  { %13781 = vst [vmem:[#allocation52_spill] sm:$0xff] %v9882_v26  ;;  %13783 = vst [vmem:[#allocation56_spill] sm:$0xff] %v9898_v39  ;;  %v9903_v41 = vld [vmem:[%s9751_s7 + $0x268] sm:$0xff] }
 0x367   :  { %v1935_v8 = vadd.f32 %v1934_v55, %v1933_v35  ;;  %v1952_v10 = vrot.slane %v1951_v59, 1  ;;  %v1946_v14 = vadd.f32 %v1945_v61, %v1944_v43  ;;  %v1936_v34 = vadd.f32 %v1928_v63, %v1894_v12  ;;  %v9895_v35 = vld [vmem:[%s9751_s7 + $0x270] sm:$0xff]  ;;  %v9906_v43 = vld [vmem:[%s9751_s7 + $0x58] sm:$0xff]  ;;  %v9930_v63 = vld [vmem:[%s9751_s7 + $0x40] sm:$0xff] }
 0x368   :  { %13784 = vst [vmem:[#allocation58_spill] sm:$0xff] %v9906_v43  ;;  %v9914_v55 = vld [vmem:[%s9751_s7 + $0x50] sm:$0xff]  ;;  %13787 = vst [vmem:[#allocation64_spill] sm:$0xff] %v9930_v63  ;;  %v9951_v12 = vld [vmem:[%s9751_s7 + $0x238] sm:$0xff] }
 0x369   :  { %v1937_v20 = vadd.f32 %v1935_v8, %v1901_v6  ;;  %v1953_v30 = vadd.f32 %v1952_v10, %v1951_v59  ;;  %v1954_v36 = vadd.f32 %v1946_v14, %v1912_v38  ;;  %13785 = vst [vmem:[#allocation60_spill] sm:$0xff] %v9914_v55  ;;  %v9922_v59 = vld [vmem:[%s9751_s7 + $0x48] sm:$0xff]  ;;  %v9927_v61 = vld [vmem:[%s9751_s7 + $0x250] sm:$0xff]  ;;  %v9938_v6 = vld [vmem:[%s9751_s7 + $0x38] sm:$0xff] }
 0x36a   :  { %13786 = vst [vmem:[#allocation62_spill] sm:$0xff] %v9922_v59  ;;  %13788 = vst [vmem:[#allocation66_spill] sm:$0xff] %v9938_v6  ;;  %v9943_v8 = vld [vmem:[%s9751_s7 + $0x240] sm:$0xff]  ;;  %v9946_v10 = vld [vmem:[%s9751_s7 + $0x30] sm:$0xff] }
 0x36b   :  { %2084 = vmatprep.mubr.f32.mxu0 %v1937_v20  ;;  %v1955_v49 = vadd.f32 %v1953_v30, %v1919_v25  ;;  %13789 = vst [vmem:[#allocation68_spill] sm:$0xff] %v9946_v10  ;;  %v9954_v14 = vld [vmem:[%s9751_s7 + $0x28] sm:$0xff]  ;;  %v9959_v20 = vld [vmem:[%s9751_s7 + $0x230] sm:$0xff]  ;;  %v9962_v25 = vld [vmem:[%s9751_s7 + $0x20] sm:$0xff] }
 0x36c   :  { %2085 = vmatmul.mubr.f32.vlgmr.msra.gmra.mxu0 %v1936_v34  ;;  %13790 = vst [vmem:[#allocation70_spill] sm:$0xff] %v9954_v14  ;;  %13791 = vst [vmem:[#allocation73_spill] sm:$0xff] %v9962_v25  ;;  %v9967_v30 = vld [vmem:[%s9751_s7 + $0x228] sm:$0xff]  ;;  %v9970_v34 = vld [vmem:[%s9751_s7 + $0x18] sm:$0xff] }
 0x36d   :  { %2158 = vmatprep.mubr.f32.mxu1 %v1955_v49  ;;  %2468 = vmatpush1.msra.mxu0 %v9792_v42  ;;  %13792 = vst [vmem:[#allocation10_spill] sm:$0xff] %v9970_v34  ;;  %v9975_v38 = vld [vmem:[%s9751_s7 + $0x220] sm:$0xff]  ;;  %v9978_v49 = vld [vmem:[%s9751_s7 + $0x10] sm:$0xff] }
 0x36e   :  { %2159 = vmatmul.mubr.f32.vlgmr.msra.gmra.mxu1 %v1954_v36  ;;  %2469 = vmatprep.subr.mxu0 %v9795_v54  ;;  %13793 = vst [vmem:[#allocation11_spill] sm:$0xff] %v9978_v49  ;;  %v9983_v36 = vld [vmem:[%s9751_s7 + $0x218] sm:$0xff] }
 0x36f   :  { %2539 = vmatpush1.msra.mxu1 %v2293_v45  ;;  %2470 = vmatpush1.msra.mxu0 %v9804_v3  ;;  %v9986_v45 = vld [vmem:[%s9751_s7 + $0x8] sm:$0xff] }
 0x370   :  { %2540 = vmatprep.subr.mxu1 %v2292_v47  ;;  %2471 = vmatprep.subr.mxu0 %v9809_v58  ;;  %13794 = vst [vmem:[#allocation12_spill] sm:$0xff] %v9986_v45  ;;  %v9991_v47 = vld [vmem:[%s9751_s7 + $0x210] sm:$0xff] }
 0x371   :  { %2541 = vmatpush1.msra.mxu1 %v2291_v1  ;;  %2472 = vmatpush1.msra.mxu0 %v9814_v11  ;;  %v9994_v1 = vld [vmem:[%s9751_s7] sm:$0xff] }
 0x372   :  { %2542 = vmatprep.subr.mxu1 %v2290_v2  ;;  %2473 = vmatprep.subr.mxu0 %v9819_v13  ;;  %13795 = vst [vmem:[#allocation13_spill] sm:$0xff] %v9994_v1  ;;  %v9999_v2 = vld [vmem:[%s9751_s7 + $0x208] sm:$0xff] }
 0x373   :  { %2543 = vmatpush1.msra.mxu1 %v2289_v7  ;;  %2474 = vmatpush1.msra.mxu0 %v9824_v32  ;;  %v10002_v7 = vld [vmem:[%s9751_s7 + $0x1f8] sm:$0xff] }
 0x374   :  { %2544 = vmatprep.subr.mxu1 %v2288_v56  ;;  %2475 = vmatprep.subr.mxu0 %v9829_v27  ;;  %13796 = vst [vmem:[#allocation14_spill] sm:$0xff] %v10002_v7  ;;  %v10007_v56 = vld [vmem:[%s9751_s7 + $0x200] sm:$0xff] }
 0x375   :  { %2545 = vmatpush1.msra.mxu1 %v2287_v9  ;;  %2476 = vmatpush1.msra.mxu0 %v9834_v44  ;;  %v10010_v9 = vld [vmem:[%s9751_s7 + $0x1f0] sm:$0xff] }
 0x376   :  { %2546 = vmatprep.subr.mxu1 %v2286_v62  ;;  %2477 = vmatprep.subr.mxu0 %v9839_v22  ;;  %13797 = vst [vmem:[#allocation15_spill] sm:$0xff] %v10010_v9  ;;  %v10015_v62 = vld [vmem:[%s9751_s7 + $0x3f8] sm:$0xff] }
 0x377   :  { %2547 = vmatpush1.msra.mxu1 %v2285_v5  ;;  %2478 = vmatpush1.msra.mxu0 %v9847_v52  ;;  %v10018_v5 = vld [vmem:[%s9751_s7 + $0x1e8] sm:$0xff] }
 0x378   :  { %2548 = vmatprep.subr.mxu1 %v2284_v28  ;;  %2479 = vmatprep.subr.mxu0 %v9855_v18  ;;  %13798 = vst [vmem:[#allocation16_spill] sm:$0xff] %v10018_v5  ;;  %v10023_v28 = vld [vmem:[%s9751_s7 + $0x3f0] sm:$0xff] }
 0x379   :  { %2549 = vmatpush1.msra.mxu1 %v2283_v40  ;;  %2480 = vmatpush1.msra.mxu0 %v9863_v17  ;;  %v10026_v40 = vld [vmem:[%s9751_s7 + $0x1e0] sm:$0xff] }
 0x37a   :  { %2550 = vmatprep.subr.mxu1 %v9842_v0  ;;  %2481 = vmatprep.subr.mxu0 %v9871_v21  ;;  %13799 = vst [vmem:[#allocation17_spill] sm:$0xff] %v10026_v40  ;;  %v10194_v0 = vld [vmem:[%s9751_s7 + $0x138] sm:$0xff] }
 0x37b   :  { %2551 = vmatpush1.msra.mxu1 %v9850_v16  ;;  %2482 = vmatpush1.msra.mxu0 %v9879_v48  ;;  %v10186_v16 = vld [vmem:[%s9751_s7 + $0x140] sm:$0xff]  ;;  %13835 = vst [vmem:[#allocation34_spill] sm:$0xff] %v10194_v0 }
 0x37c   :  { %2552 = vmatprep.subr.mxu1 %v9858_v23  ;;  %2483 = vmatprep.subr.mxu0 %v9887_v29  ;;  %v10178_v23 = vld [vmem:[%s9751_s7 + $0x148] sm:$0xff]  ;;  %13833 = vst [vmem:[#allocation32_spill] sm:$0xff] %v10186_v16 }
 0x37d   :  { %2553 = vmatpush1.msra.mxu1 %v9866_v19  ;;  %2484 = vmatpush1.msra.mxu0 %v9895_v35  ;;  %v10170_v19 = vld [vmem:[%s9751_s7 + $0x150] sm:$0xff]  ;;  %13831 = vst [vmem:[#allocation30_spill] sm:$0xff] %v10178_v23 }
 0x37e   :  { %2554 = vmatprep.subr.mxu1 %v9874_v24  ;;  %2485 = vmatprep.subr.mxu0 %v9903_v41  ;;  %v10162_v24 = vld [vmem:[%s9751_s7 + $0x158] sm:$0xff]  ;;  %13829 = vst [vmem:[#allocation28_spill] sm:$0xff] %v10170_v19 }
 0x37f   :  { %2555 = vmatpush1.msra.mxu1 %v9882_v26  ;;  %2486 = vmatpush1.msra.mxu0 %v9911_v53  ;;  %v10154_v26 = vld [vmem:[%s9751_s7 + $0x160] sm:$0xff]  ;;  %13827 = vst [vmem:[#allocation26_spill] sm:$0xff] %v10162_v24 }
 0x380   :  { %2556 = vmatprep.subr.mxu1 %v9890_v33  ;;  %2487 = vmatprep.subr.mxu0 %v9919_v57  ;;  %v10146_v33 = vld [vmem:[%s9751_s7 + $0x168] sm:$0xff]  ;;  %13825 = vst [vmem:[#allocation24_spill] sm:$0xff] %v10154_v26 }
 0x381   :  { %2557 = vmatpush1.msra.mxu1 %v9898_v39  ;;  %2488 = vmatpush1.msra.mxu0 %v9927_v61  ;;  %v10138_v39 = vld [vmem:[%s9751_s7 + $0x170] sm:$0xff]  ;;  %13823 = vst [vmem:[#allocation59_spill] sm:$0xff] %v10146_v33 }
 0x382   :  { %2558 = vmatprep.subr.mxu1 %v9906_v43  ;;  %2489 = vmatprep.subr.mxu0 %v9935_v4  ;;  %v10130_v43 = vld [vmem:[%s9751_s7 + $0x178] sm:$0xff]  ;;  %13821 = vst [vmem:[#allocation55_spill] sm:$0xff] %v10138_v39 }
 0x383   :  { %2559 = vmatpush1.msra.mxu1 %v9914_v55  ;;  %2490 = vmatpush1.msra.mxu0 %v9943_v8  ;;  %v10122_v55 = vld [vmem:[%s9751_s7 + $0x180] sm:$0xff]  ;;  %13819 = vst [vmem:[#allocation51_spill] sm:$0xff] %v10130_v43 }
 0x384   :  { %2560 = vmatprep.subr.mxu1 %v9922_v59  ;;  %2491 = vmatprep.subr.mxu0 %v9951_v12  ;;  %v10114_v59 = vld [vmem:[%s9751_s7 + $0x188] sm:$0xff]  ;;  %13817 = vst [vmem:[#allocation47_spill] sm:$0xff] %v10122_v55 }
 0x385   :  { %2561 = vmatpush1.msra.mxu1 %v9930_v63  ;;  %2492 = vmatpush1.msra.mxu0 %v9959_v20  ;;  %v10106_v63 = vld [vmem:[%s9751_s7 + $0x190] sm:$0xff]  ;;  %13815 = vst [vmem:[#allocation43_spill] sm:$0xff] %v10114_v59 }
 0x386   :  { %2562 = vmatprep.subr.mxu1 %v9938_v6  ;;  %2493 = vmatprep.subr.mxu0 %v9967_v30  ;;  %v10098_v6 = vld [vmem:[%s9751_s7 + $0x198] sm:$0xff]  ;;  %13813 = vst [vmem:[#allocation39_spill] sm:$0xff] %v10106_v63 }
 0x387   :  { %2563 = vmatpush1.msra.mxu1 %v9946_v10  ;;  %2494 = vmatpush1.msra.mxu0 %v9975_v38  ;;  %v10090_v10 = vld [vmem:[%s9751_s7 + $0x1a0] sm:$0xff]  ;;  %13811 = vst [vmem:[#allocation35_spill] sm:$0xff] %v10098_v6 }
 0x388   :  { %2564 = vmatprep.subr.mxu1 %v9954_v14  ;;  %2495 = vmatprep.subr.mxu0 %v9983_v36  ;;  %v10082_v14 = vld [vmem:[%s9751_s7 + $0x1a8] sm:$0xff]  ;;  %13809 = vst [vmem:[#allocation31_spill] sm:$0xff] %v10090_v10 }
 0x389   :  { %2565 = vmatpush1.msra.mxu1 %v9962_v25  ;;  %2496 = vmatpush1.msra.mxu0 %v9991_v47  ;;  %v10074_v25 = vld [vmem:[%s9751_s7 + $0x1b0] sm:$0xff]  ;;  %13807 = vst [vmem:[#allocation27_spill] sm:$0xff] %v10082_v14 }
 0x38a   :  { %2566 = vmatprep.subr.mxu1 %v9970_v34  ;;  %2497 = vmatprep.subr.mxu0 %v9999_v2  ;;  %v10066_v34 = vld [vmem:[%s9751_s7 + $0x1b8] sm:$0xff]  ;;  %13805 = vst [vmem:[#allocation23_spill] sm:$0xff] %v10074_v25 }
 0x38b   :  { %2567 = vmatpush1.msra.mxu1 %v9978_v49  ;;  %2498 = vmatpush1.msra.mxu0 %v10007_v56  ;;  %v10058_v49 = vld [vmem:[%s9751_s7 + $0x1c0] sm:$0xff]  ;;  %13804 = vst [vmem:[#allocation22_spill] sm:$0xff] %v10066_v34 }
 0x38c   :  { %2568 = vmatprep.subr.mxu1 %v9986_v45  ;;  %2499 = vmatprep.subr.mxu0 %v10015_v62  ;;  %v10050_v45 = vld [vmem:[%s9751_s7 + $0x1c8] sm:$0xff]  ;;  %13803 = vst [vmem:[#allocation21_spill] sm:$0xff] %v10058_v49 }
 0x38d   :  { %2569 = vmatpush1.msra.mxu1 %v9994_v1  ;;  %2500 = vmatpush2.msra.mxu0 %v10023_v28  ;;  %v10042_v1 = vld [vmem:[%s9751_s7 + $0x1d0] sm:$0xff]  ;;  %13802 = vst [vmem:[#allocation20_spill] sm:$0xff] %v10050_v45 }
 0x38e   :  { %2570 = vmatprep.subr.mxu1 %v10002_v7  ;;  %v10034_v7 = vld [vmem:[%s9751_s7 + $0x1d8] sm:$0xff]  ;;  %13801 = vst [vmem:[#allocation19_spill] sm:$0xff] %v10042_v1 }
 0x38f   :  { %2571 = vmatpush2.msra.mxu1 %v10010_v9  ;;  %v10031_v9 = vld [vmem:[%s9751_s7 + $0x3e8] sm:$0xff]  ;;  %13800 = vst [vmem:[#allocation18_spill] sm:$0xff] %v10034_v7 }
 0x390   :  { %2572 = vmatprep.subr.mxu1 %v10018_v5  ;;  %2501 = vmatprep.subr.mxu0 %v10031_v9  ;;  %v10039_v5 = vld [vmem:[%s9751_s7 + $0x3e0] sm:$0xff] }
 0x391   :  { %2573 = vmatpush2.msra.mxu1 %v10026_v40  ;;  %2502 = vmatpush2.msra.mxu0 %v10039_v5  ;;  %v10047_v40 = vld [vmem:[%s9751_s7 + $0x3d8] sm:$0xff] }
 0x392   :  { %2574 = vmatprep.subr.mxu1 %v10034_v7  ;;  %2503 = vmatprep.subr.mxu0 %v10047_v40  ;;  %v10055_v7 = vld [vmem:[%s9751_s7 + $0x3d0] sm:$0xff] }
 0x393   :  { %2575 = vmatpush2.msra.mxu1 %v10042_v1  ;;  %2504 = vmatpush2.msra.mxu0 %v10055_v7  ;;  %v10063_v1 = vld [vmem:[%s9751_s7 + $0x3c8] sm:$0xff] }
 0x394   :  { %2576 = vmatprep.subr.mxu1 %v10050_v45  ;;  %2505 = vmatprep.subr.mxu0 %v10063_v1  ;;  %v10071_v45 = vld [vmem:[%s9751_s7 + $0x3c0] sm:$0xff] }
 0x395   :  { %2577 = vmatpush2.msra.mxu1 %v10058_v49  ;;  %2506 = vmatpush2.msra.mxu0 %v10071_v45  ;;  %v10079_v49 = vld [vmem:[%s9751_s7 + $0x3b8] sm:$0xff] }
 0x396   :  { %2578 = vmatprep.subr.mxu1 %v10066_v34  ;;  %13806 = vst [vmem:[#allocation25_spill] sm:$0xff] %v10079_v49  ;;  %2507 = vmatprep.subr.mxu0 %v10079_v49  ;;  %v10087_v34 = vld [vmem:[%s9751_s7 + $0x3b0] sm:$0xff] }
 0x397   :  { %2579 = vmatpush2.msra.mxu1 %v10074_v25  ;;  %13808 = vst [vmem:[#allocation29_spill] sm:$0xff] %v10087_v34  ;;  %2508 = vmatpush2.msra.mxu0 %v10087_v34  ;;  %v10095_v25 = vld [vmem:[%s9751_s7 + $0x3a8] sm:$0xff] }
 0x398   :  { %2580 = vmatprep.subr.mxu1 %v10082_v14  ;;  %13810 = vst [vmem:[#allocation33_spill] sm:$0xff] %v10095_v25  ;;  %2509 = vmatprep.subr.mxu0 %v10095_v25  ;;  %v10103_v14 = vld [vmem:[%s9751_s7 + $0x3a0] sm:$0xff]  ;;  %v13853_v25 = vld [vmem:[#allocation75_spill] sm:$0xff] }
 0x399   :  { %2581 = vmatpush2.msra.mxu1 %v10090_v10  ;;  %13812 = vst [vmem:[#allocation37_spill] sm:$0xff] %v10103_v14  ;;  %2510 = vmatpush2.msra.mxu0 %v10103_v14  ;;  %v10111_v10 = vld [vmem:[%s9751_s7 + $0x398] sm:$0xff] }
 0x39a   :  { %2582 = vmatprep.subr.mxu1 %v10098_v6  ;;  %13814 = vst [vmem:[#allocation41_spill] sm:$0xff] %v10111_v10  ;;  %2511 = vmatprep.subr.mxu0 %v10111_v10  ;;  %v10119_v6 = vld [vmem:[%s9751_s7 + $0x390] sm:$0xff] }
 0x39b   :  { %2583 = vmatpush2.msra.mxu1 %v10106_v63  ;;  %13816 = vst [vmem:[#allocation45_spill] sm:$0xff] %v10119_v6  ;;  %2512 = vmatpush2.msra.mxu0 %v10119_v6  ;;  %v10127_v63 = vld [vmem:[%s9751_s7 + $0x388] sm:$0xff] }
 0x39c   :  { %2584 = vmatprep.subr.mxu1 %v10114_v59  ;;  %13818 = vst [vmem:[#allocation49_spill] sm:$0xff] %v10127_v63  ;;  %2513 = vmatprep.subr.mxu0 %v10127_v63  ;;  %v10135_v59 = vld [vmem:[%s9751_s7 + $0x380] sm:$0xff] }
 0x39d   :  { %2585 = vmatpush2.msra.mxu1 %v10122_v55  ;;  %13820 = vst [vmem:[#allocation53_spill] sm:$0xff] %v10135_v59  ;;  %2514 = vmatpush2.msra.mxu0 %v10135_v59  ;;  %v10143_v55 = vld [vmem:[%s9751_s7 + $0x378] sm:$0xff] }
 0x39e   :  { %2586 = vmatprep.subr.mxu1 %v10130_v43  ;;  %13822 = vst [vmem:[#allocation57_spill] sm:$0xff] %v10143_v55  ;;  %2515 = vmatprep.subr.mxu0 %v10143_v55  ;;  %v10151_v43 = vld [vmem:[%s9751_s7 + $0x370] sm:$0xff]  ;;  %v10238_v55 = vld [vmem:[%s9751_s7 + $0x108] sm:$0xff] }
 0x39f   :  { %2587 = vmatpush2.msra.mxu1 %v10138_v39  ;;  %13824 = vst [vmem:[#allocation61_spill] sm:$0xff] %v10151_v43  ;;  %2516 = vmatpush2.msra.mxu0 %v10151_v43  ;;  %v10159_v39 = vld [vmem:[%s9751_s7 + $0x368] sm:$0xff]  ;;  %v10227_v43 = vld [vmem:[%s9751_s7 + $0x320] sm:$0xff]  ;;  %13847 = vst [vmem:[#allocation82_spill] sm:$0xff] %v10238_v55 }
 0x3a0   :  { %2588 = vmatprep.subr.mxu1 %v10146_v33  ;;  %13826 = vst [vmem:[#allocation63_spill] sm:$0xff] %v10159_v39  ;;  %2517 = vmatprep.subr.mxu0 %v10159_v39  ;;  %v10167_v33 = vld [vmem:[%s9751_s7 + $0x360] sm:$0xff]  ;;  %13844 = vst [vmem:[#allocation79_spill] sm:$0xff] %v10227_v43 }
 0x3a1   :  { %2589 = vmatpush2.msra.mxu1 %v10154_v26  ;;  %13828 = vst [vmem:[#allocation65_spill] sm:$0xff] %v10167_v33  ;;  %2518 = vmatpush2.msra.mxu0 %v10167_v33  ;;  %v10175_v26 = vld [vmem:[%s9751_s7 + $0x358] sm:$0xff]  ;;  %v10213_v33 = vld [vmem:[%s9751_s7 + $0x330] sm:$0xff]  ;;  %v10216_v39 = vld [vmem:[%s9751_s7 + $0x120] sm:$0xff] }
 0x3a2   :  { %2590 = vmatprep.subr.mxu1 %v10162_v24  ;;  %13830 = vst [vmem:[#allocation67_spill] sm:$0xff] %v10175_v26  ;;  %2519 = vmatprep.subr.mxu0 %v10175_v26  ;;  %v10183_v24 = vld [vmem:[%s9751_s7 + $0x350] sm:$0xff]  ;;  %v10197_v26 = vld [vmem:[%s9751_s7 + $0x340] sm:$0xff]  ;;  %13840 = vst [vmem:[#allocation40_spill] sm:$0xff] %v10213_v33 }
 0x3a3   :  { %2591 = vmatpush2.msra.mxu1 %v10170_v19  ;;  %13832 = vst [vmem:[#allocation69_spill] sm:$0xff] %v10183_v24  ;;  %2520 = vmatpush2.msra.mxu0 %v10183_v24  ;;  %v10191_v19 = vld [vmem:[%s9751_s7 + $0x348] sm:$0xff]  ;;  %13836 = vst [vmem:[#allocation72_spill] sm:$0xff] %v10197_v26  ;;  %v10205_v24 = vld [vmem:[%s9751_s7 + $0x338] sm:$0xff] }
 0x3a4   :  { %2592 = vmatprep.subr.mxu1 %v10178_v23  ;;  %13834 = vst [vmem:[#allocation71_spill] sm:$0xff] %v10191_v19  ;;  %2521 = vmatprep.subr.mxu0 %v10191_v19  ;;  %v10202_v23 = vld [vmem:[%s9751_s7 + $0x130] sm:$0xff]  ;;  %13838 = vst [vmem:[#allocation74_spill] sm:$0xff] %v10205_v24  ;;  %v10219_v19 = vld [vmem:[%s9751_s7 + $0x328] sm:$0xff] }
 0x3a5   :  { %2593 = vmatpush2.msra.mxu1 %v10186_v16  ;;  %13837 = vst [vmem:[#allocation36_spill] sm:$0xff] %v10202_v23  ;;  %v10208_v16 = vld [vmem:[%s9751_s7 + $0x128] sm:$0xff]  ;;  %2522 = vmatpush2.msra.mxu0 %v10197_v26  ;;  %13841 = vst [vmem:[#allocation76_spill] sm:$0xff] %v10216_v39  ;;  %v10230_v26 = vld [vmem:[%s9751_s7 + $0x110] sm:$0xff] }
 0x3a6   :  { %2594 = vmatprep.subr.mxu1 %v10194_v0  ;;  %13839 = vst [vmem:[#allocation38_spill] sm:$0xff] %v10208_v16  ;;  %13842 = vst [vmem:[#allocation77_spill] sm:$0xff] %v10219_v19  ;;  %2523 = vmatprep.subr.mxu0 %v10205_v24  ;;  %v10224_v0 = vld [vmem:[%s9751_s7 + $0x118] sm:$0xff]  ;;  %v10246_v24 = vld [vmem:[%s9751_s7 + $0x100] sm:$0xff] }
 0x3a7   :  { %2595 = vmatpush2.msra.mxu1 %v10202_v23  ;;  %13843 = vst [vmem:[#allocation78_spill] sm:$0xff] %v10224_v0  ;;  %13845 = vst [vmem:[#allocation80_spill] sm:$0xff] %v10230_v26  ;;  %2524 = vmatpush2.msra.mxu0 %v10213_v33  ;;  %v10235_v23 = vld [vmem:[%s9751_s7 + $0x318] sm:$0xff]  ;;  %v10251_v33 = vld [vmem:[%s9751_s7 + $0x308] sm:$0xff] }
 0x3a8   :  { %2596 = vmatprep.subr.mxu1 %v10208_v16  ;;  %13846 = vst [vmem:[#allocation81_spill] sm:$0xff] %v10235_v23  ;;  %2525 = vmatprep.subr.mxu0 %v10219_v19  ;;  %v10243_v16 = vld [vmem:[%s9751_s7 + $0x310] sm:$0xff]  ;;  %13849 = vst [vmem:[#allocation84_spill] sm:$0xff] %v10246_v24 }
 0x3a9   :  { %2597 = vmatpush2.msra.mxu1 %v10216_v39  ;;  %13848 = vst [vmem:[#allocation83_spill] sm:$0xff] %v10243_v16  ;;  %2526 = vmatpush2.msra.mxu0 %v10227_v43  ;;  %13850 = vst [vmem:[#allocation85_spill] sm:$0xff] %v10251_v33  ;;  %v10258_v39 = vld [vmem:[%s9751_s7 + $0x300] sm:$0xff] }
 0x3aa   :  { %2598 = vmatprep.subr.mxu1 %v10224_v0  ;;  %2527 = vmatprep.subr.mxu0 %v10235_v23  ;;  %13851 = vst [vmem:[#allocation86_spill] sm:$0xff] %v10258_v39  ;;  %v10264_v0 = vld [vmem:[%s9751_s7 + $0x4f8] sm:$0xff] }
 0x3ab   :  { %2599 = vmatpush2.msra.mxu1 %v10230_v26  ;;  %2528 = vmatpush2.msra.mxu0 %v10243_v16  ;;  %13852 = vst [vmem:[#allocation87_spill] sm:$0xff] %v10264_v0 }
 0x3ac   :  { %2600 = vmatprep.subr.mxu1 %v10238_v55  ;;  %2529 = vmatprep.subr.mxu0 %v10251_v33 }
 0x3ad   :  { %2601 = vmatpush2.msra.mxu1 %v10246_v24  ;;  %2530 = vmatpush2.msra.mxu0 %v10258_v39 }
 0x3ae   :  { %2716 = vmatprep.subr.mxu1 %v9755_v51  ;;  %2617 = vmatprep.subr.mxu0 %v10264_v0 }
 0x42c   :  { %v2086_v26 = vpop.f32.mrf.mxu0 }
 0x42d   :  { %v2092_v23 = vmul.f32 0.03125, %v2086_v26 }
 0x42e   :  { %v2088_v43 = vpop.f32.mrf.mxu0  ;;  %v2160_v55 = vpop.f32.mrf.mxu1 }
 0x42f   :  { %v2167_v19 = vmul.f32 %v2092_v23, %v2092_v23  ;;  %v2093_v16 = vmul.f32 0.03125, %v2088_v43  ;;  %v2165_v59 = vmul.f32 0.03125, %v2160_v55  ;;  %v2171_v55 = vld [vmem:[%s6595_s15] sm:$0x3]  ;;  %s6610_s15 = sld [smem:[%s13337_s0 + %s8456_s12]]  }
 0x430   :  { %v2162_v24 = vpop.f32.mrf.mxu1 }
 0x431   :  { %v2168_v63 = vmul.f32 %v2093_v16, %v2093_v16  ;;  %v2169_v6 = vsub.f32 %v2165_v59, %v2167_v19  ;;  %v2166_v10 = vmul.f32 0.03125, %v2162_v24 }
 0x433   :  { %v2172_v33 = vadd.f32 1e-05, %v2169_v6  ;;  %v2170_v14 = vsub.f32 %v2166_v10, %v2168_v63  ;;  %v2195_v10 = vld [vmem:[%s6596_s19] sm:$0x3]  ;;  %s6611_s19 = sld [smem:[%s13337_s0 + %s8457_s16]]  }
 0x435   :  { %v2173_v51 = vadd.f32 1e-05, %v2170_v14  ;;  %8363 = vrsqrt.f32 %v2172_v33 }
 0x437   :  { %8365 = vrsqrt.f32 %v2173_v51 }
 0x442   :  { %v8364_v26 = vpop.eup %8363 }
 0x444   :  { %v8366_v0 = vpop.eup %8365 }
 0x445   :  { %v2178_v39 = vcombine.low %v8364_v26, %v8366_v0 }
 0x447   :  { %v2185_v43 = vrot.slane %v2178_v39, %v13853_v25 }
 0x449   :  { %v2192_v34 = vrot.slane %v2185_v43, %v13853_v25 }
 0x44b   :  { %v2194_v19 = vmul.f32 %v2192_v34, %v2171_v55 }
 0x44d   :  { %v2200_v24 = vrot.slane %v2194_v19, %v13775_v37  ;;  %v2204_v33 = vrot.slane %v2194_v19, %v13774_v31 }
 0x44f   :  { %v2207_v59 = vmul.f32 %v2200_v24, %v2092_v23  ;;  %v2208_v63 = vmul.f32 %v2204_v33, %v2093_v16  ;;  %v2228_v34 = vmul.f32 %v2200_v24, %v9765_v50  ;;  %v2229_v51 = vmul.f32 %v2204_v33, %v9763_v46 }
 0x450   :  { %v2251_v55 = vmul.f32 %v2200_v24, %v9777_v60  ;;  %v2252_v23 = vmul.f32 %v2204_v33, %v9783_v15 }
 0x451   :  { %v2211_v6 = vcombine.low %v2207_v59, %v2208_v63 }
 0x453   :  { %v2218_v0 = vrot.slane %v2211_v6, %v13853_v25 }
 0x455   :  { %v2225_v39 = vrot.slane %v2218_v0, %v13853_v25  ;;  %v13878_v25 = vld [vmem:[#allocation77_spill] sm:$0xff] }
 0x457   :  { %v2227_v14 = vsub.f32 %v2195_v10, %v2225_v39 }
 0x459   :  { %v2234_v26 = vrot.slane %v2227_v14, %v13775_v37  ;;  %v2238_v43 = vrot.slane %v2227_v14, %v13774_v31  ;;  %v13880_v37 = vld [vmem:[#allocation79_spill] sm:$0xff] }
 0x45b   :  { %v2241_v16 = vadd.f32 %v2234_v26, %v2228_v34  ;;  %v2242_v19 = vadd.f32 %v2238_v43, %v2229_v51  ;;  %v2253_v59 = vadd.f32 %v2251_v55, %v2234_v26  ;;  %v2254_v63 = vadd.f32 %v2252_v23, %v2238_v43  ;;  %v10287_v51 = vld [vmem:[%s9751_s7 + $0x4f0] sm:$0xff]  ;;  %v10295_v43 = vld [vmem:[%s9751_s7 + $0x4e0] sm:$0xff] }
 0x45c   :  { %v10314_v55 = vld [vmem:[%s9751_s7 + $0x4c0] sm:$0xff]  ;;  %v10484_v23 = vld [vmem:[%s9751_s7 + $0x5b0] sm:$0xff] }
 0x45d   :  { %v2245_v6 = vrot.slane %v2241_v16, 7  ;;  %v2246_v49 = vrot.slane %v2242_v19, 7  ;;  %v2257_v0 = vrot.slane %v2253_v59, 7  ;;  %v2258_v10 = vrot.slane %v2254_v63, 7  ;;  %v10489_v16 = vld [vmem:[%s9751_s7 + $0x5a8] sm:$0xff]  ;;  %v10494_v19 = vld [vmem:[%s9751_s7 + $0x5a0] sm:$0xff] }
 0x45e   :  { %v13857_v59 = vld [vmem:[#allocation37_spill] sm:$0xff]  ;;  %v10499_v63 = vld [vmem:[%s9751_s7 + $0x598] sm:$0xff] }
 0x45f   :  { %2249 = vst [vmem:[#allocation3 + $0x10] sm:$0x1e] %v2245_v6  ;;  %2261 = vst [vmem:[#allocation3 + $0x18] sm:$0x1e] %v2257_v0  ;;  %v13858_v6 = vld [vmem:[#allocation41_spill] sm:$0xff]  ;;  %v10504_v0 = vld [vmem:[%s9751_s7 + $0x590] sm:$0xff] }
 0x460   :  { %2262 = vst [vmem:[#allocation3 + $0x8] sm:$0x1e] %v2258_v10  ;;  %2250 = vst [vmem:[#allocation3] sm:$0x1e] %v2246_v49  ;;  %v10291_v49 = vld [vmem:[%s9751_s7 + $0x4e8] sm:$0xff] }
 0x461   :  { %v13859_v10 = vld [vmem:[#allocation45_spill] sm:$0xff] }
 0x466   :  { %v2457_v50 = vld [vmem:[#allocation3 + $0x10] sm:$0xf]  ;;  %v2708_v31 = vld [vmem:[#allocation3 + $0x18] sm:$0x1e] }
 0x467   :  { %v2458_v46 = vld [vmem:[#allocation3] sm:$0xf]  ;;  %v2709_v15 = vld [vmem:[#allocation3 + $0x8] sm:$0x1e]  ;;  %v2459_v24 = vld [vmem:[#allocation3 + $0x10] sm:$0x1e] }
 0x468   :  { %v2460_v39 = vld [vmem:[#allocation3] sm:$0x1e]  ;;  %2602 = vmatprep.mubr.f32.mxu1 %v2458_v46  ;;  %v2713_v33 = vrot.slane %v2709_v15, 1  ;;  %v2463_v14 = vrot.slane %v2459_v24, 1  ;;  %v10509_v46 = vld [vmem:[%s9751_s7 + $0x588] sm:$0xff]  ;;  %v10519_v15 = vld [vmem:[%s9751_s7 + $0x578] sm:$0xff] }
 0x469   :  { %v2464_v60 = vrot.slane %v2460_v39, 1  ;;  %2603 = vmatmul.mubr.f32.vlgmr.msra.gmra.mxu1 %v2457_v50  ;;  %v2610_v34 = vld [vmem:[#allocation3] sm:$0x3c]  ;;  %v13860_v50 = vld [vmem:[#allocation49_spill] sm:$0xff] }
 0x46a   :  { %2717 = vmatpush1.msra.mxu1 %v9792_v42  ;;  %2780 = vmatprep.mubr.f32.mxu1 %v2713_v33  ;;  %v2614_v26 = vrot.slane %v2610_v34, 2  ;;  %v10299_v42 = vld [vmem:[%s9751_s7 + $0x4d8] sm:$0xff]  ;;  %v10514_v39 = vld [vmem:[%s9751_s7 + $0x580] sm:$0xff]  ;;  %v13862_v24 = vld [vmem:[#allocation57_spill] sm:$0xff] }
 0x46b   :  { %2531 = vmatprep.mubr.f32.mxu0 %v2464_v60  ;;  %2718 = vmatprep.subr.mxu1 %v9795_v54  ;;  %v10304_v54 = vld [vmem:[%s9751_s7 + $0x4d0] sm:$0xff]  ;;  %v13861_v60 = vld [vmem:[#allocation53_spill] sm:$0xff] }
 0x46c   :  { %2532 = vmatmul.mubr.f32.vlgmr.msra.gmra.mxu0 %v2463_v14  ;;  %2719 = vmatpush1.msra.mxu1 %v9804_v3  ;;  %v10309_v3 = vld [vmem:[%s9751_s7 + $0x4c8] sm:$0xff]  ;;  %v10524_v33 = vld [vmem:[%s9751_s7 + $0x570] sm:$0xff] }
 0x46d   :  { %2618 = vmatpush1.msra.mxu0 %v10287_v51  ;;  %2681 = vmatprep.mubr.f32.mxu0 %v2614_v26  ;;  %v13863_v14 = vld [vmem:[#allocation61_spill] sm:$0xff]  ;;  %v13864_v26 = vld [vmem:[#allocation63_spill] sm:$0xff] }
 0x46e   :  { %2619 = vmatprep.subr.mxu0 %v10291_v49  ;;  %2720 = vmatprep.subr.mxu1 %v9809_v58  ;;  %v10319_v58 = vld [vmem:[%s9751_s7 + $0x4b8] sm:$0xff]  ;;  %v10529_v34 = vld [vmem:[%s9751_s7 + $0x568] sm:$0xff] }
 0x46f   :  { %2620 = vmatpush1.msra.mxu0 %v10295_v43  ;;  %2721 = vmatpush1.msra.mxu1 %v9814_v11  ;;  %v10324_v11 = vld [vmem:[%s9751_s7 + $0x4b0] sm:$0xff] }
 0x470   :  { %2621 = vmatprep.subr.mxu0 %v10299_v42  ;;  %2722 = vmatprep.subr.mxu1 %v9819_v13  ;;  %v10329_v13 = vld [vmem:[%s9751_s7 + $0x4a8] sm:$0xff] }
 0x471   :  { %2622 = vmatpush1.msra.mxu0 %v10304_v54  ;;  %2723 = vmatpush1.msra.mxu1 %v9824_v32  ;;  %v10334_v32 = vld [vmem:[%s9751_s7 + $0x4a0] sm:$0xff] }
 0x472   :  { %2623 = vmatprep.subr.mxu0 %v10309_v3  ;;  %2724 = vmatprep.subr.mxu1 %v9829_v27  ;;  %v10339_v27 = vld [vmem:[%s9751_s7 + $0x498] sm:$0xff] }
 0x473   :  { %2624 = vmatpush1.msra.mxu0 %v10314_v55  ;;  %2725 = vmatpush1.msra.mxu1 %v9834_v44  ;;  %v10344_v44 = vld [vmem:[%s9751_s7 + $0x490] sm:$0xff] }
 0x474   :  { %2625 = vmatprep.subr.mxu0 %v10319_v58  ;;  %2726 = vmatprep.subr.mxu1 %v9839_v22  ;;  %v10349_v22 = vld [vmem:[%s9751_s7 + $0x488] sm:$0xff] }
 0x475   :  { %2626 = vmatpush1.msra.mxu0 %v10324_v11  ;;  %2727 = vmatpush1.msra.mxu1 %v9847_v52  ;;  %v10354_v52 = vld [vmem:[%s9751_s7 + $0x480] sm:$0xff] }
 0x476   :  { %2627 = vmatprep.subr.mxu0 %v10329_v13  ;;  %2728 = vmatprep.subr.mxu1 %v9855_v18  ;;  %v10359_v18 = vld [vmem:[%s9751_s7 + $0x478] sm:$0xff] }
 0x477   :  { %2628 = vmatpush1.msra.mxu0 %v10334_v32  ;;  %2729 = vmatpush1.msra.mxu1 %v9863_v17  ;;  %v10364_v17 = vld [vmem:[%s9751_s7 + $0x470] sm:$0xff] }
 0x478   :  { %2629 = vmatprep.subr.mxu0 %v10339_v27  ;;  %2730 = vmatprep.subr.mxu1 %v9871_v21  ;;  %v10369_v21 = vld [vmem:[%s9751_s7 + $0x468] sm:$0xff] }
 0x479   :  { %2630 = vmatpush1.msra.mxu0 %v10344_v44  ;;  %2731 = vmatpush1.msra.mxu1 %v9879_v48  ;;  %v10374_v48 = vld [vmem:[%s9751_s7 + $0x460] sm:$0xff] }
 0x47a   :  { %2631 = vmatprep.subr.mxu0 %v10349_v22  ;;  %2732 = vmatprep.subr.mxu1 %v9887_v29  ;;  %v10379_v29 = vld [vmem:[%s9751_s7 + $0x458] sm:$0xff] }
 0x47b   :  { %2632 = vmatpush1.msra.mxu0 %v10354_v52  ;;  %2733 = vmatpush1.msra.mxu1 %v9895_v35  ;;  %v10384_v35 = vld [vmem:[%s9751_s7 + $0x450] sm:$0xff] }
 0x47c   :  { %2633 = vmatprep.subr.mxu0 %v10359_v18  ;;  %2734 = vmatprep.subr.mxu1 %v9903_v41  ;;  %v10389_v41 = vld [vmem:[%s9751_s7 + $0x448] sm:$0xff] }
 0x47d   :  { %2634 = vmatpush1.msra.mxu0 %v10364_v17  ;;  %2735 = vmatpush1.msra.mxu1 %v9911_v53  ;;  %v10394_v53 = vld [vmem:[%s9751_s7 + $0x440] sm:$0xff] }
 0x47e   :  { %2635 = vmatprep.subr.mxu0 %v10369_v21  ;;  %2736 = vmatprep.subr.mxu1 %v9919_v57  ;;  %v10399_v57 = vld [vmem:[%s9751_s7 + $0x438] sm:$0xff] }
 0x47f   :  { %2636 = vmatpush1.msra.mxu0 %v10374_v48  ;;  %2737 = vmatpush1.msra.mxu1 %v9927_v61  ;;  %v10404_v61 = vld [vmem:[%s9751_s7 + $0x430] sm:$0xff] }
 0x480   :  { %2637 = vmatprep.subr.mxu0 %v10379_v29  ;;  %2738 = vmatprep.subr.mxu1 %v9935_v4  ;;  %v10409_v4 = vld [vmem:[%s9751_s7 + $0x428] sm:$0xff] }
 0x481   :  { %2638 = vmatpush1.msra.mxu0 %v10384_v35  ;;  %2739 = vmatpush1.msra.mxu1 %v9943_v8  ;;  %v10414_v8 = vld [vmem:[%s9751_s7 + $0x420] sm:$0xff] }
 0x482   :  { %2639 = vmatprep.subr.mxu0 %v10389_v41  ;;  %2740 = vmatprep.subr.mxu1 %v9951_v12  ;;  %v10419_v12 = vld [vmem:[%s9751_s7 + $0x418] sm:$0xff] }
 0x483   :  { %2640 = vmatpush1.msra.mxu0 %v10394_v53  ;;  %2741 = vmatpush1.msra.mxu1 %v9959_v20  ;;  %v10424_v20 = vld [vmem:[%s9751_s7 + $0x410] sm:$0xff] }
 0x484   :  { %2641 = vmatprep.subr.mxu0 %v10399_v57  ;;  %2742 = vmatprep.subr.mxu1 %v9967_v30  ;;  %v10429_v30 = vld [vmem:[%s9751_s7 + $0x408] sm:$0xff] }
 0x485   :  { %2642 = vmatpush1.msra.mxu0 %v10404_v61  ;;  %2743 = vmatpush1.msra.mxu1 %v9975_v38  ;;  %v10434_v38 = vld [vmem:[%s9751_s7 + $0x400] sm:$0xff] }
 0x486   :  { %2643 = vmatprep.subr.mxu0 %v10409_v4  ;;  %2744 = vmatprep.subr.mxu1 %v9983_v36  ;;  %v10439_v36 = vld [vmem:[%s9751_s7 + $0x5f8] sm:$0xff] }
 0x487   :  { %2644 = vmatpush1.msra.mxu0 %v10414_v8  ;;  %2745 = vmatpush1.msra.mxu1 %v9991_v47  ;;  %v10444_v47 = vld [vmem:[%s9751_s7 + $0x5f0] sm:$0xff] }
 0x488   :  { %2645 = vmatprep.subr.mxu0 %v10419_v12  ;;  %2746 = vmatprep.subr.mxu1 %v9999_v2  ;;  %v10449_v2 = vld [vmem:[%s9751_s7 + $0x5e8] sm:$0xff] }
 0x489   :  { %2646 = vmatpush1.msra.mxu0 %v10424_v20  ;;  %2747 = vmatpush1.msra.mxu1 %v10007_v56  ;;  %v10454_v56 = vld [vmem:[%s9751_s7 + $0x5e0] sm:$0xff] }
 0x48a   :  { %2647 = vmatprep.subr.mxu0 %v10429_v30  ;;  %2748 = vmatprep.subr.mxu1 %v10015_v62  ;;  %v10459_v62 = vld [vmem:[%s9751_s7 + $0x5d8] sm:$0xff] }
 0x48b   :  { %2648 = vmatpush1.msra.mxu0 %v10434_v38  ;;  %2749 = vmatpush2.msra.mxu1 %v10023_v28  ;;  %v10464_v28 = vld [vmem:[%s9751_s7 + $0x5d0] sm:$0xff] }
 0x48c   :  { %2649 = vmatprep.subr.mxu0 %v10439_v36  ;;  %2750 = vmatprep.subr.mxu1 %v10031_v9  ;;  %v10469_v9 = vld [vmem:[%s9751_s7 + $0x5c8] sm:$0xff] }
 0x48d   :  { %2650 = vmatpush2.msra.mxu0 %v10444_v47  ;;  %2751 = vmatpush2.msra.mxu1 %v10039_v5  ;;  %v10474_v5 = vld [vmem:[%s9751_s7 + $0x5c0] sm:$0xff] }
 0x48e   :  { %2651 = vmatprep.subr.mxu0 %v10449_v2  ;;  %2752 = vmatprep.subr.mxu1 %v10047_v40  ;;  %v10479_v40 = vld [vmem:[%s9751_s7 + $0x5b8] sm:$0xff] }
 0x48f   :  { %2652 = vmatpush2.msra.mxu0 %v10454_v56  ;;  %2753 = vmatpush2.msra.mxu1 %v10055_v7  ;;  %v13854_v7 = vld [vmem:[#allocation25_spill] sm:$0xff] }
 0x490   :  { %2653 = vmatprep.subr.mxu0 %v10459_v62  ;;  %2754 = vmatprep.subr.mxu1 %v10063_v1  ;;  %v13855_v1 = vld [vmem:[#allocation29_spill] sm:$0xff] }
 0x491   :  { %2654 = vmatpush2.msra.mxu0 %v10464_v28  ;;  %2755 = vmatpush2.msra.mxu1 %v10071_v45  ;;  %v13856_v45 = vld [vmem:[#allocation33_spill] sm:$0xff] }
 0x492   :  { %2655 = vmatprep.subr.mxu0 %v10469_v9  ;;  %2756 = vmatprep.subr.mxu1 %v13854_v7  ;;  %v10534_v7 = vld [vmem:[%s9751_s7 + $0x560] sm:$0xff] }
 0x493   :  { %2656 = vmatpush2.msra.mxu0 %v10474_v5  ;;  %2757 = vmatpush2.msra.mxu1 %v13855_v1  ;;  %v13865_v1 = vld [vmem:[#allocation65_spill] sm:$0xff] }
 0x494   :  { %2657 = vmatprep.subr.mxu0 %v10479_v40  ;;  %2758 = vmatprep.subr.mxu1 %v13856_v45  ;;  %v10539_v45 = vld [vmem:[%s9751_s7 + $0x558] sm:$0xff] }
 0x495   :  { %2658 = vmatpush2.msra.mxu0 %v10484_v23  ;;  %2759 = vmatpush2.msra.mxu1 %v13857_v59  ;;  %v13866_v59 = vld [vmem:[#allocation67_spill] sm:$0xff] }
 0x496   :  { %2659 = vmatprep.subr.mxu0 %v10489_v16  ;;  %2760 = vmatprep.subr.mxu1 %v13858_v6  ;;  %v10544_v6 = vld [vmem:[%s9751_s7 + $0x550] sm:$0xff] }
 0x497   :  { %2660 = vmatpush2.msra.mxu0 %v10494_v19  ;;  %2761 = vmatpush2.msra.mxu1 %v13859_v10  ;;  %13867 = vst [vmem:[#allocation25_spill] sm:$0xff] %v10544_v6  ;;  %v13868_v10 = vld [vmem:[#allocation69_spill] sm:$0xff] }
 0x498   :  { %2661 = vmatprep.subr.mxu0 %v10499_v63  ;;  %2762 = vmatprep.subr.mxu1 %v13860_v50  ;;  %v10549_v50 = vld [vmem:[%s9751_s7 + $0x548] sm:$0xff] }
 0x499   :  { %2662 = vmatpush2.msra.mxu0 %v10504_v0  ;;  %2763 = vmatpush2.msra.mxu1 %v13861_v60  ;;  %13869 = vst [vmem:[#allocation29_spill] sm:$0xff] %v10549_v50  ;;  %v13870_v60 = vld [vmem:[#allocation71_spill] sm:$0xff] }
 0x49a   :  { %2663 = vmatprep.subr.mxu0 %v10509_v46  ;;  %2764 = vmatprep.subr.mxu1 %v13862_v24  ;;  %v10554_v24 = vld [vmem:[%s9751_s7 + $0x540] sm:$0xff] }
 0x49b   :  { %2664 = vmatpush2.msra.mxu0 %v10514_v39  ;;  %2765 = vmatpush2.msra.mxu1 %v13863_v14  ;;  %13871 = vst [vmem:[#allocation33_spill] sm:$0xff] %v10554_v24  ;;  %v13872_v14 = vld [vmem:[#allocation72_spill] sm:$0xff] }
 0x49c   :  { %2665 = vmatprep.subr.mxu0 %v10519_v15  ;;  %2766 = vmatprep.subr.mxu1 %v13864_v26  ;;  %v10559_v26 = vld [vmem:[%s9751_s7 + $0x538] sm:$0xff] }
 0x49d   :  { %2666 = vmatpush2.msra.mxu0 %v10524_v33  ;;  %2767 = vmatpush2.msra.mxu1 %v13865_v1  ;;  %13873 = vst [vmem:[#allocation37_spill] sm:$0xff] %v10559_v26  ;;  %v13874_v1 = vld [vmem:[#allocation74_spill] sm:$0xff] }
 0x49e   :  { %2667 = vmatprep.subr.mxu0 %v10529_v34  ;;  %2768 = vmatprep.subr.mxu1 %v13866_v59  ;;  %v10564_v59 = vld [vmem:[%s9751_s7 + $0x530] sm:$0xff] }
 0x49f   :  { %2668 = vmatpush2.msra.mxu0 %v10534_v7  ;;  %2769 = vmatpush2.msra.mxu1 %v13868_v10  ;;  %13875 = vst [vmem:[#allocation41_spill] sm:$0xff] %v10564_v59  ;;  %v13876_v10 = vld [vmem:[#allocation40_spill] sm:$0xff] }
 0x4a0   :  { %2669 = vmatprep.subr.mxu0 %v10539_v45  ;;  %2770 = vmatprep.subr.mxu1 %v13870_v60  ;;  %v10569_v60 = vld [vmem:[%s9751_s7 + $0x528] sm:$0xff] }
 0x4a1   :  { %2670 = vmatpush2.msra.mxu0 %v10544_v6  ;;  %2771 = vmatpush2.msra.mxu1 %v13872_v14  ;;  %13877 = vst [vmem:[#allocation45_spill] sm:$0xff] %v10569_v60  ;;  %v10574_v14 = vld [vmem:[%s9751_s7 + $0x520] sm:$0xff] }
 0x4a2   :  { %2671 = vmatprep.subr.mxu0 %v10549_v50  ;;  %2772 = vmatprep.subr.mxu1 %v13874_v1  ;;  %13879 = vst [vmem:[#allocation49_spill] sm:$0xff] %v10574_v14  ;;  %v10579_v1 = vld [vmem:[%s9751_s7 + $0x518] sm:$0xff]  ;;  %v2859_v50 = vld [vmem:[#allocation3 + $0x8] sm:$0x3c]  ;;  %v10594_v6 = vld [vmem:[%s9751_s7 + $0x500] sm:$0xff] }
 0x4a3   :  { %2672 = vmatpush2.msra.mxu0 %v10554_v24  ;;  %2773 = vmatpush2.msra.mxu1 %v13876_v10  ;;  %v13881_v24 = vld [vmem:[#allocation81_spill] sm:$0xff]  ;;  %v10584_v10 = vld [vmem:[%s9751_s7 + $0x510] sm:$0xff] }
 0x4a4   :  { %2673 = vmatprep.subr.mxu0 %v10559_v26  ;;  %2774 = vmatprep.subr.mxu1 %v13878_v25  ;;  %v13882_v26 = vld [vmem:[#allocation83_spill] sm:$0xff]  ;;  %v10589_v25 = vld [vmem:[%s9751_s7 + $0x508] sm:$0xff] }
 0x4a5   :  { %2674 = vmatpush2.msra.mxu0 %v10564_v59  ;;  %2775 = vmatpush2.msra.mxu1 %v13880_v37  ;;  %v13883_v59 = vld [vmem:[#allocation85_spill] sm:$0xff]  ;;  %v2712_v37 = vrot.slane %v2708_v31, 1  ;;  %v8405_v31 = vld [vmem:[%s9751_s7 + $0xf8] sm:$0xff] }
 0x4a6   :  { %2675 = vmatprep.subr.mxu0 %v10569_v60  ;;  %2776 = vmatprep.subr.mxu1 %v13881_v24  ;;  %v2609_v60 = vld [vmem:[#allocation3 + $0x10] sm:$0x3c] }
 0x4a7   :  { %2676 = vmatpush2.msra.mxu0 %v10574_v14  ;;  %2777 = vmatpush2.msra.mxu1 %v13882_v26  ;;  %v13884_v24 = vld [vmem:[#allocation86_spill] sm:$0xff]  ;;  %v2863_v26 = vrot.slane %v2859_v50, 2  ;;  %v13885_v14 = vld [vmem:[#allocation87_spill] sm:$0xff]  ;;  %v2707_v50 = vld [vmem:[#allocation3 + $0x8] sm:$0xf] }
 0x4a8   :  { %2677 = vmatprep.subr.mxu0 %v10579_v1  ;;  %2778 = vmatprep.subr.mxu1 %v13883_v59  ;;  %v2613_v59 = vrot.slane %v2609_v60, 2  ;;  %v8409_v60 = vld [vmem:[%s9751_s7 + $0xd8] sm:$0xff] }
 0x4a9   :  { %2678 = vmatpush2.msra.mxu0 %v10584_v10  ;;  %2779 = vmatpush2.msra.mxu1 %v13884_v24  ;;  %v8406_v24 = vld [vmem:[%s9751_s7 + $0xf0] sm:$0xff] }
 0x4aa   :  { %2679 = vmatprep.subr.mxu0 %v10589_v25  ;;  %2781 = vmatmul.mubr.f32.vlgmr.msra.gmra.mxu1 %v2712_v37  ;;  %v8414_v37 = vld [vmem:[%s9751_s7 + $0xb0] sm:$0xff] }
 0x4ab   :  { %2866 = vmatprep.subr.mxu1 %v13885_v14  ;;  %2680 = vmatpush2.msra.mxu0 %v10594_v6  ;;  %v8407_v14 = vld [vmem:[%s9751_s7 + $0xe8] sm:$0xff] }
 0x4ac   :  { %2867 = vmatpush1.msra.mxu1 %v10287_v51  ;;  %2930 = vmatprep.mubr.f32.mxu1 %v2863_v26  ;;  %v8408_v51 = vld [vmem:[%s9751_s7 + $0xe0] sm:$0xff]  ;;  %v13926_v26 = vld [vmem:[#allocation25_spill] sm:$0xff] }
 0x4ad   :  { %2682 = vmatmul.mubr.f32.vlgmr.msra.gmra.mxu0 %v2613_v59  ;;  %2787 = vmatprep.subr.mxu0 %v8405_v31  ;;  %v13928_v59 = vld [vmem:[#allocation29_spill] sm:$0xff] }
 0x4ae   :  { %2868 = vmatprep.subr.mxu1 %v10291_v49  ;;  %2788 = vmatpush1.msra.mxu0 %v8406_v24  ;;  %v8410_v49 = vld [vmem:[%s9751_s7 + $0xd0] sm:$0xff]  ;;  %v13930_v31 = vld [vmem:[#allocation33_spill] sm:$0xff] }
 0x4af   :  { %2851 = vmatprep.mubr.f32.mxu0 %v2707_v50  ;;  %2869 = vmatpush1.msra.mxu1 %v10295_v43  ;;  %v8411_v43 = vld [vmem:[%s9751_s7 + $0xc8] sm:$0xff] }
 0x4b0   :  { %2789 = vmatprep.subr.mxu0 %v8407_v14  ;;  %2870 = vmatprep.subr.mxu1 %v10299_v42  ;;  %v8412_v42 = vld [vmem:[%s9751_s7 + $0xc0] sm:$0xff]  ;;  %v13932_v24 = vld [vmem:[#allocation37_spill] sm:$0xff] }
 0x4b1   :  { %2790 = vmatpush1.msra.mxu0 %v8408_v51  ;;  %2871 = vmatpush1.msra.mxu1 %v10304_v54  ;;  %v8413_v54 = vld [vmem:[%s9751_s7 + $0xb8] sm:$0xff]  ;;  %v13934_v50 = vld [vmem:[#allocation41_spill] sm:$0xff]  ;;  %v13937_v51 = vld [vmem:[#allocation36_spill] sm:$0xff] }
 0x4b2   :  { %2791 = vmatprep.subr.mxu0 %v8409_v60  ;;  %2872 = vmatprep.subr.mxu1 %v10309_v3  ;;  %v8415_v3 = vld [vmem:[%s9751_s7 + $0xa8] sm:$0xff] }
 0x4b3   :  { %2792 = vmatpush1.msra.mxu0 %v8410_v49  ;;  %2873 = vmatpush1.msra.mxu1 %v10314_v55  ;;  %v8416_v55 = vld [vmem:[%s9751_s7 + $0xa0] sm:$0xff]  ;;  %v13936_v14 = vld [vmem:[#allocation45_spill] sm:$0xff]  ;;  %v2858_v49 = vld [vmem:[#allocation3 + $0x18] sm:$0x3c]  ;;  %s6609_s7 = sld [smem:[%s13337_s0 + %s8454_s4]]  }
 0x4b4   :  { %2793 = vmatprep.subr.mxu0 %v8411_v43  ;;  %2874 = vmatprep.subr.mxu1 %v10319_v58  ;;  %v13886_v58 = vld [vmem:[#allocation42_spill] sm:$0xff]  ;;  %v13938_v60 = vld [vmem:[#allocation49_spill] sm:$0xff] }
 0x4b5   :  { %2794 = vmatpush1.msra.mxu0 %v8412_v42  ;;  %2875 = vmatpush1.msra.mxu1 %v10324_v11  ;;  %v13887_v11 = vld [vmem:[#allocation44_spill] sm:$0xff]  ;;  %v13939_v43 = vld [vmem:[#allocation38_spill] sm:$0xff] }
 0x4b6   :  { %2795 = vmatprep.subr.mxu0 %v8413_v54  ;;  %2876 = vmatprep.subr.mxu1 %v10329_v13  ;;  %v13888_v13 = vld [vmem:[#allocation46_spill] sm:$0xff]  ;;  %v13940_v42 = vld [vmem:[#allocation76_spill] sm:$0xff] }
 0x4b7   :  { %2796 = vmatpush1.msra.mxu0 %v8414_v37  ;;  %2877 = vmatpush1.msra.mxu1 %v10334_v32  ;;  %v13889_v32 = vld [vmem:[#allocation48_spill] sm:$0xff]  ;;  %v13941_v54 = vld [vmem:[#allocation78_spill] sm:$0xff]  ;;  %v2862_v37 = vrot.slane %v2858_v49, 2 }
 0x4b8   :  { %2797 = vmatprep.subr.mxu0 %v8415_v3  ;;  %2878 = vmatprep.subr.mxu1 %v10339_v27  ;;  %v13890_v27 = vld [vmem:[#allocation50_spill] sm:$0xff]  ;;  %v13942_v3 = vld [vmem:[#allocation80_spill] sm:$0xff] }
 0x4b9   :  { %2798 = vmatpush1.msra.mxu0 %v8416_v55  ;;  %2879 = vmatpush1.msra.mxu1 %v10344_v44  ;;  %v13891_v44 = vld [vmem:[#allocation52_spill] sm:$0xff]  ;;  %v13943_v55 = vld [vmem:[#allocation82_spill] sm:$0xff] }
 0x4ba   :  { %2799 = vmatprep.subr.mxu0 %v13886_v58  ;;  %2880 = vmatprep.subr.mxu1 %v10349_v22  ;;  %v13892_v22 = vld [vmem:[#allocation54_spill] sm:$0xff]  ;;  %v13944_v58 = vld [vmem:[#allocation84_spill] sm:$0xff] }
 0x4bb   :  { %2800 = vmatpush1.msra.mxu0 %v13887_v11  ;;  %2881 = vmatpush1.msra.mxu1 %v10354_v52  ;;  %v13893_v52 = vld [vmem:[#allocation56_spill] sm:$0xff]  ;;  %v2706_v11 = vld [vmem:[#allocation3 + $0x18] sm:$0xf] }
 0x4bc   :  { %2801 = vmatprep.subr.mxu0 %v13888_v13  ;;  %2882 = vmatprep.subr.mxu1 %v10359_v18  ;;  %v13894_v18 = vld [vmem:[#allocation58_spill] sm:$0xff]  ;;  %v3038_v13 = vld [vmem:[%s10731_s23 + $0xd8] sm:$0xff]  ;;  %v3051_v49 = vld [vmem:[%s10731_s23 + $0x140] sm:$0xff] }
 0x4bd   :  { %2802 = vmatpush1.msra.mxu0 %v13889_v32  ;;  %2883 = vmatpush1.msra.mxu1 %v10364_v17  ;;  %v13895_v17 = vld [vmem:[#allocation60_spill] sm:$0xff]  ;;  %v3037_v32 = vld [vmem:[%s10731_s23 + $0xd0] sm:$0xff] }
 0x4be   :  { %2803 = vmatprep.subr.mxu0 %v13890_v27  ;;  %2884 = vmatprep.subr.mxu1 %v10369_v21  ;;  %v13896_v21 = vld [vmem:[#allocation62_spill] sm:$0xff]  ;;  %v3036_v27 = vld [vmem:[%s10731_s23 + $0xc8] sm:$0xff] }
 0x4bf   :  { %2804 = vmatpush1.msra.mxu0 %v13891_v44  ;;  %2885 = vmatpush1.msra.mxu1 %v10374_v48  ;;  %v13897_v48 = vld [vmem:[#allocation64_spill] sm:$0xff] }
 0x4c0   :  { %2805 = vmatprep.subr.mxu0 %v13892_v22  ;;  %2886 = vmatprep.subr.mxu1 %v10379_v29  ;;  %v13898_v29 = vld [vmem:[#allocation66_spill] sm:$0xff]  ;;  %v3035_v44 = vld [vmem:[%s10731_s23 + $0xc0] sm:$0xff]  ;;  %v3034_v22 = vld [vmem:[%s10731_s23 + $0xb8] sm:$0xff] }
 0x4c1   :  { %2806 = vmatpush1.msra.mxu0 %v13893_v52  ;;  %2887 = vmatpush1.msra.mxu1 %v10384_v35  ;;  %v13899_v35 = vld [vmem:[#allocation68_spill] sm:$0xff]  ;;  %v3033_v52 = vld [vmem:[%s10731_s23 + $0xb0] sm:$0xff] }
 0x4c2   :  { %2807 = vmatprep.subr.mxu0 %v13894_v18  ;;  %2888 = vmatprep.subr.mxu1 %v10389_v41  ;;  %v13900_v41 = vld [vmem:[#allocation70_spill] sm:$0xff]  ;;  %v3032_v18 = vld [vmem:[%s10731_s23 + $0xa8] sm:$0xff] }
 0x4c3   :  { %2808 = vmatpush1.msra.mxu0 %v13895_v17  ;;  %2889 = vmatpush1.msra.mxu1 %v10394_v53  ;;  %v13901_v53 = vld [vmem:[#allocation73_spill] sm:$0xff]  ;;  %v3031_v17 = vld [vmem:[%s10731_s23 + $0xa0] sm:$0xff] }
 0x4c4   :  { %2809 = vmatprep.subr.mxu0 %v13896_v21  ;;  %2890 = vmatprep.subr.mxu1 %v10399_v57  ;;  %v13902_v57 = vld [vmem:[#allocation10_spill] sm:$0xff]  ;;  %v3030_v21 = vld [vmem:[%s10731_s23 + $0x98] sm:$0xff] }
 0x4c5   :  { %2810 = vmatpush1.msra.mxu0 %v13897_v48  ;;  %2891 = vmatpush1.msra.mxu1 %v10404_v61  ;;  %v13903_v61 = vld [vmem:[#allocation11_spill] sm:$0xff]  ;;  %v3029_v48 = vld [vmem:[%s10731_s23 + $0x90] sm:$0xff] }
 0x4c6   :  { %2811 = vmatprep.subr.mxu0 %v13898_v29  ;;  %2892 = vmatprep.subr.mxu1 %v10409_v4  ;;  %v13904_v4 = vld [vmem:[#allocation12_spill] sm:$0xff]  ;;  %v3028_v29 = vld [vmem:[%s10731_s23 + $0x88] sm:$0xff] }
 0x4c7   :  { %2812 = vmatpush1.msra.mxu0 %v13899_v35  ;;  %2893 = vmatpush1.msra.mxu1 %v10414_v8  ;;  %v13905_v8 = vld [vmem:[#allocation13_spill] sm:$0xff]  ;;  %v3027_v35 = vld [vmem:[%s10731_s23 + $0x80] sm:$0xff] }
 0x4c8   :  { %2813 = vmatprep.subr.mxu0 %v13900_v41  ;;  %2894 = vmatprep.subr.mxu1 %v10419_v12  ;;  %v13906_v12 = vld [vmem:[#allocation14_spill] sm:$0xff]  ;;  %v3026_v41 = vld [vmem:[%s10731_s23 + $0x78] sm:$0xff] }
 0x4c9   :  { %2814 = vmatpush1.msra.mxu0 %v13901_v53  ;;  %2895 = vmatpush1.msra.mxu1 %v10424_v20  ;;  %v13907_v20 = vld [vmem:[#allocation15_spill] sm:$0xff]  ;;  %v3025_v53 = vld [vmem:[%s10731_s23 + $0x70] sm:$0xff] }
 0x4ca   :  { %2815 = vmatprep.subr.mxu0 %v13902_v57  ;;  %2896 = vmatprep.subr.mxu1 %v10429_v30  ;;  %v13908_v30 = vld [vmem:[#allocation16_spill] sm:$0xff]  ;;  %v3024_v57 = vld [vmem:[%s10731_s23 + $0x68] sm:$0xff] }
 0x4cb   :  { %2816 = vmatpush1.msra.mxu0 %v13903_v61  ;;  %2897 = vmatpush1.msra.mxu1 %v10434_v38  ;;  %v13909_v38 = vld [vmem:[#allocation17_spill] sm:$0xff]  ;;  %v3023_v61 = vld [vmem:[%s10731_s23 + $0x60] sm:$0xff] }
 0x4cc   :  { %2817 = vmatprep.subr.mxu0 %v13904_v4  ;;  %2898 = vmatprep.subr.mxu1 %v10439_v36  ;;  %v13910_v36 = vld [vmem:[#allocation18_spill] sm:$0xff]  ;;  %v3022_v4 = vld [vmem:[%s10731_s23 + $0x58] sm:$0xff] }
 0x4cd   :  { %2818 = vmatpush1.msra.mxu0 %v13905_v8  ;;  %2899 = vmatpush2.msra.mxu1 %v10444_v47  ;;  %v13911_v47 = vld [vmem:[#allocation19_spill] sm:$0xff]  ;;  %v3021_v8 = vld [vmem:[%s10731_s23 + $0x50] sm:$0xff] }
 0x4ce   :  { %2819 = vmatprep.subr.mxu0 %v13906_v12  ;;  %2900 = vmatprep.subr.mxu1 %v10449_v2  ;;  %v13912_v2 = vld [vmem:[#allocation20_spill] sm:$0xff]  ;;  %v3020_v12 = vld [vmem:[%s10731_s23 + $0x48] sm:$0xff] }
 0x4cf   :  { %2820 = vmatpush2.msra.mxu0 %v13907_v20  ;;  %2901 = vmatpush2.msra.mxu1 %v10454_v56  ;;  %v13913_v56 = vld [vmem:[#allocation21_spill] sm:$0xff]  ;;  %v3019_v20 = vld [vmem:[%s10731_s23 + $0x40] sm:$0xff] }
 0x4d0   :  { %2821 = vmatprep.subr.mxu0 %v13908_v30  ;;  %2902 = vmatprep.subr.mxu1 %v10459_v62  ;;  %v13914_v62 = vld [vmem:[#allocation22_spill] sm:$0xff]  ;;  %v3018_v30 = vld [vmem:[%s10731_s23 + $0x38] sm:$0xff] }
 0x4d1   :  { %2822 = vmatpush2.msra.mxu0 %v13909_v38  ;;  %2903 = vmatpush2.msra.mxu1 %v10464_v28  ;;  %v13915_v28 = vld [vmem:[#allocation23_spill] sm:$0xff]  ;;  %v3017_v38 = vld [vmem:[%s10731_s23 + $0x30] sm:$0xff] }
 0x4d2   :  { %2823 = vmatprep.subr.mxu0 %v13910_v36  ;;  %2904 = vmatprep.subr.mxu1 %v10469_v9  ;;  %v13916_v9 = vld [vmem:[#allocation27_spill] sm:$0xff]  ;;  %v3016_v36 = vld [vmem:[%s10731_s23 + $0x28] sm:$0xff] }
 0x4d3   :  { %2824 = vmatpush2.msra.mxu0 %v13911_v47  ;;  %2905 = vmatpush2.msra.mxu1 %v10474_v5  ;;  %v13917_v5 = vld [vmem:[#allocation31_spill] sm:$0xff]  ;;  %v3015_v47 = vld [vmem:[%s10731_s23 + $0x20] sm:$0xff] }
 0x4d4   :  { %2825 = vmatprep.subr.mxu0 %v13912_v2  ;;  %2906 = vmatprep.subr.mxu1 %v10479_v40  ;;  %v13918_v40 = vld [vmem:[#allocation35_spill] sm:$0xff] }
 0x4d5   :  { %2826 = vmatpush2.msra.mxu0 %v13913_v56  ;;  %2907 = vmatpush2.msra.mxu1 %v10484_v23  ;;  %v13919_v23 = vld [vmem:[#allocation39_spill] sm:$0xff]  ;;  %v3013_v56 = vld [vmem:[%s10731_s23 + $0x10] sm:$0xff] }
 0x4d6   :  { %2827 = vmatprep.subr.mxu0 %v13914_v62  ;;  %2908 = vmatprep.subr.mxu1 %v10489_v16  ;;  %v13920_v16 = vld [vmem:[#allocation43_spill] sm:$0xff]  ;;  %v3012_v62 = vld [vmem:[%s10731_s23 + $0x8] sm:$0xff] }
 0x4d7   :  { %2828 = vmatpush2.msra.mxu0 %v13915_v28  ;;  %2909 = vmatpush2.msra.mxu1 %v10494_v19  ;;  %v13921_v19 = vld [vmem:[#allocation47_spill] sm:$0xff]  ;;  %v3011_v28 = vld [vmem:[%s10731_s23] sm:$0xff] }
 0x4d8   :  { %2829 = vmatprep.subr.mxu0 %v13916_v9  ;;  %2910 = vmatprep.subr.mxu1 %v10499_v63  ;;  %v13922_v63 = vld [vmem:[#allocation51_spill] sm:$0xff] }
 0x4d9   :  { %2830 = vmatpush2.msra.mxu0 %v13917_v5  ;;  %2911 = vmatpush2.msra.mxu1 %v10504_v0  ;;  %v13923_v0 = vld [vmem:[#allocation55_spill] sm:$0xff]  ;;  %v3073_v5 = vld [vmem:[%s10731_s23 + $0x1f0] sm:$0xff] }
 0x4da   :  { %2831 = vmatprep.subr.mxu0 %v13918_v40  ;;  %2912 = vmatprep.subr.mxu1 %v10509_v46  ;;  %v13924_v46 = vld [vmem:[#allocation59_spill] sm:$0xff]  ;;  %v3072_v40 = vld [vmem:[%s10731_s23 + $0x1e8] sm:$0xff] }
 0x4db   :  { %2832 = vmatpush2.msra.mxu0 %v13919_v23  ;;  %2913 = vmatpush2.msra.mxu1 %v10514_v39  ;;  %v13925_v39 = vld [vmem:[#allocation24_spill] sm:$0xff]  ;;  %v3014_v2 = vld [vmem:[%s10731_s23 + $0x18] sm:$0xff] }
 0x4dc   :  { %2833 = vmatprep.subr.mxu0 %v13920_v16  ;;  %2914 = vmatprep.subr.mxu1 %v10519_v15  ;;  %v13927_v15 = vld [vmem:[#allocation26_spill] sm:$0xff]  ;;  %v3074_v9 = vld [vmem:[%s10731_s23 + $0x1f8] sm:$0xff]  ;;  %v3071_v23 = vld [vmem:[%s10731_s23 + $0x1e0] sm:$0xff] }
 0x4dd   :  { %2834 = vmatpush2.msra.mxu0 %v13921_v19  ;;  %2915 = vmatpush2.msra.mxu1 %v10524_v33  ;;  %v13929_v33 = vld [vmem:[#allocation28_spill] sm:$0xff]  ;;  %v3070_v16 = vld [vmem:[%s10731_s23 + $0x1d8] sm:$0xff]  ;;  %v3069_v19 = vld [vmem:[%s10731_s23 + $0x1d0] sm:$0xff] }
 0x4de   :  { %2835 = vmatprep.subr.mxu0 %v13922_v63  ;;  %2916 = vmatprep.subr.mxu1 %v10529_v34  ;;  %v13931_v34 = vld [vmem:[#allocation30_spill] sm:$0xff]  ;;  %v3068_v63 = vld [vmem:[%s10731_s23 + $0x1c8] sm:$0xff] }
 0x4df   :  { %2836 = vmatpush2.msra.mxu0 %v13923_v0  ;;  %2917 = vmatpush2.msra.mxu1 %v10534_v7  ;;  %v13933_v7 = vld [vmem:[#allocation32_spill] sm:$0xff] }
 0x4e0   :  { %2837 = vmatprep.subr.mxu0 %v13924_v46  ;;  %2918 = vmatprep.subr.mxu1 %v10539_v45  ;;  %v13935_v45 = vld [vmem:[#allocation34_spill] sm:$0xff]  ;;  %v3067_v0 = vld [vmem:[%s10731_s23 + $0x1c0] sm:$0xff]  ;;  %v3066_v46 = vld [vmem:[%s10731_s23 + $0x1b8] sm:$0xff] }
 0x4e1   :  { %2838 = vmatpush2.msra.mxu0 %v13925_v39  ;;  %2919 = vmatpush2.msra.mxu1 %v13926_v26  ;;  %v3065_v39 = vld [vmem:[%s10731_s23 + $0x1b0] sm:$0xff]  ;;  %v3064_v26 = vld [vmem:[%s10731_s23 + $0x1a8] sm:$0xff] }
 0x4e2   :  { %2839 = vmatprep.subr.mxu0 %v13927_v15  ;;  %2920 = vmatprep.subr.mxu1 %v13928_v59  ;;  %v3063_v15 = vld [vmem:[%s10731_s23 + $0x1a0] sm:$0xff]  ;;  %v3062_v59 = vld [vmem:[%s10731_s23 + $0x198] sm:$0xff] }
 0x4e3   :  { %2840 = vmatpush2.msra.mxu0 %v13929_v33  ;;  %2921 = vmatpush2.msra.mxu1 %v13930_v31  ;;  %v3061_v33 = vld [vmem:[%s10731_s23 + $0x190] sm:$0xff]  ;;  %v3060_v31 = vld [vmem:[%s10731_s23 + $0x188] sm:$0xff] }
 0x4e4   :  { %2841 = vmatprep.subr.mxu0 %v13931_v34  ;;  %2922 = vmatprep.subr.mxu1 %v13932_v24  ;;  %v3059_v34 = vld [vmem:[%s10731_s23 + $0x180] sm:$0xff]  ;;  %v3058_v24 = vld [vmem:[%s10731_s23 + $0x178] sm:$0xff] }
 0x4e5   :  { %2842 = vmatpush2.msra.mxu0 %v13933_v7  ;;  %2923 = vmatpush2.msra.mxu1 %v13934_v50  ;;  %v3057_v7 = vld [vmem:[%s10731_s23 + $0x170] sm:$0xff]  ;;  %v3056_v50 = vld [vmem:[%s10731_s23 + $0x168] sm:$0xff] }
 0x4e6   :  { %2843 = vmatprep.subr.mxu0 %v13935_v45  ;;  %2924 = vmatprep.subr.mxu1 %v13936_v14  ;;  %v3055_v45 = vld [vmem:[%s10731_s23 + $0x160] sm:$0xff]  ;;  %v3054_v14 = vld [vmem:[%s10731_s23 + $0x158] sm:$0xff] }
 0x4e7   :  { %2844 = vmatpush2.msra.mxu0 %v13937_v51  ;;  %2925 = vmatpush2.msra.mxu1 %v13938_v60  ;;  %v3053_v51 = vld [vmem:[%s10731_s23 + $0x150] sm:$0xff]  ;;  %v3052_v60 = vld [vmem:[%s10731_s23 + $0x148] sm:$0xff] }
 0x4e8   :  { %2845 = vmatprep.subr.mxu0 %v13939_v43  ;;  %2926 = vmatprep.subr.mxu1 %v10579_v1  ;;  %v3041_v1 = vld [vmem:[%s10731_s23 + $0xf0] sm:$0xff]  ;;  %v3050_v43 = vld [vmem:[%s10731_s23 + $0x138] sm:$0xff] }
 0x4e9   :  { %2846 = vmatpush2.msra.mxu0 %v13940_v42  ;;  %2927 = vmatpush2.msra.mxu1 %v10584_v10  ;;  %v3040_v10 = vld [vmem:[%s10731_s23 + $0xe8] sm:$0xff]  ;;  %v3049_v42 = vld [vmem:[%s10731_s23 + $0x130] sm:$0xff] }
 0x4ea   :  { %2847 = vmatprep.subr.mxu0 %v13941_v54  ;;  %2928 = vmatprep.subr.mxu1 %v10589_v25  ;;  %v3039_v25 = vld [vmem:[%s10731_s23 + $0xe0] sm:$0xff]  ;;  %v3048_v54 = vld [vmem:[%s10731_s23 + $0x128] sm:$0xff] }
 0x4eb   :  { %2848 = vmatpush2.msra.mxu0 %v13942_v3  ;;  %2929 = vmatpush2.msra.mxu1 %v10594_v6  ;;  %v3042_v6 = vld [vmem:[%s10731_s23 + $0xf8] sm:$0xff] }
 0x4ec   :  { %2849 = vmatprep.subr.mxu0 %v13943_v55  ;;  %2931 = vmatmul.mubr.f32.vlgmr.msra.gmra.mxu1 %v2862_v37  ;;  %v3047_v37 = vld [vmem:[%s10731_s23 + $0x120] sm:$0xff]  ;;  %v3046_v3 = vld [vmem:[%s10731_s23 + $0x118] sm:$0xff]  ;;  %v3045_v55 = vld [vmem:[%s10731_s23 + $0x110] sm:$0xff] }
 0x4ed   :  { %2850 = vmatpush2.msra.mxu0 %v13944_v58  ;;  %3148 = vmatprep.subr.mxu1 %v3042_v6  ;;  %v3044_v58 = vld [vmem:[%s10731_s23 + $0x108] sm:$0xff] }
 0x4ee   :  { %2852 = vmatmul.mubr.f32.vlgmr.msra.gmra.mxu0 %v2706_v11  ;;  %3075 = vmatprep.subr.mxu0 %v3042_v6  ;;  %v3043_v11 = vld [vmem:[%s10731_s23 + $0x100] sm:$0xff]  ;;  %v3348_v6 = vld [vmem:[%s10800_s27 + $0xf8] sm:$0xff]  ;;  %s12828_s23 = sld [smem:[%s13337_s0 + %s8458_s20]]  }
 0x4ef   :  { %3076 = vmatpush1.msra.mxu0 %v3041_v1  ;;  %3149 = vmatpush1.msra.mxu1 %v3041_v1  ;;  %v10804_v1 = vld [vmem:[%s10800_s27 + $0x2f8] sm:$0xff] }
 0x4f0   :  { %3077 = vmatprep.subr.mxu0 %v3040_v10  ;;  %3150 = vmatprep.subr.mxu1 %v3040_v10 }
 0x4f1   :  { %3078 = vmatpush1.msra.mxu0 %v3039_v25  ;;  %3151 = vmatpush1.msra.mxu1 %v3039_v25 }
 0x4f2   :  { %3079 = vmatprep.subr.mxu0 %v3038_v13  ;;  %3152 = vmatprep.subr.mxu1 %v3038_v13 }
 0x4f3   :  { %3080 = vmatpush1.msra.mxu0 %v3037_v32  ;;  %3153 = vmatpush1.msra.mxu1 %v3037_v32 }
 0x4f4   :  { %3081 = vmatprep.subr.mxu0 %v3036_v27  ;;  %3154 = vmatprep.subr.mxu1 %v3036_v27 }
 0x4f5   :  { %3082 = vmatpush1.msra.mxu0 %v3035_v44  ;;  %3155 = vmatpush1.msra.mxu1 %v3035_v44 }
 0x4f6   :  { %3083 = vmatprep.subr.mxu0 %v3034_v22  ;;  %3156 = vmatprep.subr.mxu1 %v3034_v22 }
 0x4f7   :  { %3084 = vmatpush1.msra.mxu0 %v3033_v52  ;;  %3157 = vmatpush1.msra.mxu1 %v3033_v52  ;;  %v2690_v52 = vld [vmem:[%s6599_s1] sm:$0x3]  ;;  %s12902_s1 = sld [smem:[%s13337_s0 + %s8460_s28]]  }
 0x4f8   :  { %3085 = vmatprep.subr.mxu0 %v3032_v18  ;;  %3158 = vmatprep.subr.mxu1 %v3032_v18 }
 0x4f9   :  { %3086 = vmatpush1.msra.mxu0 %v3031_v17  ;;  %3159 = vmatpush1.msra.mxu1 %v3031_v17 }
 0x4fa   :  { %3087 = vmatprep.subr.mxu0 %v3030_v21  ;;  %3160 = vmatprep.subr.mxu1 %v3030_v21  ;;  %v13945_v21 = vld [vmem:[#allocation8_spill] sm:$0xff] }
 0x4fb   :  { %3088 = vmatpush1.msra.mxu0 %v3029_v48  ;;  %3161 = vmatpush1.msra.mxu1 %v3029_v48  ;;  %v2699_v48 = vrot.slane %v2690_v52, %v13945_v21 }
 0x4fc   :  { %3089 = vmatprep.subr.mxu0 %v3028_v29  ;;  %3162 = vmatprep.subr.mxu1 %v3028_v29 }
 0x4fd   :  { %3090 = vmatpush1.msra.mxu0 %v3027_v35  ;;  %3163 = vmatpush1.msra.mxu1 %v3027_v35  ;;  %v13946_v35 = vld [vmem:[#allocation9_spill] sm:$0xff] }
 0x4fe   :  { %3091 = vmatprep.subr.mxu0 %v3026_v41  ;;  %3164 = vmatprep.subr.mxu1 %v3026_v41  ;;  %v2695_v41 = vrot.slane %v2690_v52, %v13946_v35 }
 0x4ff   :  { %3092 = vmatpush1.msra.mxu0 %v3025_v53  ;;  %3165 = vmatpush1.msra.mxu1 %v3025_v53 }
 0x500   :  { %3093 = vmatprep.subr.mxu0 %v3024_v57  ;;  %3166 = vmatprep.subr.mxu1 %v3024_v57 }
 0x501   :  { %3094 = vmatpush1.msra.mxu0 %v3023_v61  ;;  %3167 = vmatpush1.msra.mxu1 %v3023_v61 }
 0x502   :  { %3095 = vmatprep.subr.mxu0 %v3022_v4  ;;  %3168 = vmatprep.subr.mxu1 %v3022_v4 }
 0x503   :  { %3096 = vmatpush1.msra.mxu0 %v3021_v8  ;;  %3169 = vmatpush1.msra.mxu1 %v3021_v8 }
 0x504   :  { %3097 = vmatprep.subr.mxu0 %v3020_v12  ;;  %3170 = vmatprep.subr.mxu1 %v3020_v12 }
 0x505   :  { %3098 = vmatpush1.msra.mxu0 %v3019_v20  ;;  %3171 = vmatpush1.msra.mxu1 %v3019_v20 }
 0x506   :  { %3099 = vmatprep.subr.mxu0 %v3018_v30  ;;  %3172 = vmatprep.subr.mxu1 %v3018_v30 }
 0x507   :  { %3100 = vmatpush1.msra.mxu0 %v3017_v38  ;;  %3173 = vmatpush1.msra.mxu1 %v3017_v38 }
 0x508   :  { %3101 = vmatprep.subr.mxu0 %v3016_v36  ;;  %3174 = vmatprep.subr.mxu1 %v3016_v36 }
 0x509   :  { %3102 = vmatpush1.msra.mxu0 %v3015_v47  ;;  %3175 = vmatpush1.msra.mxu1 %v3015_v47 }
 0x50a   :  { %3103 = vmatprep.subr.mxu0 %v3014_v2  ;;  %3176 = vmatprep.subr.mxu1 %v3014_v2 }
 0x50b   :  { %3104 = vmatpush1.msra.mxu0 %v3013_v56  ;;  %3177 = vmatpush1.msra.mxu1 %v3013_v56 }
 0x50c   :  { %3105 = vmatprep.subr.mxu0 %v3012_v62  ;;  %3178 = vmatprep.subr.mxu1 %v3012_v62 }
 0x50d   :  { %3106 = vmatpush1.msra.mxu0 %v3011_v28  ;;  %3179 = vmatpush1.msra.mxu1 %v3011_v28 }
 0x50e   :  { %3107 = vmatprep.subr.mxu0 %v3074_v9  ;;  %3180 = vmatprep.subr.mxu1 %v3074_v9 }
 0x50f   :  { %3108 = vmatpush2.msra.mxu0 %v3073_v5  ;;  %3181 = vmatpush2.msra.mxu1 %v3073_v5 }
 0x510   :  { %3109 = vmatprep.subr.mxu0 %v3072_v40  ;;  %3182 = vmatprep.subr.mxu1 %v3072_v40 }
 0x511   :  { %3110 = vmatpush2.msra.mxu0 %v3071_v23  ;;  %3183 = vmatpush2.msra.mxu1 %v3071_v23 }
 0x512   :  { %3111 = vmatprep.subr.mxu0 %v3070_v16  ;;  %3184 = vmatprep.subr.mxu1 %v3070_v16 }
 0x513   :  { %3112 = vmatpush2.msra.mxu0 %v3069_v19  ;;  %3185 = vmatpush2.msra.mxu1 %v3069_v19 }
 0x514   :  { %3113 = vmatprep.subr.mxu0 %v3068_v63  ;;  %3186 = vmatprep.subr.mxu1 %v3068_v63 }
 0x515   :  { %3114 = vmatpush2.msra.mxu0 %v3067_v0  ;;  %3187 = vmatpush2.msra.mxu1 %v3067_v0 }
 0x516   :  { %3115 = vmatprep.subr.mxu0 %v3066_v46  ;;  %3188 = vmatprep.subr.mxu1 %v3066_v46 }
 0x517   :  { %3116 = vmatpush2.msra.mxu0 %v3065_v39  ;;  %3189 = vmatpush2.msra.mxu1 %v3065_v39 }
 0x518   :  { %3117 = vmatprep.subr.mxu0 %v3064_v26  ;;  %3190 = vmatprep.subr.mxu1 %v3064_v26 }
 0x519   :  { %3118 = vmatpush2.msra.mxu0 %v3063_v15  ;;  %3191 = vmatpush2.msra.mxu1 %v3063_v15 }
 0x51a   :  { %3119 = vmatprep.subr.mxu0 %v3062_v59  ;;  %3192 = vmatprep.subr.mxu1 %v3062_v59 }
 0x51b   :  { %3120 = vmatpush2.msra.mxu0 %v3061_v33  ;;  %3193 = vmatpush2.msra.mxu1 %v3061_v33 }
 0x51c   :  { %3121 = vmatprep.subr.mxu0 %v3060_v31  ;;  %3194 = vmatprep.subr.mxu1 %v3060_v31 }
 0x51d   :  { %3122 = vmatpush2.msra.mxu0 %v3059_v34  ;;  %3195 = vmatpush2.msra.mxu1 %v3059_v34 }
 0x51e   :  { %3123 = vmatprep.subr.mxu0 %v3058_v24  ;;  %3196 = vmatprep.subr.mxu1 %v3058_v24 }
 0x51f   :  { %3124 = vmatpush2.msra.mxu0 %v3057_v7  ;;  %3197 = vmatpush2.msra.mxu1 %v3057_v7 }
 0x520   :  { %3125 = vmatprep.subr.mxu0 %v3056_v50  ;;  %3198 = vmatprep.subr.mxu1 %v3056_v50 }
 0x521   :  { %3126 = vmatpush2.msra.mxu0 %v3055_v45  ;;  %3199 = vmatpush2.msra.mxu1 %v3055_v45 }
 0x522   :  { %3127 = vmatprep.subr.mxu0 %v3054_v14  ;;  %3200 = vmatprep.subr.mxu1 %v3054_v14 }
 0x523   :  { %3128 = vmatpush2.msra.mxu0 %v3053_v51  ;;  %3201 = vmatpush2.msra.mxu1 %v3053_v51 }
 0x524   :  { %3129 = vmatprep.subr.mxu0 %v3052_v60  ;;  %3202 = vmatprep.subr.mxu1 %v3052_v60 }
 0x525   :  { %3130 = vmatpush2.msra.mxu0 %v3051_v49  ;;  %3203 = vmatpush2.msra.mxu1 %v3051_v49 }
 0x526   :  { %3131 = vmatprep.subr.mxu0 %v3050_v43  ;;  %3204 = vmatprep.subr.mxu1 %v3050_v43 }
 0x527   :  { %3132 = vmatpush2.msra.mxu0 %v3049_v42  ;;  %3205 = vmatpush2.msra.mxu1 %v3049_v42 }
 0x528   :  { %3133 = vmatprep.subr.mxu0 %v3048_v54  ;;  %3206 = vmatprep.subr.mxu1 %v3048_v54 }
 0x529   :  { %3134 = vmatpush2.msra.mxu0 %v3047_v37  ;;  %3207 = vmatpush2.msra.mxu1 %v3047_v37  ;;  %v2604_v13 = vpop.f32.mrf.mxu1 }
 0x52a   :  { %3135 = vmatprep.subr.mxu0 %v3046_v3  ;;  %3208 = vmatprep.subr.mxu1 %v3046_v3 }
 0x52b   :  { %3136 = vmatpush2.msra.mxu0 %v3045_v55  ;;  %3209 = vmatpush2.msra.mxu1 %v3045_v55  ;;  %v2606_v27 = vpop.f32.mrf.mxu1 }
 0x52c   :  { %3137 = vmatprep.subr.mxu0 %v3044_v58  ;;  %3210 = vmatprep.subr.mxu1 %v3044_v58  ;;  %v2533_v10 = vpop.f32.mrf.mxu0 }
 0x52d   :  { %3138 = vmatpush2.msra.mxu0 %v3043_v11  ;;  %3211 = vmatpush2.msra.mxu1 %v3043_v11  ;;  %v2605_v18 = vadd.f32 %v2604_v13, %v2533_v10 }
 0x52e   :  { %3592 = vmatprep.subr.mxu1 %v3348_v6  ;;  %3521 = vmatprep.subr.mxu0 %v10804_v1  ;;  %v2535_v25 = vpop.f32.mrf.mxu0 }
 0x52f   :  { %v2607_v22 = vadd.f32 %v2606_v27, %v2535_v25 }
 0x56a   :  { %v2782_v8 = vpop.f32.mrf.mxu1 }
 0x56c   :  { %v2784_v30 = vpop.f32.mrf.mxu1 }
 0x56d   :  { %v2683_v32 = vpop.f32.mrf.mxu0 }
 0x56e   :  { %v2688_v29 = vadd.f32 %v2683_v32, %v2605_v18 }
 0x56f   :  { %v2685_v44 = vpop.f32.mrf.mxu0 }
 0x570   :  { %v2689_v17 = vadd.f32 %v2685_v44, %v2607_v22  ;;  %v2702_v57 = vadd.f32 %v2695_v41, %v2688_v29 }
 0x572   :  { %v2703_v53 = vadd.f32 %v2699_v48, %v2689_v17  ;;  %v10814_v4 = vmax.f32 %v2702_v57, 0.0 }
 0x574   :  { %v10812_v61 = vmax.f32 %v2703_v53, 0.0  ;;  %v2959_v20 = vmul.f32 %v10814_v4, %v10814_v4  ;;  %v2943_v36 = vsel %vm1887_vm2, %v10814_v4, 0.0 }
 0x575   :  { %v2944_v5 = vrot.slane %v2943_v36, 4 }
 0x576   :  { %v2960_v12 = vmul.f32 %v10812_v61, %v10812_v61  ;;  %v2950_v38 = vsel %vm1887_vm2, %v10812_v61, 0.0  ;;  %v2961_v62 = vsel %vm1887_vm2, %v2959_v20, 0.0 }
 0x577   :  { %v2951_v28 = vrot.slane %v2950_v38, 4  ;;  %v2962_v63 = vrot.slane %v2961_v62, 4  ;;  %v2945_v15 = vadd.f32 %v2944_v5, %v2943_v36 }
 0x578   :  { %v2968_v47 = vsel %vm1887_vm2, %v2960_v12, 0.0 }
 0x579   :  { %v2969_v23 = vrot.slane %v2968_v47, 4  ;;  %v2952_v46 = vadd.f32 %v2951_v28, %v2950_v38  ;;  %v2963_v34 = vadd.f32 %v2962_v63, %v2961_v62  ;;  %v2946_v14 = vrot.slane %v2945_v15, 2  ;;  %v10841_v63 = vld [vmem:[%s10800_s27 + $0x2f0] sm:$0xff] }
 0x57b   :  { %v2970_v31 = vadd.f32 %v2969_v23, %v2968_v47  ;;  %v2953_v45 = vrot.slane %v2952_v46, 2  ;;  %v2964_v55 = vrot.slane %v2963_v34, 2  ;;  %v2947_v32 = vadd.f32 %v2946_v14, %v2945_v15  ;;  %v3346_v15 = vld [vmem:[%s10800_s27 + $0xe8] sm:$0xff]  ;;  %v10863_v14 = vld [vmem:[%s10800_s27 + $0x2d0] sm:$0xff] }
 0x57d   :  { %v2971_v42 = vrot.slane %v2970_v31, 2  ;;  %v2954_v58 = vadd.f32 %v2953_v45, %v2952_v46  ;;  %v10844_v46 = vld [vmem:[%s10800_s27 + $0x2e8] sm:$0xff] }
 0x57e   :  { %v3342_v45 = vld [vmem:[%s10800_s27 + $0xc8] sm:$0xff] }
 0x57f   :  { %v2972_v27 = vadd.f32 %v2971_v42, %v2970_v31  ;;  %v2955_v17 = vrot.slane %v2954_v58, 1  ;;  %v3344_v31 = vld [vmem:[%s10800_s27 + $0xd8] sm:$0xff]  ;;  %v3339_v42 = vld [vmem:[%s10800_s27 + $0xb0] sm:$0xff] }
 0x581   :  { %v2973_v20 = vrot.slane %v2972_v27, 1 }
 0x5ac   :  { %v2932_v2 = vpop.f32.mrf.mxu1 }
 0x5ae   :  { %v2853_v56 = vpop.f32.mrf.mxu0  ;;  %v2934_v0 = vpop.f32.mrf.mxu1 }
 0x5af   :  { %v2854_v9 = vadd.f32 %v2853_v56, %v2782_v8  ;;  %v2948_v8 = vrot.slane %v2947_v32, 1 }
 0x5b0   :  { %v2855_v40 = vpop.f32.mrf.mxu0 }
 0x5b1   :  { %v2937_v16 = vadd.f32 %v2932_v2, %v2854_v9  ;;  %v2856_v19 = vadd.f32 %v2855_v40, %v2784_v30  ;;  %v2956_v2 = vadd.f32 %v2955_v17, %v2954_v58  ;;  %v2949_v28 = vadd.f32 %v2948_v8, %v2947_v32  ;;  %v10888_v58 = vld [vmem:[%s10800_s27 + $0x2a8] sm:$0xff]  ;;  %v10912_v32 = vld [vmem:[%s10800_s27 + $0x290] sm:$0xff]  ;;  %v10936_v17 = vld [vmem:[%s10800_s27 + $0x278] sm:$0xff] }
 0x5b2   :  { %v2974_v40 = vadd.f32 %v2973_v20, %v2972_v27  ;;  %v10915_v27 = vld [vmem:[%s10800_s27 + $0x80] sm:$0xff]  ;;  %v10968_v20 = vld [vmem:[%s10800_s27 + $0x258] sm:$0xff] }
 0x5b3   :  { %v2939_v39 = vadd.f32 %v2937_v16, %v2695_v41  ;;  %v2938_v26 = vadd.f32 %v2934_v0, %v2856_v19  ;;  %13950 = vst [vmem:[#allocation63_spill] sm:$0xff] %v10915_v27  ;;  %v10960_v8 = vld [vmem:[%s10800_s27 + $0x260] sm:$0xff] }
 0x5b5   :  { %v10826_v59 = vmax.f32 %v2939_v39, 0.0  ;;  %v2940_v33 = vadd.f32 %v2938_v26, %v2699_v48  ;;  %v2965_v48 = vadd.f32 %v2964_v55, %v2963_v34  ;;  %v3347_v26 = vld [vmem:[%s10800_s27 + $0xf0] sm:$0xff]  ;;  %v10853_v34 = vld [vmem:[%s10800_s27 + $0x2e0] sm:$0xff] }
 0x5b6   :  { %v3337_v55 = vld [vmem:[%s10800_s27 + $0xa0] sm:$0xff] }
 0x5b7   :  { %v2977_v24 = vsel %vm1887_vm2, %v10826_v59, 0.0  ;;  %v2993_v7 = vmul.f32 %v10826_v59, %v10826_v59  ;;  %v10832_v50 = vmax.f32 %v2940_v33, 0.0  ;;  %v2966_v47 = vrot.slane %v2965_v48, 1  ;;  %v3345_v33 = vld [vmem:[%s10800_s27 + $0xe0] sm:$0xff] }
 0x5b8   :  { %v2978_v51 = vrot.slane %v2977_v24, 4 }
 0x5b9   :  { %v2995_v60 = vsel %vm1887_vm2, %v2993_v7, 0.0  ;;  %v2984_v49 = vsel %vm1887_vm2, %v10832_v50, 0.0  ;;  %v2994_v43 = vmul.f32 %v10832_v50, %v10832_v50  ;;  %v2967_v19 = vadd.f32 %v2966_v47, %v2965_v48  ;;  %v10858_v7 = vld [vmem:[%s10800_s27 + $0x2d8] sm:$0xff]  ;;  %v10939_v48 = vld [vmem:[%s10800_s27 + $0x68] sm:$0xff] }
 0x5ba   :  { %v2979_v54 = vadd.f32 %v2978_v51, %v2977_v24  ;;  %v2996_v37 = vrot.slane %v2995_v60, 4  ;;  %v2985_v3 = vrot.slane %v2984_v49, 4  ;;  %v3343_v24 = vld [vmem:[%s10800_s27 + $0xd0] sm:$0xff]  ;;  %v3341_v51 = vld [vmem:[%s10800_s27 + $0xc0] sm:$0xff]  ;;  %13953 = vst [vmem:[#allocation69_spill] sm:$0xff] %v10939_v48  ;;  %v10984_v47 = vld [vmem:[%s10800_s27 + $0x248] sm:$0xff] }
 0x5bb   :  { %v3002_v11 = vsel %vm1887_vm2, %v2994_v43, 0.0  ;;  %v10873_v43 = vld [vmem:[%s10800_s27 + $0x2c0] sm:$0xff] }
 0x5bc   :  { %v2980_v6 = vrot.slane %v2979_v54, 2  ;;  %v2997_v10 = vadd.f32 %v2996_v37, %v2995_v60  ;;  %v2986_v25 = vadd.f32 %v2985_v3, %v2984_v49  ;;  %v3003_v13 = vrot.slane %v3002_v11, 4  ;;  %v10868_v60 = vld [vmem:[%s10800_s27 + $0x2c8] sm:$0xff]  ;;  %v3340_v49 = vld [vmem:[%s10800_s27 + $0xb8] sm:$0xff]  ;;  %v10883_v3 = vld [vmem:[%s10800_s27 + $0x2b0] sm:$0xff] }
 0x5bd   :  { %v3338_v37 = vld [vmem:[%s10800_s27 + $0xa8] sm:$0xff] }
 0x5be   :  { %v2987_v44 = vrot.slane %v2986_v25, 2  ;;  %v2981_v22 = vadd.f32 %v2980_v6, %v2979_v54  ;;  %v3004_v52 = vadd.f32 %v3003_v13, %v3002_v11  ;;  %v2998_v18 = vrot.slane %v2997_v10, 2  ;;  %v10878_v54 = vld [vmem:[%s10800_s27 + $0x2b8] sm:$0xff]  ;;  %v10896_v6 = vld [vmem:[%s10800_s27 + $0x2a0] sm:$0xff]  ;;  %v10907_v13 = vld [vmem:[%s10800_s27 + $0x88] sm:$0xff] }
 0x5bf   :  { %v10891_v11 = vld [vmem:[%s10800_s27 + $0x98] sm:$0xff]  ;;  %13949 = vst [vmem:[#allocation61_spill] sm:$0xff] %v10907_v13 }
 0x5c0   :  { %v2988_v29 = vadd.f32 %v2987_v44, %v2986_v25  ;;  %v2982_v41 = vrot.slane %v2981_v22, 1  ;;  %v3005_v53 = vrot.slane %v3004_v52, 2  ;;  %v2999_v57 = vadd.f32 %v2998_v18, %v2997_v10  ;;  %13947 = vst [vmem:[#allocation53_spill] sm:$0xff] %v10891_v11  ;;  %v10899_v10 = vld [vmem:[%s10800_s27 + $0x90] sm:$0xff]  ;;  %v10904_v25 = vld [vmem:[%s10800_s27 + $0x298] sm:$0xff]  ;;  %v10920_v44 = vld [vmem:[%s10800_s27 + $0x288] sm:$0xff] }
 0x5c1   :  { %13948 = vst [vmem:[#allocation57_spill] sm:$0xff] %v10899_v10  ;;  %v10931_v18 = vld [vmem:[%s10800_s27 + $0x70] sm:$0xff] }
 0x5c2   :  { %v2989_v12 = vrot.slane %v2988_v29, 1  ;;  %v3006_v30 = vadd.f32 %v3005_v53, %v3004_v52  ;;  %v3000_v38 = vrot.slane %v2999_v57, 1  ;;  %v2983_v36 = vadd.f32 %v2982_v41, %v2981_v22  ;;  %v10923_v22 = vld [vmem:[%s10800_s27 + $0x78] sm:$0xff]  ;;  %v10928_v52 = vld [vmem:[%s10800_s27 + $0x280] sm:$0xff]  ;;  %13952 = vst [vmem:[#allocation67_spill] sm:$0xff] %v10931_v18  ;;  %v10952_v53 = vld [vmem:[%s10800_s27 + $0x268] sm:$0xff] }
 0x5c3   :  { %13951 = vst [vmem:[#allocation65_spill] sm:$0xff] %v10923_v22  ;;  %v10947_v41 = vld [vmem:[%s10800_s27 + $0x60] sm:$0xff] }
 0x5c4   :  { %v2990_v56 = vadd.f32 %v2989_v12, %v2988_v29  ;;  %v3007_v62 = vrot.slane %v3006_v30, 1  ;;  %v3001_v9 = vadd.f32 %v3000_v38, %v2999_v57  ;;  %v2991_v16 = vadd.f32 %v2983_v36, %v2949_v28  ;;  %v10944_v29 = vld [vmem:[%s10800_s27 + $0x270] sm:$0xff]  ;;  %13954 = vst [vmem:[#allocation71_spill] sm:$0xff] %v10947_v41  ;;  %v10955_v57 = vld [vmem:[%s10800_s27 + $0x58] sm:$0xff]  ;;  %v10979_v36 = vld [vmem:[%s10800_s27 + $0x40] sm:$0xff] }
 0x5c5   :  { %13955 = vst [vmem:[#allocation72_spill] sm:$0xff] %v10955_v57  ;;  %v10963_v12 = vld [vmem:[%s10800_s27 + $0x50] sm:$0xff]  ;;  %13958 = vst [vmem:[#allocation77_spill] sm:$0xff] %v10979_v36  ;;  %v11000_v28 = vld [vmem:[%s10800_s27 + $0x238] sm:$0xff] }
 0x5c6   :  { %v2992_v5 = vadd.f32 %v2990_v56, %v2956_v2  ;;  %v3008_v23 = vadd.f32 %v3007_v62, %v3006_v30  ;;  %v3009_v39 = vadd.f32 %v3001_v9, %v2967_v19  ;;  %13956 = vst [vmem:[#allocation74_spill] sm:$0xff] %v10963_v12  ;;  %v10971_v30 = vld [vmem:[%s10800_s27 + $0x48] sm:$0xff]  ;;  %v10976_v38 = vld [vmem:[%s10800_s27 + $0x250] sm:$0xff]  ;;  %v10987_v2 = vld [vmem:[%s10800_s27 + $0x38] sm:$0xff] }
 0x5c7   :  { %13957 = vst [vmem:[#allocation40_spill] sm:$0xff] %v10971_v30  ;;  %13959 = vst [vmem:[#allocation79_spill] sm:$0xff] %v10987_v2  ;;  %v10992_v56 = vld [vmem:[%s10800_s27 + $0x240] sm:$0xff]  ;;  %v10995_v62 = vld [vmem:[%s10800_s27 + $0x30] sm:$0xff] }
 0x5c8   :  { %3139 = vmatprep.mubr.f32.mxu0 %v2992_v5  ;;  %v3010_v0 = vadd.f32 %v3008_v23, %v2974_v40  ;;  %13960 = vst [vmem:[#allocation81_spill] sm:$0xff] %v10995_v62  ;;  %v11003_v9 = vld [vmem:[%s10800_s27 + $0x28] sm:$0xff]  ;;  %v11008_v5 = vld [vmem:[%s10800_s27 + $0x230] sm:$0xff]  ;;  %v11011_v40 = vld [vmem:[%s10800_s27 + $0x20] sm:$0xff] }
 0x5c9   :  { %3140 = vmatmul.mubr.f32.vlgmr.msra.gmra.mxu0 %v2991_v16  ;;  %13961 = vst [vmem:[#allocation83_spill] sm:$0xff] %v11003_v9  ;;  %13962 = vst [vmem:[#allocation85_spill] sm:$0xff] %v11011_v40  ;;  %v11016_v23 = vld [vmem:[%s10800_s27 + $0x228] sm:$0xff]  ;;  %v11019_v16 = vld [vmem:[%s10800_s27 + $0x18] sm:$0xff] }
 0x5ca   :  { %3212 = vmatprep.mubr.f32.mxu1 %v3010_v0  ;;  %3522 = vmatpush1.msra.mxu0 %v10841_v63  ;;  %13963 = vst [vmem:[#allocation86_spill] sm:$0xff] %v11019_v16  ;;  %v11024_v19 = vld [vmem:[%s10800_s27 + $0x220] sm:$0xff]  ;;  %v11027_v0 = vld [vmem:[%s10800_s27 + $0x10] sm:$0xff] }
 0x5cb   :  { %3213 = vmatmul.mubr.f32.vlgmr.msra.gmra.mxu1 %v3009_v39  ;;  %3523 = vmatprep.subr.mxu0 %v10844_v46  ;;  %13964 = vst [vmem:[#allocation87_spill] sm:$0xff] %v11027_v0  ;;  %v11032_v39 = vld [vmem:[%s10800_s27 + $0x218] sm:$0xff] }
 0x5cc   :  { %3593 = vmatpush1.msra.mxu1 %v3347_v26  ;;  %3524 = vmatpush1.msra.mxu0 %v10853_v34  ;;  %v11035_v26 = vld [vmem:[%s10800_s27 + $0x8] sm:$0xff] }
 0x5cd   :  { %3594 = vmatprep.subr.mxu1 %v3346_v15  ;;  %3525 = vmatprep.subr.mxu0 %v10858_v7  ;;  %13965 = vst [vmem:[#allocation42_spill] sm:$0xff] %v11035_v26  ;;  %v11040_v15 = vld [vmem:[%s10800_s27 + $0x210] sm:$0xff] }
 0x5ce   :  { %3595 = vmatpush1.msra.mxu1 %v3345_v33  ;;  %3526 = vmatpush1.msra.mxu0 %v10863_v14  ;;  %v11043_v33 = vld [vmem:[%s10800_s27] sm:$0xff] }
 0x5cf   :  { %3596 = vmatprep.subr.mxu1 %v3344_v31  ;;  %3527 = vmatprep.subr.mxu0 %v10868_v60  ;;  %13966 = vst [vmem:[#allocation44_spill] sm:$0xff] %v11043_v33  ;;  %v11048_v31 = vld [vmem:[%s10800_s27 + $0x208] sm:$0xff] }
 0x5d0   :  { %3597 = vmatpush1.msra.mxu1 %v3343_v24  ;;  %3528 = vmatpush1.msra.mxu0 %v10873_v43  ;;  %v11051_v24 = vld [vmem:[%s10800_s27 + $0x1f8] sm:$0xff] }
 0x5d1   :  { %3598 = vmatprep.subr.mxu1 %v3342_v45  ;;  %3529 = vmatprep.subr.mxu0 %v10878_v54  ;;  %13967 = vst [vmem:[#allocation46_spill] sm:$0xff] %v11051_v24  ;;  %v11056_v45 = vld [vmem:[%s10800_s27 + $0x200] sm:$0xff] }
 0x5d2   :  { %3599 = vmatpush1.msra.mxu1 %v3341_v51  ;;  %3530 = vmatpush1.msra.mxu0 %v10883_v3  ;;  %v11059_v51 = vld [vmem:[%s10800_s27 + $0x1f0] sm:$0xff] }
 0x5d3   :  { %3600 = vmatprep.subr.mxu1 %v3340_v49  ;;  %3531 = vmatprep.subr.mxu0 %v10888_v58  ;;  %13968 = vst [vmem:[#allocation48_spill] sm:$0xff] %v11059_v51  ;;  %v11064_v49 = vld [vmem:[%s10800_s27 + $0x3f8] sm:$0xff] }
 0x5d4   :  { %3601 = vmatpush1.msra.mxu1 %v3339_v42  ;;  %3532 = vmatpush1.msra.mxu0 %v10896_v6  ;;  %v11067_v42 = vld [vmem:[%s10800_s27 + $0x1e8] sm:$0xff] }
 0x5d5   :  { %3602 = vmatprep.subr.mxu1 %v3338_v37  ;;  %3533 = vmatprep.subr.mxu0 %v10904_v25  ;;  %13969 = vst [vmem:[#allocation50_spill] sm:$0xff] %v11067_v42  ;;  %v11072_v37 = vld [vmem:[%s10800_s27 + $0x3f0] sm:$0xff] }
 0x5d6   :  { %3603 = vmatpush1.msra.mxu1 %v3337_v55  ;;  %3534 = vmatpush1.msra.mxu0 %v10912_v32  ;;  %v11075_v55 = vld [vmem:[%s10800_s27 + $0x1e0] sm:$0xff] }
 0x5d7   :  { %3604 = vmatprep.subr.mxu1 %v10891_v11  ;;  %3535 = vmatprep.subr.mxu0 %v10920_v44  ;;  %13970 = vst [vmem:[#allocation52_spill] sm:$0xff] %v11075_v55  ;;  %v11243_v11 = vld [vmem:[%s10800_s27 + $0x138] sm:$0xff] }
 0x5d8   :  { %3605 = vmatpush1.msra.mxu1 %v10899_v10  ;;  %3536 = vmatpush1.msra.mxu0 %v10928_v52  ;;  %v11235_v10 = vld [vmem:[%s10800_s27 + $0x140] sm:$0xff]  ;;  %14006 = vst [vmem:[#allocation26_spill] sm:$0xff] %v11243_v11 }
 0x5d9   :  { %3606 = vmatprep.subr.mxu1 %v10907_v13  ;;  %3537 = vmatprep.subr.mxu0 %v10936_v17  ;;  %v11227_v13 = vld [vmem:[%s10800_s27 + $0x148] sm:$0xff]  ;;  %14004 = vst [vmem:[#allocation24_spill] sm:$0xff] %v11235_v10 }
 0x5da   :  { %3607 = vmatpush1.msra.mxu1 %v10915_v27  ;;  %3538 = vmatpush1.msra.mxu0 %v10944_v29  ;;  %v11219_v27 = vld [vmem:[%s10800_s27 + $0x150] sm:$0xff]  ;;  %14002 = vst [vmem:[#allocation55_spill] sm:$0xff] %v11227_v13 }
 0x5db   :  { %3608 = vmatprep.subr.mxu1 %v10923_v22  ;;  %3539 = vmatprep.subr.mxu0 %v10952_v53  ;;  %v11211_v22 = vld [vmem:[%s10800_s27 + $0x158] sm:$0xff]  ;;  %14000 = vst [vmem:[#allocation47_spill] sm:$0xff] %v11219_v27 }
 0x5dc   :  { %3609 = vmatpush1.msra.mxu1 %v10931_v18  ;;  %3540 = vmatpush1.msra.mxu0 %v10960_v8  ;;  %v11203_v18 = vld [vmem:[%s10800_s27 + $0x160] sm:$0xff]  ;;  %13998 = vst [vmem:[#allocation39_spill] sm:$0xff] %v11211_v22 }
 0x5dd   :  { %3610 = vmatprep.subr.mxu1 %v10939_v48  ;;  %3541 = vmatprep.subr.mxu0 %v10968_v20  ;;  %v11195_v48 = vld [vmem:[%s10800_s27 + $0x168] sm:$0xff]  ;;  %13996 = vst [vmem:[#allocation31_spill] sm:$0xff] %v11203_v18 }
 0x5de   :  { %3611 = vmatpush1.msra.mxu1 %v10947_v41  ;;  %3542 = vmatpush1.msra.mxu0 %v10976_v38  ;;  %v11187_v41 = vld [vmem:[%s10800_s27 + $0x170] sm:$0xff]  ;;  %13994 = vst [vmem:[#allocation23_spill] sm:$0xff] %v11195_v48 }
 0x5df   :  { %3612 = vmatprep.subr.mxu1 %v10955_v57  ;;  %3543 = vmatprep.subr.mxu0 %v10984_v47  ;;  %v11179_v57 = vld [vmem:[%s10800_s27 + $0x178] sm:$0xff]  ;;  %13992 = vst [vmem:[#allocation21_spill] sm:$0xff] %v11187_v41 }
 0x5e0   :  { %3613 = vmatpush1.msra.mxu1 %v10963_v12  ;;  %3544 = vmatpush1.msra.mxu0 %v10992_v56  ;;  %v11171_v12 = vld [vmem:[%s10800_s27 + $0x180] sm:$0xff]  ;;  %13990 = vst [vmem:[#allocation19_spill] sm:$0xff] %v11179_v57 }
 0x5e1   :  { %3614 = vmatprep.subr.mxu1 %v10971_v30  ;;  %3545 = vmatprep.subr.mxu0 %v11000_v28  ;;  %v11163_v30 = vld [vmem:[%s10800_s27 + $0x188] sm:$0xff]  ;;  %13988 = vst [vmem:[#allocation17_spill] sm:$0xff] %v11171_v12 }
 0x5e2   :  { %3615 = vmatpush1.msra.mxu1 %v10979_v36  ;;  %3546 = vmatpush1.msra.mxu0 %v11008_v5  ;;  %v11155_v36 = vld [vmem:[%s10800_s27 + $0x190] sm:$0xff]  ;;  %13986 = vst [vmem:[#allocation15_spill] sm:$0xff] %v11163_v30 }
 0x5e3   :  { %3616 = vmatprep.subr.mxu1 %v10987_v2  ;;  %3547 = vmatprep.subr.mxu0 %v11016_v23  ;;  %v11147_v2 = vld [vmem:[%s10800_s27 + $0x198] sm:$0xff]  ;;  %13984 = vst [vmem:[#allocation13_spill] sm:$0xff] %v11155_v36 }
 0x5e4   :  { %3617 = vmatpush1.msra.mxu1 %v10995_v62  ;;  %3548 = vmatpush1.msra.mxu0 %v11024_v19  ;;  %v11139_v62 = vld [vmem:[%s10800_s27 + $0x1a0] sm:$0xff]  ;;  %13982 = vst [vmem:[#allocation11_spill] sm:$0xff] %v11147_v2 }
 0x5e5   :  { %3618 = vmatprep.subr.mxu1 %v11003_v9  ;;  %3549 = vmatprep.subr.mxu0 %v11032_v39  ;;  %v11131_v9 = vld [vmem:[%s10800_s27 + $0x1a8] sm:$0xff]  ;;  %13980 = vst [vmem:[#allocation73_spill] sm:$0xff] %v11139_v62 }
 0x5e6   :  { %3619 = vmatpush1.msra.mxu1 %v11011_v40  ;;  %3550 = vmatpush1.msra.mxu0 %v11040_v15  ;;  %v11123_v40 = vld [vmem:[%s10800_s27 + $0x1b0] sm:$0xff]  ;;  %13978 = vst [vmem:[#allocation68_spill] sm:$0xff] %v11131_v9 }
 0x5e7   :  { %3620 = vmatprep.subr.mxu1 %v11019_v16  ;;  %3551 = vmatprep.subr.mxu0 %v11048_v31  ;;  %v11115_v16 = vld [vmem:[%s10800_s27 + $0x1b8] sm:$0xff]  ;;  %13976 = vst [vmem:[#allocation64_spill] sm:$0xff] %v11123_v40 }
 0x5e8   :  { %3621 = vmatpush1.msra.mxu1 %v11027_v0  ;;  %3552 = vmatpush1.msra.mxu0 %v11056_v45  ;;  %v11107_v0 = vld [vmem:[%s10800_s27 + $0x1c0] sm:$0xff]  ;;  %13975 = vst [vmem:[#allocation62_spill] sm:$0xff] %v11115_v16 }
 0x5e9   :  { %3622 = vmatprep.subr.mxu1 %v11035_v26  ;;  %3553 = vmatprep.subr.mxu0 %v11064_v49  ;;  %v11099_v26 = vld [vmem:[%s10800_s27 + $0x1c8] sm:$0xff]  ;;  %13974 = vst [vmem:[#allocation60_spill] sm:$0xff] %v11107_v0 }
 0x5ea   :  { %3623 = vmatpush1.msra.mxu1 %v11043_v33  ;;  %3554 = vmatpush2.msra.mxu0 %v11072_v37  ;;  %v11091_v33 = vld [vmem:[%s10800_s27 + $0x1d0] sm:$0xff]  ;;  %13973 = vst [vmem:[#allocation58_spill] sm:$0xff] %v11099_v26 }
 0x5eb   :  { %3624 = vmatprep.subr.mxu1 %v11051_v24  ;;  %v11083_v24 = vld [vmem:[%s10800_s27 + $0x1d8] sm:$0xff]  ;;  %13972 = vst [vmem:[#allocation56_spill] sm:$0xff] %v11091_v33 }
 0x5ec   :  { %3625 = vmatpush2.msra.mxu1 %v11059_v51  ;;  %v11080_v51 = vld [vmem:[%s10800_s27 + $0x3e8] sm:$0xff]  ;;  %13971 = vst [vmem:[#allocation54_spill] sm:$0xff] %v11083_v24 }
 0x5ed   :  { %3626 = vmatprep.subr.mxu1 %v11067_v42  ;;  %3555 = vmatprep.subr.mxu0 %v11080_v51  ;;  %v11088_v42 = vld [vmem:[%s10800_s27 + $0x3e0] sm:$0xff] }
 0x5ee   :  { %3627 = vmatpush2.msra.mxu1 %v11075_v55  ;;  %3556 = vmatpush2.msra.mxu0 %v11088_v42  ;;  %v11096_v55 = vld [vmem:[%s10800_s27 + $0x3d8] sm:$0xff] }
 0x5ef   :  { %3628 = vmatprep.subr.mxu1 %v11083_v24  ;;  %3557 = vmatprep.subr.mxu0 %v11096_v55  ;;  %v11104_v24 = vld [vmem:[%s10800_s27 + $0x3d0] sm:$0xff] }
 0x5f0   :  { %3629 = vmatpush2.msra.mxu1 %v11091_v33  ;;  %3558 = vmatpush2.msra.mxu0 %v11104_v24  ;;  %v11112_v33 = vld [vmem:[%s10800_s27 + $0x3c8] sm:$0xff] }
 0x5f1   :  { %3630 = vmatprep.subr.mxu1 %v11099_v26  ;;  %3559 = vmatprep.subr.mxu0 %v11112_v33  ;;  %v11120_v26 = vld [vmem:[%s10800_s27 + $0x3c0] sm:$0xff] }
 0x5f2   :  { %3631 = vmatpush2.msra.mxu1 %v11107_v0  ;;  %3560 = vmatpush2.msra.mxu0 %v11120_v26  ;;  %v11128_v0 = vld [vmem:[%s10800_s27 + $0x3b8] sm:$0xff] }
 0x5f3   :  { %3632 = vmatprep.subr.mxu1 %v11115_v16  ;;  %13977 = vst [vmem:[#allocation66_spill] sm:$0xff] %v11128_v0  ;;  %3561 = vmatprep.subr.mxu0 %v11128_v0  ;;  %v11136_v16 = vld [vmem:[%s10800_s27 + $0x3b0] sm:$0xff] }
 0x5f4   :  { %3633 = vmatpush2.msra.mxu1 %v11123_v40  ;;  %13979 = vst [vmem:[#allocation70_spill] sm:$0xff] %v11136_v16  ;;  %3562 = vmatpush2.msra.mxu0 %v11136_v16  ;;  %v11144_v40 = vld [vmem:[%s10800_s27 + $0x3a8] sm:$0xff] }
 0x5f5   :  { %3634 = vmatprep.subr.mxu1 %v11131_v9  ;;  %13981 = vst [vmem:[#allocation10_spill] sm:$0xff] %v11144_v40  ;;  %3563 = vmatprep.subr.mxu0 %v11144_v40  ;;  %v11152_v9 = vld [vmem:[%s10800_s27 + $0x3a0] sm:$0xff]  ;;  %v14024_v40 = vld [vmem:[#allocation75_spill] sm:$0xff] }
 0x5f6   :  { %3635 = vmatpush2.msra.mxu1 %v11139_v62  ;;  %13983 = vst [vmem:[#allocation12_spill] sm:$0xff] %v11152_v9  ;;  %3564 = vmatpush2.msra.mxu0 %v11152_v9  ;;  %v11160_v62 = vld [vmem:[%s10800_s27 + $0x398] sm:$0xff] }
 0x5f7   :  { %3636 = vmatprep.subr.mxu1 %v11147_v2  ;;  %13985 = vst [vmem:[#allocation14_spill] sm:$0xff] %v11160_v62  ;;  %3565 = vmatprep.subr.mxu0 %v11160_v62  ;;  %v11168_v2 = vld [vmem:[%s10800_s27 + $0x390] sm:$0xff] }
 0x5f8   :  { %3637 = vmatpush2.msra.mxu1 %v11155_v36  ;;  %13987 = vst [vmem:[#allocation16_spill] sm:$0xff] %v11168_v2  ;;  %3566 = vmatpush2.msra.mxu0 %v11168_v2  ;;  %v11176_v36 = vld [vmem:[%s10800_s27 + $0x388] sm:$0xff] }
 0x5f9   :  { %3638 = vmatprep.subr.mxu1 %v11163_v30  ;;  %13989 = vst [vmem:[#allocation18_spill] sm:$0xff] %v11176_v36  ;;  %3567 = vmatprep.subr.mxu0 %v11176_v36  ;;  %v11184_v30 = vld [vmem:[%s10800_s27 + $0x380] sm:$0xff] }
 0x5fa   :  { %3639 = vmatpush2.msra.mxu1 %v11171_v12  ;;  %13991 = vst [vmem:[#allocation20_spill] sm:$0xff] %v11184_v30  ;;  %3568 = vmatpush2.msra.mxu0 %v11184_v30  ;;  %v11192_v12 = vld [vmem:[%s10800_s27 + $0x378] sm:$0xff] }
 0x5fb   :  { %3640 = vmatprep.subr.mxu1 %v11179_v57  ;;  %13993 = vst [vmem:[#allocation22_spill] sm:$0xff] %v11192_v12  ;;  %3569 = vmatprep.subr.mxu0 %v11192_v12  ;;  %v11200_v57 = vld [vmem:[%s10800_s27 + $0x370] sm:$0xff]  ;;  %v11287_v12 = vld [vmem:[%s10800_s27 + $0x108] sm:$0xff] }
 0x5fc   :  { %3641 = vmatpush2.msra.mxu1 %v11187_v41  ;;  %13995 = vst [vmem:[#allocation27_spill] sm:$0xff] %v11200_v57  ;;  %3570 = vmatpush2.msra.mxu0 %v11200_v57  ;;  %v11208_v41 = vld [vmem:[%s10800_s27 + $0x368] sm:$0xff]  ;;  %v11276_v57 = vld [vmem:[%s10800_s27 + $0x320] sm:$0xff]  ;;  %14018 = vst [vmem:[#allocation38_spill] sm:$0xff] %v11287_v12 }
 0x5fd   :  { %3642 = vmatprep.subr.mxu1 %v11195_v48  ;;  %13997 = vst [vmem:[#allocation35_spill] sm:$0xff] %v11208_v41  ;;  %3571 = vmatprep.subr.mxu0 %v11208_v41  ;;  %v11216_v48 = vld [vmem:[%s10800_s27 + $0x360] sm:$0xff]  ;;  %14015 = vst [vmem:[#allocation45_spill] sm:$0xff] %v11276_v57 }
 0x5fe   :  { %3643 = vmatpush2.msra.mxu1 %v11203_v18  ;;  %13999 = vst [vmem:[#allocation43_spill] sm:$0xff] %v11216_v48  ;;  %3572 = vmatpush2.msra.mxu0 %v11216_v48  ;;  %v11224_v18 = vld [vmem:[%s10800_s27 + $0x358] sm:$0xff]  ;;  %v11262_v48 = vld [vmem:[%s10800_s27 + $0x330] sm:$0xff]  ;;  %v11265_v41 = vld [vmem:[%s10800_s27 + $0x120] sm:$0xff] }
 0x5ff   :  { %3644 = vmatprep.subr.mxu1 %v11211_v22  ;;  %14001 = vst [vmem:[#allocation51_spill] sm:$0xff] %v11224_v18  ;;  %3573 = vmatprep.subr.mxu0 %v11224_v18  ;;  %v11232_v22 = vld [vmem:[%s10800_s27 + $0x350] sm:$0xff]  ;;  %v11246_v18 = vld [vmem:[%s10800_s27 + $0x340] sm:$0xff]  ;;  %14011 = vst [vmem:[#allocation37_spill] sm:$0xff] %v11262_v48 }
 0x600   :  { %3645 = vmatpush2.msra.mxu1 %v11219_v27  ;;  %14003 = vst [vmem:[#allocation59_spill] sm:$0xff] %v11232_v22  ;;  %3574 = vmatpush2.msra.mxu0 %v11232_v22  ;;  %v11240_v27 = vld [vmem:[%s10800_s27 + $0x348] sm:$0xff]  ;;  %14007 = vst [vmem:[#allocation29_spill] sm:$0xff] %v11246_v18  ;;  %v11254_v22 = vld [vmem:[%s10800_s27 + $0x338] sm:$0xff] }
 0x601   :  { %3646 = vmatprep.subr.mxu1 %v11227_v13  ;;  %14005 = vst [vmem:[#allocation25_spill] sm:$0xff] %v11240_v27  ;;  %3575 = vmatprep.subr.mxu0 %v11240_v27  ;;  %v11251_v13 = vld [vmem:[%s10800_s27 + $0x130] sm:$0xff]  ;;  %14009 = vst [vmem:[#allocation33_spill] sm:$0xff] %v11254_v22  ;;  %v11268_v27 = vld [vmem:[%s10800_s27 + $0x328] sm:$0xff] }
 0x602   :  { %3647 = vmatpush2.msra.mxu1 %v11235_v10  ;;  %14008 = vst [vmem:[#allocation28_spill] sm:$0xff] %v11251_v13  ;;  %v11257_v10 = vld [vmem:[%s10800_s27 + $0x128] sm:$0xff]  ;;  %3576 = vmatpush2.msra.mxu0 %v11246_v18  ;;  %14012 = vst [vmem:[#allocation32_spill] sm:$0xff] %v11265_v41  ;;  %v11279_v18 = vld [vmem:[%s10800_s27 + $0x110] sm:$0xff] }
 0x603   :  { %3648 = vmatprep.subr.mxu1 %v11243_v11  ;;  %14010 = vst [vmem:[#allocation30_spill] sm:$0xff] %v11257_v10  ;;  %14013 = vst [vmem:[#allocation41_spill] sm:$0xff] %v11268_v27  ;;  %3577 = vmatprep.subr.mxu0 %v11254_v22  ;;  %v11273_v11 = vld [vmem:[%s10800_s27 + $0x118] sm:$0xff]  ;;  %v11295_v22 = vld [vmem:[%s10800_s27 + $0x100] sm:$0xff] }
 0x604   :  { %3649 = vmatpush2.msra.mxu1 %v11251_v13  ;;  %14014 = vst [vmem:[#allocation34_spill] sm:$0xff] %v11273_v11  ;;  %14016 = vst [vmem:[#allocation36_spill] sm:$0xff] %v11279_v18  ;;  %3578 = vmatpush2.msra.mxu0 %v11262_v48  ;;  %v11284_v13 = vld [vmem:[%s10800_s27 + $0x318] sm:$0xff]  ;;  %v11300_v48 = vld [vmem:[%s10800_s27 + $0x308] sm:$0xff] }
 0x605   :  { %3650 = vmatprep.subr.mxu1 %v11257_v10  ;;  %14017 = vst [vmem:[#allocation49_spill] sm:$0xff] %v11284_v13  ;;  %3579 = vmatprep.subr.mxu0 %v11268_v27  ;;  %v11292_v10 = vld [vmem:[%s10800_s27 + $0x310] sm:$0xff]  ;;  %14020 = vst [vmem:[#allocation78_spill] sm:$0xff] %v11295_v22 }
 0x606   :  { %3651 = vmatpush2.msra.mxu1 %v11265_v41  ;;  %14019 = vst [vmem:[#allocation76_spill] sm:$0xff] %v11292_v10  ;;  %3580 = vmatpush2.msra.mxu0 %v11276_v57  ;;  %14021 = vst [vmem:[#allocation80_spill] sm:$0xff] %v11300_v48  ;;  %v11307_v41 = vld [vmem:[%s10800_s27 + $0x300] sm:$0xff] }
 0x607   :  { %3652 = vmatprep.subr.mxu1 %v11273_v11  ;;  %3581 = vmatprep.subr.mxu0 %v11284_v13  ;;  %14022 = vst [vmem:[#allocation82_spill] sm:$0xff] %v11307_v41  ;;  %v11313_v11 = vld [vmem:[%s10800_s27 + $0x4f8] sm:$0xff] }
 0x608   :  { %3653 = vmatpush2.msra.mxu1 %v11279_v18  ;;  %3582 = vmatpush2.msra.mxu0 %v11292_v10  ;;  %14023 = vst [vmem:[#allocation84_spill] sm:$0xff] %v11313_v11 }
 0x609   :  { %3654 = vmatprep.subr.mxu1 %v11287_v12  ;;  %3583 = vmatprep.subr.mxu0 %v11300_v48 }
 0x60a   :  { %3655 = vmatpush2.msra.mxu1 %v11295_v22  ;;  %3584 = vmatpush2.msra.mxu0 %v11307_v41 }
 0x60b   :  { %3770 = vmatprep.subr.mxu1 %v10804_v1  ;;  %3671 = vmatprep.subr.mxu0 %v11313_v11 }
 0x689   :  { %v3141_v18 = vpop.f32.mrf.mxu0 }
 0x68a   :  { %v3146_v13 = vmul.f32 0.03125, %v3141_v18 }
 0x68b   :  { %v3143_v57 = vpop.f32.mrf.mxu0  ;;  %v3214_v12 = vpop.f32.mrf.mxu1 }
 0x68c   :  { %v3221_v27 = vmul.f32 %v3146_v13, %v3146_v13  ;;  %v3147_v10 = vmul.f32 0.03125, %v3143_v57  ;;  %v3219_v30 = vmul.f32 0.03125, %v3214_v12  ;;  %v3225_v12 = vld [vmem:[%s6600_s5] sm:$0x3]  ;;  %s6615_s5 = sld [smem:[%s13337_s0 + %s8461_s2]]  }
 0x68d   :  { %v3216_v22 = vpop.f32.mrf.mxu1 }
 0x68e   :  { %v3222_v36 = vmul.f32 %v3147_v10, %v3147_v10  ;;  %v3223_v2 = vsub.f32 %v3219_v30, %v3221_v27  ;;  %v3220_v62 = vmul.f32 0.03125, %v3216_v22 }
 0x690   :  { %v3226_v48 = vadd.f32 1e-05, %v3223_v2  ;;  %v3224_v9 = vsub.f32 %v3220_v62, %v3222_v36  ;;  %v3249_v62 = vld [vmem:[%s6601_s9] sm:$0x3]  ;;  %s6616_s9 = sld [smem:[%s13337_s0 + %s8462_s6]]  }
 0x692   :  { %v3227_v1 = vadd.f32 1e-05, %v3224_v9  ;;  %8367 = vrsqrt.f32 %v3226_v48 }
 0x694   :  { %8369 = vrsqrt.f32 %v3227_v1 }
 0x69f   :  { %v8368_v18 = vpop.eup %8367 }
 0x6a1   :  { %v8370_v11 = vpop.eup %8369 }
 0x6a2   :  { %v3232_v41 = vcombine.low %v8368_v18, %v8370_v11 }
 0x6a4   :  { %v3239_v57 = vrot.slane %v3232_v41, %v14024_v40 }
 0x6a6   :  { %v3246_v16 = vrot.slane %v3239_v57, %v14024_v40 }
 0x6a8   :  { %v3248_v27 = vmul.f32 %v3246_v16, %v3225_v12 }
 0x6aa   :  { %v3254_v22 = vrot.slane %v3248_v27, %v13946_v35  ;;  %v3258_v48 = vrot.slane %v3248_v27, %v13945_v21 }
 0x6ac   :  { %v3261_v30 = vmul.f32 %v3254_v22, %v3146_v13  ;;  %v3262_v36 = vmul.f32 %v3258_v48, %v3147_v10  ;;  %v3282_v16 = vmul.f32 %v3254_v22, %v10814_v4  ;;  %v3283_v1 = vmul.f32 %v3258_v48, %v10812_v61 }
 0x6ad   :  { %v3305_v12 = vmul.f32 %v3254_v22, %v10826_v59  ;;  %v3306_v13 = vmul.f32 %v3258_v48, %v10832_v50 }
 0x6ae   :  { %v3265_v2 = vcombine.low %v3261_v30, %v3262_v36 }
 0x6b0   :  { %v3272_v11 = vrot.slane %v3265_v2, %v14024_v40 }
 0x6b2   :  { %v3279_v41 = vrot.slane %v3272_v11, %v14024_v40  ;;  %v14049_v40 = vld [vmem:[#allocation41_spill] sm:$0xff] }
 0x6b4   :  { %v3281_v9 = vsub.f32 %v3249_v62, %v3279_v41 }
 0x6b6   :  { %v3288_v18 = vrot.slane %v3281_v9, %v13946_v35  ;;  %v3292_v57 = vrot.slane %v3281_v9, %v13945_v21  ;;  %v14051_v35 = vld [vmem:[#allocation45_spill] sm:$0xff] }
 0x6b8   :  { %v3295_v10 = vadd.f32 %v3288_v18, %v3282_v16  ;;  %v3296_v27 = vadd.f32 %v3292_v57, %v3283_v1  ;;  %v3307_v30 = vadd.f32 %v3305_v12, %v3288_v18  ;;  %v3308_v36 = vadd.f32 %v3306_v13, %v3292_v57  ;;  %v11336_v1 = vld [vmem:[%s10800_s27 + $0x4f0] sm:$0xff]  ;;  %v11344_v57 = vld [vmem:[%s10800_s27 + $0x4e0] sm:$0xff] }
 0x6b9   :  { %v11363_v12 = vld [vmem:[%s10800_s27 + $0x4c0] sm:$0xff]  ;;  %v11533_v13 = vld [vmem:[%s10800_s27 + $0x5b0] sm:$0xff] }
 0x6ba   :  { %v3299_v2 = vrot.slane %v3295_v10, 7  ;;  %v3300_v0 = vrot.slane %v3296_v27, 7  ;;  %v3311_v11 = vrot.slane %v3307_v30, 7  ;;  %v3312_v62 = vrot.slane %v3308_v36, 7  ;;  %v11538_v10 = vld [vmem:[%s10800_s27 + $0x5a8] sm:$0xff]  ;;  %v11543_v27 = vld [vmem:[%s10800_s27 + $0x5a0] sm:$0xff] }
 0x6bb   :  { %v14028_v30 = vld [vmem:[#allocation12_spill] sm:$0xff]  ;;  %v11548_v36 = vld [vmem:[%s10800_s27 + $0x598] sm:$0xff] }
 0x6bc   :  { %3303 = vst [vmem:[#allocation4] sm:$0x1e] %v3299_v2  ;;  %3315 = vst [vmem:[#allocation4 + $0x8] sm:$0x1e] %v3311_v11  ;;  %v14029_v2 = vld [vmem:[#allocation14_spill] sm:$0xff] }
 0x6bd   :  { %3316 = vst [vmem:[#allocation4 + $0x10] sm:$0x1e] %v3312_v62  ;;  %3304 = vst [vmem:[#allocation4 + $0x18] sm:$0x1e] %v3300_v0  ;;  %v11340_v0 = vld [vmem:[%s10800_s27 + $0x4e8] sm:$0xff]  ;;  %v11553_v11 = vld [vmem:[%s10800_s27 + $0x590] sm:$0xff] }
 0x6be   :  { %v14030_v62 = vld [vmem:[#allocation16_spill] sm:$0xff] }
 0x6c3   :  { %v3511_v4 = vld [vmem:[#allocation4] sm:$0xf]  ;;  %v3762_v21 = vld [vmem:[#allocation4 + $0x8] sm:$0x1e] }
 0x6c4   :  { %v3512_v61 = vld [vmem:[#allocation4 + $0x18] sm:$0xf]  ;;  %v3763_v50 = vld [vmem:[#allocation4 + $0x10] sm:$0x1e]  ;;  %v3513_v22 = vld [vmem:[#allocation4] sm:$0x1e] }
 0x6c5   :  { %v3514_v41 = vld [vmem:[#allocation4 + $0x18] sm:$0x1e]  ;;  %3656 = vmatprep.mubr.f32.mxu1 %v3512_v61  ;;  %v3767_v48 = vrot.slane %v3763_v50, 1  ;;  %v3517_v9 = vrot.slane %v3513_v22, 1  ;;  %v11558_v61 = vld [vmem:[%s10800_s27 + $0x588] sm:$0xff]  ;;  %v14033_v22 = vld [vmem:[#allocation22_spill] sm:$0xff] }
 0x6c6   :  { %v3518_v59 = vrot.slane %v3514_v41, 1  ;;  %3657 = vmatmul.mubr.f32.vlgmr.msra.gmra.mxu1 %v3511_v4  ;;  %v3664_v16 = vld [vmem:[#allocation4 + $0x18] sm:$0x3c]  ;;  %v14031_v4 = vld [vmem:[#allocation18_spill] sm:$0xff]  ;;  %v11563_v41 = vld [vmem:[%s10800_s27 + $0x580] sm:$0xff] }
 0x6c7   :  { %3771 = vmatpush1.msra.mxu1 %v10841_v63  ;;  %3834 = vmatprep.mubr.f32.mxu1 %v3767_v48  ;;  %v3668_v18 = vrot.slane %v3664_v16, 2  ;;  %v11348_v63 = vld [vmem:[%s10800_s27 + $0x4d8] sm:$0xff]  ;;  %v11573_v48 = vld [vmem:[%s10800_s27 + $0x570] sm:$0xff]  ;;  %v11578_v16 = vld [vmem:[%s10800_s27 + $0x568] sm:$0xff] }
 0x6c8   :  { %3585 = vmatprep.mubr.f32.mxu0 %v3518_v59  ;;  %3772 = vmatprep.subr.mxu1 %v10844_v46  ;;  %v11353_v46 = vld [vmem:[%s10800_s27 + $0x4d0] sm:$0xff]  ;;  %v14032_v59 = vld [vmem:[#allocation20_spill] sm:$0xff]  ;;  %v11568_v50 = vld [vmem:[%s10800_s27 + $0x578] sm:$0xff] }
 0x6c9   :  { %3586 = vmatmul.mubr.f32.vlgmr.msra.gmra.mxu0 %v3517_v9  ;;  %3773 = vmatpush1.msra.mxu1 %v10853_v34  ;;  %v11358_v34 = vld [vmem:[%s10800_s27 + $0x4c8] sm:$0xff]  ;;  %v14034_v9 = vld [vmem:[#allocation27_spill] sm:$0xff] }
 0x6ca   :  { %3672 = vmatpush1.msra.mxu0 %v11336_v1  ;;  %3735 = vmatprep.mubr.f32.mxu0 %v3668_v18  ;;  %v14035_v18 = vld [vmem:[#allocation35_spill] sm:$0xff] }
 0x6cb   :  { %3673 = vmatprep.subr.mxu0 %v11340_v0  ;;  %3774 = vmatprep.subr.mxu1 %v10858_v7  ;;  %v11368_v7 = vld [vmem:[%s10800_s27 + $0x4b8] sm:$0xff] }
 0x6cc   :  { %3674 = vmatpush1.msra.mxu0 %v11344_v57  ;;  %3775 = vmatpush1.msra.mxu1 %v10863_v14  ;;  %v11373_v14 = vld [vmem:[%s10800_s27 + $0x4b0] sm:$0xff] }
 0x6cd   :  { %3675 = vmatprep.subr.mxu0 %v11348_v63  ;;  %3776 = vmatprep.subr.mxu1 %v10868_v60  ;;  %v11378_v60 = vld [vmem:[%s10800_s27 + $0x4a8] sm:$0xff] }
 0x6ce   :  { %3676 = vmatpush1.msra.mxu0 %v11353_v46  ;;  %3777 = vmatpush1.msra.mxu1 %v10873_v43  ;;  %v11383_v43 = vld [vmem:[%s10800_s27 + $0x4a0] sm:$0xff] }
 0x6cf   :  { %3677 = vmatprep.subr.mxu0 %v11358_v34  ;;  %3778 = vmatprep.subr.mxu1 %v10878_v54  ;;  %v11388_v54 = vld [vmem:[%s10800_s27 + $0x498] sm:$0xff] }
 0x6d0   :  { %3678 = vmatpush1.msra.mxu0 %v11363_v12  ;;  %3779 = vmatpush1.msra.mxu1 %v10883_v3  ;;  %v11393_v3 = vld [vmem:[%s10800_s27 + $0x490] sm:$0xff] }
 0x6d1   :  { %3679 = vmatprep.subr.mxu0 %v11368_v7  ;;  %3780 = vmatprep.subr.mxu1 %v10888_v58  ;;  %v11398_v58 = vld [vmem:[%s10800_s27 + $0x488] sm:$0xff] }
 0x6d2   :  { %3680 = vmatpush1.msra.mxu0 %v11373_v14  ;;  %3781 = vmatpush1.msra.mxu1 %v10896_v6  ;;  %v11403_v6 = vld [vmem:[%s10800_s27 + $0x480] sm:$0xff] }
 0x6d3   :  { %3681 = vmatprep.subr.mxu0 %v11378_v60  ;;  %3782 = vmatprep.subr.mxu1 %v10904_v25  ;;  %v11408_v25 = vld [vmem:[%s10800_s27 + $0x478] sm:$0xff] }
 0x6d4   :  { %3682 = vmatpush1.msra.mxu0 %v11383_v43  ;;  %3783 = vmatpush1.msra.mxu1 %v10912_v32  ;;  %v11413_v32 = vld [vmem:[%s10800_s27 + $0x470] sm:$0xff] }
 0x6d5   :  { %3683 = vmatprep.subr.mxu0 %v11388_v54  ;;  %3784 = vmatprep.subr.mxu1 %v10920_v44  ;;  %v11418_v44 = vld [vmem:[%s10800_s27 + $0x468] sm:$0xff] }
 0x6d6   :  { %3684 = vmatpush1.msra.mxu0 %v11393_v3  ;;  %3785 = vmatpush1.msra.mxu1 %v10928_v52  ;;  %v11423_v52 = vld [vmem:[%s10800_s27 + $0x460] sm:$0xff] }
 0x6d7   :  { %3685 = vmatprep.subr.mxu0 %v11398_v58  ;;  %3786 = vmatprep.subr.mxu1 %v10936_v17  ;;  %v11428_v17 = vld [vmem:[%s10800_s27 + $0x458] sm:$0xff] }
 0x6d8   :  { %3686 = vmatpush1.msra.mxu0 %v11403_v6  ;;  %3787 = vmatpush1.msra.mxu1 %v10944_v29  ;;  %v11433_v29 = vld [vmem:[%s10800_s27 + $0x450] sm:$0xff] }
 0x6d9   :  { %3687 = vmatprep.subr.mxu0 %v11408_v25  ;;  %3788 = vmatprep.subr.mxu1 %v10952_v53  ;;  %v11438_v53 = vld [vmem:[%s10800_s27 + $0x448] sm:$0xff] }
 0x6da   :  { %3688 = vmatpush1.msra.mxu0 %v11413_v32  ;;  %3789 = vmatpush1.msra.mxu1 %v10960_v8  ;;  %v11443_v8 = vld [vmem:[%s10800_s27 + $0x440] sm:$0xff] }
 0x6db   :  { %3689 = vmatprep.subr.mxu0 %v11418_v44  ;;  %3790 = vmatprep.subr.mxu1 %v10968_v20  ;;  %v11448_v20 = vld [vmem:[%s10800_s27 + $0x438] sm:$0xff] }
 0x6dc   :  { %3690 = vmatpush1.msra.mxu0 %v11423_v52  ;;  %3791 = vmatpush1.msra.mxu1 %v10976_v38  ;;  %v11453_v38 = vld [vmem:[%s10800_s27 + $0x430] sm:$0xff] }
 0x6dd   :  { %3691 = vmatprep.subr.mxu0 %v11428_v17  ;;  %3792 = vmatprep.subr.mxu1 %v10984_v47  ;;  %v11458_v47 = vld [vmem:[%s10800_s27 + $0x428] sm:$0xff] }
 0x6de   :  { %3692 = vmatpush1.msra.mxu0 %v11433_v29  ;;  %3793 = vmatpush1.msra.mxu1 %v10992_v56  ;;  %v11463_v56 = vld [vmem:[%s10800_s27 + $0x420] sm:$0xff] }
 0x6df   :  { %3693 = vmatprep.subr.mxu0 %v11438_v53  ;;  %3794 = vmatprep.subr.mxu1 %v11000_v28  ;;  %v11468_v28 = vld [vmem:[%s10800_s27 + $0x418] sm:$0xff] }
 0x6e0   :  { %3694 = vmatpush1.msra.mxu0 %v11443_v8  ;;  %3795 = vmatpush1.msra.mxu1 %v11008_v5  ;;  %v11473_v5 = vld [vmem:[%s10800_s27 + $0x410] sm:$0xff] }
 0x6e1   :  { %3695 = vmatprep.subr.mxu0 %v11448_v20  ;;  %3796 = vmatprep.subr.mxu1 %v11016_v23  ;;  %v11478_v23 = vld [vmem:[%s10800_s27 + $0x408] sm:$0xff] }
 0x6e2   :  { %3696 = vmatpush1.msra.mxu0 %v11453_v38  ;;  %3797 = vmatpush1.msra.mxu1 %v11024_v19  ;;  %v11483_v19 = vld [vmem:[%s10800_s27 + $0x400] sm:$0xff] }
 0x6e3   :  { %3697 = vmatprep.subr.mxu0 %v11458_v47  ;;  %3798 = vmatprep.subr.mxu1 %v11032_v39  ;;  %v11488_v39 = vld [vmem:[%s10800_s27 + $0x5f8] sm:$0xff] }
 0x6e4   :  { %3698 = vmatpush1.msra.mxu0 %v11463_v56  ;;  %3799 = vmatpush1.msra.mxu1 %v11040_v15  ;;  %v11493_v15 = vld [vmem:[%s10800_s27 + $0x5f0] sm:$0xff] }
 0x6e5   :  { %3699 = vmatprep.subr.mxu0 %v11468_v28  ;;  %3800 = vmatprep.subr.mxu1 %v11048_v31  ;;  %v11498_v31 = vld [vmem:[%s10800_s27 + $0x5e8] sm:$0xff] }
 0x6e6   :  { %3700 = vmatpush1.msra.mxu0 %v11473_v5  ;;  %3801 = vmatpush1.msra.mxu1 %v11056_v45  ;;  %v11503_v45 = vld [vmem:[%s10800_s27 + $0x5e0] sm:$0xff] }
 0x6e7   :  { %3701 = vmatprep.subr.mxu0 %v11478_v23  ;;  %3802 = vmatprep.subr.mxu1 %v11064_v49  ;;  %v11508_v49 = vld [vmem:[%s10800_s27 + $0x5d8] sm:$0xff] }
 0x6e8   :  { %3702 = vmatpush1.msra.mxu0 %v11483_v19  ;;  %3803 = vmatpush2.msra.mxu1 %v11072_v37  ;;  %v11513_v37 = vld [vmem:[%s10800_s27 + $0x5d0] sm:$0xff] }
 0x6e9   :  { %3703 = vmatprep.subr.mxu0 %v11488_v39  ;;  %3804 = vmatprep.subr.mxu1 %v11080_v51  ;;  %v11518_v51 = vld [vmem:[%s10800_s27 + $0x5c8] sm:$0xff] }
 0x6ea   :  { %3704 = vmatpush2.msra.mxu0 %v11493_v15  ;;  %3805 = vmatpush2.msra.mxu1 %v11088_v42  ;;  %v11523_v42 = vld [vmem:[%s10800_s27 + $0x5c0] sm:$0xff] }
 0x6eb   :  { %3705 = vmatprep.subr.mxu0 %v11498_v31  ;;  %3806 = vmatprep.subr.mxu1 %v11096_v55  ;;  %v11528_v55 = vld [vmem:[%s10800_s27 + $0x5b8] sm:$0xff] }
 0x6ec   :  { %3706 = vmatpush2.msra.mxu0 %v11503_v45  ;;  %3807 = vmatpush2.msra.mxu1 %v11104_v24  ;;  %v14025_v24 = vld [vmem:[#allocation66_spill] sm:$0xff] }
 0x6ed   :  { %3707 = vmatprep.subr.mxu0 %v11508_v49  ;;  %3808 = vmatprep.subr.mxu1 %v11112_v33  ;;  %v14026_v33 = vld [vmem:[#allocation70_spill] sm:$0xff] }
 0x6ee   :  { %3708 = vmatpush2.msra.mxu0 %v11513_v37  ;;  %3809 = vmatpush2.msra.mxu1 %v11120_v26  ;;  %v14027_v26 = vld [vmem:[#allocation10_spill] sm:$0xff] }
 0x6ef   :  { %3709 = vmatprep.subr.mxu0 %v11518_v51  ;;  %3810 = vmatprep.subr.mxu1 %v14025_v24  ;;  %v11583_v24 = vld [vmem:[%s10800_s27 + $0x560] sm:$0xff] }
 0x6f0   :  { %3710 = vmatpush2.msra.mxu0 %v11523_v42  ;;  %3811 = vmatpush2.msra.mxu1 %v14026_v33  ;;  %v14036_v33 = vld [vmem:[#allocation43_spill] sm:$0xff] }
 0x6f1   :  { %3711 = vmatprep.subr.mxu0 %v11528_v55  ;;  %3812 = vmatprep.subr.mxu1 %v14027_v26  ;;  %v11588_v26 = vld [vmem:[%s10800_s27 + $0x558] sm:$0xff] }
 0x6f2   :  { %3712 = vmatpush2.msra.mxu0 %v11533_v13  ;;  %3813 = vmatpush2.msra.mxu1 %v14028_v30  ;;  %v14037_v30 = vld [vmem:[#allocation51_spill] sm:$0xff] }
 0x6f3   :  { %3713 = vmatprep.subr.mxu0 %v11538_v10  ;;  %3814 = vmatprep.subr.mxu1 %v14029_v2  ;;  %v11593_v2 = vld [vmem:[%s10800_s27 + $0x550] sm:$0xff] }
 0x6f4   :  { %3714 = vmatpush2.msra.mxu0 %v11543_v27  ;;  %3815 = vmatpush2.msra.mxu1 %v14030_v62  ;;  %14038 = vst [vmem:[#allocation66_spill] sm:$0xff] %v11593_v2  ;;  %v14039_v62 = vld [vmem:[#allocation59_spill] sm:$0xff] }
 0x6f5   :  { %3715 = vmatprep.subr.mxu0 %v11548_v36  ;;  %3816 = vmatprep.subr.mxu1 %v14031_v4  ;;  %v11598_v4 = vld [vmem:[%s10800_s27 + $0x548] sm:$0xff] }
 0x6f6   :  { %3716 = vmatpush2.msra.mxu0 %v11553_v11  ;;  %3817 = vmatpush2.msra.mxu1 %v14032_v59  ;;  %14040 = vst [vmem:[#allocation70_spill] sm:$0xff] %v11598_v4  ;;  %v14041_v59 = vld [vmem:[#allocation25_spill] sm:$0xff] }
 0x6f7   :  { %3717 = vmatprep.subr.mxu0 %v11558_v61  ;;  %3818 = vmatprep.subr.mxu1 %v14033_v22  ;;  %v11603_v22 = vld [vmem:[%s10800_s27 + $0x540] sm:$0xff] }
 0x6f8   :  { %3718 = vmatpush2.msra.mxu0 %v11563_v41  ;;  %3819 = vmatpush2.msra.mxu1 %v14034_v9  ;;  %14042 = vst [vmem:[#allocation10_spill] sm:$0xff] %v11603_v22  ;;  %v14043_v9 = vld [vmem:[#allocation29_spill] sm:$0xff] }
 0x6f9   :  { %3719 = vmatprep.subr.mxu0 %v11568_v50  ;;  %3820 = vmatprep.subr.mxu1 %v14035_v18  ;;  %v11608_v18 = vld [vmem:[%s10800_s27 + $0x538] sm:$0xff] }
 0x6fa   :  { %3720 = vmatpush2.msra.mxu0 %v11573_v48  ;;  %3821 = vmatpush2.msra.mxu1 %v14036_v33  ;;  %14044 = vst [vmem:[#allocation12_spill] sm:$0xff] %v11608_v18  ;;  %v14045_v33 = vld [vmem:[#allocation33_spill] sm:$0xff] }
 0x6fb   :  { %3721 = vmatprep.subr.mxu0 %v11578_v16  ;;  %3822 = vmatprep.subr.mxu1 %v14037_v30  ;;  %v11613_v30 = vld [vmem:[%s10800_s27 + $0x530] sm:$0xff] }
 0x6fc   :  { %3722 = vmatpush2.msra.mxu0 %v11583_v24  ;;  %3823 = vmatpush2.msra.mxu1 %v14039_v62  ;;  %14046 = vst [vmem:[#allocation14_spill] sm:$0xff] %v11613_v30  ;;  %v14047_v62 = vld [vmem:[#allocation37_spill] sm:$0xff] }
 0x6fd   :  { %3723 = vmatprep.subr.mxu0 %v11588_v26  ;;  %3824 = vmatprep.subr.mxu1 %v14041_v59  ;;  %v11618_v59 = vld [vmem:[%s10800_s27 + $0x528] sm:$0xff] }
 0x6fe   :  { %3724 = vmatpush2.msra.mxu0 %v11593_v2  ;;  %3825 = vmatpush2.msra.mxu1 %v14043_v9  ;;  %14048 = vst [vmem:[#allocation16_spill] sm:$0xff] %v11618_v59  ;;  %v11623_v9 = vld [vmem:[%s10800_s27 + $0x520] sm:$0xff] }
 0x6ff   :  { %3725 = vmatprep.subr.mxu0 %v11598_v4  ;;  %3826 = vmatprep.subr.mxu1 %v14045_v33  ;;  %14050 = vst [vmem:[#allocation18_spill] sm:$0xff] %v11623_v9  ;;  %v11628_v33 = vld [vmem:[%s10800_s27 + $0x518] sm:$0xff]  ;;  %v3913_v4 = vld [vmem:[#allocation4 + $0x10] sm:$0x3c]  ;;  %v11643_v2 = vld [vmem:[%s10800_s27 + $0x500] sm:$0xff] }
 0x700   :  { %3726 = vmatpush2.msra.mxu0 %v11603_v22  ;;  %3827 = vmatpush2.msra.mxu1 %v14047_v62  ;;  %v14052_v22 = vld [vmem:[#allocation49_spill] sm:$0xff]  ;;  %v11633_v62 = vld [vmem:[%s10800_s27 + $0x510] sm:$0xff] }
 0x701   :  { %3727 = vmatprep.subr.mxu0 %v11608_v18  ;;  %3828 = vmatprep.subr.mxu1 %v14049_v40  ;;  %v14053_v18 = vld [vmem:[#allocation76_spill] sm:$0xff]  ;;  %v11638_v40 = vld [vmem:[%s10800_s27 + $0x508] sm:$0xff] }
 0x702   :  { %3728 = vmatpush2.msra.mxu0 %v11613_v30  ;;  %3829 = vmatpush2.msra.mxu1 %v14051_v35  ;;  %v14054_v30 = vld [vmem:[#allocation80_spill] sm:$0xff]  ;;  %v3766_v35 = vrot.slane %v3762_v21, 1  ;;  %v8417_v21 = vld [vmem:[%s10800_s27 + $0xf8] sm:$0xff] }
 0x703   :  { %3729 = vmatprep.subr.mxu0 %v11618_v59  ;;  %3830 = vmatprep.subr.mxu1 %v14052_v22  ;;  %v3663_v59 = vld [vmem:[#allocation4] sm:$0x3c]  ;;  %v14055_v22 = vld [vmem:[#allocation82_spill] sm:$0xff] }
 0x704   :  { %3730 = vmatpush2.msra.mxu0 %v11623_v9  ;;  %3831 = vmatpush2.msra.mxu1 %v14053_v18  ;;  %v3917_v18 = vrot.slane %v3913_v4, 2  ;;  %v14056_v9 = vld [vmem:[#allocation84_spill] sm:$0xff]  ;;  %v3761_v4 = vld [vmem:[#allocation4 + $0x10] sm:$0xf] }
 0x705   :  { %3731 = vmatprep.subr.mxu0 %v11628_v33  ;;  %3832 = vmatprep.subr.mxu1 %v14054_v30  ;;  %v3667_v30 = vrot.slane %v3663_v59, 2  ;;  %v8421_v59 = vld [vmem:[%s10800_s27 + $0xd8] sm:$0xff] }
 0x706   :  { %3732 = vmatpush2.msra.mxu0 %v11633_v62  ;;  %3833 = vmatpush2.msra.mxu1 %v14055_v22  ;;  %v8418_v22 = vld [vmem:[%s10800_s27 + $0xf0] sm:$0xff] }
 0x707   :  { %3733 = vmatprep.subr.mxu0 %v11638_v40  ;;  %3835 = vmatmul.mubr.f32.vlgmr.msra.gmra.mxu1 %v3766_v35  ;;  %v8426_v35 = vld [vmem:[%s10800_s27 + $0xb0] sm:$0xff] }
 0x708   :  { %3920 = vmatprep.subr.mxu1 %v14056_v9  ;;  %3734 = vmatpush2.msra.mxu0 %v11643_v2  ;;  %v8419_v9 = vld [vmem:[%s10800_s27 + $0xe8] sm:$0xff] }
 0x709   :  { %3921 = vmatpush1.msra.mxu1 %v11336_v1  ;;  %3984 = vmatprep.mubr.f32.mxu1 %v3917_v18  ;;  %v8420_v1 = vld [vmem:[%s10800_s27 + $0xe0] sm:$0xff]  ;;  %v14097_v18 = vld [vmem:[#allocation66_spill] sm:$0xff] }
 0x70a   :  { %3736 = vmatmul.mubr.f32.vlgmr.msra.gmra.mxu0 %v3667_v30  ;;  %3841 = vmatprep.subr.mxu0 %v8417_v21  ;;  %v14099_v30 = vld [vmem:[#allocation70_spill] sm:$0xff] }
 0x70b   :  { %3922 = vmatprep.subr.mxu1 %v11340_v0  ;;  %3842 = vmatpush1.msra.mxu0 %v8418_v22  ;;  %v8422_v0 = vld [vmem:[%s10800_s27 + $0xd0] sm:$0xff]  ;;  %v14103_v22 = vld [vmem:[#allocation12_spill] sm:$0xff] }
 0x70c   :  { %3905 = vmatprep.mubr.f32.mxu0 %v3761_v4  ;;  %3923 = vmatpush1.msra.mxu1 %v11344_v57  ;;  %v8423_v57 = vld [vmem:[%s10800_s27 + $0xc8] sm:$0xff]  ;;  %v14101_v21 = vld [vmem:[#allocation10_spill] sm:$0xff] }
 0x70d   :  { %3843 = vmatprep.subr.mxu0 %v8419_v9  ;;  %3924 = vmatprep.subr.mxu1 %v11348_v63  ;;  %v8424_v63 = vld [vmem:[%s10800_s27 + $0xc0] sm:$0xff]  ;;  %v14105_v4 = vld [vmem:[#allocation14_spill] sm:$0xff] }
 0x70e   :  { %3844 = vmatpush1.msra.mxu0 %v8420_v1  ;;  %3925 = vmatpush1.msra.mxu1 %v11353_v46  ;;  %v8425_v46 = vld [vmem:[%s10800_s27 + $0xb8] sm:$0xff]  ;;  %v14107_v9 = vld [vmem:[#allocation16_spill] sm:$0xff] }
 0x70f   :  { %3845 = vmatprep.subr.mxu0 %v8421_v59  ;;  %3926 = vmatprep.subr.mxu1 %v11358_v34  ;;  %v8427_v34 = vld [vmem:[%s10800_s27 + $0xa8] sm:$0xff]  ;;  %v14108_v1 = vld [vmem:[#allocation28_spill] sm:$0xff]  ;;  %v14109_v59 = vld [vmem:[#allocation18_spill] sm:$0xff] }
 0x710   :  { %3846 = vmatpush1.msra.mxu0 %v8422_v0  ;;  %3927 = vmatpush1.msra.mxu1 %v11363_v12  ;;  %v8428_v12 = vld [vmem:[%s10800_s27 + $0xa0] sm:$0xff]  ;;  %v3912_v0 = vld [vmem:[#allocation4 + $0x8] sm:$0x3c]  ;;  %s6614_s27 = sld [smem:[%s13337_s0 + %s8459_s24]]  }
 0x711   :  { %3847 = vmatprep.subr.mxu0 %v8423_v57  ;;  %3928 = vmatprep.subr.mxu1 %v11368_v7  ;;  %v14057_v7 = vld [vmem:[#allocation53_spill] sm:$0xff]  ;;  %v14110_v57 = vld [vmem:[#allocation30_spill] sm:$0xff] }
 0x712   :  { %3848 = vmatpush1.msra.mxu0 %v8424_v63  ;;  %3929 = vmatpush1.msra.mxu1 %v11373_v14  ;;  %v14058_v14 = vld [vmem:[#allocation57_spill] sm:$0xff]  ;;  %v14111_v63 = vld [vmem:[#allocation32_spill] sm:$0xff] }
 0x713   :  { %3849 = vmatprep.subr.mxu0 %v8425_v46  ;;  %3930 = vmatprep.subr.mxu1 %v11378_v60  ;;  %v14059_v60 = vld [vmem:[#allocation61_spill] sm:$0xff]  ;;  %v14112_v46 = vld [vmem:[#allocation34_spill] sm:$0xff] }
 0x714   :  { %3850 = vmatpush1.msra.mxu0 %v8426_v35  ;;  %3931 = vmatpush1.msra.mxu1 %v11383_v43  ;;  %v14060_v43 = vld [vmem:[#allocation63_spill] sm:$0xff]  ;;  %v3916_v35 = vrot.slane %v3912_v0, 2  ;;  %v4105_v0 = vld [vmem:[%s11780_s13 + $0x140] sm:$0xff] }
 0x715   :  { %3851 = vmatprep.subr.mxu0 %v8427_v34  ;;  %3932 = vmatprep.subr.mxu1 %v11388_v54  ;;  %v14061_v54 = vld [vmem:[#allocation65_spill] sm:$0xff]  ;;  %v14113_v34 = vld [vmem:[#allocation36_spill] sm:$0xff] }
 0x716   :  { %3852 = vmatpush1.msra.mxu0 %v8428_v12  ;;  %3933 = vmatpush1.msra.mxu1 %v11393_v3  ;;  %v14062_v3 = vld [vmem:[#allocation67_spill] sm:$0xff]  ;;  %v14114_v12 = vld [vmem:[#allocation38_spill] sm:$0xff] }
 0x717   :  { %3853 = vmatprep.subr.mxu0 %v14057_v7  ;;  %3934 = vmatprep.subr.mxu1 %v11398_v58  ;;  %v14063_v58 = vld [vmem:[#allocation69_spill] sm:$0xff]  ;;  %v14115_v7 = vld [vmem:[#allocation78_spill] sm:$0xff] }
 0x718   :  { %3854 = vmatpush1.msra.mxu0 %v14058_v14  ;;  %3935 = vmatpush1.msra.mxu1 %v11403_v6  ;;  %v14064_v6 = vld [vmem:[#allocation71_spill] sm:$0xff]  ;;  %v3760_v14 = vld [vmem:[#allocation4 + $0x8] sm:$0xf] }
 0x719   :  { %3855 = vmatprep.subr.mxu0 %v14059_v60  ;;  %3936 = vmatprep.subr.mxu1 %v11408_v25  ;;  %v14065_v25 = vld [vmem:[#allocation72_spill] sm:$0xff]  ;;  %v4092_v60 = vld [vmem:[%s11780_s13 + $0xd8] sm:$0xff] }
 0x71a   :  { %3856 = vmatpush1.msra.mxu0 %v14060_v43  ;;  %3937 = vmatpush1.msra.mxu1 %v11413_v32  ;;  %v14066_v32 = vld [vmem:[#allocation74_spill] sm:$0xff] }
 0x71b   :  { %3857 = vmatprep.subr.mxu0 %v14061_v54  ;;  %3938 = vmatprep.subr.mxu1 %v11418_v44  ;;  %v14067_v44 = vld [vmem:[#allocation40_spill] sm:$0xff]  ;;  %v4091_v43 = vld [vmem:[%s11780_s13 + $0xd0] sm:$0xff]  ;;  %v4090_v54 = vld [vmem:[%s11780_s13 + $0xc8] sm:$0xff] }
 0x71c   :  { %3858 = vmatpush1.msra.mxu0 %v14062_v3  ;;  %3939 = vmatpush1.msra.mxu1 %v11423_v52  ;;  %v14068_v52 = vld [vmem:[#allocation77_spill] sm:$0xff]  ;;  %v4089_v3 = vld [vmem:[%s11780_s13 + $0xc0] sm:$0xff] }
 0x71d   :  { %3859 = vmatprep.subr.mxu0 %v14063_v58  ;;  %3940 = vmatprep.subr.mxu1 %v11428_v17  ;;  %v14069_v17 = vld [vmem:[#allocation79_spill] sm:$0xff] }
 0x71e   :  { %3860 = vmatpush1.msra.mxu0 %v14064_v6  ;;  %3941 = vmatpush1.msra.mxu1 %v11433_v29  ;;  %v14070_v29 = vld [vmem:[#allocation81_spill] sm:$0xff]  ;;  %v4088_v58 = vld [vmem:[%s11780_s13 + $0xb8] sm:$0xff]  ;;  %v4087_v6 = vld [vmem:[%s11780_s13 + $0xb0] sm:$0xff] }
 0x71f   :  { %3861 = vmatprep.subr.mxu0 %v14065_v25  ;;  %3942 = vmatprep.subr.mxu1 %v11438_v53  ;;  %v14071_v53 = vld [vmem:[#allocation83_spill] sm:$0xff]  ;;  %v4086_v25 = vld [vmem:[%s11780_s13 + $0xa8] sm:$0xff] }
 0x720   :  { %3862 = vmatpush1.msra.mxu0 %v14066_v32  ;;  %3943 = vmatpush1.msra.mxu1 %v11443_v8  ;;  %v14072_v8 = vld [vmem:[#allocation85_spill] sm:$0xff]  ;;  %v4085_v32 = vld [vmem:[%s11780_s13 + $0xa0] sm:$0xff] }
 0x721   :  { %3863 = vmatprep.subr.mxu0 %v14067_v44  ;;  %3944 = vmatprep.subr.mxu1 %v11448_v20  ;;  %v14073_v20 = vld [vmem:[#allocation86_spill] sm:$0xff]  ;;  %v4084_v44 = vld [vmem:[%s11780_s13 + $0x98] sm:$0xff] }
 0x722   :  { %3864 = vmatpush1.msra.mxu0 %v14068_v52  ;;  %3945 = vmatpush1.msra.mxu1 %v11453_v38  ;;  %v14074_v38 = vld [vmem:[#allocation87_spill] sm:$0xff]  ;;  %v4083_v52 = vld [vmem:[%s11780_s13 + $0x90] sm:$0xff] }
 0x723   :  { %3865 = vmatprep.subr.mxu0 %v14069_v17  ;;  %3946 = vmatprep.subr.mxu1 %v11458_v47  ;;  %v14075_v47 = vld [vmem:[#allocation42_spill] sm:$0xff]  ;;  %v4082_v17 = vld [vmem:[%s11780_s13 + $0x88] sm:$0xff] }
 0x724   :  { %3866 = vmatpush1.msra.mxu0 %v14070_v29  ;;  %3947 = vmatpush1.msra.mxu1 %v11463_v56  ;;  %v14076_v56 = vld [vmem:[#allocation44_spill] sm:$0xff] }
 0x725   :  { %3867 = vmatprep.subr.mxu0 %v14071_v53  ;;  %3948 = vmatprep.subr.mxu1 %v11468_v28  ;;  %v14077_v28 = vld [vmem:[#allocation46_spill] sm:$0xff]  ;;  %v4081_v29 = vld [vmem:[%s11780_s13 + $0x80] sm:$0xff]  ;;  %v4080_v53 = vld [vmem:[%s11780_s13 + $0x78] sm:$0xff] }
 0x726   :  { %3868 = vmatpush1.msra.mxu0 %v14072_v8  ;;  %3949 = vmatpush1.msra.mxu1 %v11473_v5  ;;  %v14078_v5 = vld [vmem:[#allocation48_spill] sm:$0xff]  ;;  %v4079_v8 = vld [vmem:[%s11780_s13 + $0x70] sm:$0xff] }
 0x727   :  { %3869 = vmatprep.subr.mxu0 %v14073_v20  ;;  %3950 = vmatprep.subr.mxu1 %v11478_v23  ;;  %v14079_v23 = vld [vmem:[#allocation50_spill] sm:$0xff]  ;;  %v4078_v20 = vld [vmem:[%s11780_s13 + $0x68] sm:$0xff] }
 0x728   :  { %3870 = vmatpush1.msra.mxu0 %v14074_v38  ;;  %3951 = vmatpush1.msra.mxu1 %v11483_v19  ;;  %v14080_v19 = vld [vmem:[#allocation52_spill] sm:$0xff] }
 0x729   :  { %3871 = vmatprep.subr.mxu0 %v14075_v47  ;;  %3952 = vmatprep.subr.mxu1 %v11488_v39  ;;  %v14081_v39 = vld [vmem:[#allocation54_spill] sm:$0xff]  ;;  %v4077_v38 = vld [vmem:[%s11780_s13 + $0x60] sm:$0xff]  ;;  %v4076_v47 = vld [vmem:[%s11780_s13 + $0x58] sm:$0xff] }
 0x72a   :  { %3872 = vmatpush1.msra.mxu0 %v14076_v56  ;;  %3953 = vmatpush2.msra.mxu1 %v11493_v15  ;;  %v14082_v15 = vld [vmem:[#allocation56_spill] sm:$0xff]  ;;  %v4075_v56 = vld [vmem:[%s11780_s13 + $0x50] sm:$0xff] }
 0x72b   :  { %3873 = vmatprep.subr.mxu0 %v14077_v28  ;;  %3954 = vmatprep.subr.mxu1 %v11498_v31  ;;  %v14083_v31 = vld [vmem:[#allocation58_spill] sm:$0xff]  ;;  %v4074_v28 = vld [vmem:[%s11780_s13 + $0x48] sm:$0xff] }
 0x72c   :  { %3874 = vmatpush2.msra.mxu0 %v14078_v5  ;;  %3955 = vmatpush2.msra.mxu1 %v11503_v45  ;;  %v14084_v45 = vld [vmem:[#allocation60_spill] sm:$0xff] }
 0x72d   :  { %3875 = vmatprep.subr.mxu0 %v14079_v23  ;;  %3956 = vmatprep.subr.mxu1 %v11508_v49  ;;  %v14085_v49 = vld [vmem:[#allocation62_spill] sm:$0xff]  ;;  %v4073_v5 = vld [vmem:[%s11780_s13 + $0x40] sm:$0xff]  ;;  %v4072_v23 = vld [vmem:[%s11780_s13 + $0x38] sm:$0xff] }
 0x72e   :  { %3876 = vmatpush2.msra.mxu0 %v14080_v19  ;;  %3957 = vmatpush2.msra.mxu1 %v11513_v37  ;;  %v14086_v37 = vld [vmem:[#allocation64_spill] sm:$0xff]  ;;  %v4071_v19 = vld [vmem:[%s11780_s13 + $0x30] sm:$0xff] }
 0x72f   :  { %3877 = vmatprep.subr.mxu0 %v14081_v39  ;;  %3958 = vmatprep.subr.mxu1 %v11518_v51  ;;  %v14087_v51 = vld [vmem:[#allocation68_spill] sm:$0xff]  ;;  %v4070_v39 = vld [vmem:[%s11780_s13 + $0x28] sm:$0xff] }
 0x730   :  { %3878 = vmatpush2.msra.mxu0 %v14082_v15  ;;  %3959 = vmatpush2.msra.mxu1 %v11523_v42  ;;  %v14088_v42 = vld [vmem:[#allocation73_spill] sm:$0xff]  ;;  %v4069_v15 = vld [vmem:[%s11780_s13 + $0x20] sm:$0xff] }
 0x731   :  { %3879 = vmatprep.subr.mxu0 %v14083_v31  ;;  %3960 = vmatprep.subr.mxu1 %v11528_v55  ;;  %v14089_v55 = vld [vmem:[#allocation11_spill] sm:$0xff] }
 0x732   :  { %3880 = vmatpush2.msra.mxu0 %v14084_v45  ;;  %3961 = vmatpush2.msra.mxu1 %v11533_v13  ;;  %v14090_v13 = vld [vmem:[#allocation13_spill] sm:$0xff]  ;;  %v4068_v31 = vld [vmem:[%s11780_s13 + $0x18] sm:$0xff]  ;;  %v4067_v45 = vld [vmem:[%s11780_s13 + $0x10] sm:$0xff] }
 0x733   :  { %3881 = vmatprep.subr.mxu0 %v14085_v49  ;;  %3962 = vmatprep.subr.mxu1 %v11538_v10  ;;  %v14091_v10 = vld [vmem:[#allocation15_spill] sm:$0xff]  ;;  %v4066_v49 = vld [vmem:[%s11780_s13 + $0x8] sm:$0xff] }
 0x734   :  { %3882 = vmatpush2.msra.mxu0 %v14086_v37  ;;  %3963 = vmatpush2.msra.mxu1 %v11543_v27  ;;  %v14092_v27 = vld [vmem:[#allocation17_spill] sm:$0xff]  ;;  %v4065_v37 = vld [vmem:[%s11780_s13] sm:$0xff] }
 0x735   :  { %3883 = vmatprep.subr.mxu0 %v14087_v51  ;;  %3964 = vmatprep.subr.mxu1 %v11548_v36  ;;  %v14093_v36 = vld [vmem:[#allocation19_spill] sm:$0xff] }
 0x736   :  { %3884 = vmatpush2.msra.mxu0 %v14088_v42  ;;  %3965 = vmatpush2.msra.mxu1 %v11553_v11  ;;  %v14094_v11 = vld [vmem:[#allocation21_spill] sm:$0xff]  ;;  %v4128_v51 = vld [vmem:[%s11780_s13 + $0x1f8] sm:$0xff]  ;;  %v4127_v42 = vld [vmem:[%s11780_s13 + $0x1f0] sm:$0xff] }
 0x737   :  { %3885 = vmatprep.subr.mxu0 %v14089_v55  ;;  %3966 = vmatprep.subr.mxu1 %v11558_v61  ;;  %v14095_v61 = vld [vmem:[#allocation23_spill] sm:$0xff]  ;;  %v4126_v55 = vld [vmem:[%s11780_s13 + $0x1e8] sm:$0xff] }
 0x738   :  { %3886 = vmatpush2.msra.mxu0 %v14090_v13  ;;  %3967 = vmatpush2.msra.mxu1 %v11563_v41  ;;  %v14096_v41 = vld [vmem:[#allocation31_spill] sm:$0xff]  ;;  %v4125_v13 = vld [vmem:[%s11780_s13 + $0x1e0] sm:$0xff] }
 0x739   :  { %3887 = vmatprep.subr.mxu0 %v14091_v10  ;;  %3968 = vmatprep.subr.mxu1 %v11568_v50  ;;  %v14098_v50 = vld [vmem:[#allocation39_spill] sm:$0xff] }
 0x73a   :  { %3888 = vmatpush2.msra.mxu0 %v14092_v27  ;;  %3969 = vmatpush2.msra.mxu1 %v11573_v48  ;;  %v14100_v48 = vld [vmem:[#allocation47_spill] sm:$0xff]  ;;  %v4123_v27 = vld [vmem:[%s11780_s13 + $0x1d0] sm:$0xff] }
 0x73b   :  { %3889 = vmatprep.subr.mxu0 %v14093_v36  ;;  %3970 = vmatprep.subr.mxu1 %v11578_v16  ;;  %v14102_v16 = vld [vmem:[#allocation55_spill] sm:$0xff]  ;;  %v4122_v36 = vld [vmem:[%s11780_s13 + $0x1c8] sm:$0xff] }
 0x73c   :  { %3890 = vmatpush2.msra.mxu0 %v14094_v11  ;;  %3971 = vmatpush2.msra.mxu1 %v11583_v24  ;;  %v14104_v24 = vld [vmem:[#allocation24_spill] sm:$0xff]  ;;  %v4124_v10 = vld [vmem:[%s11780_s13 + $0x1d8] sm:$0xff] }
 0x73d   :  { %3891 = vmatprep.subr.mxu0 %v14095_v61  ;;  %3972 = vmatprep.subr.mxu1 %v11588_v26  ;;  %v14106_v26 = vld [vmem:[#allocation26_spill] sm:$0xff]  ;;  %v4121_v11 = vld [vmem:[%s11780_s13 + $0x1c0] sm:$0xff]  ;;  %v4120_v61 = vld [vmem:[%s11780_s13 + $0x1b8] sm:$0xff] }
 0x73e   :  { %3892 = vmatpush2.msra.mxu0 %v14096_v41  ;;  %3973 = vmatpush2.msra.mxu1 %v14097_v18  ;;  %v4119_v41 = vld [vmem:[%s11780_s13 + $0x1b0] sm:$0xff]  ;;  %v4118_v18 = vld [vmem:[%s11780_s13 + $0x1a8] sm:$0xff] }
 0x73f   :  { %3893 = vmatprep.subr.mxu0 %v14098_v50  ;;  %3974 = vmatprep.subr.mxu1 %v14099_v30  ;;  %v4117_v50 = vld [vmem:[%s11780_s13 + $0x1a0] sm:$0xff]  ;;  %v4116_v30 = vld [vmem:[%s11780_s13 + $0x198] sm:$0xff] }
 0x740   :  { %3894 = vmatpush2.msra.mxu0 %v14100_v48  ;;  %3975 = vmatpush2.msra.mxu1 %v14101_v21  ;;  %v4115_v48 = vld [vmem:[%s11780_s13 + $0x190] sm:$0xff]  ;;  %v4114_v21 = vld [vmem:[%s11780_s13 + $0x188] sm:$0xff] }
 0x741   :  { %3895 = vmatprep.subr.mxu0 %v14102_v16  ;;  %3976 = vmatprep.subr.mxu1 %v14103_v22  ;;  %v4113_v16 = vld [vmem:[%s11780_s13 + $0x180] sm:$0xff]  ;;  %v4112_v22 = vld [vmem:[%s11780_s13 + $0x178] sm:$0xff] }
 0x742   :  { %3896 = vmatpush2.msra.mxu0 %v14104_v24  ;;  %3977 = vmatpush2.msra.mxu1 %v14105_v4  ;;  %v4111_v24 = vld [vmem:[%s11780_s13 + $0x170] sm:$0xff]  ;;  %v4110_v4 = vld [vmem:[%s11780_s13 + $0x168] sm:$0xff] }
 0x743   :  { %3897 = vmatprep.subr.mxu0 %v14106_v26  ;;  %3978 = vmatprep.subr.mxu1 %v14107_v9  ;;  %v4109_v26 = vld [vmem:[%s11780_s13 + $0x160] sm:$0xff]  ;;  %v4108_v9 = vld [vmem:[%s11780_s13 + $0x158] sm:$0xff] }
 0x744   :  { %3898 = vmatpush2.msra.mxu0 %v14108_v1  ;;  %3979 = vmatpush2.msra.mxu1 %v14109_v59  ;;  %v4107_v1 = vld [vmem:[%s11780_s13 + $0x150] sm:$0xff]  ;;  %v4106_v59 = vld [vmem:[%s11780_s13 + $0x148] sm:$0xff] }
 0x745   :  { %3899 = vmatprep.subr.mxu0 %v14110_v57  ;;  %3980 = vmatprep.subr.mxu1 %v11628_v33  ;;  %v4095_v33 = vld [vmem:[%s11780_s13 + $0xf0] sm:$0xff]  ;;  %v4104_v57 = vld [vmem:[%s11780_s13 + $0x138] sm:$0xff] }
 0x746   :  { %3900 = vmatpush2.msra.mxu0 %v14111_v63  ;;  %3981 = vmatpush2.msra.mxu1 %v11633_v62  ;;  %v4094_v62 = vld [vmem:[%s11780_s13 + $0xe8] sm:$0xff]  ;;  %v4103_v63 = vld [vmem:[%s11780_s13 + $0x130] sm:$0xff] }
 0x747   :  { %3901 = vmatprep.subr.mxu0 %v14112_v46  ;;  %3982 = vmatprep.subr.mxu1 %v11638_v40  ;;  %v4093_v40 = vld [vmem:[%s11780_s13 + $0xe0] sm:$0xff]  ;;  %v4102_v46 = vld [vmem:[%s11780_s13 + $0x128] sm:$0xff] }
 0x748   :  { %3902 = vmatpush2.msra.mxu0 %v14113_v34  ;;  %3983 = vmatpush2.msra.mxu1 %v11643_v2  ;;  %v4096_v2 = vld [vmem:[%s11780_s13 + $0xf8] sm:$0xff] }
 0x749   :  { %3903 = vmatprep.subr.mxu0 %v14114_v12  ;;  %3985 = vmatmul.mubr.f32.vlgmr.msra.gmra.mxu1 %v3916_v35  ;;  %v4101_v35 = vld [vmem:[%s11780_s13 + $0x120] sm:$0xff]  ;;  %v4100_v34 = vld [vmem:[%s11780_s13 + $0x118] sm:$0xff]  ;;  %v4099_v12 = vld [vmem:[%s11780_s13 + $0x110] sm:$0xff] }
 0x74a   :  { %3904 = vmatpush2.msra.mxu0 %v14115_v7  ;;  %4202 = vmatprep.subr.mxu1 %v4096_v2  ;;  %v4098_v7 = vld [vmem:[%s11780_s13 + $0x108] sm:$0xff] }
 0x74b   :  { %3906 = vmatmul.mubr.f32.vlgmr.msra.gmra.mxu0 %v3760_v14  ;;  %4129 = vmatprep.subr.mxu0 %v4096_v2  ;;  %v4097_v14 = vld [vmem:[%s11780_s13 + $0x100] sm:$0xff]  ;;  %s13265_s13 = sld [smem:[%s13337_s0 + %s8463_s10]]  }
 0x74c   :  { %4130 = vmatpush1.msra.mxu0 %v4095_v33  ;;  %4203 = vmatpush1.msra.mxu1 %v4095_v33 }
 0x74d   :  { %4131 = vmatprep.subr.mxu0 %v4094_v62  ;;  %4204 = vmatprep.subr.mxu1 %v4094_v62 }
 0x74e   :  { %4132 = vmatpush1.msra.mxu0 %v4093_v40  ;;  %4205 = vmatpush1.msra.mxu1 %v4093_v40 }
 0x74f   :  { %4133 = vmatprep.subr.mxu0 %v4092_v60  ;;  %4206 = vmatprep.subr.mxu1 %v4092_v60 }
 0x750   :  { %4134 = vmatpush1.msra.mxu0 %v4091_v43  ;;  %4207 = vmatpush1.msra.mxu1 %v4091_v43 }
 0x751   :  { %4135 = vmatprep.subr.mxu0 %v4090_v54  ;;  %4208 = vmatprep.subr.mxu1 %v4090_v54 }
 0x752   :  { %4136 = vmatpush1.msra.mxu0 %v4089_v3  ;;  %4209 = vmatpush1.msra.mxu1 %v4089_v3  ;;  %v3744_v3 = vld [vmem:[%s6604_s17] sm:$0x3]  ;;  %s6619_s17 = sld [smem:[%s13337_s0 + %s8464_s14]]  }
 0x753   :  { %4137 = vmatprep.subr.mxu0 %v4088_v58  ;;  %4210 = vmatprep.subr.mxu1 %v4088_v58 }
 0x754   :  { %4138 = vmatpush1.msra.mxu0 %v4087_v6  ;;  %4211 = vmatpush1.msra.mxu1 %v4087_v6 }
 0x755   :  { %4139 = vmatprep.subr.mxu0 %v4086_v25  ;;  %4212 = vmatprep.subr.mxu1 %v4086_v25  ;;  %v14116_v25 = vld [vmem:[#allocation8_spill] sm:$0xff] }
 0x756   :  { %4140 = vmatpush1.msra.mxu0 %v4085_v32  ;;  %4213 = vmatpush1.msra.mxu1 %v4085_v32  ;;  %v3753_v32 = vrot.slane %v3744_v3, %v14116_v25 }
 0x757   :  { %4141 = vmatprep.subr.mxu0 %v4084_v44  ;;  %4214 = vmatprep.subr.mxu1 %v4084_v44 }
 0x758   :  { %4142 = vmatpush1.msra.mxu0 %v4083_v52  ;;  %4215 = vmatpush1.msra.mxu1 %v4083_v52  ;;  %v14117_v52 = vld [vmem:[#allocation9_spill] sm:$0xff] }
 0x759   :  { %4143 = vmatprep.subr.mxu0 %v4082_v17  ;;  %4216 = vmatprep.subr.mxu1 %v4082_v17  ;;  %v3749_v17 = vrot.slane %v3744_v3, %v14117_v52 }
 0x75a   :  { %4144 = vmatpush1.msra.mxu0 %v4081_v29  ;;  %4217 = vmatpush1.msra.mxu1 %v4081_v29 }
 0x75b   :  { %4145 = vmatprep.subr.mxu0 %v4080_v53  ;;  %4218 = vmatprep.subr.mxu1 %v4080_v53 }
 0x75c   :  { %4146 = vmatpush1.msra.mxu0 %v4079_v8  ;;  %4219 = vmatpush1.msra.mxu1 %v4079_v8 }
 0x75d   :  { %4147 = vmatprep.subr.mxu0 %v4078_v20  ;;  %4220 = vmatprep.subr.mxu1 %v4078_v20 }
 0x75e   :  { %4148 = vmatpush1.msra.mxu0 %v4077_v38  ;;  %4221 = vmatpush1.msra.mxu1 %v4077_v38 }
 0x75f   :  { %4149 = vmatprep.subr.mxu0 %v4076_v47  ;;  %4222 = vmatprep.subr.mxu1 %v4076_v47 }
 0x760   :  { %4150 = vmatpush1.msra.mxu0 %v4075_v56  ;;  %4223 = vmatpush1.msra.mxu1 %v4075_v56 }
 0x761   :  { %4151 = vmatprep.subr.mxu0 %v4074_v28  ;;  %4224 = vmatprep.subr.mxu1 %v4074_v28 }
 0x762   :  { %4152 = vmatpush1.msra.mxu0 %v4073_v5  ;;  %4225 = vmatpush1.msra.mxu1 %v4073_v5 }
 0x763   :  { %4153 = vmatprep.subr.mxu0 %v4072_v23  ;;  %4226 = vmatprep.subr.mxu1 %v4072_v23 }
 0x764   :  { %4154 = vmatpush1.msra.mxu0 %v4071_v19  ;;  %4227 = vmatpush1.msra.mxu1 %v4071_v19 }
 0x765   :  { %4155 = vmatprep.subr.mxu0 %v4070_v39  ;;  %4228 = vmatprep.subr.mxu1 %v4070_v39 }
 0x766   :  { %4156 = vmatpush1.msra.mxu0 %v4069_v15  ;;  %4229 = vmatpush1.msra.mxu1 %v4069_v15 }
 0x767   :  { %4157 = vmatprep.subr.mxu0 %v4068_v31  ;;  %4230 = vmatprep.subr.mxu1 %v4068_v31 }
 0x768   :  { %4158 = vmatpush1.msra.mxu0 %v4067_v45  ;;  %4231 = vmatpush1.msra.mxu1 %v4067_v45 }
 0x769   :  { %4159 = vmatprep.subr.mxu0 %v4066_v49  ;;  %4232 = vmatprep.subr.mxu1 %v4066_v49 }
 0x76a   :  { %4160 = vmatpush1.msra.mxu0 %v4065_v37  ;;  %4233 = vmatpush1.msra.mxu1 %v4065_v37 }
 0x76b   :  { %4161 = vmatprep.subr.mxu0 %v4128_v51  ;;  %4234 = vmatprep.subr.mxu1 %v4128_v51 }
 0x76c   :  { %4162 = vmatpush2.msra.mxu0 %v4127_v42  ;;  %4235 = vmatpush2.msra.mxu1 %v4127_v42 }
 0x76d   :  { %4163 = vmatprep.subr.mxu0 %v4126_v55  ;;  %4236 = vmatprep.subr.mxu1 %v4126_v55 }
 0x76e   :  { %4164 = vmatpush2.msra.mxu0 %v4125_v13  ;;  %4237 = vmatpush2.msra.mxu1 %v4125_v13 }
 0x76f   :  { %4165 = vmatprep.subr.mxu0 %v4124_v10  ;;  %4238 = vmatprep.subr.mxu1 %v4124_v10 }
 0x770   :  { %4166 = vmatpush2.msra.mxu0 %v4123_v27  ;;  %4239 = vmatpush2.msra.mxu1 %v4123_v27 }
 0x771   :  { %4167 = vmatprep.subr.mxu0 %v4122_v36  ;;  %4240 = vmatprep.subr.mxu1 %v4122_v36 }
 0x772   :  { %4168 = vmatpush2.msra.mxu0 %v4121_v11  ;;  %4241 = vmatpush2.msra.mxu1 %v4121_v11 }
 0x773   :  { %4169 = vmatprep.subr.mxu0 %v4120_v61  ;;  %4242 = vmatprep.subr.mxu1 %v4120_v61 }
 0x774   :  { %4170 = vmatpush2.msra.mxu0 %v4119_v41  ;;  %4243 = vmatpush2.msra.mxu1 %v4119_v41 }
 0x775   :  { %4171 = vmatprep.subr.mxu0 %v4118_v18  ;;  %4244 = vmatprep.subr.mxu1 %v4118_v18 }
 0x776   :  { %4172 = vmatpush2.msra.mxu0 %v4117_v50  ;;  %4245 = vmatpush2.msra.mxu1 %v4117_v50 }
 0x777   :  { %4173 = vmatprep.subr.mxu0 %v4116_v30  ;;  %4246 = vmatprep.subr.mxu1 %v4116_v30 }
 0x778   :  { %4174 = vmatpush2.msra.mxu0 %v4115_v48  ;;  %4247 = vmatpush2.msra.mxu1 %v4115_v48 }
 0x779   :  { %4175 = vmatprep.subr.mxu0 %v4114_v21  ;;  %4248 = vmatprep.subr.mxu1 %v4114_v21 }
 0x77a   :  { %4176 = vmatpush2.msra.mxu0 %v4113_v16  ;;  %4249 = vmatpush2.msra.mxu1 %v4113_v16 }
 0x77b   :  { %4177 = vmatprep.subr.mxu0 %v4112_v22  ;;  %4250 = vmatprep.subr.mxu1 %v4112_v22 }
 0x77c   :  { %4178 = vmatpush2.msra.mxu0 %v4111_v24  ;;  %4251 = vmatpush2.msra.mxu1 %v4111_v24 }
 0x77d   :  { %4179 = vmatprep.subr.mxu0 %v4110_v4  ;;  %4252 = vmatprep.subr.mxu1 %v4110_v4 }
 0x77e   :  { %4180 = vmatpush2.msra.mxu0 %v4109_v26  ;;  %4253 = vmatpush2.msra.mxu1 %v4109_v26 }
 0x77f   :  { %4181 = vmatprep.subr.mxu0 %v4108_v9  ;;  %4254 = vmatprep.subr.mxu1 %v4108_v9 }
 0x780   :  { %4182 = vmatpush2.msra.mxu0 %v4107_v1  ;;  %4255 = vmatpush2.msra.mxu1 %v4107_v1 }
 0x781   :  { %4183 = vmatprep.subr.mxu0 %v4106_v59  ;;  %4256 = vmatprep.subr.mxu1 %v4106_v59 }
 0x782   :  { %4184 = vmatpush2.msra.mxu0 %v4105_v0  ;;  %4257 = vmatpush2.msra.mxu1 %v4105_v0 }
 0x783   :  { %4185 = vmatprep.subr.mxu0 %v4104_v57  ;;  %4258 = vmatprep.subr.mxu1 %v4104_v57 }
 0x784   :  { %4186 = vmatpush2.msra.mxu0 %v4103_v63  ;;  %4259 = vmatpush2.msra.mxu1 %v4103_v63 }
 0x785   :  { %4187 = vmatprep.subr.mxu0 %v4102_v46  ;;  %4260 = vmatprep.subr.mxu1 %v4102_v46 }
 0x786   :  { %4188 = vmatpush2.msra.mxu0 %v4101_v35  ;;  %4261 = vmatpush2.msra.mxu1 %v4101_v35  ;;  %v3658_v62 = vpop.f32.mrf.mxu1 }
 0x787   :  { %4189 = vmatprep.subr.mxu0 %v4100_v34  ;;  %4262 = vmatprep.subr.mxu1 %v4100_v34 }
 0x788   :  { %4190 = vmatpush2.msra.mxu0 %v4099_v12  ;;  %4263 = vmatpush2.msra.mxu1 %v4099_v12  ;;  %v3660_v60 = vpop.f32.mrf.mxu1 }
 0x789   :  { %4191 = vmatprep.subr.mxu0 %v4098_v7  ;;  %4264 = vmatprep.subr.mxu1 %v4098_v7  ;;  %v3587_v2 = vpop.f32.mrf.mxu0 }
 0x78a   :  { %4192 = vmatpush2.msra.mxu0 %v4097_v14  ;;  %4265 = vmatpush2.msra.mxu1 %v4097_v14  ;;  %v3659_v58 = vadd.f32 %v3658_v62, %v3587_v2 }
 0x78b   :  { %v3589_v33 = vpop.f32.mrf.mxu0 }
 0x78c   :  { %v3661_v54 = vadd.f32 %v3660_v60, %v3589_v33 }
 0x7c7   :  { %v3836_v38 = vpop.f32.mrf.mxu1 }
 0x7c9   :  { %v3838_v28 = vpop.f32.mrf.mxu1 }
 0x7ca   :  { %v3737_v40 = vpop.f32.mrf.mxu0 }
 0x7cb   :  { %v3742_v44 = vadd.f32 %v3737_v40, %v3659_v58 }
 0x7cc   :  { %v3739_v43 = vpop.f32.mrf.mxu0 }
 0x7cd   :  { %v3743_v6 = vadd.f32 %v3739_v43, %v3661_v54  ;;  %v3756_v53 = vadd.f32 %v3749_v17, %v3742_v44 }
 0x7cf   :  { %v3757_v29 = vadd.f32 %v3753_v32, %v3743_v6  ;;  %v11853_v20 = vmax.f32 %v3756_v53, 0.0 }
 0x7d1   :  { %v11851_v8 = vmax.f32 %v3757_v29, 0.0  ;;  %v4013_v56 = vmul.f32 %v11853_v20, %v11853_v20  ;;  %v3997_v23 = vsel %vm1887_vm2, %v11853_v20, 0.0 }
 0x7d2   :  { %v3998_v37 = vrot.slane %v3997_v23, 4 }
 0x7d3   :  { %v4014_v47 = vmul.f32 %v11851_v8, %v11851_v8  ;;  %v4004_v5 = vsel %vm1887_vm2, %v11851_v8, 0.0  ;;  %v4015_v31 = vsel %vm1887_vm2, %v4013_v56, 0.0 }
 0x7d4   :  { %v4005_v45 = vrot.slane %v4004_v5, 4  ;;  %v4016_v10 = vrot.slane %v4015_v31, 4  ;;  %v3999_v41 = vadd.f32 %v3998_v37, %v3997_v23 }
 0x7d5   :  { %v4022_v19 = vsel %vm1887_vm2, %v4014_v47, 0.0 }
 0x7d6   :  { %v4023_v42 = vrot.slane %v4022_v19, 4  ;;  %v4006_v36 = vadd.f32 %v4005_v45, %v4004_v5  ;;  %v4017_v48 = vadd.f32 %v4016_v10, %v4015_v31  ;;  %v4000_v4 = vrot.slane %v3999_v41, 2 }
 0x7d8   :  { %v4024_v30 = vadd.f32 %v4023_v42, %v4022_v19  ;;  %v4007_v24 = vrot.slane %v4006_v36, 2  ;;  %v4018_v35 = vrot.slane %v4017_v48, 2  ;;  %v4001_v62 = vadd.f32 %v4000_v4, %v3999_v41  ;;  %v11901_v41 = vld [vmem:[%s11882_s21 + $0x178] sm:$0xff]  ;;  %v11928_v4 = vld [vmem:[%s11882_s21 + $0xe0] sm:$0xff] }
 0x7da   :  { %v4025_v0 = vrot.slane %v4024_v30, 2  ;;  %v4008_v34 = vadd.f32 %v4007_v24, %v4006_v36  ;;  %v4019_v6 = vadd.f32 %v4018_v35, %v4017_v48  ;;  %v4002_v53 = vrot.slane %v4001_v62, 1  ;;  %v11889_v36 = vld [vmem:[%s11882_s21 + $0x78] sm:$0xff]  ;;  %v11912_v48 = vld [vmem:[%s11882_s21 + $0xe8] sm:$0xff] }
 0x7db   :  { %v11925_v24 = vld [vmem:[%s11882_s21 + $0x1e8] sm:$0xff]  ;;  %v11965_v35 = vld [vmem:[%s11882_s21 + $0x158] sm:$0xff] }
 0x7dc   :  { %v4026_v40 = vadd.f32 %v4025_v0, %v4024_v30  ;;  %v4009_v58 = vrot.slane %v4008_v34, 1  ;;  %v4020_v23 = vrot.slane %v4019_v6, 1  ;;  %v4003_v31 = vadd.f32 %v4002_v53, %v4001_v62  ;;  %v11909_v30 = vld [vmem:[%s11882_s21 + $0x1f0] sm:$0xff]  ;;  %v11949_v0 = vld [vmem:[%s11882_s21 + $0x160] sm:$0xff]  ;;  %v12040_v53 = vld [vmem:[%s11882_s21 + $0xa8] sm:$0xff] }
 0x7dd   :  { %v11992_v62 = vld [vmem:[%s11882_s21 + $0xc0] sm:$0xff]  ;;  %14131 = vst [vmem:[#allocation49_spill] sm:$0xff] %v12040_v53 }
 0x7de   :  { %v4027_v47 = vrot.slane %v4026_v40, 1  ;;  %v4010_v19 = vadd.f32 %v4009_v58, %v4008_v34  ;;  %v11968_v34 = vld [vmem:[%s11882_s21 + $0x50] sm:$0xff]  ;;  %14125 = vst [vmem:[#allocation25_spill] sm:$0xff] %v11992_v62  ;;  %v12016_v58 = vld [vmem:[%s11882_s21 + $0x38] sm:$0xff] }
 0x7df   :  { %14122 = vst [vmem:[#allocation43_spill] sm:$0xff] %v11968_v34  ;;  %14128 = vst [vmem:[#allocation37_spill] sm:$0xff] %v12016_v58 }
 0x7e0   :  { %v4028_v37 = vadd.f32 %v4027_v47, %v4026_v40  ;;  %v11997_v40 = vld [vmem:[%s11882_s21 + $0x148] sm:$0xff] }
 0x7e1   :  { %v12048_v47 = vld [vmem:[%s11882_s21 + $0x28] sm:$0xff] }
 0x7e2   :  { %14132 = vst [vmem:[#allocation76_spill] sm:$0xff] %v12048_v47 }
 0x809   :  { %v3986_v39 = vpop.f32.mrf.mxu1 }
 0x80b   :  { %v3907_v15 = vpop.f32.mrf.mxu0  ;;  %v3988_v27 = vpop.f32.mrf.mxu1 }
 0x80c   :  { %v3908_v49 = vadd.f32 %v3907_v15, %v3836_v38 }
 0x80d   :  { %v3909_v51 = vpop.f32.mrf.mxu0 }
 0x80e   :  { %v3991_v55 = vadd.f32 %v3986_v39, %v3908_v49  ;;  %v3910_v13 = vadd.f32 %v3909_v51, %v3838_v28 }
 0x810   :  { %v3993_v11 = vadd.f32 %v3991_v55, %v3749_v17  ;;  %v3992_v61 = vadd.f32 %v3988_v27, %v3910_v13  ;;  %v4021_v55 = vadd.f32 %v4020_v23, %v4019_v6  ;;  %v11885_v27 = vld [vmem:[%s11882_s21 + $0xf8] sm:$0xff]  ;;  %v12064_v23 = vld [vmem:[%s11882_s21 + $0x20] sm:$0xff] }
 0x811   :  { %7209 = vmatprep.subr.mxu1 %v11885_v27  ;;  %v12021_v6 = vld [vmem:[%s11882_s21 + $0x1b8] sm:$0xff]  ;;  %14134 = vst [vmem:[#allocation82_spill] sm:$0xff] %v12064_v23 }
 0x812   :  { %v11865_v18 = vmax.f32 %v3993_v11, 0.0  ;;  %v3994_v50 = vadd.f32 %v3992_v61, %v3753_v32  ;;  %v11893_v11 = vld [vmem:[%s11882_s21 + $0x1f8] sm:$0xff]  ;;  %v11896_v61 = vld [vmem:[%s11882_s21 + $0xf0] sm:$0xff] }
 0x813   :  { %7174 = vmatprep.subr.mxu0 %v11893_v11 }
 0x814   :  { %v4031_v21 = vsel %vm1887_vm2, %v11865_v18, 0.0  ;;  %v4047_v16 = vmul.f32 %v11865_v18, %v11865_v18  ;;  %v11871_v22 = vmax.f32 %v3994_v50, 0.0  ;;  %v11904_v50 = vld [vmem:[%s11882_s21 + $0x70] sm:$0xff] }
 0x815   :  { %v4032_v26 = vrot.slane %v4031_v21, 4 }
 0x816   :  { %v4049_v9 = vsel %vm1887_vm2, %v4047_v16, 0.0  ;;  %v4038_v1 = vsel %vm1887_vm2, %v11871_v22, 0.0  ;;  %v4048_v59 = vmul.f32 %v11871_v22, %v11871_v22  ;;  %v11920_v16 = vld [vmem:[%s11882_s21 + $0x68] sm:$0xff] }
 0x817   :  { %v4033_v57 = vadd.f32 %v4032_v26, %v4031_v21  ;;  %v4050_v63 = vrot.slane %v4049_v9, 4  ;;  %v4039_v46 = vrot.slane %v4038_v1, 4  ;;  %v11917_v21 = vld [vmem:[%s11882_s21 + $0x170] sm:$0xff]  ;;  %v11933_v26 = vld [vmem:[%s11882_s21 + $0x168] sm:$0xff] }
 0x818   :  { %v4056_v12 = vsel %vm1887_vm2, %v4048_v59, 0.0  ;;  %v11944_v59 = vld [vmem:[%s11882_s21 + $0xd8] sm:$0xff] }
 0x819   :  { %v4034_v7 = vrot.slane %v4033_v57, 2  ;;  %v4051_v14 = vadd.f32 %v4050_v63, %v4049_v9  ;;  %v4040_v2 = vadd.f32 %v4039_v46, %v4038_v1  ;;  %v4057_v33 = vrot.slane %v4056_v12, 4  ;;  %v11936_v9 = vld [vmem:[%s11882_s21 + $0x60] sm:$0xff]  ;;  %14119 = vst [vmem:[#allocation22_spill] sm:$0xff] %v11944_v59  ;;  %v11957_v63 = vld [vmem:[%s11882_s21 + $0x1d8] sm:$0xff]  ;;  %v11960_v46 = vld [vmem:[%s11882_s21 + $0xd0] sm:$0xff] }
 0x81a   :  { %14118 = vst [vmem:[#allocation20_spill] sm:$0xff] %v11936_v9  ;;  %v11941_v1 = vld [vmem:[%s11882_s21 + $0x1e0] sm:$0xff]  ;;  %14121 = vst [vmem:[#allocation35_spill] sm:$0xff] %v11960_v46 }
 0x81b   :  { %v4041_v60 = vrot.slane %v4040_v2, 2  ;;  %v4035_v43 = vadd.f32 %v4034_v7, %v4033_v57  ;;  %v4058_v54 = vadd.f32 %v4057_v33, %v4056_v12  ;;  %v4052_v3 = vrot.slane %v4051_v14, 2  ;;  %v11952_v57 = vld [vmem:[%s11882_s21 + $0x58] sm:$0xff]  ;;  %v11973_v12 = vld [vmem:[%s11882_s21 + $0x1d0] sm:$0xff]  ;;  %v11976_v7 = vld [vmem:[%s11882_s21 + $0xc8] sm:$0xff] }
 0x81c   :  { %14120 = vst [vmem:[#allocation27_spill] sm:$0xff] %v11952_v57  ;;  %14123 = vst [vmem:[#allocation51_spill] sm:$0xff] %v11976_v7  ;;  %v11989_v33 = vld [vmem:[%s11882_s21 + $0x1c8] sm:$0xff] }
 0x81d   :  { %v4042_v32 = vadd.f32 %v4041_v60, %v4040_v2  ;;  %v4036_v44 = vrot.slane %v4035_v43, 1  ;;  %v4059_v17 = vrot.slane %v4058_v54, 2  ;;  %v4053_v29 = vadd.f32 %v4052_v3, %v4051_v14  ;;  %v11981_v14 = vld [vmem:[%s11882_s21 + $0x150] sm:$0xff]  ;;  %v11984_v2 = vld [vmem:[%s11882_s21 + $0x48] sm:$0xff]  ;;  %v12000_v60 = vld [vmem:[%s11882_s21 + $0x40] sm:$0xff] }
 0x81e   :  { %14124 = vst [vmem:[#allocation59_spill] sm:$0xff] %v11984_v2  ;;  %14126 = vst [vmem:[#allocation29_spill] sm:$0xff] %v12000_v60  ;;  %v12013_v3 = vld [vmem:[%s11882_s21 + $0x140] sm:$0xff] }
 0x81f   :  { %v4043_v38 = vrot.slane %v4042_v32, 1  ;;  %v4060_v56 = vadd.f32 %v4059_v17, %v4058_v54  ;;  %v4054_v28 = vrot.slane %v4053_v29, 1  ;;  %v4037_v5 = vadd.f32 %v4036_v44, %v4035_v43  ;;  %v12005_v43 = vld [vmem:[%s11882_s21 + $0x1c0] sm:$0xff]  ;;  %v12008_v54 = vld [vmem:[%s11882_s21 + $0xb8] sm:$0xff]  ;;  %v12032_v17 = vld [vmem:[%s11882_s21 + $0x30] sm:$0xff] }
 0x820   :  { %14127 = vst [vmem:[#allocation33_spill] sm:$0xff] %v12008_v54  ;;  %v12029_v44 = vld [vmem:[%s11882_s21 + $0x138] sm:$0xff]  ;;  %14130 = vst [vmem:[#allocation45_spill] sm:$0xff] %v12032_v17 }
 0x821   :  { %v4044_v39 = vadd.f32 %v4043_v38, %v4042_v32  ;;  %v4061_v15 = vrot.slane %v4060_v56, 1  ;;  %v4055_v45 = vadd.f32 %v4054_v28, %v4053_v29  ;;  %v4045_v42 = vadd.f32 %v4037_v5, %v4003_v31  ;;  %v12024_v32 = vld [vmem:[%s11882_s21 + $0xb0] sm:$0xff]  ;;  %v12056_v28 = vld [vmem:[%s11882_s21 + $0xa0] sm:$0xff]  ;;  %v12061_v5 = vld [vmem:[%s11882_s21 + $0x128] sm:$0xff] }
 0x822   :  { %14129 = vst [vmem:[#allocation41_spill] sm:$0xff] %v12024_v32  ;;  %v12037_v29 = vld [vmem:[%s11882_s21 + $0x1b0] sm:$0xff]  ;;  %14133 = vst [vmem:[#allocation80_spill] sm:$0xff] %v12056_v28  ;;  %v12080_v31 = vld [vmem:[%s11882_s21 + $0x18] sm:$0xff] }
 0x823   :  { %v4046_v49 = vadd.f32 %v4044_v39, %v4010_v19  ;;  %v4062_v51 = vadd.f32 %v4061_v15, %v4060_v56  ;;  %v4063_v10 = vadd.f32 %v4055_v45, %v4021_v55  ;;  %v12045_v38 = vld [vmem:[%s11882_s21 + $0x130] sm:$0xff]  ;;  %v12053_v56 = vld [vmem:[%s11882_s21 + $0x1a8] sm:$0xff]  ;;  %v12069_v19 = vld [vmem:[%s11882_s21 + $0x1a0] sm:$0xff]  ;;  %14136 = vst [vmem:[#allocation53_spill] sm:$0xff] %v12080_v31 }
 0x824   :  { %v12072_v39 = vld [vmem:[%s11882_s21 + $0x98] sm:$0xff]  ;;  %v12075_v15 = vld [vmem:[%s11882_s21 + $0x120] sm:$0xff]  ;;  %v12102_v55 = vld [vmem:[%s11882_s21 + $0x88] sm:$0xff] }
 0x825   :  { %4193 = vmatprep.mubr.f32.mxu0 %v4046_v49  ;;  %v4064_v13 = vadd.f32 %v4062_v51, %v4028_v37  ;;  %14135 = vst [vmem:[#allocation84_spill] sm:$0xff] %v12072_v39  ;;  %v12083_v45 = vld [vmem:[%s11882_s21 + $0x198] sm:$0xff]  ;;  %v12086_v49 = vld [vmem:[%s11882_s21 + $0x90] sm:$0xff]  ;;  %14139 = vst [vmem:[#allocation63_spill] sm:$0xff] %v12102_v55 }
 0x826   :  { %4194 = vmatmul.mubr.f32.vlgmr.msra.gmra.mxu0 %v4045_v42  ;;  %14137 = vst [vmem:[#allocation57_spill] sm:$0xff] %v12086_v49  ;;  %v12091_v37 = vld [vmem:[%s11882_s21 + $0x118] sm:$0xff]  ;;  %v12094_v51 = vld [vmem:[%s11882_s21 + $0x10] sm:$0xff] }
 0x827   :  { %4266 = vmatprep.mubr.f32.mxu1 %v4064_v13  ;;  %7175 = vmatpush3.msra.mxu0 %v11901_v41  ;;  %14138 = vst [vmem:[#allocation61_spill] sm:$0xff] %v12094_v51  ;;  %v12097_v42 = vld [vmem:[%s11882_s21 + $0x190] sm:$0xff] }
 0x828   :  { %4267 = vmatmul.mubr.f32.vlgmr.msra.gmra.mxu1 %v4063_v10  ;;  %7176 = vmatprep.subr.mxu0 %v11909_v30  ;;  %v12105_v13 = vld [vmem:[%s11882_s21 + $0x110] sm:$0xff]  ;;  %v12108_v10 = vld [vmem:[%s11882_s21 + $0x8] sm:$0xff] }
 0x829   :  { %7210 = vmatpush3.msra.mxu1 %v11889_v36  ;;  %7177 = vmatpush3.msra.mxu0 %v11917_v21  ;;  %14140 = vst [vmem:[#allocation65_spill] sm:$0xff] %v12108_v10 }
 0x82a   :  { %7211 = vmatprep.subr.mxu1 %v11896_v61  ;;  %7178 = vmatprep.subr.mxu0 %v11925_v24 }
 0x82b   :  { %7212 = vmatpush3.msra.mxu1 %v11904_v50  ;;  %7179 = vmatpush3.msra.mxu0 %v11933_v26 }
 0x82c   :  { %7213 = vmatprep.subr.mxu1 %v11912_v48  ;;  %7180 = vmatprep.subr.mxu0 %v11941_v1 }
 0x82d   :  { %7214 = vmatpush3.msra.mxu1 %v11920_v16  ;;  %7181 = vmatpush3.msra.mxu0 %v11949_v0 }
 0x82e   :  { %7215 = vmatprep.subr.mxu1 %v11928_v4  ;;  %7182 = vmatprep.subr.mxu0 %v11957_v63 }
 0x82f   :  { %7216 = vmatpush3.msra.mxu1 %v11936_v9  ;;  %7183 = vmatpush3.msra.mxu0 %v11965_v35 }
 0x830   :  { %7217 = vmatprep.subr.mxu1 %v11944_v59  ;;  %7184 = vmatprep.subr.mxu0 %v11973_v12 }
 0x831   :  { %7218 = vmatpush3.msra.mxu1 %v11952_v57  ;;  %7185 = vmatpush3.msra.mxu0 %v11981_v14  ;;  %v14143_v57 = vld [vmem:[#allocation75_spill] sm:$0xff] }
 0x832   :  { %7219 = vmatprep.subr.mxu1 %v11960_v46  ;;  %7186 = vmatprep.subr.mxu0 %v11989_v33 }
 0x833   :  { %7220 = vmatpush3.msra.mxu1 %v11968_v34  ;;  %7187 = vmatpush3.msra.mxu0 %v11997_v40 }
 0x834   :  { %7221 = vmatprep.subr.mxu1 %v11976_v7  ;;  %7188 = vmatprep.subr.mxu0 %v12005_v43 }
 0x835   :  { %7222 = vmatpush3.msra.mxu1 %v11984_v2  ;;  %7189 = vmatpush3.msra.mxu0 %v12013_v3 }
 0x836   :  { %7223 = vmatprep.subr.mxu1 %v11992_v62  ;;  %7190 = vmatprep.subr.mxu0 %v12021_v6 }
 0x837   :  { %7224 = vmatpush3.msra.mxu1 %v12000_v60  ;;  %7191 = vmatpush3.msra.mxu0 %v12029_v44 }
 0x838   :  { %7225 = vmatprep.subr.mxu1 %v12008_v54  ;;  %7192 = vmatprep.subr.mxu0 %v12037_v29 }
 0x839   :  { %7226 = vmatpush3.msra.mxu1 %v12016_v58  ;;  %7193 = vmatpush3.msra.mxu0 %v12045_v38 }
 0x83a   :  { %7227 = vmatprep.subr.mxu1 %v12024_v32  ;;  %7194 = vmatprep.subr.mxu0 %v12053_v56 }
 0x83b   :  { %7228 = vmatpush3.msra.mxu1 %v12032_v17  ;;  %7195 = vmatpush3.msra.mxu0 %v12061_v5 }
 0x83c   :  { %7229 = vmatprep.subr.mxu1 %v12040_v53  ;;  %7196 = vmatprep.subr.mxu0 %v12069_v19 }
 0x83d   :  { %7230 = vmatpush3.msra.mxu1 %v12048_v47  ;;  %7197 = vmatpush3.msra.mxu0 %v12075_v15 }
 0x83e   :  { %7231 = vmatprep.subr.mxu1 %v12056_v28  ;;  %7198 = vmatprep.subr.mxu0 %v12083_v45  ;;  %v12129_v28 = vld [vmem:[%s11882_s21 + $0x180] sm:$0xff] }
 0x83f   :  { %7232 = vmatpush3.msra.mxu1 %v12064_v23  ;;  %7199 = vmatpush3.msra.mxu0 %v12091_v37  ;;  %v12124_v23 = vld [vmem:[%s11882_s21] sm:$0xff] }
 0x840   :  { %7233 = vmatprep.subr.mxu1 %v12072_v39  ;;  %v12116_v39 = vld [vmem:[%s11882_s21 + $0x80] sm:$0xff]  ;;  %7200 = vmatprep.subr.mxu0 %v12097_v42  ;;  %14142 = vst [vmem:[#allocation69_spill] sm:$0xff] %v12124_v23 }
 0x841   :  { %7234 = vmatpush3.msra.mxu1 %v12080_v31  ;;  %v12113_v31 = vld [vmem:[%s11882_s21 + $0x188] sm:$0xff]  ;;  %14141 = vst [vmem:[#allocation67_spill] sm:$0xff] %v12116_v39  ;;  %7201 = vmatpush3.msra.mxu0 %v12105_v13 }
 0x842   :  { %7235 = vmatprep.subr.mxu1 %v12086_v49  ;;  %v12121_v49 = vld [vmem:[%s11882_s21 + $0x108] sm:$0xff]  ;;  %7202 = vmatprep.subr.mxu0 %v12113_v31 }
 0x843   :  { %7236 = vmatpush3.msra.mxu1 %v12094_v51  ;;  %7203 = vmatpush3.msra.mxu0 %v12121_v49  ;;  %v12136_v51 = vld [vmem:[%s11882_s21 + $0x100] sm:$0xff] }
 0x844   :  { %7237 = vmatprep.subr.mxu1 %v12102_v55  ;;  %7204 = vmatprep.subr.mxu0 %v12129_v28  ;;  %v12142_v55 = vld [vmem:[%s11882_s21 + $0x2f8] sm:$0xff] }
 0x845   :  { %7238 = vmatpush3.msra.mxu1 %v12108_v10  ;;  %7205 = vmatpush3.msra.mxu0 %v12136_v51 }
 0x846   :  { %7239 = vmatprep.subr.mxu1 %v12116_v39  ;;  %7244 = vmatprep.subr.mxu0 %v12142_v55 }
 0x847   :  { %7240 = vmatpush3.msra.mxu1 %v12124_v23 }
 0x848   :  { %7279 = vmatprep.subr.mxu1 %v11893_v11 }
 0x8e6   :  { %v4195_v10 = vpop.f32.mrf.mxu0 }
 0x8e7   :  { %v4200_v47 = vmul.f32 0.03125, %v4195_v10 }
 0x8e8   :  { %v4197_v53 = vpop.f32.mrf.mxu0  ;;  %v4268_v39 = vpop.f32.mrf.mxu1 }
 0x8e9   :  { %v4275_v17 = vmul.f32 %v4200_v47, %v4200_v47  ;;  %v4201_v32 = vmul.f32 0.03125, %v4197_v53  ;;  %v4273_v58 = vmul.f32 0.03125, %v4268_v39  ;;  %v4279_v39 = vld [vmem:[%s6605_s25] sm:$0x3]  ;;  %s6621_s25 = sld [smem:[%s13337_s0 + %s8466_s22]]  }
 0x8ea   :  { %v4270_v23 = vpop.f32.mrf.mxu1 }
 0x8eb   :  { %v4276_v54 = vmul.f32 %v4201_v32, %v4201_v32  ;;  %v4277_v60 = vsub.f32 %v4273_v58, %v4275_v17  ;;  %v4274_v62 = vmul.f32 0.03125, %v4270_v23  ;;  %v4303_v17 = vld [vmem:[%s6606_s29] sm:$0x3]  ;;  %s6623_s29 = sld [smem:[%s13337_s0 + %s8467_s26]]  }
 0x8ed   :  { %v4280_v2 = vadd.f32 1e-05, %v4277_v60  ;;  %v4278_v7 = vsub.f32 %v4274_v62, %v4276_v54 }
 0x8ef   :  { %v4281_v11 = vadd.f32 1e-05, %v4278_v7  ;;  %8371 = vrsqrt.f32 %v4280_v2 }
 0x8f1   :  { %8373 = vrsqrt.f32 %v4281_v11 }
 0x8fc   :  { %v8372_v10 = vpop.eup %8371 }
 0x8fe   :  { %v8374_v34 = vpop.eup %8373 }
 0x8ff   :  { %v4286_v46 = vcombine.low %v8372_v10, %v8374_v34 }
 0x901   :  { %v4293_v53 = vrot.slane %v4286_v46, %v14143_v57 }
 0x903   :  { %v4300_v59 = vrot.slane %v4293_v53, %v14143_v57 }
 0x905   :  { %v4302_v58 = vmul.f32 %v4300_v59, %v4279_v39 }
 0x907   :  { %v4308_v7 = vrot.slane %v4302_v58, %v14117_v52  ;;  %v4312_v2 = vrot.slane %v4302_v58, %v14116_v25 }
 0x909   :  { %v4315_v62 = vmul.f32 %v4308_v7, %v4200_v47  ;;  %v4316_v60 = vmul.f32 %v4312_v2, %v4201_v32  ;;  %v4336_v59 = vmul.f32 %v4308_v7, %v11853_v20  ;;  %v4337_v11 = vmul.f32 %v4312_v2, %v11851_v8 }
 0x90a   :  { %v4359_v39 = vmul.f32 %v4308_v7, %v11865_v18  ;;  %v4360_v47 = vmul.f32 %v4312_v2, %v11871_v22 }
 0x90b   :  { %v4319_v54 = vcombine.low %v4315_v62, %v4316_v60 }
 0x90d   :  { %v4326_v34 = vrot.slane %v4319_v54, %v14143_v57 }
 0x90f   :  { %v4333_v46 = vrot.slane %v4326_v34, %v14143_v57 }
 0x911   :  { %v4335_v23 = vsub.f32 %v4303_v17, %v4333_v46 }
 0x913   :  { %v4342_v10 = vrot.slane %v4335_v23, %v14117_v52  ;;  %v4346_v53 = vrot.slane %v4335_v23, %v14116_v25  ;;  %v12165_v23 = vld [vmem:[%s11882_s21 + $0x278] sm:$0xff] }
 0x915   :  { %v4349_v32 = vadd.f32 %v4342_v10, %v4336_v59  ;;  %v4350_v58 = vadd.f32 %v4346_v53, %v4337_v11  ;;  %v4361_v62 = vadd.f32 %v4359_v39, %v4342_v10  ;;  %v4362_v60 = vadd.f32 %v4360_v47, %v4346_v53  ;;  %v12173_v11 = vld [vmem:[%s11882_s21 + $0x270] sm:$0xff]  ;;  %v12192_v10 = vld [vmem:[%s11882_s21 + $0x260] sm:$0xff] }
 0x916   :  { %v12312_v47 = vld [vmem:[%s11882_s21 + $0x200] sm:$0xff] }
 0x917   :  { %v4353_v54 = vrot.slane %v4349_v32, 7  ;;  %v4354_v9 = vrot.slane %v4350_v58, 7  ;;  %v4365_v57 = vrot.slane %v4361_v62, 7  ;;  %v4366_v34 = vrot.slane %v4362_v60, 7  ;;  %v14153_v58 = vld [vmem:[#allocation33_spill] sm:$0xff] }
 0x918   :  { %v14154_v62 = vld [vmem:[#allocation37_spill] sm:$0xff] }
 0x919   :  { %4357 = vst [vmem:[#allocation5] sm:$0x1e] %v4353_v54  ;;  %4369 = vst [vmem:[#allocation5 + $0x10] sm:$0x1e] %v4365_v57  ;;  %v14155_v60 = vld [vmem:[#allocation41_spill] sm:$0xff] }
 0x91a   :  { %4370 = vst [vmem:[#allocation5 + $0x18] sm:$0x1e] %v4366_v34  ;;  %4358 = vst [vmem:[#allocation5 + $0x8] sm:$0x1e] %v4354_v9  ;;  %v12169_v9 = vld [vmem:[%s11882_s21 + $0x2f0] sm:$0xff]  ;;  %v14156_v54 = vld [vmem:[#allocation45_spill] sm:$0xff] }
 0x91b   :  { %v14157_v57 = vld [vmem:[#allocation49_spill] sm:$0xff]  ;;  %v14158_v34 = vld [vmem:[#allocation76_spill] sm:$0xff] }
 0x920   :  { %v4469_v25 = vld [vmem:[#allocation5] sm:$0xf]  ;;  %v4709_v53 = vld [vmem:[#allocation5 + $0x10] sm:$0x1e] }
 0x921   :  { %v4470_v8 = vld [vmem:[#allocation5 + $0x8] sm:$0xf]  ;;  %v4710_v22 = vld [vmem:[#allocation5 + $0x18] sm:$0x1e]  ;;  %v4471_v7 = vld [vmem:[#allocation5] sm:$0x1e] }
 0x922   :  { %v4472_v20 = vld [vmem:[#allocation5 + $0x8] sm:$0x1e]  ;;  %4613 = vmatprep.mubr.f32.mxu1 %v4470_v8  ;;  %v4714_v2 = vrot.slane %v4710_v22, 1  ;;  %v4475_v17 = vrot.slane %v4471_v7, 1  ;;  %v4858_v39 = vld [vmem:[#allocation5 + $0x18] sm:$0x3c] }
 0x923   :  { %v4476_v18 = vrot.slane %v4472_v20, 1  ;;  %4614 = vmatmul.mubr.f32.vlgmr.msra.gmra.mxu1 %v4469_v25  ;;  %v4620_v46 = vld [vmem:[#allocation5 + $0x8] sm:$0x3c]  ;;  %v4619_v32 = vld [vmem:[#allocation5] sm:$0x3c]  ;;  %v14160_v25 = vld [vmem:[#allocation82_spill] sm:$0xff] }
 0x924   :  { %7280 = vmatpush3.msra.mxu1 %v11901_v41  ;;  %4781 = vmatprep.mubr.f32.mxu1 %v4714_v2  ;;  %v4624_v59 = vrot.slane %v4620_v46, 2  ;;  %v12177_v41 = vld [vmem:[%s11882_s21 + $0x2e8] sm:$0xff]  ;;  %v14159_v8 = vld [vmem:[#allocation80_spill] sm:$0xff]  ;;  %v4857_v22 = vld [vmem:[#allocation5 + $0x10] sm:$0x3c] }
 0x925   :  { %4543 = vmatprep.mubr.f32.mxu0 %v4476_v18  ;;  %7281 = vmatprep.subr.mxu1 %v11909_v30  ;;  %v12182_v30 = vld [vmem:[%s11882_s21 + $0x268] sm:$0xff]  ;;  %v14161_v20 = vld [vmem:[#allocation84_spill] sm:$0xff]  ;;  %v4861_v46 = vrot.slane %v4857_v22, 2 }
 0x926   :  { %4544 = vmatmul.mubr.f32.vlgmr.msra.gmra.mxu0 %v4475_v17  ;;  %7282 = vmatpush3.msra.mxu1 %v11917_v21  ;;  %v12187_v21 = vld [vmem:[%s11882_s21 + $0x2e0] sm:$0xff]  ;;  %v14162_v18 = vld [vmem:[#allocation53_spill] sm:$0xff]  ;;  %v14165_v17 = vld [vmem:[#allocation63_spill] sm:$0xff] }
 0x927   :  { %7245 = vmatpush3.msra.mxu0 %v12165_v23  ;;  %4691 = vmatprep.mubr.f32.mxu0 %v4624_v59  ;;  %v14163_v7 = vld [vmem:[#allocation57_spill] sm:$0xff] }
 0x928   :  { %7246 = vmatprep.subr.mxu0 %v12169_v9  ;;  %7283 = vmatprep.subr.mxu1 %v11925_v24  ;;  %v12197_v24 = vld [vmem:[%s11882_s21 + $0x2d8] sm:$0xff]  ;;  %v14164_v2 = vld [vmem:[#allocation61_spill] sm:$0xff] }
 0x929   :  { %7247 = vmatpush3.msra.mxu0 %v12173_v11  ;;  %7284 = vmatpush3.msra.mxu1 %v11933_v26  ;;  %v12202_v26 = vld [vmem:[%s11882_s21 + $0x258] sm:$0xff]  ;;  %v14168_v59 = vld [vmem:[#allocation69_spill] sm:$0xff] }
 0x92a   :  { %7248 = vmatprep.subr.mxu0 %v12177_v41  ;;  %7285 = vmatprep.subr.mxu1 %v11941_v1  ;;  %v12207_v1 = vld [vmem:[%s11882_s21 + $0x2d0] sm:$0xff] }
 0x92b   :  { %7249 = vmatpush3.msra.mxu0 %v12182_v30  ;;  %7286 = vmatpush3.msra.mxu1 %v11949_v0  ;;  %v12212_v0 = vld [vmem:[%s11882_s21 + $0x250] sm:$0xff] }
 0x92c   :  { %7250 = vmatprep.subr.mxu0 %v12187_v21  ;;  %7287 = vmatprep.subr.mxu1 %v11957_v63  ;;  %v12217_v63 = vld [vmem:[%s11882_s21 + $0x2c8] sm:$0xff] }
 0x92d   :  { %7251 = vmatpush3.msra.mxu0 %v12192_v10  ;;  %7288 = vmatpush3.msra.mxu1 %v11965_v35  ;;  %v12222_v35 = vld [vmem:[%s11882_s21 + $0x248] sm:$0xff] }
 0x92e   :  { %7252 = vmatprep.subr.mxu0 %v12197_v24  ;;  %7289 = vmatprep.subr.mxu1 %v11973_v12  ;;  %v12227_v12 = vld [vmem:[%s11882_s21 + $0x2c0] sm:$0xff] }
 0x92f   :  { %7253 = vmatpush3.msra.mxu0 %v12202_v26  ;;  %7290 = vmatpush3.msra.mxu1 %v11981_v14  ;;  %v12232_v14 = vld [vmem:[%s11882_s21 + $0x240] sm:$0xff] }
 0x930   :  { %7254 = vmatprep.subr.mxu0 %v12207_v1  ;;  %7291 = vmatprep.subr.mxu1 %v11989_v33  ;;  %v12237_v33 = vld [vmem:[%s11882_s21 + $0x2b8] sm:$0xff] }
 0x931   :  { %7255 = vmatpush3.msra.mxu0 %v12212_v0  ;;  %7292 = vmatpush3.msra.mxu1 %v11997_v40  ;;  %v12242_v40 = vld [vmem:[%s11882_s21 + $0x238] sm:$0xff] }
 0x932   :  { %7256 = vmatprep.subr.mxu0 %v12217_v63  ;;  %7293 = vmatprep.subr.mxu1 %v12005_v43  ;;  %v12247_v43 = vld [vmem:[%s11882_s21 + $0x2b0] sm:$0xff] }
 0x933   :  { %7257 = vmatpush3.msra.mxu0 %v12222_v35  ;;  %7294 = vmatpush3.msra.mxu1 %v12013_v3  ;;  %v12252_v3 = vld [vmem:[%s11882_s21 + $0x230] sm:$0xff] }
 0x934   :  { %7258 = vmatprep.subr.mxu0 %v12227_v12  ;;  %7295 = vmatprep.subr.mxu1 %v12021_v6  ;;  %v12257_v6 = vld [vmem:[%s11882_s21 + $0x2a8] sm:$0xff] }
 0x935   :  { %7259 = vmatpush3.msra.mxu0 %v12232_v14  ;;  %7296 = vmatpush3.msra.mxu1 %v12029_v44  ;;  %v12262_v44 = vld [vmem:[%s11882_s21 + $0x228] sm:$0xff] }
 0x936   :  { %7260 = vmatprep.subr.mxu0 %v12237_v33  ;;  %7297 = vmatprep.subr.mxu1 %v12037_v29  ;;  %v12267_v29 = vld [vmem:[%s11882_s21 + $0x2a0] sm:$0xff] }
 0x937   :  { %7261 = vmatpush3.msra.mxu0 %v12242_v40  ;;  %7298 = vmatpush3.msra.mxu1 %v12045_v38  ;;  %v12272_v38 = vld [vmem:[%s11882_s21 + $0x220] sm:$0xff] }
 0x938   :  { %7262 = vmatprep.subr.mxu0 %v12247_v43  ;;  %7299 = vmatprep.subr.mxu1 %v12053_v56  ;;  %v12277_v56 = vld [vmem:[%s11882_s21 + $0x298] sm:$0xff] }
 0x939   :  { %7263 = vmatpush3.msra.mxu0 %v12252_v3  ;;  %7300 = vmatpush3.msra.mxu1 %v12061_v5  ;;  %v12282_v5 = vld [vmem:[%s11882_s21 + $0x218] sm:$0xff] }
 0x93a   :  { %7264 = vmatprep.subr.mxu0 %v12257_v6  ;;  %7301 = vmatprep.subr.mxu1 %v12069_v19  ;;  %v12287_v19 = vld [vmem:[%s11882_s21 + $0x290] sm:$0xff] }
 0x93b   :  { %7265 = vmatpush3.msra.mxu0 %v12262_v44  ;;  %7302 = vmatpush3.msra.mxu1 %v12075_v15  ;;  %v12292_v15 = vld [vmem:[%s11882_s21 + $0x210] sm:$0xff] }
 0x93c   :  { %7266 = vmatprep.subr.mxu0 %v12267_v29  ;;  %7303 = vmatprep.subr.mxu1 %v12083_v45  ;;  %v12297_v45 = vld [vmem:[%s11882_s21 + $0x288] sm:$0xff] }
 0x93d   :  { %7267 = vmatpush3.msra.mxu0 %v12272_v38  ;;  %7304 = vmatpush3.msra.mxu1 %v12091_v37  ;;  %v12302_v37 = vld [vmem:[%s11882_s21 + $0x208] sm:$0xff] }
 0x93e   :  { %7268 = vmatprep.subr.mxu0 %v12277_v56  ;;  %7305 = vmatprep.subr.mxu1 %v12097_v42  ;;  %v12307_v42 = vld [vmem:[%s11882_s21 + $0x280] sm:$0xff]  ;;  %s6620_s21 = sld [smem:[%s13337_s0 + %s8465_s18]]  }
 0x93f   :  { %7269 = vmatpush3.msra.mxu0 %v12282_v5  ;;  %7306 = vmatpush3.msra.mxu1 %v12105_v13  ;;  %v4713_v13 = vrot.slane %v4709_v53, 1 }
 0x940   :  { %7270 = vmatprep.subr.mxu0 %v12287_v19  ;;  %7307 = vmatprep.subr.mxu1 %v12113_v31  ;;  %v4862_v31 = vrot.slane %v4858_v39, 2  ;;  %v7106_v39 = vld [vmem:[%s6609_s7] ss:$0 sm:$0xff] }
 0x941   :  { %7271 = vmatpush3.msra.mxu0 %v12292_v15  ;;  %7308 = vmatpush3.msra.mxu1 %v12121_v49  ;;  %v4623_v49 = vrot.slane %v4619_v32, 2 }
 0x942   :  { %7272 = vmatprep.subr.mxu0 %v12297_v45  ;;  %7309 = vmatprep.subr.mxu1 %v12129_v28  ;;  %v4708_v28 = vld [vmem:[#allocation5 + $0x18] sm:$0xf] }
 0x943   :  { %7273 = vmatpush3.msra.mxu0 %v12302_v37  ;;  %7310 = vmatpush3.msra.mxu1 %v12136_v51  ;;  %v14151_v51 = vld [vmem:[#allocation25_spill] sm:$0xff] }
 0x944   :  { %7274 = vmatprep.subr.mxu0 %v12307_v42  ;;  %4782 = vmatmul.mubr.f32.vlgmr.msra.gmra.mxu1 %v4713_v13 }
 0x945   :  { %7349 = vmatprep.subr.mxu1 %v12142_v55  ;;  %7275 = vmatpush3.msra.mxu0 %v12312_v47  ;;  %v14152_v55 = vld [vmem:[#allocation29_spill] sm:$0xff] }
 0x946   :  { %7350 = vmatpush3.msra.mxu1 %v12165_v23  ;;  %4929 = vmatprep.mubr.f32.mxu1 %v4862_v31  ;;  %v14166_v23 = vld [vmem:[#allocation65_spill] sm:$0xff] }
 0x947   :  { %4692 = vmatmul.mubr.f32.vlgmr.msra.gmra.mxu0 %v4623_v49  ;;  %7314 = vmatprep.subr.mxu0 %v11885_v27  ;;  %v14144_v27 = vld [vmem:[#allocation20_spill] sm:$0xff] }
 0x948   :  { %7351 = vmatprep.subr.mxu1 %v12169_v9  ;;  %7315 = vmatpush3.msra.mxu0 %v11889_v36  ;;  %v14145_v36 = vld [vmem:[#allocation22_spill] sm:$0xff]  ;;  %v14167_v9 = vld [vmem:[#allocation67_spill] sm:$0xff] }
 0x949   :  { %4851 = vmatprep.mubr.f32.mxu0 %v4708_v28  ;;  %7352 = vmatpush3.msra.mxu1 %v12173_v11  ;;  %v4707_v11 = vld [vmem:[#allocation5 + $0x10] sm:$0xf] }
 0x94a   :  { %7316 = vmatprep.subr.mxu0 %v11896_v61  ;;  %7353 = vmatprep.subr.mxu1 %v12177_v41  ;;  %v14146_v61 = vld [vmem:[#allocation27_spill] sm:$0xff]  ;;  %v14169_v41 = vmov 0.0  }
 0x94b   :  { %7317 = vmatpush3.msra.mxu0 %v11904_v50  ;;  %7354 = vmatpush3.msra.mxu1 %v12182_v30  ;;  %v14147_v50 = vld [vmem:[#allocation35_spill] sm:$0xff] }
 0x94c   :  { %7318 = vmatprep.subr.mxu0 %v11912_v48  ;;  %7355 = vmatprep.subr.mxu1 %v12187_v21  ;;  %v14148_v48 = vld [vmem:[#allocation43_spill] sm:$0xff]  ;;  %v4986_v21 = vld [vmem:[%s12387_s3 + $0x70] sm:$0xff] }
 0x94d   :  { %7319 = vmatpush3.msra.mxu0 %v11920_v16  ;;  %7356 = vmatpush3.msra.mxu1 %v12192_v10  ;;  %v14149_v16 = vld [vmem:[#allocation51_spill] sm:$0xff]  ;;  %v4985_v10 = vld [vmem:[%s12387_s3 + $0x68] sm:$0xff] }
 0x94e   :  { %7320 = vmatprep.subr.mxu0 %v11928_v4  ;;  %7357 = vmatprep.subr.mxu1 %v12197_v24  ;;  %v14150_v4 = vld [vmem:[#allocation59_spill] sm:$0xff]  ;;  %v4984_v24 = vld [vmem:[%s12387_s3 + $0x60] sm:$0xff] }
 0x94f   :  { %7321 = vmatpush3.msra.mxu0 %v14144_v27  ;;  %7358 = vmatpush3.msra.mxu1 %v12202_v26  ;;  %v4987_v30 = vld [vmem:[%s12387_s3 + $0x78] sm:$0xff] }
 0x950   :  { %7322 = vmatprep.subr.mxu0 %v14145_v36  ;;  %7359 = vmatprep.subr.mxu1 %v12207_v1  ;;  %v4983_v26 = vld [vmem:[%s12387_s3 + $0x58] sm:$0xff]  ;;  %v4982_v1 = vld [vmem:[%s12387_s3 + $0x50] sm:$0xff] }
 0x951   :  { %7323 = vmatpush3.msra.mxu0 %v14146_v61  ;;  %7360 = vmatpush3.msra.mxu1 %v12212_v0  ;;  %v4981_v0 = vld [vmem:[%s12387_s3 + $0x48] sm:$0xff] }
 0x952   :  { %7324 = vmatprep.subr.mxu0 %v14147_v50  ;;  %7361 = vmatprep.subr.mxu1 %v12217_v63  ;;  %v4980_v63 = vld [vmem:[%s12387_s3 + $0x40] sm:$0xff] }
 0x953   :  { %7325 = vmatpush3.msra.mxu0 %v14148_v48  ;;  %7362 = vmatpush3.msra.mxu1 %v12222_v35  ;;  %v4979_v35 = vld [vmem:[%s12387_s3 + $0x38] sm:$0xff] }
 0x954   :  { %7326 = vmatprep.subr.mxu0 %v14149_v16  ;;  %7363 = vmatprep.subr.mxu1 %v12227_v12  ;;  %v4978_v12 = vld [vmem:[%s12387_s3 + $0x30] sm:$0xff] }
 0x955   :  { %7327 = vmatpush3.msra.mxu0 %v14150_v4  ;;  %7364 = vmatpush3.msra.mxu1 %v12232_v14  ;;  %v4977_v14 = vld [vmem:[%s12387_s3 + $0x28] sm:$0xff] }
 0x956   :  { %7328 = vmatprep.subr.mxu0 %v14151_v51  ;;  %7365 = vmatprep.subr.mxu1 %v12237_v33  ;;  %v4976_v33 = vld [vmem:[%s12387_s3 + $0x20] sm:$0xff] }
 0x957   :  { %7329 = vmatpush3.msra.mxu0 %v14152_v55  ;;  %7366 = vmatpush3.msra.mxu1 %v12242_v40  ;;  %v4975_v40 = vld [vmem:[%s12387_s3 + $0x18] sm:$0xff] }
 0x958   :  { %7330 = vmatprep.subr.mxu0 %v14153_v58  ;;  %7367 = vmatprep.subr.mxu1 %v12247_v43  ;;  %v4974_v43 = vld [vmem:[%s12387_s3 + $0x10] sm:$0xff] }
 0x959   :  { %7331 = vmatpush3.msra.mxu0 %v14154_v62  ;;  %7368 = vmatpush3.msra.mxu1 %v12252_v3  ;;  %v4973_v3 = vld [vmem:[%s12387_s3 + $0x8] sm:$0xff] }
 0x95a   :  { %7332 = vmatprep.subr.mxu0 %v14155_v60  ;;  %7369 = vmatprep.subr.mxu1 %v12257_v6  ;;  %v4972_v6 = vld [vmem:[%s12387_s3] sm:$0xff] }
 0x95b   :  { %7333 = vmatpush3.msra.mxu0 %v14156_v54  ;;  %7370 = vmatpush3.msra.mxu1 %v12262_v44 }
 0x95c   :  { %7334 = vmatprep.subr.mxu0 %v14157_v57  ;;  %7371 = vmatprep.subr.mxu1 %v12267_v29 }
 0x95d   :  { %7335 = vmatpush3.msra.mxu0 %v14158_v34  ;;  %7372 = vmatpush3.msra.mxu1 %v12272_v38 }
 0x95e   :  { %7336 = vmatprep.subr.mxu0 %v14159_v8  ;;  %7373 = vmatprep.subr.mxu1 %v12277_v56 }
 0x95f   :  { %7337 = vmatpush3.msra.mxu0 %v14160_v25  ;;  %7374 = vmatpush3.msra.mxu1 %v12282_v5 }
 0x960   :  { %7338 = vmatprep.subr.mxu0 %v14161_v20  ;;  %7375 = vmatprep.subr.mxu1 %v12287_v19 }
 0x961   :  { %7339 = vmatpush3.msra.mxu0 %v14162_v18  ;;  %7376 = vmatpush3.msra.mxu1 %v12292_v15 }
 0x962   :  { %7340 = vmatprep.subr.mxu0 %v14163_v7  ;;  %7377 = vmatprep.subr.mxu1 %v12297_v45 }
 0x963   :  { %7341 = vmatpush3.msra.mxu0 %v14164_v2  ;;  %7378 = vmatpush3.msra.mxu1 %v12302_v37 }
 0x964   :  { %7342 = vmatprep.subr.mxu0 %v14165_v17  ;;  %7379 = vmatprep.subr.mxu1 %v12307_v42 }
 0x965   :  { %7343 = vmatpush3.msra.mxu0 %v14166_v23  ;;  %7380 = vmatpush3.msra.mxu1 %v12312_v47 }
 0x966   :  { %7344 = vmatprep.subr.mxu0 %v14167_v9  ;;  %4930 = vmatmul.mubr.f32.vlgmr.msra.gmra.mxu1 %v4861_v46 }
 0x967   :  { %7345 = vmatpush3.msra.mxu0 %v14168_v59  ;;  %7725 = vmatprep.subr.mxu1 %v14169_v41 }
 0x968   :  { %4852 = vmatmul.mubr.f32.vlgmr.msra.gmra.mxu0 %v4707_v11  ;;  %7690 = vmatprep.subr.mxu0 %v14169_v41 }
 0x969   :  { %7691 = vmatpush3.msra.mxu0 %v4987_v30  ;;  %7726 = vmatpush3.msra.mxu1 %v4987_v30 }
 0x96a   :  { %7692 = vmatprep.subr.mxu0 %v14169_v41  ;;  %7727 = vmatprep.subr.mxu1 %v14169_v41 }
 0x96b   :  { %7693 = vmatpush3.msra.mxu0 %v4986_v21  ;;  %7728 = vmatpush3.msra.mxu1 %v4986_v21 }
 0x96c   :  { %7694 = vmatprep.subr.mxu0 %v14169_v41  ;;  %7729 = vmatprep.subr.mxu1 %v14169_v41 }
 0x96d   :  { %7695 = vmatpush3.msra.mxu0 %v4985_v10  ;;  %7730 = vmatpush3.msra.mxu1 %v4985_v10 }
 0x96e   :  { %7696 = vmatprep.subr.mxu0 %v14169_v41  ;;  %7731 = vmatprep.subr.mxu1 %v14169_v41 }
 0x96f   :  { %7697 = vmatpush3.msra.mxu0 %v4984_v24  ;;  %7732 = vmatpush3.msra.mxu1 %v4984_v24 }
 0x970   :  { %7698 = vmatprep.subr.mxu0 %v14169_v41  ;;  %7733 = vmatprep.subr.mxu1 %v14169_v41 }
 0x971   :  { %7699 = vmatpush3.msra.mxu0 %v4983_v26  ;;  %7734 = vmatpush3.msra.mxu1 %v4983_v26 }
 0x972   :  { %7700 = vmatprep.subr.mxu0 %v14169_v41  ;;  %7735 = vmatprep.subr.mxu1 %v14169_v41 }
 0x973   :  { %7701 = vmatpush3.msra.mxu0 %v4982_v1  ;;  %7736 = vmatpush3.msra.mxu1 %v4982_v1 }
 0x974   :  { %7702 = vmatprep.subr.mxu0 %v14169_v41  ;;  %7737 = vmatprep.subr.mxu1 %v14169_v41 }
 0x975   :  { %7703 = vmatpush3.msra.mxu0 %v4981_v0  ;;  %7738 = vmatpush3.msra.mxu1 %v4981_v0 }
 0x976   :  { %7704 = vmatprep.subr.mxu0 %v14169_v41  ;;  %7739 = vmatprep.subr.mxu1 %v14169_v41 }
 0x977   :  { %7705 = vmatpush3.msra.mxu0 %v4980_v63  ;;  %7740 = vmatpush3.msra.mxu1 %v4980_v63 }
 0x978   :  { %7706 = vmatprep.subr.mxu0 %v14169_v41  ;;  %7741 = vmatprep.subr.mxu1 %v14169_v41 }
 0x979   :  { %7707 = vmatpush3.msra.mxu0 %v4979_v35  ;;  %7742 = vmatpush3.msra.mxu1 %v4979_v35 }
 0x97a   :  { %7708 = vmatprep.subr.mxu0 %v14169_v41  ;;  %7743 = vmatprep.subr.mxu1 %v14169_v41 }
 0x97b   :  { %7709 = vmatpush3.msra.mxu0 %v4978_v12  ;;  %7744 = vmatpush3.msra.mxu1 %v4978_v12 }
 0x97c   :  { %7710 = vmatprep.subr.mxu0 %v14169_v41  ;;  %7745 = vmatprep.subr.mxu1 %v14169_v41 }
 0x97d   :  { %7711 = vmatpush3.msra.mxu0 %v4977_v14  ;;  %7746 = vmatpush3.msra.mxu1 %v4977_v14 }
 0x97e   :  { %7712 = vmatprep.subr.mxu0 %v14169_v41  ;;  %7747 = vmatprep.subr.mxu1 %v14169_v41 }
 0x97f   :  { %7713 = vmatpush3.msra.mxu0 %v4976_v33  ;;  %7748 = vmatpush3.msra.mxu1 %v4976_v33 }
 0x980   :  { %7714 = vmatprep.subr.mxu0 %v14169_v41  ;;  %7749 = vmatprep.subr.mxu1 %v14169_v41 }
 0x981   :  { %7715 = vmatpush3.msra.mxu0 %v4975_v40  ;;  %7750 = vmatpush3.msra.mxu1 %v4975_v40 }
 0x982   :  { %7716 = vmatprep.subr.mxu0 %v14169_v41  ;;  %7751 = vmatprep.subr.mxu1 %v14169_v41 }
 0x983   :  { %7717 = vmatpush3.msra.mxu0 %v4974_v43  ;;  %7752 = vmatpush3.msra.mxu1 %v4974_v43  ;;  %v12468_v43 = vld [vmem:[%s12465_s11 + $0xf8] sm:$0xff] }
 0x984   :  { %7718 = vmatprep.subr.mxu0 %v14169_v41  ;;  %7753 = vmatprep.subr.mxu1 %v14169_v41 }
 0x985   :  { %7719 = vmatpush3.msra.mxu0 %v4973_v3  ;;  %7722 = vmatprep.mubr.msk.f32.mxu0 %vm8453_vm3, %v14169_v41 }
 0x986   :  { %7720 = vmatprep.subr.mxu0 %v14169_v41  ;;  %7754 = vmatpush3.msra.mxu1 %v4973_v3  ;;  %v12471_v3 = vld [vmem:[%s12465_s11 + $0x78] sm:$0xff] }
 0x987   :  { %7721 = vmatpush3.msra.mxu0 %v4972_v6  ;;  %7755 = vmatprep.subr.mxu1 %v14169_v41 }
 0x988   :  { %7756 = vmatpush3.msra.mxu1 %v4972_v6  ;;  %7757 = vmatprep.mubr.msk.f32.mxu1 %vm8453_vm3, %v14169_v41  ;;  %v12474_v6 = vld [vmem:[%s12465_s11 + $0xf0] sm:$0xff] }
 0x989   :  { %7760 = vmatprep.subr.mxu0 %v14169_v41  ;;  %7795 = vmatprep.subr.mxu1 %v14169_v41 }
 0x9e3   :  { %v7241_v38 = vpop.f32.mrf.mxu1 }
 0x9e5   :  { %v7242_v5 = vpop.f32.mrf.mxu1 }
 0x9e6   :  { %v7206_v44 = vpop.f32.mrf.mxu0  ;;  %v7243_v45 = vadd.f32 %v7242_v5, %v7241_v38  ;;  %v12487_v38 = vld [vmem:[%s12465_s11 + $0x68] sm:$0xff]  ;;  %v12497_v5 = vld [vmem:[%s12465_s11 + $0x60] sm:$0xff] }
 0x9e8   :  { %v7207_v29 = vpop.f32.mrf.mxu0 }
 0x9e9   :  { %v7208_v15 = vadd.f32 %v7207_v29, %v7206_v44  ;;  %v12479_v44 = vld [vmem:[%s12465_s11 + $0x70] sm:$0xff]  ;;  %v12484_v29 = vld [vmem:[%s12465_s11 + $0xe8] sm:$0xff] }
 0x9eb   :  { %v4616_v37 = vadd.f32 %v7243_v45, %v7208_v15  ;;  %v12507_v15 = vld [vmem:[%s12465_s11 + $0x58] sm:$0xff]  ;;  %v12514_v45 = vld [vmem:[%s12465_s11 + $0xd0] sm:$0xff] }
 0xa04   :  { %v7311_v47 = vpop.f32.mrf.mxu1 }
 0xa06   :  { %v7312_v31 = vpop.f32.mrf.mxu1 }
 0xa07   :  { %v7276_v56 = vpop.f32.mrf.mxu0  ;;  %v7313_v48 = vadd.f32 %v7312_v31, %v7311_v47  ;;  %v12544_v47 = vld [vmem:[%s12465_s11 + $0xb8] sm:$0xff] }
 0xa08   :  { %v12547_v31 = vld [vmem:[%s12465_s11 + $0x38] sm:$0xff] }
 0xa09   :  { %v7277_v19 = vpop.f32.mrf.mxu0 }
 0xa0a   :  { %v7278_v53 = vadd.f32 %v7277_v19, %v7276_v56  ;;  %v12494_v56 = vld [vmem:[%s12465_s11 + $0xe0] sm:$0xff]  ;;  %v12504_v19 = vld [vmem:[%s12465_s11 + $0xd8] sm:$0xff] }
 0xa0c   :  { %v4697_v42 = vadd.f32 %v7278_v53, %v4616_v37  ;;  %v12517_v53 = vld [vmem:[%s12465_s11 + $0x50] sm:$0xff]  ;;  %v12524_v37 = vld [vmem:[%s12465_s11 + $0xc8] sm:$0xff] }
 0xa0e   :  { %v4705_v13 = vadd.f32 %v7106_v39, %v4697_v42  ;;  %v12527_v42 = vld [vmem:[%s12465_s11 + $0x48] sm:$0xff] }
 0xa10   :  { %v12444_v32 = vmax.f32 %v4705_v13, 0.0  ;;  %v12537_v13 = vld [vmem:[%s12465_s11 + $0x40] sm:$0xff] }
 0xa12   :  { %v4946_v28 = vmul.f32 %v12444_v32, %v12444_v32  ;;  %v4938_v36 = vsel %vm1887_vm2, %v12444_v32, 0.0 }
 0xa13   :  { %v4939_v51 = vrot.slane %v4938_v36, 4 }
 0xa14   :  { %v4947_v16 = vsel %vm1887_vm2, %v4946_v28, 0.0  ;;  %v12557_v28 = vld [vmem:[%s12465_s11 + $0x30] sm:$0xff] }
 0xa15   :  { %v4948_v62 = vrot.slane %v4947_v16, 4  ;;  %v4940_v54 = vadd.f32 %v4939_v51, %v4938_v36  ;;  %v12567_v36 = vld [vmem:[%s12465_s11 + $0x28] sm:$0xff]  ;;  %v12597_v51 = vld [vmem:[%s12465_s11 + $0x10] sm:$0xff] }
 0xa17   :  { %v4949_v34 = vadd.f32 %v4948_v62, %v4947_v16  ;;  %v4941_v25 = vrot.slane %v4940_v54, 2  ;;  %v12587_v16 = vld [vmem:[%s12465_s11 + $0x18] sm:$0xff]  ;;  %v12614_v62 = vld [vmem:[%s12465_s11 + $0x80] sm:$0xff] }
 0xa19   :  { %v4950_v7 = vrot.slane %v4949_v34, 2  ;;  %v4942_v23 = vadd.f32 %v4941_v25, %v4940_v54 }
 0xa1b   :  { %v4951_v59 = vadd.f32 %v4950_v7, %v4949_v34  ;;  %v4943_v30 = vrot.slane %v4942_v23, 1 }
 0xa1d   :  { %v4952_v26 = vrot.slane %v4951_v59, 1  ;;  %v4944_v0 = vadd.f32 %v4943_v30, %v4942_v23 }
 0xa1f   :  { %v4953_v14 = vadd.f32 %v4952_v26, %v4951_v59 }
 0xa26   :  { %v7381_v49 = vpop.f32.mrf.mxu1 }
 0xa28   :  { %v7346_v27 = vpop.f32.mrf.mxu0  ;;  %v7382_v61 = vpop.f32.mrf.mxu1 }
 0xa29   :  { %v7383_v55 = vadd.f32 %v7382_v61, %v7381_v49  ;;  %v12554_v49 = vld [vmem:[%s12465_s11 + $0xb0] sm:$0xff]  ;;  %v12574_v61 = vld [vmem:[%s12465_s11 + $0xa0] sm:$0xff] }
 0xa2a   :  { %v7347_v50 = vpop.f32.mrf.mxu0 }
 0xa2b   :  { %v7348_v4 = vadd.f32 %v7347_v50, %v7346_v27  ;;  %v12564_v27 = vld [vmem:[%s12465_s11 + $0xa8] sm:$0xff]  ;;  %v12577_v50 = vld [vmem:[%s12465_s11 + $0x20] sm:$0xff] }
 0xa2d   :  { %v4854_v58 = vadd.f32 %v7348_v4, %v7313_v48  ;;  %v12584_v48 = vld [vmem:[%s12465_s11 + $0x98] sm:$0xff]  ;;  %v12594_v4 = vld [vmem:[%s12465_s11 + $0x90] sm:$0xff] }
 0xa2f   :  { %v4935_v60 = vadd.f32 %v7383_v55, %v4854_v58  ;;  %v12604_v55 = vld [vmem:[%s12465_s11 + $0x88] sm:$0xff] }
 0xa30   :  { %v12607_v58 = vld [vmem:[%s12465_s11 + $0x8] sm:$0xff] }
 0xa31   :  { %v4936_v57 = vadd.f32 %v7106_v39, %v4935_v60  ;;  %v12534_v39 = vld [vmem:[%s12465_s11 + $0xc0] sm:$0xff] }
 0xa32   :  { %v12617_v60 = vld [vmem:[%s12465_s11] sm:$0xff] }
 0xa33   :  { %v12451_v8 = vmax.f32 %v4936_v57, 0.0 }
 0xa35   :  { %v4955_v20 = vsel %vm1887_vm2, %v12451_v8, 0.0  ;;  %v4963_v18 = vmul.f32 %v12451_v8, %v12451_v8 }
 0xa36   :  { %v4956_v22 = vrot.slane %v4955_v20, 4 }
 0xa37   :  { %v4964_v2 = vsel %vm1887_vm2, %v4963_v18, 0.0 }
 0xa38   :  { %v4957_v17 = vadd.f32 %v4956_v22, %v4955_v20  ;;  %v4965_v46 = vrot.slane %v4964_v2, 4 }
 0xa3a   :  { %v4958_v9 = vrot.slane %v4957_v17, 2  ;;  %v4966_v11 = vadd.f32 %v4965_v46, %v4964_v2 }
 0xa3c   :  { %v4959_v21 = vadd.f32 %v4958_v9, %v4957_v17  ;;  %v4967_v10 = vrot.slane %v4966_v11, 2  ;;  %v5132_v17 = vld [vmem:[%s6610_s15] sm:$0x1] }
 0xa3d   :  { %v5136_v9 = vld [vmem:[%s6611_s19] sm:$0x1] }
 0xa3e   :  { %v4960_v24 = vrot.slane %v4959_v21, 1  ;;  %v4968_v1 = vadd.f32 %v4967_v10, %v4966_v11 }
 0xa40   :  { %v4961_v63 = vadd.f32 %v4960_v24, %v4959_v21  ;;  %v4969_v35 = vrot.slane %v4968_v1, 1 }
 0xa42   :  { %v4962_v12 = vadd.f32 %v4961_v63, %v4944_v0  ;;  %v4970_v33 = vadd.f32 %v4969_v35, %v4968_v1  ;;  %v12638_v0 = vld [vmem:[%s12465_s11 + $0x178] sm:$0xff] }
 0xa44   :  { %7723 = vmatmul.mubr.f32.vlgmr.msra.gmra.mxu0 %v4962_v12  ;;  %v4971_v40 = vadd.f32 %v4970_v33, %v4953_v14  ;;  %v12641_v12 = vld [vmem:[%s12465_s11 + $0x170] sm:$0xff]  ;;  %v12662_v14 = vld [vmem:[%s12465_s11 + $0x158] sm:$0xff] }
 0xa45   :  { %7792 = vmatprep.mubr.msk.f32.mxu0 %vm8453_vm3, %v14169_v41  ;;  %7761 = vmatpush3.msra.mxu0 %v12468_v43  ;;  %v12669_v33 = vld [vmem:[%s12465_s11 + $0x150] sm:$0xff] }
 0xa46   :  { %7758 = vmatmul.mubr.f32.vlgmr.msra.gmra.mxu1 %v4971_v40  ;;  %7762 = vmatprep.subr.mxu0 %v14169_v41  ;;  %v12676_v40 = vld [vmem:[%s12465_s11 + $0x148] sm:$0xff] }
 0xa47   :  { %7827 = vmatprep.mubr.msk.f32.mxu1 %vm8453_vm3, %v14169_v41  ;;  %7796 = vmatpush3.msra.mxu1 %v12471_v3 }
 0xa48   :  { %7797 = vmatprep.subr.mxu1 %v14169_v41  ;;  %7763 = vmatpush3.msra.mxu0 %v12474_v6 }
 0xa49   :  { %7798 = vmatpush3.msra.mxu1 %v12479_v44  ;;  %7764 = vmatprep.subr.mxu0 %v14169_v41 }
 0xa4a   :  { %7799 = vmatprep.subr.mxu1 %v14169_v41  ;;  %7765 = vmatpush3.msra.mxu0 %v12484_v29 }
 0xa4b   :  { %7800 = vmatpush3.msra.mxu1 %v12487_v38  ;;  %7766 = vmatprep.subr.mxu0 %v14169_v41 }
 0xa4c   :  { %7801 = vmatprep.subr.mxu1 %v14169_v41  ;;  %7767 = vmatpush3.msra.mxu0 %v12494_v56 }
 0xa4d   :  { %7802 = vmatpush3.msra.mxu1 %v12497_v5  ;;  %7768 = vmatprep.subr.mxu0 %v14169_v41 }
 0xa4e   :  { %7803 = vmatprep.subr.mxu1 %v14169_v41  ;;  %7769 = vmatpush3.msra.mxu0 %v12504_v19 }
 0xa4f   :  { %7804 = vmatpush3.msra.mxu1 %v12507_v15  ;;  %7770 = vmatprep.subr.mxu0 %v14169_v41 }
 0xa50   :  { %7805 = vmatprep.subr.mxu1 %v14169_v41  ;;  %7771 = vmatpush3.msra.mxu0 %v12514_v45 }
 0xa51   :  { %7806 = vmatpush3.msra.mxu1 %v12517_v53  ;;  %7772 = vmatprep.subr.mxu0 %v14169_v41 }
 0xa52   :  { %7807 = vmatprep.subr.mxu1 %v14169_v41  ;;  %7773 = vmatpush3.msra.mxu0 %v12524_v37 }
 0xa53   :  { %7808 = vmatpush3.msra.mxu1 %v12527_v42  ;;  %7774 = vmatprep.subr.mxu0 %v14169_v41 }
 0xa54   :  { %7809 = vmatprep.subr.mxu1 %v14169_v41  ;;  %7775 = vmatpush3.msra.mxu0 %v12534_v39 }
 0xa55   :  { %7810 = vmatpush3.msra.mxu1 %v12537_v13  ;;  %7776 = vmatprep.subr.mxu0 %v14169_v41 }
 0xa56   :  { %7811 = vmatprep.subr.mxu1 %v14169_v41  ;;  %7777 = vmatpush3.msra.mxu0 %v12544_v47 }
 0xa57   :  { %7812 = vmatpush3.msra.mxu1 %v12547_v31  ;;  %7778 = vmatprep.subr.mxu0 %v14169_v41 }
 0xa58   :  { %7813 = vmatprep.subr.mxu1 %v14169_v41  ;;  %7779 = vmatpush3.msra.mxu0 %v12554_v49 }
 0xa59   :  { %7814 = vmatpush3.msra.mxu1 %v12557_v28  ;;  %7780 = vmatprep.subr.mxu0 %v14169_v41 }
 0xa5a   :  { %7815 = vmatprep.subr.mxu1 %v14169_v41  ;;  %7781 = vmatpush3.msra.mxu0 %v12564_v27 }
 0xa5b   :  { %7816 = vmatpush3.msra.mxu1 %v12567_v36  ;;  %7782 = vmatprep.subr.mxu0 %v14169_v41 }
 0xa5c   :  { %7817 = vmatprep.subr.mxu1 %v14169_v41  ;;  %7783 = vmatpush3.msra.mxu0 %v12574_v61 }
 0xa5d   :  { %7818 = vmatpush3.msra.mxu1 %v12577_v50  ;;  %7784 = vmatprep.subr.mxu0 %v14169_v41 }
 0xa5e   :  { %7819 = vmatprep.subr.mxu1 %v14169_v41  ;;  %7785 = vmatpush3.msra.mxu0 %v12584_v48 }
 0xa5f   :  { %7820 = vmatpush3.msra.mxu1 %v12587_v16  ;;  %7786 = vmatprep.subr.mxu0 %v14169_v41 }
 0xa60   :  { %7821 = vmatprep.subr.mxu1 %v14169_v41  ;;  %7787 = vmatpush3.msra.mxu0 %v12594_v4 }
 0xa61   :  { %7822 = vmatpush3.msra.mxu1 %v12597_v51  ;;  %7788 = vmatprep.subr.mxu0 %v14169_v41 }
 0xa62   :  { %7823 = vmatprep.subr.mxu1 %v14169_v41  ;;  %7789 = vmatpush3.msra.mxu0 %v12604_v55 }
 0xa63   :  { %7824 = vmatpush3.msra.mxu1 %v12607_v58  ;;  %7790 = vmatprep.subr.mxu0 %v14169_v41 }
 0xa64   :  { %7825 = vmatprep.subr.mxu1 %v14169_v41  ;;  %7791 = vmatpush3.msra.mxu0 %v12614_v62 }
 0xa65   :  { %7826 = vmatpush3.msra.mxu1 %v12617_v60  ;;  %7830 = vmatprep.subr.mxu0 %v14169_v41 }
 0xa66   :  { %7865 = vmatprep.subr.mxu1 %v14169_v41 }
 0xb04   :  { %v5054_v54 = vpop.f32.mrf.mxu0 }
 0xb05   :  { %v5058_v57 = vmul.f32 0.03125, %v5054_v54 }
 0xb06   :  { %v7724_v34 = vpop.f32.mrf.mxu0  ;;  %v5125_v25 = vpop.f32.mrf.mxu1 }
 0xb07   :  { %v5130_v20 = vmul.f32 %v5058_v57, %v5058_v57  ;;  %v5129_v18 = vmul.f32 0.03125, %v5125_v25 }
 0xb08   :  { %v7759_v22 = vpop.f32.mrf.mxu1 }
 0xb09   :  { %v5131_v7 = vsub.f32 %v5129_v18, %v5130_v20 }
 0xb0b   :  { %v5133_v2 = vadd.f32 1e-05, %v5131_v7  ;;  %v7139_v7 = vld [vmem:[%s6614_s27] ss:$0 sm:$0xff] }
 0xb0d   :  { %8375 = vrsqrt.f32 %v5133_v2 }
 0xb1a   :  { %v8376_v46 = vpop.eup %8375 }
 0xb1b   :  { %v5135_v23 = vmul.f32 %v8376_v46, %v5132_v17 }
 0xb1d   :  { %v5137_v59 = vmul.f32 %v5135_v23, %v5058_v57  ;;  %v5143_v11 = vrot.slane %v5135_v23, %v14117_v52 }
 0xb1f   :  { %v5138_v30 = vsub.f32 %v5136_v9, %v5137_v59  ;;  %v5145_v21 = vmul.f32 %v5143_v11, %v12444_v32  ;;  %v5154_v24 = vmul.f32 %v5143_v11, %v12451_v8  ;;  %v12648_v32 = vld [vmem:[%s12465_s11 + $0x168] sm:$0xff]  ;;  %v12655_v8 = vld [vmem:[%s12465_s11 + $0x160] sm:$0xff] }
 0xb21   :  { %v5150_v10 = vrot.slane %v5138_v30, %v14117_v52 }
 0xb23   :  { %v5152_v26 = vadd.f32 %v5150_v10, %v5145_v21  ;;  %v5155_v1 = vadd.f32 %v5154_v24, %v5150_v10 }
 0xb25   :  { %5153 = vst [vmem:[#allocation6 + $0x1] sm:$0xf] %v5152_v26  ;;  %5156 = vst [vmem:[#allocation6 + $0x9] sm:$0xf] %v5155_v1 }
 0xb2c   :  { %v5208_v63 = vld [vmem:[#allocation6 + $0x1] sm:$0xf] }
 0xb2d   :  { %v5207_v35 = vld [vmem:[#allocation6] sm:$0xf]  ;;  %7793 = vmatmul.mubr.f32.vlgmr.msra.gmra.mxu0 %v5208_v63 }
 0xb2e   :  { %7828 = vmatmul.mubr.f32.vlgmr.msra.gmra.mxu1 %v5207_v35  ;;  %7831 = vmatpush3.msra.mxu0 %v12638_v0 }
 0xb2f   :  { %7866 = vmatpush3.msra.mxu1 %v12468_v43  ;;  %7832 = vmatprep.subr.mxu0 %v14169_v41  ;;  %v12683_v43 = vld [vmem:[%s12465_s11 + $0x140] sm:$0xff] }
 0xb30   :  { %7867 = vmatprep.subr.mxu1 %v14169_v41  ;;  %7833 = vmatpush3.msra.mxu0 %v12641_v12 }
 0xb31   :  { %7868 = vmatpush3.msra.mxu1 %v12474_v6  ;;  %7834 = vmatprep.subr.mxu0 %v14169_v41  ;;  %v12690_v6 = vld [vmem:[%s12465_s11 + $0x138] sm:$0xff] }
 0xb32   :  { %7869 = vmatprep.subr.mxu1 %v14169_v41  ;;  %7835 = vmatpush3.msra.mxu0 %v12648_v32 }
 0xb33   :  { %7870 = vmatpush3.msra.mxu1 %v12484_v29  ;;  %7836 = vmatprep.subr.mxu0 %v14169_v41  ;;  %v12697_v29 = vld [vmem:[%s12465_s11 + $0x130] sm:$0xff] }
 0xb34   :  { %7871 = vmatprep.subr.mxu1 %v14169_v41  ;;  %7837 = vmatpush3.msra.mxu0 %v12655_v8 }
 0xb35   :  { %7872 = vmatpush3.msra.mxu1 %v12494_v56  ;;  %7838 = vmatprep.subr.mxu0 %v14169_v41  ;;  %v12704_v56 = vld [vmem:[%s12465_s11 + $0x128] sm:$0xff] }
 0xb36   :  { %7873 = vmatprep.subr.mxu1 %v14169_v41  ;;  %7839 = vmatpush3.msra.mxu0 %v12662_v14 }
 0xb37   :  { %7874 = vmatpush3.msra.mxu1 %v12504_v19  ;;  %7840 = vmatprep.subr.mxu0 %v14169_v41  ;;  %v12711_v19 = vld [vmem:[%s12465_s11 + $0x120] sm:$0xff] }
 0xb38   :  { %7875 = vmatprep.subr.mxu1 %v14169_v41  ;;  %7841 = vmatpush3.msra.mxu0 %v12669_v33 }
 0xb39   :  { %7876 = vmatpush3.msra.mxu1 %v12514_v45  ;;  %7842 = vmatprep.subr.mxu0 %v14169_v41  ;;  %v12718_v45 = vld [vmem:[%s12465_s11 + $0x118] sm:$0xff] }
 0xb3a   :  { %7877 = vmatprep.subr.mxu1 %v14169_v41  ;;  %7843 = vmatpush3.msra.mxu0 %v12676_v40 }
 0xb3b   :  { %7878 = vmatpush3.msra.mxu1 %v12524_v37  ;;  %7844 = vmatprep.subr.mxu0 %v14169_v41  ;;  %v12725_v37 = vld [vmem:[%s12465_s11 + $0x110] sm:$0xff] }
 0xb3c   :  { %7879 = vmatprep.subr.mxu1 %v14169_v41  ;;  %7845 = vmatpush3.msra.mxu0 %v12683_v43 }
 0xb3d   :  { %7880 = vmatpush3.msra.mxu1 %v12534_v39  ;;  %7846 = vmatprep.subr.mxu0 %v14169_v41  ;;  %v12732_v39 = vld [vmem:[%s12465_s11 + $0x108] sm:$0xff] }
 0xb3e   :  { %7881 = vmatprep.subr.mxu1 %v14169_v41  ;;  %7847 = vmatpush3.msra.mxu0 %v12690_v6 }
 0xb3f   :  { %7882 = vmatpush3.msra.mxu1 %v12544_v47  ;;  %7848 = vmatprep.subr.mxu0 %v14169_v41  ;;  %v12739_v47 = vld [vmem:[%s12465_s11 + $0x100] sm:$0xff] }
 0xb40   :  { %7883 = vmatprep.subr.mxu1 %v14169_v41  ;;  %7849 = vmatpush3.msra.mxu0 %v12697_v29 }
 0xb41   :  { %7884 = vmatpush3.msra.mxu1 %v12554_v49  ;;  %7850 = vmatprep.subr.mxu0 %v14169_v41  ;;  %v5349_v49 = vld [vmem:[#allocation6 + $0x2] sm:$0xf] }
 0xb42   :  { %7885 = vmatprep.subr.mxu1 %v14169_v41  ;;  %7851 = vmatpush3.msra.mxu0 %v12704_v56 }
 0xb43   :  { %7886 = vmatpush3.msra.mxu1 %v12564_v27  ;;  %7852 = vmatprep.subr.mxu0 %v14169_v41  ;;  %v5431_v27 = vld [vmem:[#allocation6 + $0x9] sm:$0xf] }
 0xb44   :  { %7887 = vmatprep.subr.mxu1 %v14169_v41  ;;  %7853 = vmatpush3.msra.mxu0 %v12711_v19 }
 0xb45   :  { %7888 = vmatpush3.msra.mxu1 %v12574_v61  ;;  %7854 = vmatprep.subr.mxu0 %v14169_v41  ;;  %v5686_v61 = vld [vmem:[%s12828_s23 + $0x30] sm:$0xff] }
 0xb46   :  { %7889 = vmatprep.subr.mxu1 %v14169_v41  ;;  %7855 = vmatpush3.msra.mxu0 %v12718_v45 }
 0xb47   :  { %7890 = vmatpush3.msra.mxu1 %v12584_v48  ;;  %7856 = vmatprep.subr.mxu0 %v14169_v41  ;;  %v5684_v48 = vld [vmem:[%s12828_s23 + $0x20] sm:$0xff] }
 0xb48   :  { %7891 = vmatprep.subr.mxu1 %v14169_v41  ;;  %7857 = vmatpush3.msra.mxu0 %v12725_v37 }
 0xb49   :  { %7892 = vmatpush3.msra.mxu1 %v12594_v4  ;;  %7858 = vmatprep.subr.mxu0 %v14169_v41  ;;  %v5682_v4 = vld [vmem:[%s12828_s23 + $0x10] sm:$0xff] }
 0xb4a   :  { %7893 = vmatprep.subr.mxu1 %v14169_v41  ;;  %7859 = vmatpush3.msra.mxu0 %v12732_v39 }
 0xb4b   :  { %7894 = vmatpush3.msra.mxu1 %v12604_v55  ;;  %7860 = vmatprep.subr.mxu0 %v14169_v41  ;;  %v5680_v55 = vld [vmem:[%s12828_s23] sm:$0xff] }
 0xb4c   :  { %7895 = vmatprep.subr.mxu1 %v14169_v41  ;;  %7861 = vmatpush3.msra.mxu0 %v12739_v47 }
 0xb4d   :  { %7862 = vmatprep.mubr.msk.f32.mxu0 %vm8453_vm3, %v14169_v41  ;;  %7896 = vmatpush3.msra.mxu1 %v12614_v62 }
 0xb4e   :  { %7897 = vmatprep.mubr.msk.f32.mxu1 %vm8453_vm3, %v14169_v41  ;;  %7863 = vmatmul.mubr.f32.vlgmr.msra.gmra.mxu0 %v5349_v49 }
 0xb4f   :  { %7898 = vmatmul.mubr.f32.vlgmr.msra.gmra.mxu1 %v5431_v27  ;;  %7900 = vmatprep.subr.mxu0 %v14169_v41 }
 0xb50   :  { %7935 = vmatprep.subr.mxu1 %v14169_v41  ;;  %7901 = vmatpush3.msra.mxu0 %v12471_v3  ;;  %v5430_v3 = vld [vmem:[#allocation6 + $0x8] sm:$0xf] }
 0xb51   :  { %7936 = vmatpush3.msra.mxu1 %v12638_v0  ;;  %7902 = vmatprep.subr.mxu0 %v14169_v41 }
 0xb52   :  { %7937 = vmatprep.subr.mxu1 %v14169_v41  ;;  %7903 = vmatpush3.msra.mxu0 %v12479_v44  ;;  %v5572_v44 = vld [vmem:[#allocation6 + $0xa] sm:$0xf] }
 0xb53   :  { %7938 = vmatpush3.msra.mxu1 %v12641_v12  ;;  %7904 = vmatprep.subr.mxu0 %v14169_v41 }
 0xb54   :  { %7939 = vmatprep.subr.mxu1 %v14169_v41  ;;  %7905 = vmatpush3.msra.mxu0 %v12487_v38  ;;  %v5695_v38 = vld [vmem:[%s12828_s23 + $0x78] sm:$0xff] }
 0xb55   :  { %7940 = vmatpush3.msra.mxu1 %v12648_v32  ;;  %7906 = vmatprep.subr.mxu0 %v14169_v41 }
 0xb56   :  { %7941 = vmatprep.subr.mxu1 %v14169_v41  ;;  %7907 = vmatpush3.msra.mxu0 %v12497_v5  ;;  %v5694_v5 = vld [vmem:[%s12828_s23 + $0x70] sm:$0xff] }
 0xb57   :  { %7942 = vmatpush3.msra.mxu1 %v12655_v8  ;;  %7908 = vmatprep.subr.mxu0 %v14169_v41 }
 0xb58   :  { %7943 = vmatprep.subr.mxu1 %v14169_v41  ;;  %7909 = vmatpush3.msra.mxu0 %v12507_v15  ;;  %v5693_v15 = vld [vmem:[%s12828_s23 + $0x68] sm:$0xff] }
 0xb59   :  { %7944 = vmatpush3.msra.mxu1 %v12662_v14  ;;  %7910 = vmatprep.subr.mxu0 %v14169_v41 }
 0xb5a   :  { %7945 = vmatprep.subr.mxu1 %v14169_v41  ;;  %7911 = vmatpush3.msra.mxu0 %v12517_v53  ;;  %v5692_v53 = vld [vmem:[%s12828_s23 + $0x60] sm:$0xff] }
 0xb5b   :  { %7946 = vmatpush3.msra.mxu1 %v12669_v33  ;;  %7912 = vmatprep.subr.mxu0 %v14169_v41 }
 0xb5c   :  { %7947 = vmatprep.subr.mxu1 %v14169_v41  ;;  %7913 = vmatpush3.msra.mxu0 %v12527_v42  ;;  %v5691_v42 = vld [vmem:[%s12828_s23 + $0x58] sm:$0xff] }
 0xb5d   :  { %7948 = vmatpush3.msra.mxu1 %v12676_v40  ;;  %7914 = vmatprep.subr.mxu0 %v14169_v41 }
 0xb5e   :  { %7949 = vmatprep.subr.mxu1 %v14169_v41  ;;  %7915 = vmatpush3.msra.mxu0 %v12537_v13  ;;  %v5690_v13 = vld [vmem:[%s12828_s23 + $0x50] sm:$0xff] }
 0xb5f   :  { %7950 = vmatpush3.msra.mxu1 %v12683_v43  ;;  %7916 = vmatprep.subr.mxu0 %v14169_v41 }
 0xb60   :  { %7951 = vmatprep.subr.mxu1 %v14169_v41  ;;  %7917 = vmatpush3.msra.mxu0 %v12547_v31  ;;  %v5689_v31 = vld [vmem:[%s12828_s23 + $0x48] sm:$0xff] }
 0xb61   :  { %7952 = vmatpush3.msra.mxu1 %v12690_v6  ;;  %7918 = vmatprep.subr.mxu0 %v14169_v41 }
 0xb62   :  { %7953 = vmatprep.subr.mxu1 %v14169_v41  ;;  %7919 = vmatpush3.msra.mxu0 %v12557_v28  ;;  %v5688_v28 = vld [vmem:[%s12828_s23 + $0x40] sm:$0xff] }
 0xb63   :  { %7954 = vmatpush3.msra.mxu1 %v12697_v29  ;;  %7920 = vmatprep.subr.mxu0 %v14169_v41 }
 0xb64   :  { %7955 = vmatprep.subr.mxu1 %v14169_v41  ;;  %7921 = vmatpush3.msra.mxu0 %v12567_v36  ;;  %v5687_v36 = vld [vmem:[%s12828_s23 + $0x38] sm:$0xff] }
 0xb65   :  { %7956 = vmatpush3.msra.mxu1 %v12704_v56  ;;  %7922 = vmatprep.subr.mxu0 %v14169_v41 }
 0xb66   :  { %7957 = vmatprep.subr.mxu1 %v14169_v41  ;;  %7923 = vmatpush3.msra.mxu0 %v12577_v50  ;;  %v5685_v50 = vld [vmem:[%s12828_s23 + $0x28] sm:$0xff] }
 0xb67   :  { %7958 = vmatpush3.msra.mxu1 %v12711_v19  ;;  %7924 = vmatprep.subr.mxu0 %v14169_v41 }
 0xb68   :  { %7959 = vmatprep.subr.mxu1 %v14169_v41  ;;  %7925 = vmatpush3.msra.mxu0 %v12587_v16  ;;  %v5683_v16 = vld [vmem:[%s12828_s23 + $0x18] sm:$0xff] }
 0xb69   :  { %7960 = vmatpush3.msra.mxu1 %v12718_v45  ;;  %7926 = vmatprep.subr.mxu0 %v14169_v41 }
 0xb6a   :  { %7961 = vmatprep.subr.mxu1 %v14169_v41  ;;  %7927 = vmatpush3.msra.mxu0 %v12597_v51  ;;  %v5681_v51 = vld [vmem:[%s12828_s23 + $0x8] sm:$0xff] }
 0xb6b   :  { %7962 = vmatpush3.msra.mxu1 %v12725_v37  ;;  %7928 = vmatprep.subr.mxu0 %v14169_v41 }
 0xb6c   :  { %7963 = vmatprep.subr.mxu1 %v14169_v41  ;;  %7929 = vmatpush3.msra.mxu0 %v12607_v58 }
 0xb6d   :  { %7964 = vmatpush3.msra.mxu1 %v12732_v39  ;;  %7930 = vmatprep.subr.mxu0 %v14169_v41 }
 0xb6e   :  { %7965 = vmatprep.subr.mxu1 %v14169_v41  ;;  %7931 = vmatpush3.msra.mxu0 %v12617_v60 }
 0xb6f   :  { %7932 = vmatprep.mubr.msk.f32.mxu0 %vm8453_vm3, %v14169_v41  ;;  %7966 = vmatpush3.msra.mxu1 %v12739_v47 }
 0xb70   :  { %7967 = vmatprep.mubr.msk.f32.mxu1 %vm8453_vm3, %v14169_v41  ;;  %7933 = vmatmul.mubr.f32.vlgmr.msra.gmra.mxu0 %v5430_v3 }
 0xb71   :  { %7968 = vmatmul.mubr.f32.vlgmr.msra.gmra.mxu1 %v5572_v44  ;;  %7970 = vmatprep.subr.mxu0 %v14169_v41 }
 0xb72   :  { %8005 = vmatprep.subr.mxu1 %v14169_v41  ;;  %8002 = vmatprep.mubr.msk.f32.mxu0 %vm8453_vm3, %v14169_v41 }
 0xb73   :  { %8037 = vmatprep.mubr.msk.f32.mxu1 %vm8453_vm3, %v14169_v41  ;;  %7971 = vmatpush3.msra.mxu0 %v5695_v38 }
 0xb74   :  { %8006 = vmatpush3.msra.mxu1 %v5695_v38  ;;  %7972 = vmatprep.subr.mxu0 %v14169_v41 }
 0xb75   :  { %8007 = vmatprep.subr.mxu1 %v14169_v41  ;;  %7973 = vmatpush3.msra.mxu0 %v5694_v5 }
 0xb76   :  { %8008 = vmatpush3.msra.mxu1 %v5694_v5  ;;  %7974 = vmatprep.subr.mxu0 %v14169_v41 }
 0xb77   :  { %8009 = vmatprep.subr.mxu1 %v14169_v41  ;;  %7975 = vmatpush3.msra.mxu0 %v5693_v15 }
 0xb78   :  { %8010 = vmatpush3.msra.mxu1 %v5693_v15  ;;  %7976 = vmatprep.subr.mxu0 %v14169_v41 }
 0xb79   :  { %8011 = vmatprep.subr.mxu1 %v14169_v41  ;;  %7977 = vmatpush3.msra.mxu0 %v5692_v53 }
 0xb7a   :  { %8012 = vmatpush3.msra.mxu1 %v5692_v53  ;;  %7978 = vmatprep.subr.mxu0 %v14169_v41 }
 0xb7b   :  { %8013 = vmatprep.subr.mxu1 %v14169_v41  ;;  %7979 = vmatpush3.msra.mxu0 %v5691_v42 }
 0xb7c   :  { %8014 = vmatpush3.msra.mxu1 %v5691_v42  ;;  %7980 = vmatprep.subr.mxu0 %v14169_v41 }
 0xb7d   :  { %8015 = vmatprep.subr.mxu1 %v14169_v41  ;;  %7981 = vmatpush3.msra.mxu0 %v5690_v13 }
 0xb7e   :  { %8016 = vmatpush3.msra.mxu1 %v5690_v13  ;;  %7982 = vmatprep.subr.mxu0 %v14169_v41 }
 0xb7f   :  { %8017 = vmatprep.subr.mxu1 %v14169_v41  ;;  %7983 = vmatpush3.msra.mxu0 %v5689_v31 }
 0xb80   :  { %8018 = vmatpush3.msra.mxu1 %v5689_v31  ;;  %7984 = vmatprep.subr.mxu0 %v14169_v41 }
 0xb81   :  { %8019 = vmatprep.subr.mxu1 %v14169_v41  ;;  %7985 = vmatpush3.msra.mxu0 %v5688_v28 }
 0xb82   :  { %8020 = vmatpush3.msra.mxu1 %v5688_v28  ;;  %7986 = vmatprep.subr.mxu0 %v14169_v41  ;;  %v12905_v28 = vld [vmem:[%s12902_s1 + $0xf8] sm:$0xff] }
 0xb83   :  { %8021 = vmatprep.subr.mxu1 %v14169_v41  ;;  %7987 = vmatpush3.msra.mxu0 %v5687_v36 }
 0xb84   :  { %8022 = vmatpush3.msra.mxu1 %v5687_v36  ;;  %7988 = vmatprep.subr.mxu0 %v14169_v41  ;;  %v12908_v36 = vld [vmem:[%s12902_s1 + $0x78] sm:$0xff] }
 0xb85   :  { %8023 = vmatprep.subr.mxu1 %v14169_v41  ;;  %7989 = vmatpush3.msra.mxu0 %v5686_v61 }
 0xb86   :  { %8024 = vmatpush3.msra.mxu1 %v5686_v61  ;;  %7990 = vmatprep.subr.mxu0 %v14169_v41  ;;  %v12915_v61 = vld [vmem:[%s12902_s1 + $0xf0] sm:$0xff] }
 0xb87   :  { %8025 = vmatprep.subr.mxu1 %v14169_v41  ;;  %7991 = vmatpush3.msra.mxu0 %v5685_v50 }
 0xb88   :  { %8026 = vmatpush3.msra.mxu1 %v5685_v50  ;;  %7992 = vmatprep.subr.mxu0 %v14169_v41  ;;  %v12918_v50 = vld [vmem:[%s12902_s1 + $0x70] sm:$0xff] }
 0xb89   :  { %8027 = vmatprep.subr.mxu1 %v14169_v41  ;;  %7993 = vmatpush3.msra.mxu0 %v5684_v48 }
 0xb8a   :  { %8028 = vmatpush3.msra.mxu1 %v5684_v48  ;;  %7994 = vmatprep.subr.mxu0 %v14169_v41  ;;  %v12925_v48 = vld [vmem:[%s12902_s1 + $0xe8] sm:$0xff] }
 0xb8b   :  { %8029 = vmatprep.subr.mxu1 %v14169_v41  ;;  %7995 = vmatpush3.msra.mxu0 %v5683_v16 }
 0xb8c   :  { %8030 = vmatpush3.msra.mxu1 %v5683_v16  ;;  %7996 = vmatprep.subr.mxu0 %v14169_v41  ;;  %v12928_v16 = vld [vmem:[%s12902_s1 + $0x68] sm:$0xff] }
 0xb8d   :  { %8031 = vmatprep.subr.mxu1 %v14169_v41  ;;  %7997 = vmatpush3.msra.mxu0 %v5682_v4 }
 0xb8e   :  { %8032 = vmatpush3.msra.mxu1 %v5682_v4  ;;  %7998 = vmatprep.subr.mxu0 %v14169_v41  ;;  %v12935_v4 = vld [vmem:[%s12902_s1 + $0xe0] sm:$0xff] }
 0xb8f   :  { %8033 = vmatprep.subr.mxu1 %v14169_v41  ;;  %7999 = vmatpush3.msra.mxu0 %v5681_v51 }
 0xb90   :  { %8034 = vmatpush3.msra.mxu1 %v5681_v51  ;;  %8000 = vmatprep.subr.mxu0 %v14169_v41  ;;  %v12938_v51 = vld [vmem:[%s12902_s1 + $0x60] sm:$0xff] }
 0xb91   :  { %8035 = vmatprep.subr.mxu1 %v14169_v41  ;;  %8001 = vmatpush3.msra.mxu0 %v5680_v55 }
 0xb92   :  { %8036 = vmatpush3.msra.mxu1 %v5680_v55  ;;  %8040 = vmatprep.subr.mxu0 %v14169_v41  ;;  %v12945_v55 = vld [vmem:[%s12902_s1 + $0xd8] sm:$0xff] }
 0xb93   :  { %8075 = vmatprep.subr.mxu1 %v14169_v41 }
 0xbed   :  { %v5275_v58 = vpop.f32.mrf.mxu0 }
 0xbee   :  { %v5345_v62 = vpop.f32.mrf.mxu1 }
 0xbef   :  { %v5346_v60 = vadd.f32 %v5345_v62, %v5275_v58  ;;  %v7794_v54 = vpop.f32.mrf.mxu0  ;;  %v12948_v58 = vld [vmem:[%s12902_s1 + $0x58] sm:$0xff]  ;;  %v12955_v62 = vld [vmem:[%s12902_s1 + $0xd0] sm:$0xff] }
 0xbf0   :  { %v7829_v57 = vpop.f32.mrf.mxu1  ;;  %v12965_v54 = vld [vmem:[%s12902_s1 + $0xc8] sm:$0xff] }
 0xbf1   :  { %v12968_v57 = vld [vmem:[%s12902_s1 + $0x48] sm:$0xff] }
 0xc0e   :  { %v5416_v34 = vpop.f32.mrf.mxu0 }
 0xc0f   :  { %v5498_v25 = vpop.f32.mrf.mxu1  ;;  %v5420_v22 = vadd.f32 %v5416_v34, %v5346_v60  ;;  %v12958_v60 = vld [vmem:[%s12902_s1 + $0x50] sm:$0xff]  ;;  %v12975_v34 = vld [vmem:[%s12902_s1 + $0xc0] sm:$0xff] }
 0xc10   :  { %v7864_v20 = vpop.f32.mrf.mxu0 }
 0xc11   :  { %v7899_v18 = vpop.f32.mrf.mxu1  ;;  %v5428_v2 = vadd.f32 %v7139_v7, %v5420_v22  ;;  %v12985_v20 = vld [vmem:[%s12902_s1 + $0xb8] sm:$0xff]  ;;  %v12995_v22 = vld [vmem:[%s12902_s1 + $0xb0] sm:$0xff] }
 0xc12   :  { %v12988_v18 = vld [vmem:[%s12902_s1 + $0x38] sm:$0xff] }
 0xc13   :  { %v12881_v17 = vmax.f32 %v5428_v2, 0.0  ;;  %v13005_v2 = vld [vmem:[%s12902_s1 + $0xa8] sm:$0xff] }
 0xc15   :  { %v5654_v46 = vmul.f32 %v12881_v17, %v12881_v17  ;;  %v5646_v23 = vsel %vm1887_vm2, %v12881_v17, 0.0 }
 0xc16   :  { %v5647_v59 = vrot.slane %v5646_v23, 4 }
 0xc17   :  { %v5655_v9 = vsel %vm1887_vm2, %v5654_v46, 0.0  ;;  %v13008_v46 = vld [vmem:[%s12902_s1 + $0x28] sm:$0xff] }
 0xc18   :  { %v5656_v10 = vrot.slane %v5655_v9, 4  ;;  %v5648_v0 = vadd.f32 %v5647_v59, %v5646_v23  ;;  %v13015_v23 = vld [vmem:[%s12902_s1 + $0xa0] sm:$0xff]  ;;  %v13025_v59 = vld [vmem:[%s12902_s1 + $0x98] sm:$0xff] }
 0xc1a   :  { %v5657_v35 = vadd.f32 %v5656_v10, %v5655_v9  ;;  %v5649_v32 = vrot.slane %v5648_v0, 2  ;;  %v13018_v9 = vld [vmem:[%s12902_s1 + $0x20] sm:$0xff]  ;;  %v13041_v10 = vld [vmem:[%s12902_s1 + $0x88] sm:$0xff] }
 0xc1c   :  { %v5658_v33 = vrot.slane %v5657_v35, 2  ;;  %v5650_v6 = vadd.f32 %v5649_v32, %v5648_v0 }
 0xc1e   :  { %v5659_v37 = vadd.f32 %v5658_v33, %v5657_v35  ;;  %v5651_v49 = vrot.slane %v5650_v6, 1 }
 0xc20   :  { %v5660_v3 = vrot.slane %v5659_v37, 1  ;;  %v5652_v38 = vadd.f32 %v5651_v49, %v5650_v6  ;;  %v5840_v6 = vld [vmem:[%s6615_s5] sm:$0x1] }
 0xc22   :  { %v5661_v42 = vadd.f32 %v5660_v3, %v5659_v37 }
 0xc30   :  { %v5568_v11 = vpop.f32.mrf.mxu0 }
 0xc31   :  { %v5639_v30 = vpop.f32.mrf.mxu1  ;;  %v5569_v21 = vadd.f32 %v5568_v11, %v5498_v25  ;;  %v12978_v25 = vld [vmem:[%s12902_s1 + $0x40] sm:$0xff]  ;;  %v13028_v11 = vld [vmem:[%s12902_s1 + $0x18] sm:$0xff] }
 0xc32   :  { %v7934_v24 = vpop.f32.mrf.mxu0 }
 0xc33   :  { %v7969_v26 = vpop.f32.mrf.mxu1  ;;  %v5643_v1 = vadd.f32 %v5639_v30, %v5569_v21  ;;  %v13033_v30 = vld [vmem:[%s12902_s1 + $0x90] sm:$0xff]  ;;  %v13044_v24 = vld [vmem:[%s12902_s1 + $0x8] sm:$0xff] }
 0xc34   :  { %v13036_v21 = vld [vmem:[%s12902_s1 + $0x10] sm:$0xff]  ;;  %v13051_v26 = vld [vmem:[%s12902_s1 + $0x80] sm:$0xff] }
 0xc35   :  { %v5644_v63 = vadd.f32 %v7139_v7, %v5643_v1  ;;  %v12998_v7 = vld [vmem:[%s12902_s1 + $0x30] sm:$0xff]  ;;  %v13054_v1 = vld [vmem:[%s12902_s1] sm:$0xff] }
 0xc37   :  { %v12888_v12 = vmax.f32 %v5644_v63, 0.0 }
 0xc39   :  { %v5663_v8 = vsel %vm1887_vm2, %v12888_v12, 0.0  ;;  %v5671_v14 = vmul.f32 %v12888_v12, %v12888_v12 }
 0xc3a   :  { %v5664_v40 = vrot.slane %v5663_v8, 4 }
 0xc3b   :  { %v5672_v43 = vsel %vm1887_vm2, %v5671_v14, 0.0 }
 0xc3c   :  { %v5665_v29 = vadd.f32 %v5664_v40, %v5663_v8  ;;  %v5673_v56 = vrot.slane %v5672_v43, 4 }
 0xc3e   :  { %v5666_v19 = vrot.slane %v5665_v29, 2  ;;  %v5674_v45 = vadd.f32 %v5673_v56, %v5672_v43 }
 0xc40   :  { %v5667_v39 = vadd.f32 %v5666_v19, %v5665_v29  ;;  %v5675_v47 = vrot.slane %v5674_v45, 2  ;;  %v5844_v19 = vld [vmem:[%s6616_s9] sm:$0x1] }
 0xc42   :  { %v5668_v27 = vrot.slane %v5667_v39, 1  ;;  %v5676_v44 = vadd.f32 %v5675_v47, %v5674_v45 }
 0xc44   :  { %v5669_v5 = vadd.f32 %v5668_v27, %v5667_v39  ;;  %v5677_v15 = vrot.slane %v5676_v44, 1 }
 0xc46   :  { %v5670_v53 = vadd.f32 %v5669_v5, %v5652_v38  ;;  %v5678_v13 = vadd.f32 %v5677_v15, %v5676_v44  ;;  %v13075_v38 = vld [vmem:[%s12902_s1 + $0x178] sm:$0xff] }
 0xc48   :  { %8003 = vmatmul.mubr.f32.vlgmr.msra.gmra.mxu0 %v5670_v53  ;;  %v5679_v31 = vadd.f32 %v5678_v13, %v5661_v42  ;;  %v13078_v53 = vld [vmem:[%s12902_s1 + $0x170] sm:$0xff]  ;;  %v13099_v42 = vld [vmem:[%s12902_s1 + $0x158] sm:$0xff] }
 0xc49   :  { %8072 = vmatprep.mubr.msk.f32.mxu0 %vm8453_vm3, %v14169_v41  ;;  %8041 = vmatpush3.msra.mxu0 %v12905_v28  ;;  %v13106_v13 = vld [vmem:[%s12902_s1 + $0x150] sm:$0xff] }
 0xc4a   :  { %8038 = vmatmul.mubr.f32.vlgmr.msra.gmra.mxu1 %v5679_v31  ;;  %8042 = vmatprep.subr.mxu0 %v14169_v41  ;;  %v13113_v31 = vld [vmem:[%s12902_s1 + $0x148] sm:$0xff] }
 0xc4b   :  { %8107 = vmatprep.mubr.msk.f32.mxu1 %vm8453_vm3, %v14169_v41  ;;  %8076 = vmatpush3.msra.mxu1 %v12908_v36 }
 0xc4c   :  { %8077 = vmatprep.subr.mxu1 %v14169_v41  ;;  %8043 = vmatpush3.msra.mxu0 %v12915_v61 }
 0xc4d   :  { %8078 = vmatpush3.msra.mxu1 %v12918_v50  ;;  %8044 = vmatprep.subr.mxu0 %v14169_v41 }
 0xc4e   :  { %8079 = vmatprep.subr.mxu1 %v14169_v41  ;;  %8045 = vmatpush3.msra.mxu0 %v12925_v48 }
 0xc4f   :  { %8080 = vmatpush3.msra.mxu1 %v12928_v16  ;;  %8046 = vmatprep.subr.mxu0 %v14169_v41 }
 0xc50   :  { %8081 = vmatprep.subr.mxu1 %v14169_v41  ;;  %8047 = vmatpush3.msra.mxu0 %v12935_v4 }
 0xc51   :  { %8082 = vmatpush3.msra.mxu1 %v12938_v51  ;;  %8048 = vmatprep.subr.mxu0 %v14169_v41 }
 0xc52   :  { %8083 = vmatprep.subr.mxu1 %v14169_v41  ;;  %8049 = vmatpush3.msra.mxu0 %v12945_v55 }
 0xc53   :  { %8084 = vmatpush3.msra.mxu1 %v12948_v58  ;;  %8050 = vmatprep.subr.mxu0 %v14169_v41 }
 0xc54   :  { %8085 = vmatprep.subr.mxu1 %v14169_v41  ;;  %8051 = vmatpush3.msra.mxu0 %v12955_v62 }
 0xc55   :  { %8086 = vmatpush3.msra.mxu1 %v12958_v60  ;;  %8052 = vmatprep.subr.mxu0 %v14169_v41 }
 0xc56   :  { %8087 = vmatprep.subr.mxu1 %v14169_v41  ;;  %8053 = vmatpush3.msra.mxu0 %v12965_v54 }
 0xc57   :  { %8088 = vmatpush3.msra.mxu1 %v12968_v57  ;;  %8054 = vmatprep.subr.mxu0 %v14169_v41 }
 0xc58   :  { %8089 = vmatprep.subr.mxu1 %v14169_v41  ;;  %8055 = vmatpush3.msra.mxu0 %v12975_v34 }
 0xc59   :  { %8090 = vmatpush3.msra.mxu1 %v12978_v25  ;;  %8056 = vmatprep.subr.mxu0 %v14169_v41 }
 0xc5a   :  { %8091 = vmatprep.subr.mxu1 %v14169_v41  ;;  %8057 = vmatpush3.msra.mxu0 %v12985_v20 }
 0xc5b   :  { %8092 = vmatpush3.msra.mxu1 %v12988_v18  ;;  %8058 = vmatprep.subr.mxu0 %v14169_v41 }
 0xc5c   :  { %8093 = vmatprep.subr.mxu1 %v14169_v41  ;;  %8059 = vmatpush3.msra.mxu0 %v12995_v22 }
 0xc5d   :  { %8094 = vmatpush3.msra.mxu1 %v12998_v7  ;;  %8060 = vmatprep.subr.mxu0 %v14169_v41 }
 0xc5e   :  { %8095 = vmatprep.subr.mxu1 %v14169_v41  ;;  %8061 = vmatpush3.msra.mxu0 %v13005_v2 }
 0xc5f   :  { %8096 = vmatpush3.msra.mxu1 %v13008_v46  ;;  %8062 = vmatprep.subr.mxu0 %v14169_v41 }
 0xc60   :  { %8097 = vmatprep.subr.mxu1 %v14169_v41  ;;  %8063 = vmatpush3.msra.mxu0 %v13015_v23 }
 0xc61   :  { %8098 = vmatpush3.msra.mxu1 %v13018_v9  ;;  %8064 = vmatprep.subr.mxu0 %v14169_v41 }
 0xc62   :  { %8099 = vmatprep.subr.mxu1 %v14169_v41  ;;  %8065 = vmatpush3.msra.mxu0 %v13025_v59 }
 0xc63   :  { %8100 = vmatpush3.msra.mxu1 %v13028_v11  ;;  %8066 = vmatprep.subr.mxu0 %v14169_v41 }
 0xc64   :  { %8101 = vmatprep.subr.mxu1 %v14169_v41  ;;  %8067 = vmatpush3.msra.mxu0 %v13033_v30 }
 0xc65   :  { %8102 = vmatpush3.msra.mxu1 %v13036_v21  ;;  %8068 = vmatprep.subr.mxu0 %v14169_v41 }
 0xc66   :  { %8103 = vmatprep.subr.mxu1 %v14169_v41  ;;  %8069 = vmatpush3.msra.mxu0 %v13041_v10 }
 0xc67   :  { %8104 = vmatpush3.msra.mxu1 %v13044_v24  ;;  %8070 = vmatprep.subr.mxu0 %v14169_v41 }
 0xc68   :  { %8105 = vmatprep.subr.mxu1 %v14169_v41  ;;  %8071 = vmatpush3.msra.mxu0 %v13051_v26 }
 0xc69   :  { %8106 = vmatpush3.msra.mxu1 %v13054_v1  ;;  %8110 = vmatprep.subr.mxu0 %v14169_v41 }
 0xc6a   :  { %8145 = vmatprep.subr.mxu1 %v14169_v41 }
 0xd08   :  { %v5762_v0 = vpop.f32.mrf.mxu0 }
 0xd09   :  { %v5766_v63 = vmul.f32 0.03125, %v5762_v0 }
 0xd0a   :  { %v8004_v35 = vpop.f32.mrf.mxu0  ;;  %v5833_v32 = vpop.f32.mrf.mxu1 }
 0xd0b   :  { %v5838_v8 = vmul.f32 %v5766_v63, %v5766_v63  ;;  %v5837_v14 = vmul.f32 0.03125, %v5833_v32 }
 0xd0c   :  { %v8039_v33 = vpop.f32.mrf.mxu1 }
 0xd0d   :  { %v5839_v40 = vsub.f32 %v5837_v14, %v5838_v8 }
 0xd0f   :  { %v5841_v43 = vadd.f32 1e-05, %v5839_v40  ;;  %v7172_v40 = vld [vmem:[%s6619_s17] ss:$0 sm:$0xff] }
 0xd11   :  { %8377 = vrsqrt.f32 %v5841_v43 }
 0xd1e   :  { %v8378_v29 = vpop.eup %8377 }
 0xd1f   :  { %v5843_v56 = vmul.f32 %v8378_v29, %v5840_v6 }
 0xd21   :  { %v5845_v45 = vmul.f32 %v5843_v56, %v5766_v63  ;;  %v5851_v37 = vrot.slane %v5843_v56, %v14117_v52 }
 0xd23   :  { %v5846_v39 = vsub.f32 %v5844_v19, %v5845_v45  ;;  %v5853_v47 = vmul.f32 %v5851_v37, %v12881_v17  ;;  %v5862_v27 = vmul.f32 %v5851_v37, %v12888_v12  ;;  %v13085_v17 = vld [vmem:[%s12902_s1 + $0x168] sm:$0xff]  ;;  %v13092_v12 = vld [vmem:[%s12902_s1 + $0x160] sm:$0xff] }
 0xd25   :  { %v5858_v49 = vrot.slane %v5846_v39, %v14117_v52 }
 0xd27   :  { %v5860_v3 = vadd.f32 %v5858_v49, %v5853_v47  ;;  %v5863_v44 = vadd.f32 %v5862_v27, %v5858_v49 }
 0xd29   :  { %5861 = vst [vmem:[#allocation7 + $0x1] sm:$0xf] %v5860_v3  ;;  %5864 = vst [vmem:[#allocation7 + $0x9] sm:$0xf] %v5863_v44 }
 0xd30   :  { %v5916_v5 = vld [vmem:[#allocation7 + $0x1] sm:$0xf] }
 0xd31   :  { %v5915_v15 = vld [vmem:[#allocation7] sm:$0xf]  ;;  %8073 = vmatmul.mubr.f32.vlgmr.msra.gmra.mxu0 %v5916_v5 }
 0xd32   :  { %8108 = vmatmul.mubr.f32.vlgmr.msra.gmra.mxu1 %v5915_v15  ;;  %8111 = vmatpush3.msra.mxu0 %v13075_v38 }
 0xd33   :  { %8146 = vmatpush3.msra.mxu1 %v12905_v28  ;;  %8112 = vmatprep.subr.mxu0 %v14169_v41  ;;  %v13120_v28 = vld [vmem:[%s12902_s1 + $0x140] sm:$0xff] }
 0xd34   :  { %8147 = vmatprep.subr.mxu1 %v14169_v41  ;;  %8113 = vmatpush3.msra.mxu0 %v13078_v53 }
 0xd35   :  { %8148 = vmatpush3.msra.mxu1 %v12915_v61  ;;  %8114 = vmatprep.subr.mxu0 %v14169_v41  ;;  %v13127_v61 = vld [vmem:[%s12902_s1 + $0x138] sm:$0xff] }
 0xd36   :  { %8149 = vmatprep.subr.mxu1 %v14169_v41  ;;  %8115 = vmatpush3.msra.mxu0 %v13085_v17 }
 0xd37   :  { %8150 = vmatpush3.msra.mxu1 %v12925_v48  ;;  %8116 = vmatprep.subr.mxu0 %v14169_v41  ;;  %v13134_v48 = vld [vmem:[%s12902_s1 + $0x130] sm:$0xff] }
 0xd38   :  { %8151 = vmatprep.subr.mxu1 %v14169_v41  ;;  %8117 = vmatpush3.msra.mxu0 %v13092_v12 }
 0xd39   :  { %8152 = vmatpush3.msra.mxu1 %v12935_v4  ;;  %8118 = vmatprep.subr.mxu0 %v14169_v41  ;;  %v13141_v4 = vld [vmem:[%s12902_s1 + $0x128] sm:$0xff] }
 0xd3a   :  { %8153 = vmatprep.subr.mxu1 %v14169_v41  ;;  %8119 = vmatpush3.msra.mxu0 %v13099_v42 }
 0xd3b   :  { %8154 = vmatpush3.msra.mxu1 %v12945_v55  ;;  %8120 = vmatprep.subr.mxu0 %v14169_v41  ;;  %v13148_v55 = vld [vmem:[%s12902_s1 + $0x120] sm:$0xff] }
 0xd3c   :  { %8155 = vmatprep.subr.mxu1 %v14169_v41  ;;  %8121 = vmatpush3.msra.mxu0 %v13106_v13 }
 0xd3d   :  { %8156 = vmatpush3.msra.mxu1 %v12955_v62  ;;  %8122 = vmatprep.subr.mxu0 %v14169_v41  ;;  %v13155_v62 = vld [vmem:[%s12902_s1 + $0x118] sm:$0xff] }
 0xd3e   :  { %8157 = vmatprep.subr.mxu1 %v14169_v41  ;;  %8123 = vmatpush3.msra.mxu0 %v13113_v31 }
 0xd3f   :  { %8158 = vmatpush3.msra.mxu1 %v12965_v54  ;;  %8124 = vmatprep.subr.mxu0 %v14169_v41  ;;  %v13162_v54 = vld [vmem:[%s12902_s1 + $0x110] sm:$0xff] }
 0xd40   :  { %8159 = vmatprep.subr.mxu1 %v14169_v41  ;;  %8125 = vmatpush3.msra.mxu0 %v13120_v28 }
 0xd41   :  { %8160 = vmatpush3.msra.mxu1 %v12975_v34  ;;  %8126 = vmatprep.subr.mxu0 %v14169_v41  ;;  %v13169_v34 = vld [vmem:[%s12902_s1 + $0x108] sm:$0xff] }
 0xd42   :  { %8161 = vmatprep.subr.mxu1 %v14169_v41  ;;  %8127 = vmatpush3.msra.mxu0 %v13127_v61 }
 0xd43   :  { %8162 = vmatpush3.msra.mxu1 %v12985_v20  ;;  %8128 = vmatprep.subr.mxu0 %v14169_v41  ;;  %v13176_v20 = vld [vmem:[%s12902_s1 + $0x100] sm:$0xff] }
 0xd44   :  { %8163 = vmatprep.subr.mxu1 %v14169_v41  ;;  %8129 = vmatpush3.msra.mxu0 %v13134_v48 }
 0xd45   :  { %8164 = vmatpush3.msra.mxu1 %v12995_v22  ;;  %8130 = vmatprep.subr.mxu0 %v14169_v41  ;;  %v6057_v22 = vld [vmem:[#allocation7 + $0x2] sm:$0xf] }
 0xd46   :  { %8165 = vmatprep.subr.mxu1 %v14169_v41  ;;  %8131 = vmatpush3.msra.mxu0 %v13141_v4 }
 0xd47   :  { %8166 = vmatpush3.msra.mxu1 %v13005_v2  ;;  %8132 = vmatprep.subr.mxu0 %v14169_v41  ;;  %v6139_v2 = vld [vmem:[#allocation7 + $0x9] sm:$0xf] }
 0xd48   :  { %8167 = vmatprep.subr.mxu1 %v14169_v41  ;;  %8133 = vmatpush3.msra.mxu0 %v13148_v55 }
 0xd49   :  { %8168 = vmatpush3.msra.mxu1 %v13015_v23  ;;  %8134 = vmatprep.subr.mxu0 %v14169_v41  ;;  %v6394_v23 = vld [vmem:[%s13265_s13 + $0x30] sm:$0xff] }
 0xd4a   :  { %8169 = vmatprep.subr.mxu1 %v14169_v41  ;;  %8135 = vmatpush3.msra.mxu0 %v13155_v62 }
 0xd4b   :  { %8170 = vmatpush3.msra.mxu1 %v13025_v59  ;;  %8136 = vmatprep.subr.mxu0 %v14169_v41  ;;  %v6392_v59 = vld [vmem:[%s13265_s13 + $0x20] sm:$0xff] }
 0xd4c   :  { %8171 = vmatprep.subr.mxu1 %v14169_v41  ;;  %8137 = vmatpush3.msra.mxu0 %v13162_v54 }
 0xd4d   :  { %8172 = vmatpush3.msra.mxu1 %v13033_v30  ;;  %8138 = vmatprep.subr.mxu0 %v14169_v41  ;;  %v6390_v30 = vld [vmem:[%s13265_s13 + $0x10] sm:$0xff] }
 0xd4e   :  { %8173 = vmatprep.subr.mxu1 %v14169_v41  ;;  %8139 = vmatpush3.msra.mxu0 %v13169_v34 }
 0xd4f   :  { %8174 = vmatpush3.msra.mxu1 %v13041_v10  ;;  %8140 = vmatprep.subr.mxu0 %v14169_v41  ;;  %v6388_v10 = vld [vmem:[%s13265_s13] sm:$0xff] }
 0xd50   :  { %8175 = vmatprep.subr.mxu1 %v14169_v41  ;;  %8141 = vmatpush3.msra.mxu0 %v13176_v20 }
 0xd51   :  { %8142 = vmatprep.mubr.msk.f32.mxu0 %vm8453_vm3, %v14169_v41  ;;  %8176 = vmatpush3.msra.mxu1 %v13051_v26 }
 0xd52   :  { %8177 = vmatprep.mubr.msk.f32.mxu1 %vm8453_vm3, %v14169_v41  ;;  %8143 = vmatmul.mubr.f32.vlgmr.msra.gmra.mxu0 %v6057_v22 }
 0xd53   :  { %8178 = vmatmul.mubr.f32.vlgmr.msra.gmra.mxu1 %v6139_v2  ;;  %8180 = vmatprep.subr.mxu0 %v14169_v41 }
 0xd54   :  { %8215 = vmatprep.subr.mxu1 %v14169_v41  ;;  %8181 = vmatpush3.msra.mxu0 %v12908_v36  ;;  %v6138_v36 = vld [vmem:[#allocation7 + $0x8] sm:$0xf] }
 0xd55   :  { %8216 = vmatpush3.msra.mxu1 %v13075_v38  ;;  %8182 = vmatprep.subr.mxu0 %v14169_v41 }
 0xd56   :  { %8217 = vmatprep.subr.mxu1 %v14169_v41  ;;  %8183 = vmatpush3.msra.mxu0 %v12918_v50  ;;  %v6280_v50 = vld [vmem:[#allocation7 + $0xa] sm:$0xf] }
 0xd57   :  { %8218 = vmatpush3.msra.mxu1 %v13078_v53  ;;  %8184 = vmatprep.subr.mxu0 %v14169_v41 }
 0xd58   :  { %8219 = vmatprep.subr.mxu1 %v14169_v41  ;;  %8185 = vmatpush3.msra.mxu0 %v12928_v16  ;;  %v6403_v16 = vld [vmem:[%s13265_s13 + $0x78] sm:$0xff] }
 0xd59   :  { %8220 = vmatpush3.msra.mxu1 %v13085_v17  ;;  %8186 = vmatprep.subr.mxu0 %v14169_v41 }
 0xd5a   :  { %8221 = vmatprep.subr.mxu1 %v14169_v41  ;;  %8187 = vmatpush3.msra.mxu0 %v12938_v51  ;;  %v6402_v51 = vld [vmem:[%s13265_s13 + $0x70] sm:$0xff] }
 0xd5b   :  { %8222 = vmatpush3.msra.mxu1 %v13092_v12  ;;  %8188 = vmatprep.subr.mxu0 %v14169_v41 }
 0xd5c   :  { %8223 = vmatprep.subr.mxu1 %v14169_v41  ;;  %8189 = vmatpush3.msra.mxu0 %v12948_v58  ;;  %v6401_v58 = vld [vmem:[%s13265_s13 + $0x68] sm:$0xff] }
 0xd5d   :  { %8224 = vmatpush3.msra.mxu1 %v13099_v42  ;;  %8190 = vmatprep.subr.mxu0 %v14169_v41 }
 0xd5e   :  { %8225 = vmatprep.subr.mxu1 %v14169_v41  ;;  %8191 = vmatpush3.msra.mxu0 %v12958_v60  ;;  %v6400_v60 = vld [vmem:[%s13265_s13 + $0x60] sm:$0xff] }
 0xd5f   :  { %8226 = vmatpush3.msra.mxu1 %v13106_v13  ;;  %8192 = vmatprep.subr.mxu0 %v14169_v41 }
 0xd60   :  { %8227 = vmatprep.subr.mxu1 %v14169_v41  ;;  %8193 = vmatpush3.msra.mxu0 %v12968_v57  ;;  %v6399_v57 = vld [vmem:[%s13265_s13 + $0x58] sm:$0xff] }
 0xd61   :  { %8228 = vmatpush3.msra.mxu1 %v13113_v31  ;;  %8194 = vmatprep.subr.mxu0 %v14169_v41 }
 0xd62   :  { %8229 = vmatprep.subr.mxu1 %v14169_v41  ;;  %8195 = vmatpush3.msra.mxu0 %v12978_v25  ;;  %v6398_v25 = vld [vmem:[%s13265_s13 + $0x50] sm:$0xff] }
 0xd63   :  { %8230 = vmatpush3.msra.mxu1 %v13120_v28  ;;  %8196 = vmatprep.subr.mxu0 %v14169_v41 }
 0xd64   :  { %8231 = vmatprep.subr.mxu1 %v14169_v41  ;;  %8197 = vmatpush3.msra.mxu0 %v12988_v18  ;;  %v6397_v18 = vld [vmem:[%s13265_s13 + $0x48] sm:$0xff] }
 0xd65   :  { %8232 = vmatpush3.msra.mxu1 %v13127_v61  ;;  %8198 = vmatprep.subr.mxu0 %v14169_v41 }
 0xd66   :  { %8233 = vmatprep.subr.mxu1 %v14169_v41  ;;  %8199 = vmatpush3.msra.mxu0 %v12998_v7  ;;  %v6396_v7 = vld [vmem:[%s13265_s13 + $0x40] sm:$0xff] }
 0xd67   :  { %8234 = vmatpush3.msra.mxu1 %v13134_v48  ;;  %8200 = vmatprep.subr.mxu0 %v14169_v41 }
 0xd68   :  { %8235 = vmatprep.subr.mxu1 %v14169_v41  ;;  %8201 = vmatpush3.msra.mxu0 %v13008_v46  ;;  %v6395_v46 = vld [vmem:[%s13265_s13 + $0x38] sm:$0xff] }
 0xd69   :  { %8236 = vmatpush3.msra.mxu1 %v13141_v4  ;;  %8202 = vmatprep.subr.mxu0 %v14169_v41 }
 0xd6a   :  { %8237 = vmatprep.subr.mxu1 %v14169_v41  ;;  %8203 = vmatpush3.msra.mxu0 %v13018_v9  ;;  %v6393_v9 = vld [vmem:[%s13265_s13 + $0x28] sm:$0xff] }
 0xd6b   :  { %8238 = vmatpush3.msra.mxu1 %v13148_v55  ;;  %8204 = vmatprep.subr.mxu0 %v14169_v41 }
 0xd6c   :  { %8239 = vmatprep.subr.mxu1 %v14169_v41  ;;  %8205 = vmatpush3.msra.mxu0 %v13028_v11  ;;  %v6391_v11 = vld [vmem:[%s13265_s13 + $0x18] sm:$0xff] }
 0xd6d   :  { %8240 = vmatpush3.msra.mxu1 %v13155_v62  ;;  %8206 = vmatprep.subr.mxu0 %v14169_v41 }
 0xd6e   :  { %8241 = vmatprep.subr.mxu1 %v14169_v41  ;;  %8207 = vmatpush3.msra.mxu0 %v13036_v21  ;;  %v6389_v21 = vld [vmem:[%s13265_s13 + $0x8] sm:$0xff] }
 0xd6f   :  { %8242 = vmatpush3.msra.mxu1 %v13162_v54  ;;  %8208 = vmatprep.subr.mxu0 %v14169_v41 }
 0xd70   :  { %8243 = vmatprep.subr.mxu1 %v14169_v41  ;;  %8209 = vmatpush3.msra.mxu0 %v13044_v24 }
 0xd71   :  { %8244 = vmatpush3.msra.mxu1 %v13169_v34  ;;  %8210 = vmatprep.subr.mxu0 %v14169_v41 }
 0xd72   :  { %8245 = vmatprep.subr.mxu1 %v14169_v41  ;;  %8211 = vmatpush3.msra.mxu0 %v13054_v1 }
 0xd73   :  { %8212 = vmatprep.mubr.msk.f32.mxu0 %vm8453_vm3, %v14169_v41  ;;  %8246 = vmatpush3.msra.mxu1 %v13176_v20 }
 0xd74   :  { %8247 = vmatprep.mubr.msk.f32.mxu1 %vm8453_vm3, %v14169_v41  ;;  %8213 = vmatmul.mubr.f32.vlgmr.msra.gmra.mxu0 %v6138_v36 }
 0xd75   :  { %8248 = vmatmul.mubr.f32.vlgmr.msra.gmra.mxu1 %v6280_v50  ;;  %8250 = vmatprep.subr.mxu0 %v14169_v41 }
 0xd76   :  { %8285 = vmatprep.subr.mxu1 %v14169_v41  ;;  %8282 = vmatprep.mubr.msk.f32.mxu0 %vm8453_vm3, %v14169_v41 }
 0xd77   :  { %8317 = vmatprep.mubr.msk.f32.mxu1 %vm8453_vm3, %v14169_v41  ;;  %8251 = vmatpush3.msra.mxu0 %v6403_v16 }
 0xd78   :  { %8286 = vmatpush3.msra.mxu1 %v6403_v16  ;;  %8252 = vmatprep.subr.mxu0 %v14169_v41 }
 0xd79   :  { %8287 = vmatprep.subr.mxu1 %v14169_v41  ;;  %8253 = vmatpush3.msra.mxu0 %v6402_v51 }
 0xd7a   :  { %8288 = vmatpush3.msra.mxu1 %v6402_v51  ;;  %8254 = vmatprep.subr.mxu0 %v14169_v41 }
 0xd7b   :  { %8289 = vmatprep.subr.mxu1 %v14169_v41  ;;  %8255 = vmatpush3.msra.mxu0 %v6401_v58 }
 0xd7c   :  { %8290 = vmatpush3.msra.mxu1 %v6401_v58  ;;  %8256 = vmatprep.subr.mxu0 %v14169_v41 }
 0xd7d   :  { %8291 = vmatprep.subr.mxu1 %v14169_v41  ;;  %8257 = vmatpush3.msra.mxu0 %v6400_v60 }
 0xd7e   :  { %8292 = vmatpush3.msra.mxu1 %v6400_v60  ;;  %8258 = vmatprep.subr.mxu0 %v14169_v41 }
 0xd7f   :  { %8293 = vmatprep.subr.mxu1 %v14169_v41  ;;  %8259 = vmatpush3.msra.mxu0 %v6399_v57 }
 0xd80   :  { %8294 = vmatpush3.msra.mxu1 %v6399_v57  ;;  %8260 = vmatprep.subr.mxu0 %v14169_v41 }
 0xd81   :  { %8295 = vmatprep.subr.mxu1 %v14169_v41  ;;  %8261 = vmatpush3.msra.mxu0 %v6398_v25 }
 0xd82   :  { %8296 = vmatpush3.msra.mxu1 %v6398_v25  ;;  %8262 = vmatprep.subr.mxu0 %v14169_v41 }
 0xd83   :  { %8297 = vmatprep.subr.mxu1 %v14169_v41  ;;  %8263 = vmatpush3.msra.mxu0 %v6397_v18 }
 0xd84   :  { %8298 = vmatpush3.msra.mxu1 %v6397_v18  ;;  %8264 = vmatprep.subr.mxu0 %v14169_v41 }
 0xd85   :  { %8299 = vmatprep.subr.mxu1 %v14169_v41  ;;  %8265 = vmatpush3.msra.mxu0 %v6396_v7 }
 0xd86   :  { %8300 = vmatpush3.msra.mxu1 %v6396_v7  ;;  %8266 = vmatprep.subr.mxu0 %v14169_v41 }
 0xd87   :  { %8301 = vmatprep.subr.mxu1 %v14169_v41  ;;  %8267 = vmatpush3.msra.mxu0 %v6395_v46 }
 0xd88   :  { %8302 = vmatpush3.msra.mxu1 %v6395_v46  ;;  %8268 = vmatprep.subr.mxu0 %v14169_v41 }
 0xd89   :  { %8303 = vmatprep.subr.mxu1 %v14169_v41  ;;  %8269 = vmatpush3.msra.mxu0 %v6394_v23 }
 0xd8a   :  { %8304 = vmatpush3.msra.mxu1 %v6394_v23  ;;  %8270 = vmatprep.subr.mxu0 %v14169_v41 }
 0xd8b   :  { %8305 = vmatprep.subr.mxu1 %v14169_v41  ;;  %8271 = vmatpush3.msra.mxu0 %v6393_v9 }
 0xd8c   :  { %8306 = vmatpush3.msra.mxu1 %v6393_v9  ;;  %8272 = vmatprep.subr.mxu0 %v14169_v41 }
 0xd8d   :  { %8307 = vmatprep.subr.mxu1 %v14169_v41  ;;  %8273 = vmatpush3.msra.mxu0 %v6392_v59 }
 0xd8e   :  { %8308 = vmatpush3.msra.mxu1 %v6392_v59  ;;  %8274 = vmatprep.subr.mxu0 %v14169_v41 }
 0xd8f   :  { %8309 = vmatprep.subr.mxu1 %v14169_v41  ;;  %8275 = vmatpush3.msra.mxu0 %v6391_v11 }
 0xd90   :  { %8310 = vmatpush3.msra.mxu1 %v6391_v11  ;;  %8276 = vmatprep.subr.mxu0 %v14169_v41 }
 0xd91   :  { %8311 = vmatprep.subr.mxu1 %v14169_v41  ;;  %8277 = vmatpush3.msra.mxu0 %v6390_v30 }
 0xd92   :  { %8312 = vmatpush3.msra.mxu1 %v6390_v30  ;;  %8278 = vmatprep.subr.mxu0 %v14169_v41 }
 0xd93   :  { %8313 = vmatprep.subr.mxu1 %v14169_v41  ;;  %8279 = vmatpush3.msra.mxu0 %v6389_v21 }
 0xd94   :  { %8314 = vmatpush3.msra.mxu1 %v6389_v21  ;;  %8280 = vmatprep.subr.mxu0 %v14169_v41 }
 0xd95   :  { %8315 = vmatprep.subr.mxu1 %v14169_v41  ;;  %8281 = vmatpush3.msra.mxu0 %v6388_v10 }
 0xd96   :  { %8316 = vmatpush3.msra.mxu1 %v6388_v10  ;;  %v6548_v10 = vld [vmem:[%s6620_s21] sm:$0x1] }
 0xdf1   :  { %v5983_v24 = vpop.f32.mrf.mxu0 }
 0xdf2   :  { %v6053_v26 = vpop.f32.mrf.mxu1 }
 0xdf3   :  { %v6054_v1 = vadd.f32 %v6053_v26, %v5983_v24  ;;  %v8074_v0 = vpop.f32.mrf.mxu0 }
 0xdf4   :  { %v8109_v63 = vpop.f32.mrf.mxu1 }
 0xe12   :  { %v6124_v35 = vpop.f32.mrf.mxu0 }
 0xe13   :  { %v6206_v32 = vpop.f32.mrf.mxu1  ;;  %v6128_v33 = vadd.f32 %v6124_v35, %v6054_v1  ;;  %v6552_v1 = vld [vmem:[%s6621_s25] sm:$0x1] }
 0xe14   :  { %v8144_v8 = vpop.f32.mrf.mxu0 }
 0xe15   :  { %v8179_v14 = vpop.f32.mrf.mxu1  ;;  %v6136_v43 = vadd.f32 %v7172_v40, %v6128_v33 }
 0xe17   :  { %v13316_v41 = vmax.f32 %v6136_v43, 0.0 }
 0xe19   :  { %v6362_v6 = vmul.f32 %v13316_v41, %v13316_v41  ;;  %v6354_v29 = vsel %vm1887_vm2, %v13316_v41, 0.0 }
 0xe1a   :  { %v6355_v19 = vrot.slane %v6354_v29, 4 }
 0xe1b   :  { %v6363_v56 = vsel %vm1887_vm2, %v6362_v6, 0.0 }
 0xe1c   :  { %v6364_v47 = vrot.slane %v6363_v56, 4  ;;  %v6356_v44 = vadd.f32 %v6355_v19, %v6354_v29 }
 0xe1e   :  { %v6365_v5 = vadd.f32 %v6364_v47, %v6363_v56  ;;  %v6357_v53 = vrot.slane %v6356_v44, 2 }
 0xe20   :  { %v6366_v42 = vrot.slane %v6365_v5, 2  ;;  %v6358_v28 = vadd.f32 %v6357_v53, %v6356_v44 }
 0xe22   :  { %v6367_v62 = vadd.f32 %v6366_v42, %v6365_v5  ;;  %v6359_v20 = vrot.slane %v6358_v28, 1 }
 0xe24   :  { %v6368_v2 = vrot.slane %v6367_v62, 1  ;;  %v6360_v50 = vadd.f32 %v6359_v20, %v6358_v28 }
 0xe26   :  { %v6369_v60 = vadd.f32 %v6368_v2, %v6367_v62 }
 0xe34   :  { %v6276_v45 = vpop.f32.mrf.mxu0 }
 0xe35   :  { %v6347_v37 = vpop.f32.mrf.mxu1  ;;  %v6277_v39 = vadd.f32 %v6276_v45, %v6206_v32 }
 0xe36   :  { %v8214_v49 = vpop.f32.mrf.mxu0 }
 0xe37   :  { %v8249_v27 = vpop.f32.mrf.mxu1  ;;  %v6351_v3 = vadd.f32 %v6347_v37, %v6277_v39 }
 0xe39   :  { %v6352_v38 = vadd.f32 %v7172_v40, %v6351_v3 }
 0xe3b   :  { %v6353_v15 = vmax.f32 %v6352_v38, 0.0 }
 0xe3d   :  { %v6371_v17 = vsel %vm1887_vm2, %v6353_v15, 0.0  ;;  %v6379_v12 = vmul.f32 %v6353_v15, %v6353_v15 }
 0xe3e   :  { %v6372_v13 = vrot.slane %v6371_v17, 4 }
 0xe3f   :  { %v6380_v31 = vsel %vm1887_vm2, %v6379_v12, 0.0 }
 0xe40   :  { %v6373_v61 = vadd.f32 %v6372_v13, %v6371_v17  ;;  %v6381_v48 = vrot.slane %v6380_v31, 4 }
 0xe42   :  { %v6374_v4 = vrot.slane %v6373_v61, 2  ;;  %v6382_v55 = vadd.f32 %v6381_v48, %v6380_v31 }
 0xe44   :  { %v6375_v54 = vadd.f32 %v6374_v4, %v6373_v61  ;;  %v6383_v34 = vrot.slane %v6382_v55, 2 }
 0xe46   :  { %v6376_v22 = vrot.slane %v6375_v54, 1  ;;  %v6384_v36 = vadd.f32 %v6383_v34, %v6382_v55 }
 0xe48   :  { %v6377_v16 = vadd.f32 %v6376_v22, %v6375_v54  ;;  %v6385_v51 = vrot.slane %v6384_v36, 1 }
 0xe4a   :  { %v6378_v58 = vadd.f32 %v6377_v16, %v6360_v50  ;;  %v6386_v57 = vadd.f32 %v6385_v51, %v6384_v36 }
 0xe4c   :  { %8283 = vmatmul.mubr.f32.vlgmr.msra.gmra.mxu0 %v6378_v58  ;;  %v6387_v25 = vadd.f32 %v6386_v57, %v6369_v60 }
 0xe4e   :  { %8318 = vmatmul.mubr.f32.vlgmr.msra.gmra.mxu1 %v6387_v25 }
 0xf0c   :  { %v6470_v18 = vpop.f32.mrf.mxu0 }
 0xf0d   :  { %v6474_v7 = vmul.f32 0.03125, %v6470_v18 }
 0xf0e   :  { %v8284_v46 = vpop.f32.mrf.mxu0  ;;  %v6541_v23 = vpop.f32.mrf.mxu1 }
 0xf0f   :  { %v6546_v9 = vmul.f32 %v6474_v7, %v6474_v7  ;;  %v6545_v59 = vmul.f32 0.03125, %v6541_v23 }
 0xf10   :  { %v8319_v11 = vpop.f32.mrf.mxu1 }
 0xf11   :  { %v6547_v30 = vsub.f32 %v6545_v59, %v6546_v9 }
 0xf13   :  { %v6549_v21 = vadd.f32 1e-05, %v6547_v30 }
 0xf15   :  { %8379 = vrsqrt.f32 %v6549_v21 }
 0xf22   :  { %v8380_v24 = vpop.eup %8379 }
 0xf23   :  { %v6551_v26 = vmul.f32 %v8380_v24, %v6548_v10 }
 0xf25   :  { %v6553_v0 = vmul.f32 %v6551_v26, %v6474_v7  ;;  %v6559_v63 = vrot.slane %v6551_v26, %v14117_v52 }
 0xf27   :  { %v6554_v35 = vsub.f32 %v6552_v1, %v6553_v0  ;;  %v6561_v32 = vmul.f32 %v6559_v63, %v13316_v41  ;;  %v6570_v14 = vmul.f32 %v6559_v63, %v6353_v15 }
 0xf29   :  { %v6566_v8 = vrot.slane %v6554_v35, %v14117_v52 }
 0xf2b   :  { %v6568_v33 = vadd.f32 %v6566_v8, %v6561_v32  ;;  %v6571_v40 = vadd.f32 %v6570_v14, %v6566_v8 }
 0xf2d   :  { %6569 = vst [vmem:[%s6623_s29] sm:$0xf] %v6568_v33  ;;  %7173 = vst [vmem:[%s6623_s29 + $0x4] sm:$0xf] %v6571_v40 }

</bundles_post_ra>
